<compile_context>
chip_gen: v7x
topology: tpu7x:2x2x1
jax: 0.10.0
libtpu: 0.0.40
codegen_flags: <defaults>
</compile_context>

<pallas_src>
import functools

import jax
import jax.numpy as jnp
from jax.experimental import pallas as pl
from jax.experimental.pallas import tpu as pltpu

# ----------------------------- synthetic hparams -----------------------------
N_SPK = 2           # hparams.N
M_UTT = 3           # hparams.M
T_STEPS = 8         # sequence length
INPUT_SIZE = 24     # mel-feature size
HIDDEN_SIZE = 32    # hidden_size_tisv (small synthetic value)
PROJECT_SIZE = 16   # project_size_tisv (small synthetic value)
W_SIM = 10.0        # self.w init
B_SIM = -5.0        # self.b init
COS_EPS = 1e-8      # F.cosine_similarity eps

# TODO(synk): nn.LSTM(dropout=0.5) is a no-op for a single-layer LSTM in
# forward(), so no dropout is implemented here.


# ----------------------------- fused forward kernel --------------------------
def _encoder_kernel(
        x_ref,
        wih1_ref, whh1_ref, b1_ref, wp1_ref, bp1_ref,
        wih2_ref, whh2_ref, b2_ref, wp2_ref, bp2_ref,
        wih3_ref, whh3_ref, b3_ref, wp3_ref, bp3_ref,
        e_ref, sim_ref,
        gi_scr, gf_scr, gg_scr, go_scr, hseq_scr, h_scr, c_scr,
        *, T, BP, B, H, P, N, M, w_scale, b_bias):
    """Fused SpeakerEncoder forward. All intermediates live in VMEM scratch."""

    def lstm_proj(x2d, wih_ref, whh_ref, b_ref, wp_ref, bp_ref):
        # ---- Hoisted input projection: one batched (T*BP, Din)@(Din, H)
        # matmul per gate, computed for all time steps before the recurrence.
        gi_scr[...] = jnp.dot(x2d, wih_ref[0],
                              preferred_element_type=jnp.float32) + b_ref[0]
        gf_scr[...] = jnp.dot(x2d, wih_ref[1],
                              preferred_element_type=jnp.float32) + b_ref[1]
        gg_scr[...] = jnp.dot(x2d, wih_ref[2],
                              preferred_element_type=jnp.float32) + b_ref[2]
        go_scr[...] = jnp.dot(x2d, wih_ref[3],
                              preferred_element_type=jnp.float32) + b_ref[3]

        # Loop-invariant recurrent weights: load once (per gate, lane-aligned).
        u_i = whh_ref[0]
        u_f = whh_ref[1]
        u_g = whh_ref[2]
        u_o = whh_ref[3]

        h_scr[...] = jnp.zeros_like(h_scr)
        c_scr[...] = jnp.zeros_like(c_scr)

        def step(t, carry):
            idx = pl.multiple_of(t * BP, BP)           # aligned sublane offset
            h_prev = h_scr[...]
            a_i = gi_scr[pl.ds(idx, BP), :] + jnp.dot(
                h_prev, u_i, preferred_element_type=jnp.float32)
            a_f = gf_scr[pl.ds(idx, BP), :] + jnp.dot(
                h_prev, u_f, preferred_element_type=jnp.float32)
            a_g = gg_scr[pl.ds(idx, BP), :] + jnp.dot(
                h_prev, u_g, preferred_element_type=jnp.float32)
            a_o = go_scr[pl.ds(idx, BP), :] + jnp.dot(
                h_prev, u_o, preferred_element_type=jnp.float32)
            i_t = jax.nn.sigmoid(a_i)
            f_t = jax.nn.sigmoid(a_f)
            g_t = jnp.tanh(a_g)
            o_t = jax.nn.sigmoid(a_o)
            c_new = f_t * c_scr[...] + i_t * g_t
            h_new = o_t * jnp.tanh(c_new)
            c_scr[...] = c_new
            h_scr[...] = h_new
            hseq_scr[pl.ds(idx, BP), :] = h_new
            return carry

        jax.lax.fori_loop(0, T, step, 0, unroll=True)

        # ---- Per-layer Linear folded into the epilogue: one (T*BP,H)@(H,P).
        return (jnp.dot(hseq_scr[...], wp_ref[...],
                        preferred_element_type=jnp.float32) + bp_ref[...])

    y = lstm_proj(x_ref[...], wih1_ref, whh1_ref, b1_ref, wp1_ref, bp1_ref)
    y = lstm_proj(y, wih2_ref, whh2_ref, b2_ref, wp2_ref, bp2_ref)
    y = lstm_proj(y, wih3_ref, whh3_ref, b3_ref, wp3_ref, bp3_ref)  # (T*BP, P)

    # Last time step: rows [(T-1)*BP, T*BP) of the time-major flattened output.
    x_last = y[(T - 1) * BP:, :]                                    # (BP, P)

    # x / torch.norm(x): Frobenius norm over the REAL (unpadded) rows only.
    row_id = jax.lax.broadcasted_iota(jnp.int32, (BP, P), 0)
    sq = jnp.where(row_id < B, x_last * x_last, 0.0)
    gnorm = jnp.sqrt(jnp.sum(sq, keepdims=True))                    # (1, 1)
    e = x_last / gnorm                                              # (BP, P)
    e_ref[...] = e

    # Per-speaker centroids via an in-kernel averaging matrix (no HBM input):
    # row s has 1/M on columns [s*M, (s+1)*M); padded columns get weight 0.
    col = jax.lax.broadcasted_iota(jnp.int32, (N, BP), 1)
    row = jax.lax.broadcasted_iota(jnp.int32, (N, BP), 0)
    gmat = jnp.where((col >= row * M) & (col < (row + 1) * M), 1.0 / M, 0.0)
    cent = jnp.dot(gmat, e, preferred_element_type=jnp.float32)     # (N, P)

    e_norm = jnp.sqrt(jnp.sum(e * e, axis=-1, keepdims=True))       # (BP, 1)
    c_norm = jnp.sqrt(jnp.sum(cent * cent, axis=-1, keepdims=True))  # (N, 1)
    e_hat = e / jnp.maximum(e_norm, COS_EPS)
    c_hat = cent / jnp.maximum(c_norm, COS_EPS)
    cos = jax.lax.dot_general(e_hat, c_hat, (((1,), (1,)), ((), ())),
                              preferred_element_type=jnp.float32)   # (BP, N)
    sim_ref[...] = w_scale * cos + b_bias


# ---------------------------- weight repacking (wrapper) ---------------------
def _prep_lstm(w_ih, w_hh, b_ih, b_hh):
    """Torch (4H, Din)/(4H, H)/(4H,) -> per-gate stacked, transposed weights."""
    h = w_hh.shape[1]
    wih_g = jnp.stack(
        [jnp.transpose(w_ih[k * h:(k + 1) * h]) for k in range(4)], axis=0)
    whh_g = jnp.stack(
        [jnp.transpose(w_hh[k * h:(k + 1) * h]) for k in range(4)], axis=0)
    bias = b_ih + b_hh
    b_g = jnp.stack(
        [bias[k * h:(k + 1) * h].reshape(1, h) for k in range(4)], axis=0)
    return wih_g, whh_g, b_g                        # (4,Din,H), (4,H,H), (4,1,H)


def _prep_proj(w, b):
    return jnp.transpose(w), b.reshape(1, -1)       # (H,P), (1,P)


# ------------------------------- full forward --------------------------------
def speaker_encoder_forward(params, x, n=N_SPK, m=M_UTT, return_sim=True):
    """x: (T, B, F) time-major, B = n*m. Returns (embeddings (B,P), sim (B,n))."""
    T, B, F = x.shape
    H = HIDDEN_SIZE
    P = PROJECT_SIZE
    BP = ((B + 7) // 8) * 8                         # pad batch to sublane multiple

    x_pad = jnp.pad(x, ((0, 0), (0, BP - B), (0, 0)))
    x2d = x_pad.reshape(T * BP, F)                  # time-major: row = t*BP + b

    wih1, whh1, b1 = _prep_lstm(*params["lstm1"])
    wih2, whh2, b2 = _prep_lstm(*params["lstm2"])
    wih3, whh3, b3 = _prep_lstm(*params["lstm3"])
    wp1, bp1 = _prep_proj(*params["proj1"])
    wp2, bp2 = _prep_proj(*params["proj2"])
    wp3, bp3 = _prep_proj(*params["proj3"])

    kernel = functools.partial(
        _encoder_kernel, T=T, BP=BP, B=B, H=H, P=P, N=n, M=m,
        w_scale=float(params["w"]), b_bias=float(params["b"]))

    def lstm_specs(din):
        return [
            pl.BlockSpec((4, din, H), lambda i: (0, 0, 0)),   # per-gate W_ih^T
            pl.BlockSpec((4, H, H), lambda i: (0, 0, 0)),     # per-gate W_hh^T
            pl.BlockSpec((4, 1, H), lambda i: (0, 0, 0)),     # per-gate bias
            pl.BlockSpec((H, P), lambda i: (0, 0)),           # proj weight^T
            pl.BlockSpec((1, P), lambda i: (0, 0)),           # proj bias
        ]

    e_pad, sim_pad = pl.pallas_call(
        kernel,
        out_shape=(jax.ShapeDtypeStruct((BP, P), jnp.float32),
                   jax.ShapeDtypeStruct((BP, n), jnp.float32)),
        grid_spec=pltpu.PrefetchScalarGridSpec(
            num_scalar_prefetch=0,
            grid=(1,),
            in_specs=[pl.BlockSpec((T * BP, F), lambda i: (0, 0))]
                     + lstm_specs(F) + lstm_specs(P) + lstm_specs(P),
            out_specs=[pl.BlockSpec((BP, P), lambda i: (0, 0)),
                       pl.BlockSpec((BP, n), lambda i: (0, 0))],
            scratch_shapes=[
                pltpu.VMEM((T * BP, H), jnp.float32),   # gate-i pre-activations
                pltpu.VMEM((T * BP, H), jnp.float32),   # gate-f
                pltpu.VMEM((T * BP, H), jnp.float32),   # gate-g
                pltpu.VMEM((T * BP, H), jnp.float32),   # gate-o
                pltpu.VMEM((T * BP, H), jnp.float32),   # hidden sequence
                pltpu.VMEM((BP, H), jnp.float32),       # h state
                pltpu.VMEM((BP, H), jnp.float32),       # c state
            ]),
        compiler_params=pltpu.CompilerParams(
            dimension_semantics=("arbitrary",)),
    )(x2d,
      wih1, whh1, b1, wp1, bp1,
      wih2, whh2, b2, wp2, bp2,
      wih3, whh3, b3, wp3, bp3)

    e = e_pad[:B]
    if not return_sim:
        return e, None
    return e, sim_pad[:B]


# --------------------------- deterministic params ----------------------------
def init_params(key):
    def nrm(k, shape, scale):
        return scale * jax.random.normal(k, shape, dtype=jnp.float32)

    keys = iter(jax.random.split(key, 32))
    params = {"w": W_SIM, "b": B_SIM}
    in_sizes = [INPUT_SIZE, PROJECT_SIZE, PROJECT_SIZE]
    for layer_idx, din in enumerate(in_sizes, start=1):
        params[f"lstm{layer_idx}"] = (
            nrm(next(keys), (4 * HIDDEN_SIZE, din), 0.1),          # w_ih
            nrm(next(keys), (4 * HIDDEN_SIZE, HIDDEN_SIZE), 0.1),  # w_hh
            nrm(next(keys), (4 * HIDDEN_SIZE,), 0.01),             # b_ih
            nrm(next(keys), (4 * HIDDEN_SIZE,), 0.01),             # b_hh
        )
        params[f"proj{layer_idx}"] = (
            nrm(next(keys), (PROJECT_SIZE, HIDDEN_SIZE), 0.02),    # weight
            nrm(next(keys), (PROJECT_SIZE,), 0.01),                # bias
        )
    return params


if __name__ == "__main__":
    key = jax.random.PRNGKey(0)
    pkey, xkey = jax.random.split(key)
    params = init_params(pkey)

    B = N_SPK * M_UTT
    x = jax.random.normal(xkey, (T_STEPS, B, INPUT_SIZE), dtype=jnp.float32)

    emb, sim = speaker_encoder_forward(params, x)
    jax.block_until_ready((emb, sim))

    assert emb.shape == (B, PROJECT_SIZE)
    assert sim.shape == (B, N_SPK)
    assert jnp.all(jnp.isfinite(emb)) and jnp.all(jnp.isfinite(sim))
    print("KERNEL_OK")
</pallas_src>

<mosaic_0001>
module attributes {stable_mosaic.version = 11 : i64} {
  func.func @_encoder_kernel(%arg0: i32, %arg1: memref<64x24xf32, #tpu.memory_space<vmem>>, %arg2: memref<4x24x32xf32, #tpu.memory_space<vmem>>, %arg3: memref<4x32x32xf32, #tpu.memory_space<vmem>>, %arg4: memref<4x1x32xf32, #tpu.memory_space<vmem>>, %arg5: memref<32x16xf32, #tpu.memory_space<vmem>>, %arg6: memref<1x16xf32, #tpu.memory_space<vmem>>, %arg7: memref<4x16x32xf32, #tpu.memory_space<vmem>>, %arg8: memref<4x32x32xf32, #tpu.memory_space<vmem>>, %arg9: memref<4x1x32xf32, #tpu.memory_space<vmem>>, %arg10: memref<32x16xf32, #tpu.memory_space<vmem>>, %arg11: memref<1x16xf32, #tpu.memory_space<vmem>>, %arg12: memref<4x16x32xf32, #tpu.memory_space<vmem>>, %arg13: memref<4x32x32xf32, #tpu.memory_space<vmem>>, %arg14: memref<4x1x32xf32, #tpu.memory_space<vmem>>, %arg15: memref<32x16xf32, #tpu.memory_space<vmem>>, %arg16: memref<1x16xf32, #tpu.memory_space<vmem>>, %arg17: memref<8x16xf32, #tpu.memory_space<vmem>>, %arg18: memref<8x2xf32, #tpu.memory_space<vmem>>, %arg19: memref<64x32xf32, #tpu.memory_space<vmem>>, %arg20: memref<64x32xf32, #tpu.memory_space<vmem>>, %arg21: memref<64x32xf32, #tpu.memory_space<vmem>>, %arg22: memref<64x32xf32, #tpu.memory_space<vmem>>, %arg23: memref<64x32xf32, #tpu.memory_space<vmem>>, %arg24: memref<8x32xf32, #tpu.memory_space<vmem>>, %arg25: memref<8x32xf32, #tpu.memory_space<vmem>>) attributes {dimension_semantics = [#tpu.dimension_semantics<arbitrary>], iteration_bounds = array<i64: 1>, scalar_prefetch = 0 : i64, scratch_operands = 7 : i64, tpu.core_type = #tpu.core_type<tc>, window_params = [{pipeline_mode = #tpu.pipeline_mode<synchronous>, transform_indices = @transform_0, window_bounds = array<i64: 64, 24>}, {pipeline_mode = #tpu.pipeline_mode<synchronous>, transform_indices = @transform_1, window_bounds = array<i64: 4, 24, 32>}, {pipeline_mode = #tpu.pipeline_mode<synchronous>, transform_indices = @transform_2, window_bounds = array<i64: 4, 32, 32>}, {pipeline_mode = #tpu.pipeline_mode<synchronous>, transform_indices = @transform_3, window_bounds = array<i64: 4, 1, 32>}, {pipeline_mode = #tpu.pipeline_mode<synchronous>, transform_indices = @transform_4, window_bounds = array<i64: 32, 16>}, {pipeline_mode = #tpu.pipeline_mode<synchronous>, transform_indices = @transform_5, window_bounds = array<i64: 1, 16>}, {pipeline_mode = #tpu.pipeline_mode<synchronous>, transform_indices = @transform_6, window_bounds = array<i64: 4, 16, 32>}, {pipeline_mode = #tpu.pipeline_mode<synchronous>, transform_indices = @transform_7, window_bounds = array<i64: 4, 32, 32>}, {pipeline_mode = #tpu.pipeline_mode<synchronous>, transform_indices = @transform_8, window_bounds = array<i64: 4, 1, 32>}, {pipeline_mode = #tpu.pipeline_mode<synchronous>, transform_indices = @transform_9, window_bounds = array<i64: 32, 16>}, {pipeline_mode = #tpu.pipeline_mode<synchronous>, transform_indices = @transform_10, window_bounds = array<i64: 1, 16>}, {pipeline_mode = #tpu.pipeline_mode<synchronous>, transform_indices = @transform_11, window_bounds = array<i64: 4, 16, 32>}, {pipeline_mode = #tpu.pipeline_mode<synchronous>, transform_indices = @transform_12, window_bounds = array<i64: 4, 32, 32>}, {pipeline_mode = #tpu.pipeline_mode<synchronous>, transform_indices = @transform_13, window_bounds = array<i64: 4, 1, 32>}, {pipeline_mode = #tpu.pipeline_mode<synchronous>, transform_indices = @transform_14, window_bounds = array<i64: 32, 16>}, {pipeline_mode = #tpu.pipeline_mode<synchronous>, transform_indices = @transform_15, window_bounds = array<i64: 1, 16>}, {pipeline_mode = #tpu.pipeline_mode<synchronous>, transform_indices = @transform_16, window_bounds = array<i64: 8, 16>}, {pipeline_mode = #tpu.pipeline_mode<synchronous>, transform_indices = @transform_17, window_bounds = array<i64: 8, 2>}]} {
    %c0 = arith.constant 0 : index
    %c0_0 = arith.constant 0 : index
    %0 = vector.load %arg1[%c0, %c0_0] : memref<64x24xf32, #tpu.memory_space<vmem>>, vector<64x24xf32>
    %c0_1 = arith.constant 0 : index
    %c0_2 = arith.constant 0 : index
    %c0_3 = arith.constant 0 : index
    %1 = vector.load %arg2[%c0_1, %c0_2, %c0_3] : memref<4x24x32xf32, #tpu.memory_space<vmem>>, vector<1x24x32xf32>
    %2 = vector.shape_cast %1 : vector<1x24x32xf32> to vector<24x32xf32>
    %cst = arith.constant dense<0.000000e+00> : vector<64x32xf32>
    %3 = tpu.matmul %0, %2, %cst {dimension_numbers = #tpu.dot_dimension_numbers<[1], [0], [0], [1], [0, 0, 1, 1], [], []>} : vector<64x24xf32>, vector<24x32xf32>, vector<64x32xf32> -> vector<64x32xf32>
    %c0_4 = arith.constant 0 : index
    %c0_5 = arith.constant 0 : index
    %c0_6 = arith.constant 0 : index
    %4 = vector.load %arg4[%c0_4, %c0_5, %c0_6] : memref<4x1x32xf32, #tpu.memory_space<vmem>>, vector<1x1x32xf32>
    %5 = vector.shape_cast %4 : vector<1x1x32xf32> to vector<1x32xf32>
    %6 = vector.broadcast %5 : vector<1x32xf32> to vector<64x32xf32>
    %7 = arith.addf %3, %6 : vector<64x32xf32>
    %c0_7 = arith.constant 0 : index
    %c0_8 = arith.constant 0 : index
    %8 = vector.load %arg19[%c0_7, %c0_8] : memref<64x32xf32, #tpu.memory_space<vmem>>, vector<64x32xf32>
    tpu.vector_store %arg19[%c0_7, %c0_8], %7 {strides = array<i32>} : memref<64x32xf32, #tpu.memory_space<vmem>>, vector<64x32xf32>,
    %c1 = arith.constant 1 : index
    %c0_9 = arith.constant 0 : index
    %c0_10 = arith.constant 0 : index
    %9 = vector.load %arg2[%c1, %c0_9, %c0_10] : memref<4x24x32xf32, #tpu.memory_space<vmem>>, vector<1x24x32xf32>
    %10 = vector.shape_cast %9 : vector<1x24x32xf32> to vector<24x32xf32>
    %cst_11 = arith.constant dense<0.000000e+00> : vector<64x32xf32>
    %11 = tpu.matmul %0, %10, %cst_11 {dimension_numbers = #tpu.dot_dimension_numbers<[1], [0], [0], [1], [0, 0, 1, 1], [], []>} : vector<64x24xf32>, vector<24x32xf32>, vector<64x32xf32> -> vector<64x32xf32>
    %c1_12 = arith.constant 1 : index
    %c0_13 = arith.constant 0 : index
    %c0_14 = arith.constant 0 : index
    %12 = vector.load %arg4[%c1_12, %c0_13, %c0_14] : memref<4x1x32xf32, #tpu.memory_space<vmem>>, vector<1x1x32xf32>
    %13 = vector.shape_cast %12 : vector<1x1x32xf32> to vector<1x32xf32>
    %14 = vector.broadcast %13 : vector<1x32xf32> to vector<64x32xf32>
    %15 = arith.addf %11, %14 : vector<64x32xf32>
    %c0_15 = arith.constant 0 : index
    %c0_16 = arith.constant 0 : index
    %16 = vector.load %arg20[%c0_15, %c0_16] : memref<64x32xf32, #tpu.memory_space<vmem>>, vector<64x32xf32>
    tpu.vector_store %arg20[%c0_15, %c0_16], %15 {strides = array<i32>} : memref<64x32xf32, #tpu.memory_space<vmem>>, vector<64x32xf32>,
    %c2 = arith.constant 2 : index
    %c0_17 = arith.constant 0 : index
    %c0_18 = arith.constant 0 : index
    %17 = vector.load %arg2[%c2, %c0_17, %c0_18] : memref<4x24x32xf32, #tpu.memory_space<vmem>>, vector<1x24x32xf32>
    %18 = vector.shape_cast %17 : vector<1x24x32xf32> to vector<24x32xf32>
    %cst_19 = arith.constant dense<0.000000e+00> : vector<64x32xf32>
    %19 = tpu.matmul %0, %18, %cst_19 {dimension_numbers = #tpu.dot_dimension_numbers<[1], [0], [0], [1], [0, 0, 1, 1], [], []>} : vector<64x24xf32>, vector<24x32xf32>, vector<64x32xf32> -> vector<64x32xf32>
    %c2_20 = arith.constant 2 : index
    %c0_21 = arith.constant 0 : index
    %c0_22 = arith.constant 0 : index
    %20 = vector.load %arg4[%c2_20, %c0_21, %c0_22] : memref<4x1x32xf32, #tpu.memory_space<vmem>>, vector<1x1x32xf32>
    %21 = vector.shape_cast %20 : vector<1x1x32xf32> to vector<1x32xf32>
    %22 = vector.broadcast %21 : vector<1x32xf32> to vector<64x32xf32>
    %23 = arith.addf %19, %22 : vector<64x32xf32>
    %c0_23 = arith.constant 0 : index
    %c0_24 = arith.constant 0 : index
    %24 = vector.load %arg21[%c0_23, %c0_24] : memref<64x32xf32, #tpu.memory_space<vmem>>, vector<64x32xf32>
    tpu.vector_store %arg21[%c0_23, %c0_24], %23 {strides = array<i32>} : memref<64x32xf32, #tpu.memory_space<vmem>>, vector<64x32xf32>,
    %c3 = arith.constant 3 : index
    %c0_25 = arith.constant 0 : index
    %c0_26 = arith.constant 0 : index
    %25 = vector.load %arg2[%c3, %c0_25, %c0_26] : memref<4x24x32xf32, #tpu.memory_space<vmem>>, vector<1x24x32xf32>
    %26 = vector.shape_cast %25 : vector<1x24x32xf32> to vector<24x32xf32>
    %cst_27 = arith.constant dense<0.000000e+00> : vector<64x32xf32>
    %27 = tpu.matmul %0, %26, %cst_27 {dimension_numbers = #tpu.dot_dimension_numbers<[1], [0], [0], [1], [0, 0, 1, 1], [], []>} : vector<64x24xf32>, vector<24x32xf32>, vector<64x32xf32> -> vector<64x32xf32>
    %c3_28 = arith.constant 3 : index
    %c0_29 = arith.constant 0 : index
    %c0_30 = arith.constant 0 : index
    %28 = vector.load %arg4[%c3_28, %c0_29, %c0_30] : memref<4x1x32xf32, #tpu.memory_space<vmem>>, vector<1x1x32xf32>
    %29 = vector.shape_cast %28 : vector<1x1x32xf32> to vector<1x32xf32>
    %30 = vector.broadcast %29 : vector<1x32xf32> to vector<64x32xf32>
    %31 = arith.addf %27, %30 : vector<64x32xf32>
    %c0_31 = arith.constant 0 : index
    %c0_32 = arith.constant 0 : index
    %32 = vector.load %arg22[%c0_31, %c0_32] : memref<64x32xf32, #tpu.memory_space<vmem>>, vector<64x32xf32>
    tpu.vector_store %arg22[%c0_31, %c0_32], %31 {strides = array<i32>} : memref<64x32xf32, #tpu.memory_space<vmem>>, vector<64x32xf32>,
    %c0_33 = arith.constant 0 : index
    %c0_34 = arith.constant 0 : index
    %c0_35 = arith.constant 0 : index
    %33 = vector.load %arg3[%c0_33, %c0_34, %c0_35] : memref<4x32x32xf32, #tpu.memory_space<vmem>>, vector<1x32x32xf32>
    %34 = vector.shape_cast %33 : vector<1x32x32xf32> to vector<32x32xf32>
    %c1_36 = arith.constant 1 : index
    %c0_37 = arith.constant 0 : index
    %c0_38 = arith.constant 0 : index
    %35 = vector.load %arg3[%c1_36, %c0_37, %c0_38] : memref<4x32x32xf32, #tpu.memory_space<vmem>>, vector<1x32x32xf32>
    %36 = vector.shape_cast %35 : vector<1x32x32xf32> to vector<32x32xf32>
    %c2_39 = arith.constant 2 : index
    %c0_40 = arith.constant 0 : index
    %c0_41 = arith.constant 0 : index
    %37 = vector.load %arg3[%c2_39, %c0_40, %c0_41] : memref<4x32x32xf32, #tpu.memory_space<vmem>>, vector<1x32x32xf32>
    %38 = vector.shape_cast %37 : vector<1x32x32xf32> to vector<32x32xf32>
    %c3_42 = arith.constant 3 : index
    %c0_43 = arith.constant 0 : index
    %c0_44 = arith.constant 0 : index
    %39 = vector.load %arg3[%c3_42, %c0_43, %c0_44] : memref<4x32x32xf32, #tpu.memory_space<vmem>>, vector<1x32x32xf32>
    %40 = vector.shape_cast %39 : vector<1x32x32xf32> to vector<32x32xf32>
    %cst_45 = arith.constant 0.000000e+00 : f32
    %41 = vector.broadcast %cst_45 : f32 to vector<8x32xf32>
    %c0_46 = arith.constant 0 : index
    %c0_47 = arith.constant 0 : index
    %42 = vector.load %arg24[%c0_46, %c0_47] : memref<8x32xf32, #tpu.memory_space<vmem>>, vector<8x32xf32>
    tpu.vector_store %arg24[%c0_46, %c0_47], %41 {strides = array<i32>} : memref<8x32xf32, #tpu.memory_space<vmem>>, vector<8x32xf32>,
    %cst_48 = arith.constant 0.000000e+00 : f32
    %43 = vector.broadcast %cst_48 : f32 to vector<8x32xf32>
    %c0_49 = arith.constant 0 : index
    %c0_50 = arith.constant 0 : index
    %44 = vector.load %arg25[%c0_49, %c0_50] : memref<8x32xf32, #tpu.memory_space<vmem>>, vector<8x32xf32>
    tpu.vector_store %arg25[%c0_49, %c0_50], %43 {strides = array<i32>} : memref<8x32xf32, #tpu.memory_space<vmem>>, vector<8x32xf32>,
    %c0_i32 = arith.constant 0 : i32
    %c8_i32 = arith.constant 8 : i32
    %45 = arith.muli %c0_i32, %c8_i32 : i32
    %46 = tpu.assume_multiple %45, 8 : i32
    %c0_51 = arith.constant 0 : index
    %c0_52 = arith.constant 0 : index
    %47 = vector.load %arg24[%c0_51, %c0_52] : memref<8x32xf32, #tpu.memory_space<vmem>>, vector<8x32xf32>
    %48 = arith.index_cast %46 : i32 to index
    %c0_53 = arith.constant 0 : index
    %49 = vector.load %arg19[%48, %c0_53] : memref<64x32xf32, #tpu.memory_space<vmem>>, vector<8x32xf32>
    %cst_54 = arith.constant dense<0.000000e+00> : vector<8x32xf32>
    %50 = tpu.matmul %47, %34, %cst_54 {dimension_numbers = #tpu.dot_dimension_numbers<[1], [0], [0], [1], [0, 0, 1, 1], [], []>} : vector<8x32xf32>, vector<32x32xf32>, vector<8x32xf32> -> vector<8x32xf32>
    %51 = arith.addf %49, %50 : vector<8x32xf32>
    %52 = arith.index_cast %46 : i32 to index
    %c0_55 = arith.constant 0 : index
    %53 = vector.load %arg20[%52, %c0_55] : memref<64x32xf32, #tpu.memory_space<vmem>>, vector<8x32xf32>
    %cst_56 = arith.constant dense<0.000000e+00> : vector<8x32xf32>
    %54 = tpu.matmul %47, %36, %cst_56 {dimension_numbers = #tpu.dot_dimension_numbers<[1], [0], [0], [1], [0, 0, 1, 1], [], []>} : vector<8x32xf32>, vector<32x32xf32>, vector<8x32xf32> -> vector<8x32xf32>
    %55 = arith.addf %53, %54 : vector<8x32xf32>
    %56 = arith.index_cast %46 : i32 to index
    %c0_57 = arith.constant 0 : index
    %57 = vector.load %arg21[%56, %c0_57] : memref<64x32xf32, #tpu.memory_space<vmem>>, vector<8x32xf32>
    %cst_58 = arith.constant dense<0.000000e+00> : vector<8x32xf32>
    %58 = tpu.matmul %47, %38, %cst_58 {dimension_numbers = #tpu.dot_dimension_numbers<[1], [0], [0], [1], [0, 0, 1, 1], [], []>} : vector<8x32xf32>, vector<32x32xf32>, vector<8x32xf32> -> vector<8x32xf32>
    %59 = arith.addf %57, %58 : vector<8x32xf32>
    %60 = arith.index_cast %46 : i32 to index
    %c0_59 = arith.constant 0 : index
    %61 = vector.load %arg22[%60, %c0_59] : memref<64x32xf32, #tpu.memory_space<vmem>>, vector<8x32xf32>
    %cst_60 = arith.constant dense<0.000000e+00> : vector<8x32xf32>
    %62 = tpu.matmul %47, %40, %cst_60 {dimension_numbers = #tpu.dot_dimension_numbers<[1], [0], [0], [1], [0, 0, 1, 1], [], []>} : vector<8x32xf32>, vector<32x32xf32>, vector<8x32xf32> -> vector<8x32xf32>
    %63 = arith.addf %61, %62 : vector<8x32xf32>
    %64 = arith.negf %51 : vector<8x32xf32>
    %65 = math.exp %64 : vector<8x32xf32>
    %cst_61 = arith.constant 1.000000e+00 : f32
    %66 = vector.broadcast %cst_61 : f32 to vector<8x32xf32>
    %67 = arith.addf %66, %65 : vector<8x32xf32>
    %68 = arith.divf %66, %67 : vector<8x32xf32>
    %69 = arith.negf %55 : vector<8x32xf32>
    %70 = math.exp %69 : vector<8x32xf32>
    %cst_62 = arith.constant 1.000000e+00 : f32
    %71 = vector.broadcast %cst_62 : f32 to vector<8x32xf32>
    %72 = arith.addf %71, %70 : vector<8x32xf32>
    %73 = arith.divf %71, %72 : vector<8x32xf32>
    %74 = math.tanh %59 : vector<8x32xf32>
    %75 = arith.negf %63 : vector<8x32xf32>
    %76 = math.exp %75 : vector<8x32xf32>
    %cst_63 = arith.constant 1.000000e+00 : f32
    %77 = vector.broadcast %cst_63 : f32 to vector<8x32xf32>
    %78 = arith.addf %77, %76 : vector<8x32xf32>
    %79 = arith.divf %77, %78 : vector<8x32xf32>
    %c0_64 = arith.constant 0 : index
    %c0_65 = arith.constant 0 : index
    %80 = vector.load %arg25[%c0_64, %c0_65] : memref<8x32xf32, #tpu.memory_space<vmem>>, vector<8x32xf32>
    %81 = arith.mulf %73, %80 : vector<8x32xf32>
    %82 = arith.mulf %68, %74 : vector<8x32xf32>
    %83 = arith.addf %81, %82 : vector<8x32xf32>
    %84 = math.tanh %83 : vector<8x32xf32>
    %85 = arith.mulf %79, %84 : vector<8x32xf32>
    %c0_66 = arith.constant 0 : index
    %c0_67 = arith.constant 0 : index
    %86 = vector.load %arg25[%c0_66, %c0_67] : memref<8x32xf32, #tpu.memory_space<vmem>>, vector<8x32xf32>
    tpu.vector_store %arg25[%c0_66, %c0_67], %83 {strides = array<i32>} : memref<8x32xf32, #tpu.memory_space<vmem>>, vector<8x32xf32>,
    %c0_68 = arith.constant 0 : index
    %c0_69 = arith.constant 0 : index
    %87 = vector.load %arg24[%c0_68, %c0_69] : memref<8x32xf32, #tpu.memory_space<vmem>>, vector<8x32xf32>
    tpu.vector_store %arg24[%c0_68, %c0_69], %85 {strides = array<i32>} : memref<8x32xf32, #tpu.memory_space<vmem>>, vector<8x32xf32>,
    %88 = arith.index_cast %46 : i32 to index
    %c0_70 = arith.constant 0 : index
    %89 = vector.load %arg23[%88, %c0_70] : memref<64x32xf32, #tpu.memory_space<vmem>>, vector<8x32xf32>
    tpu.vector_store %arg23[%88, %c0_70], %85 {strides = array<i32>} : memref<64x32xf32, #tpu.memory_space<vmem>>, vector<8x32xf32>,
    %c1_i32 = arith.constant 1 : i32
    %c8_i32_71 = arith.constant 8 : i32
    %90 = arith.muli %c1_i32, %c8_i32_71 : i32
    %91 = tpu.assume_multiple %90, 8 : i32
    %c0_72 = arith.constant 0 : index
    %c0_73 = arith.constant 0 : index
    %92 = vector.load %arg24[%c0_72, %c0_73] : memref<8x32xf32, #tpu.memory_space<vmem>>, vector<8x32xf32>
    %93 = arith.index_cast %91 : i32 to index
    %c0_74 = arith.constant 0 : index
    %94 = vector.load %arg19[%93, %c0_74] : memref<64x32xf32, #tpu.memory_space<vmem>>, vector<8x32xf32>
    %cst_75 = arith.constant dense<0.000000e+00> : vector<8x32xf32>
    %95 = tpu.matmul %92, %34, %cst_75 {dimension_numbers = #tpu.dot_dimension_numbers<[1], [0], [0], [1], [0, 0, 1, 1], [], []>} : vector<8x32xf32>, vector<32x32xf32>, vector<8x32xf32> -> vector<8x32xf32>
    %96 = arith.addf %94, %95 : vector<8x32xf32>
    %97 = arith.index_cast %91 : i32 to index
    %c0_76 = arith.constant 0 : index
    %98 = vector.load %arg20[%97, %c0_76] : memref<64x32xf32, #tpu.memory_space<vmem>>, vector<8x32xf32>
    %cst_77 = arith.constant dense<0.000000e+00> : vector<8x32xf32>
    %99 = tpu.matmul %92, %36, %cst_77 {dimension_numbers = #tpu.dot_dimension_numbers<[1], [0], [0], [1], [0, 0, 1, 1], [], []>} : vector<8x32xf32>, vector<32x32xf32>, vector<8x32xf32> -> vector<8x32xf32>
    %100 = arith.addf %98, %99 : vector<8x32xf32>
    %101 = arith.index_cast %91 : i32 to index
    %c0_78 = arith.constant 0 : index
    %102 = vector.load %arg21[%101, %c0_78] : memref<64x32xf32, #tpu.memory_space<vmem>>, vector<8x32xf32>
    %cst_79 = arith.constant dense<0.000000e+00> : vector<8x32xf32>
    %103 = tpu.matmul %92, %38, %cst_79 {dimension_numbers = #tpu.dot_dimension_numbers<[1], [0], [0], [1], [0, 0, 1, 1], [], []>} : vector<8x32xf32>, vector<32x32xf32>, vector<8x32xf32> -> vector<8x32xf32>
    %104 = arith.addf %102, %103 : vector<8x32xf32>
    %105 = arith.index_cast %91 : i32 to index
    %c0_80 = arith.constant 0 : index
    %106 = vector.load %arg22[%105, %c0_80] : memref<64x32xf32, #tpu.memory_space<vmem>>, vector<8x32xf32>
    %cst_81 = arith.constant dense<0.000000e+00> : vector<8x32xf32>
    %107 = tpu.matmul %92, %40, %cst_81 {dimension_numbers = #tpu.dot_dimension_numbers<[1], [0], [0], [1], [0, 0, 1, 1], [], []>} : vector<8x32xf32>, vector<32x32xf32>, vector<8x32xf32> -> vector<8x32xf32>
    %108 = arith.addf %106, %107 : vector<8x32xf32>
    %109 = arith.negf %96 : vector<8x32xf32>
    %110 = math.exp %109 : vector<8x32xf32>
    %cst_82 = arith.constant 1.000000e+00 : f32
    %111 = vector.broadcast %cst_82 : f32 to vector<8x32xf32>
    %112 = arith.addf %111, %110 : vector<8x32xf32>
    %113 = arith.divf %111, %112 : vector<8x32xf32>
    %114 = arith.negf %100 : vector<8x32xf32>
    %115 = math.exp %114 : vector<8x32xf32>
    %cst_83 = arith.constant 1.000000e+00 : f32
    %116 = vector.broadcast %cst_83 : f32 to vector<8x32xf32>
    %117 = arith.addf %116, %115 : vector<8x32xf32>
    %118 = arith.divf %116, %117 : vector<8x32xf32>
    %119 = math.tanh %104 : vector<8x32xf32>
    %120 = arith.negf %108 : vector<8x32xf32>
    %121 = math.exp %120 : vector<8x32xf32>
    %cst_84 = arith.constant 1.000000e+00 : f32
    %122 = vector.broadcast %cst_84 : f32 to vector<8x32xf32>
    %123 = arith.addf %122, %121 : vector<8x32xf32>
    %124 = arith.divf %122, %123 : vector<8x32xf32>
    %c0_85 = arith.constant 0 : index
    %c0_86 = arith.constant 0 : index
    %125 = vector.load %arg25[%c0_85, %c0_86] : memref<8x32xf32, #tpu.memory_space<vmem>>, vector<8x32xf32>
    %126 = arith.mulf %118, %125 : vector<8x32xf32>
    %127 = arith.mulf %113, %119 : vector<8x32xf32>
    %128 = arith.addf %126, %127 : vector<8x32xf32>
    %129 = math.tanh %128 : vector<8x32xf32>
    %130 = arith.mulf %124, %129 : vector<8x32xf32>
    %c0_87 = arith.constant 0 : index
    %c0_88 = arith.constant 0 : index
    %131 = vector.load %arg25[%c0_87, %c0_88] : memref<8x32xf32, #tpu.memory_space<vmem>>, vector<8x32xf32>
    tpu.vector_store %arg25[%c0_87, %c0_88], %128 {strides = array<i32>} : memref<8x32xf32, #tpu.memory_space<vmem>>, vector<8x32xf32>,
    %c0_89 = arith.constant 0 : index
    %c0_90 = arith.constant 0 : index
    %132 = vector.load %arg24[%c0_89, %c0_90] : memref<8x32xf32, #tpu.memory_space<vmem>>, vector<8x32xf32>
    tpu.vector_store %arg24[%c0_89, %c0_90], %130 {strides = array<i32>} : memref<8x32xf32, #tpu.memory_space<vmem>>, vector<8x32xf32>,
    %133 = arith.index_cast %91 : i32 to index
    %c0_91 = arith.constant 0 : index
    %134 = vector.load %arg23[%133, %c0_91] : memref<64x32xf32, #tpu.memory_space<vmem>>, vector<8x32xf32>
    tpu.vector_store %arg23[%133, %c0_91], %130 {strides = array<i32>} : memref<64x32xf32, #tpu.memory_space<vmem>>, vector<8x32xf32>,
    %c2_i32 = arith.constant 2 : i32
    %c8_i32_92 = arith.constant 8 : i32
    %135 = arith.muli %c2_i32, %c8_i32_92 : i32
    %136 = tpu.assume_multiple %135, 8 : i32
    %c0_93 = arith.constant 0 : index
    %c0_94 = arith.constant 0 : index
    %137 = vector.load %arg24[%c0_93, %c0_94] : memref<8x32xf32, #tpu.memory_space<vmem>>, vector<8x32xf32>
    %138 = arith.index_cast %136 : i32 to index
    %c0_95 = arith.constant 0 : index
    %139 = vector.load %arg19[%138, %c0_95] : memref<64x32xf32, #tpu.memory_space<vmem>>, vector<8x32xf32>
    %cst_96 = arith.constant dense<0.000000e+00> : vector<8x32xf32>
    %140 = tpu.matmul %137, %34, %cst_96 {dimension_numbers = #tpu.dot_dimension_numbers<[1], [0], [0], [1], [0, 0, 1, 1], [], []>} : vector<8x32xf32>, vector<32x32xf32>, vector<8x32xf32> -> vector<8x32xf32>
    %141 = arith.addf %139, %140 : vector<8x32xf32>
    %142 = arith.index_cast %136 : i32 to index
    %c0_97 = arith.constant 0 : index
    %143 = vector.load %arg20[%142, %c0_97] : memref<64x32xf32, #tpu.memory_space<vmem>>, vector<8x32xf32>
    %cst_98 = arith.constant dense<0.000000e+00> : vector<8x32xf32>
    %144 = tpu.matmul %137, %36, %cst_98 {dimension_numbers = #tpu.dot_dimension_numbers<[1], [0], [0], [1], [0, 0, 1, 1], [], []>} : vector<8x32xf32>, vector<32x32xf32>, vector<8x32xf32> -> vector<8x32xf32>
    %145 = arith.addf %143, %144 : vector<8x32xf32>
    %146 = arith.index_cast %136 : i32 to index
    %c0_99 = arith.constant 0 : index
    %147 = vector.load %arg21[%146, %c0_99] : memref<64x32xf32, #tpu.memory_space<vmem>>, vector<8x32xf32>
    %cst_100 = arith.constant dense<0.000000e+00> : vector<8x32xf32>
    %148 = tpu.matmul %137, %38, %cst_100 {dimension_numbers = #tpu.dot_dimension_numbers<[1], [0], [0], [1], [0, 0, 1, 1], [], []>} : vector<8x32xf32>, vector<32x32xf32>, vector<8x32xf32> -> vector<8x32xf32>
    %149 = arith.addf %147, %148 : vector<8x32xf32>
    %150 = arith.index_cast %136 : i32 to index
    %c0_101 = arith.constant 0 : index
    %151 = vector.load %arg22[%150, %c0_101] : memref<64x32xf32, #tpu.memory_space<vmem>>, vector<8x32xf32>
    %cst_102 = arith.constant dense<0.000000e+00> : vector<8x32xf32>
    %152 = tpu.matmul %137, %40, %cst_102 {dimension_numbers = #tpu.dot_dimension_numbers<[1], [0], [0], [1], [0, 0, 1, 1], [], []>} : vector<8x32xf32>, vector<32x32xf32>, vector<8x32xf32> -> vector<8x32xf32>
    %153 = arith.addf %151, %152 : vector<8x32xf32>
    %154 = arith.negf %141 : vector<8x32xf32>
    %155 = math.exp %154 : vector<8x32xf32>
    %cst_103 = arith.constant 1.000000e+00 : f32
    %156 = vector.broadcast %cst_103 : f32 to vector<8x32xf32>
    %157 = arith.addf %156, %155 : vector<8x32xf32>
    %158 = arith.divf %156, %157 : vector<8x32xf32>
    %159 = arith.negf %145 : vector<8x32xf32>
    %160 = math.exp %159 : vector<8x32xf32>
    %cst_104 = arith.constant 1.000000e+00 : f32
    %161 = vector.broadcast %cst_104 : f32 to vector<8x32xf32>
    %162 = arith.addf %161, %160 : vector<8x32xf32>
    %163 = arith.divf %161, %162 : vector<8x32xf32>
    %164 = math.tanh %149 : vector<8x32xf32>
    %165 = arith.negf %153 : vector<8x32xf32>
    %166 = math.exp %165 : vector<8x32xf32>
    %cst_105 = arith.constant 1.000000e+00 : f32
    %167 = vector.broadcast %cst_105 : f32 to vector<8x32xf32>
    %168 = arith.addf %167, %166 : vector<8x32xf32>
    %169 = arith.divf %167, %168 : vector<8x32xf32>
    %c0_106 = arith.constant 0 : index
    %c0_107 = arith.constant 0 : index
    %170 = vector.load %arg25[%c0_106, %c0_107] : memref<8x32xf32, #tpu.memory_space<vmem>>, vector<8x32xf32>
    %171 = arith.mulf %163, %170 : vector<8x32xf32>
    %172 = arith.mulf %158, %164 : vector<8x32xf32>
    %173 = arith.addf %171, %172 : vector<8x32xf32>
    %174 = math.tanh %173 : vector<8x32xf32>
    %175 = arith.mulf %169, %174 : vector<8x32xf32>
    %c0_108 = arith.constant 0 : index
    %c0_109 = arith.constant 0 : index
    %176 = vector.load %arg25[%c0_108, %c0_109] : memref<8x32xf32, #tpu.memory_space<vmem>>, vector<8x32xf32>
    tpu.vector_store %arg25[%c0_108, %c0_109], %173 {strides = array<i32>} : memref<8x32xf32, #tpu.memory_space<vmem>>, vector<8x32xf32>,
    %c0_110 = arith.constant 0 : index
    %c0_111 = arith.constant 0 : index
    %177 = vector.load %arg24[%c0_110, %c0_111] : memref<8x32xf32, #tpu.memory_space<vmem>>, vector<8x32xf32>
    tpu.vector_store %arg24[%c0_110, %c0_111], %175 {strides = array<i32>} : memref<8x32xf32, #tpu.memory_space<vmem>>, vector<8x32xf32>,
    %178 = arith.index_cast %136 : i32 to index
    %c0_112 = arith.constant 0 : index
    %179 = vector.load %arg23[%178, %c0_112] : memref<64x32xf32, #tpu.memory_space<vmem>>, vector<8x32xf32>
    tpu.vector_store %arg23[%178, %c0_112], %175 {strides = array<i32>} : memref<64x32xf32, #tpu.memory_space<vmem>>, vector<8x32xf32>,
    %c3_i32 = arith.constant 3 : i32
    %c8_i32_113 = arith.constant 8 : i32
    %180 = arith.muli %c3_i32, %c8_i32_113 : i32
    %181 = tpu.assume_multiple %180, 8 : i32
    %c0_114 = arith.constant 0 : index
    %c0_115 = arith.constant 0 : index
    %182 = vector.load %arg24[%c0_114, %c0_115] : memref<8x32xf32, #tpu.memory_space<vmem>>, vector<8x32xf32>
    %183 = arith.index_cast %181 : i32 to index
    %c0_116 = arith.constant 0 : index
    %184 = vector.load %arg19[%183, %c0_116] : memref<64x32xf32, #tpu.memory_space<vmem>>, vector<8x32xf32>
    %cst_117 = arith.constant dense<0.000000e+00> : vector<8x32xf32>
    %185 = tpu.matmul %182, %34, %cst_117 {dimension_numbers = #tpu.dot_dimension_numbers<[1], [0], [0], [1], [0, 0, 1, 1], [], []>} : vector<8x32xf32>, vector<32x32xf32>, vector<8x32xf32> -> vector<8x32xf32>
    %186 = arith.addf %184, %185 : vector<8x32xf32>
    %187 = arith.index_cast %181 : i32 to index
    %c0_118 = arith.constant 0 : index
    %188 = vector.load %arg20[%187, %c0_118] : memref<64x32xf32, #tpu.memory_space<vmem>>, vector<8x32xf32>
    %cst_119 = arith.constant dense<0.000000e+00> : vector<8x32xf32>
    %189 = tpu.matmul %182, %36, %cst_119 {dimension_numbers = #tpu.dot_dimension_numbers<[1], [0], [0], [1], [0, 0, 1, 1], [], []>} : vector<8x32xf32>, vector<32x32xf32>, vector<8x32xf32> -> vector<8x32xf32>
    %190 = arith.addf %188, %189 : vector<8x32xf32>
    %191 = arith.index_cast %181 : i32 to index
    %c0_120 = arith.constant 0 : index
    %192 = vector.load %arg21[%191, %c0_120] : memref<64x32xf32, #tpu.memory_space<vmem>>, vector<8x32xf32>
    %cst_121 = arith.constant dense<0.000000e+00> : vector<8x32xf32>
    %193 = tpu.matmul %182, %38, %cst_121 {dimension_numbers = #tpu.dot_dimension_numbers<[1], [0], [0], [1], [0, 0, 1, 1], [], []>} : vector<8x32xf32>, vector<32x32xf32>, vector<8x32xf32> -> vector<8x32xf32>
    %194 = arith.addf %192, %193 : vector<8x32xf32>
    %195 = arith.index_cast %181 : i32 to index
    %c0_122 = arith.constant 0 : index
    %196 = vector.load %arg22[%195, %c0_122] : memref<64x32xf32, #tpu.memory_space<vmem>>, vector<8x32xf32>
    %cst_123 = arith.constant dense<0.000000e+00> : vector<8x32xf32>
    %197 = tpu.matmul %182, %40, %cst_123 {dimension_numbers = #tpu.dot_dimension_numbers<[1], [0], [0], [1], [0, 0, 1, 1], [], []>} : vector<8x32xf32>, vector<32x32xf32>, vector<8x32xf32> -> vector<8x32xf32>
    %198 = arith.addf %196, %197 : vector<8x32xf32>
    %199 = arith.negf %186 : vector<8x32xf32>
    %200 = math.exp %199 : vector<8x32xf32>
    %cst_124 = arith.constant 1.000000e+00 : f32
    %201 = vector.broadcast %cst_124 : f32 to vector<8x32xf32>
    %202 = arith.addf %201, %200 : vector<8x32xf32>
    %203 = arith.divf %201, %202 : vector<8x32xf32>
    %204 = arith.negf %190 : vector<8x32xf32>
    %205 = math.exp %204 : vector<8x32xf32>
    %cst_125 = arith.constant 1.000000e+00 : f32
    %206 = vector.broadcast %cst_125 : f32 to vector<8x32xf32>
    %207 = arith.addf %206, %205 : vector<8x32xf32>
    %208 = arith.divf %206, %207 : vector<8x32xf32>
    %209 = math.tanh %194 : vector<8x32xf32>
    %210 = arith.negf %198 : vector<8x32xf32>
    %211 = math.exp %210 : vector<8x32xf32>
    %cst_126 = arith.constant 1.000000e+00 : f32
    %212 = vector.broadcast %cst_126 : f32 to vector<8x32xf32>
    %213 = arith.addf %212, %211 : vector<8x32xf32>
    %214 = arith.divf %212, %213 : vector<8x32xf32>
    %c0_127 = arith.constant 0 : index
    %c0_128 = arith.constant 0 : index
    %215 = vector.load %arg25[%c0_127, %c0_128] : memref<8x32xf32, #tpu.memory_space<vmem>>, vector<8x32xf32>
    %216 = arith.mulf %208, %215 : vector<8x32xf32>
    %217 = arith.mulf %203, %209 : vector<8x32xf32>
    %218 = arith.addf %216, %217 : vector<8x32xf32>
    %219 = math.tanh %218 : vector<8x32xf32>
    %220 = arith.mulf %214, %219 : vector<8x32xf32>
    %c0_129 = arith.constant 0 : index
    %c0_130 = arith.constant 0 : index
    %221 = vector.load %arg25[%c0_129, %c0_130] : memref<8x32xf32, #tpu.memory_space<vmem>>, vector<8x32xf32>
    tpu.vector_store %arg25[%c0_129, %c0_130], %218 {strides = array<i32>} : memref<8x32xf32, #tpu.memory_space<vmem>>, vector<8x32xf32>,
    %c0_131 = arith.constant 0 : index
    %c0_132 = arith.constant 0 : index
    %222 = vector.load %arg24[%c0_131, %c0_132] : memref<8x32xf32, #tpu.memory_space<vmem>>, vector<8x32xf32>
    tpu.vector_store %arg24[%c0_131, %c0_132], %220 {strides = array<i32>} : memref<8x32xf32, #tpu.memory_space<vmem>>, vector<8x32xf32>,
    %223 = arith.index_cast %181 : i32 to index
    %c0_133 = arith.constant 0 : index
    %224 = vector.load %arg23[%223, %c0_133] : memref<64x32xf32, #tpu.memory_space<vmem>>, vector<8x32xf32>
    tpu.vector_store %arg23[%223, %c0_133], %220 {strides = array<i32>} : memref<64x32xf32, #tpu.memory_space<vmem>>, vector<8x32xf32>,
    %c4_i32 = arith.constant 4 : i32
    %c8_i32_134 = arith.constant 8 : i32
    %225 = arith.muli %c4_i32, %c8_i32_134 : i32
    %226 = tpu.assume_multiple %225, 8 : i32
    %c0_135 = arith.constant 0 : index
    %c0_136 = arith.constant 0 : index
    %227 = vector.load %arg24[%c0_135, %c0_136] : memref<8x32xf32, #tpu.memory_space<vmem>>, vector<8x32xf32>
    %228 = arith.index_cast %226 : i32 to index
    %c0_137 = arith.constant 0 : index
    %229 = vector.load %arg19[%228, %c0_137] : memref<64x32xf32, #tpu.memory_space<vmem>>, vector<8x32xf32>
    %cst_138 = arith.constant dense<0.000000e+00> : vector<8x32xf32>
    %230 = tpu.matmul %227, %34, %cst_138 {dimension_numbers = #tpu.dot_dimension_numbers<[1], [0], [0], [1], [0, 0, 1, 1], [], []>} : vector<8x32xf32>, vector<32x32xf32>, vector<8x32xf32> -> vector<8x32xf32>
    %231 = arith.addf %229, %230 : vector<8x32xf32>
    %232 = arith.index_cast %226 : i32 to index
    %c0_139 = arith.constant 0 : index
    %233 = vector.load %arg20[%232, %c0_139] : memref<64x32xf32, #tpu.memory_space<vmem>>, vector<8x32xf32>
    %cst_140 = arith.constant dense<0.000000e+00> : vector<8x32xf32>
    %234 = tpu.matmul %227, %36, %cst_140 {dimension_numbers = #tpu.dot_dimension_numbers<[1], [0], [0], [1], [0, 0, 1, 1], [], []>} : vector<8x32xf32>, vector<32x32xf32>, vector<8x32xf32> -> vector<8x32xf32>
    %235 = arith.addf %233, %234 : vector<8x32xf32>
    %236 = arith.index_cast %226 : i32 to index
    %c0_141 = arith.constant 0 : index
    %237 = vector.load %arg21[%236, %c0_141] : memref<64x32xf32, #tpu.memory_space<vmem>>, vector<8x32xf32>
    %cst_142 = arith.constant dense<0.000000e+00> : vector<8x32xf32>
    %238 = tpu.matmul %227, %38, %cst_142 {dimension_numbers = #tpu.dot_dimension_numbers<[1], [0], [0], [1], [0, 0, 1, 1], [], []>} : vector<8x32xf32>, vector<32x32xf32>, vector<8x32xf32> -> vector<8x32xf32>
    %239 = arith.addf %237, %238 : vector<8x32xf32>
    %240 = arith.index_cast %226 : i32 to index
    %c0_143 = arith.constant 0 : index
    %241 = vector.load %arg22[%240, %c0_143] : memref<64x32xf32, #tpu.memory_space<vmem>>, vector<8x32xf32>
    %cst_144 = arith.constant dense<0.000000e+00> : vector<8x32xf32>
    %242 = tpu.matmul %227, %40, %cst_144 {dimension_numbers = #tpu.dot_dimension_numbers<[1], [0], [0], [1], [0, 0, 1, 1], [], []>} : vector<8x32xf32>, vector<32x32xf32>, vector<8x32xf32> -> vector<8x32xf32>
    %243 = arith.addf %241, %242 : vector<8x32xf32>
    %244 = arith.negf %231 : vector<8x32xf32>
    %245 = math.exp %244 : vector<8x32xf32>
    %cst_145 = arith.constant 1.000000e+00 : f32
    %246 = vector.broadcast %cst_145 : f32 to vector<8x32xf32>
    %247 = arith.addf %246, %245 : vector<8x32xf32>
    %248 = arith.divf %246, %247 : vector<8x32xf32>
    %249 = arith.negf %235 : vector<8x32xf32>
    %250 = math.exp %249 : vector<8x32xf32>
    %cst_146 = arith.constant 1.000000e+00 : f32
    %251 = vector.broadcast %cst_146 : f32 to vector<8x32xf32>
    %252 = arith.addf %251, %250 : vector<8x32xf32>
    %253 = arith.divf %251, %252 : vector<8x32xf32>
    %254 = math.tanh %239 : vector<8x32xf32>
    %255 = arith.negf %243 : vector<8x32xf32>
    %256 = math.exp %255 : vector<8x32xf32>
    %cst_147 = arith.constant 1.000000e+00 : f32
    %257 = vector.broadcast %cst_147 : f32 to vector<8x32xf32>
    %258 = arith.addf %257, %256 : vector<8x32xf32>
    %259 = arith.divf %257, %258 : vector<8x32xf32>
    %c0_148 = arith.constant 0 : index
    %c0_149 = arith.constant 0 : index
    %260 = vector.load %arg25[%c0_148, %c0_149] : memref<8x32xf32, #tpu.memory_space<vmem>>, vector<8x32xf32>
    %261 = arith.mulf %253, %260 : vector<8x32xf32>
    %262 = arith.mulf %248, %254 : vector<8x32xf32>
    %263 = arith.addf %261, %262 : vector<8x32xf32>
    %264 = math.tanh %263 : vector<8x32xf32>
    %265 = arith.mulf %259, %264 : vector<8x32xf32>
    %c0_150 = arith.constant 0 : index
    %c0_151 = arith.constant 0 : index
    %266 = vector.load %arg25[%c0_150, %c0_151] : memref<8x32xf32, #tpu.memory_space<vmem>>, vector<8x32xf32>
    tpu.vector_store %arg25[%c0_150, %c0_151], %263 {strides = array<i32>} : memref<8x32xf32, #tpu.memory_space<vmem>>, vector<8x32xf32>,
    %c0_152 = arith.constant 0 : index
    %c0_153 = arith.constant 0 : index
    %267 = vector.load %arg24[%c0_152, %c0_153] : memref<8x32xf32, #tpu.memory_space<vmem>>, vector<8x32xf32>
    tpu.vector_store %arg24[%c0_152, %c0_153], %265 {strides = array<i32>} : memref<8x32xf32, #tpu.memory_space<vmem>>, vector<8x32xf32>,
    %268 = arith.index_cast %226 : i32 to index
    %c0_154 = arith.constant 0 : index
    %269 = vector.load %arg23[%268, %c0_154] : memref<64x32xf32, #tpu.memory_space<vmem>>, vector<8x32xf32>
    tpu.vector_store %arg23[%268, %c0_154], %265 {strides = array<i32>} : memref<64x32xf32, #tpu.memory_space<vmem>>, vector<8x32xf32>,
    %c5_i32 = arith.constant 5 : i32
    %c8_i32_155 = arith.constant 8 : i32
    %270 = arith.muli %c5_i32, %c8_i32_155 : i32
    %271 = tpu.assume_multiple %270, 8 : i32
    %c0_156 = arith.constant 0 : index
    %c0_157 = arith.constant 0 : index
    %272 = vector.load %arg24[%c0_156, %c0_157] : memref<8x32xf32, #tpu.memory_space<vmem>>, vector<8x32xf32>
    %273 = arith.index_cast %271 : i32 to index
    %c0_158 = arith.constant 0 : index
    %274 = vector.load %arg19[%273, %c0_158] : memref<64x32xf32, #tpu.memory_space<vmem>>, vector<8x32xf32>
    %cst_159 = arith.constant dense<0.000000e+00> : vector<8x32xf32>
    %275 = tpu.matmul %272, %34, %cst_159 {dimension_numbers = #tpu.dot_dimension_numbers<[1], [0], [0], [1], [0, 0, 1, 1], [], []>} : vector<8x32xf32>, vector<32x32xf32>, vector<8x32xf32> -> vector<8x32xf32>
    %276 = arith.addf %274, %275 : vector<8x32xf32>
    %277 = arith.index_cast %271 : i32 to index
    %c0_160 = arith.constant 0 : index
    %278 = vector.load %arg20[%277, %c0_160] : memref<64x32xf32, #tpu.memory_space<vmem>>, vector<8x32xf32>
    %cst_161 = arith.constant dense<0.000000e+00> : vector<8x32xf32>
    %279 = tpu.matmul %272, %36, %cst_161 {dimension_numbers = #tpu.dot_dimension_numbers<[1], [0], [0], [1], [0, 0, 1, 1], [], []>} : vector<8x32xf32>, vector<32x32xf32>, vector<8x32xf32> -> vector<8x32xf32>
    %280 = arith.addf %278, %279 : vector<8x32xf32>
    %281 = arith.index_cast %271 : i32 to index
    %c0_162 = arith.constant 0 : index
    %282 = vector.load %arg21[%281, %c0_162] : memref<64x32xf32, #tpu.memory_space<vmem>>, vector<8x32xf32>
    %cst_163 = arith.constant dense<0.000000e+00> : vector<8x32xf32>
    %283 = tpu.matmul %272, %38, %cst_163 {dimension_numbers = #tpu.dot_dimension_numbers<[1], [0], [0], [1], [0, 0, 1, 1], [], []>} : vector<8x32xf32>, vector<32x32xf32>, vector<8x32xf32> -> vector<8x32xf32>
    %284 = arith.addf %282, %283 : vector<8x32xf32>
    %285 = arith.index_cast %271 : i32 to index
    %c0_164 = arith.constant 0 : index
    %286 = vector.load %arg22[%285, %c0_164] : memref<64x32xf32, #tpu.memory_space<vmem>>, vector<8x32xf32>
    %cst_165 = arith.constant dense<0.000000e+00> : vector<8x32xf32>
    %287 = tpu.matmul %272, %40, %cst_165 {dimension_numbers = #tpu.dot_dimension_numbers<[1], [0], [0], [1], [0, 0, 1, 1], [], []>} : vector<8x32xf32>, vector<32x32xf32>, vector<8x32xf32> -> vector<8x32xf32>
    %288 = arith.addf %286, %287 : vector<8x32xf32>
    %289 = arith.negf %276 : vector<8x32xf32>
    %290 = math.exp %289 : vector<8x32xf32>
    %cst_166 = arith.constant 1.000000e+00 : f32
    %291 = vector.broadcast %cst_166 : f32 to vector<8x32xf32>
    %292 = arith.addf %291, %290 : vector<8x32xf32>
    %293 = arith.divf %291, %292 : vector<8x32xf32>
    %294 = arith.negf %280 : vector<8x32xf32>
    %295 = math.exp %294 : vector<8x32xf32>
    %cst_167 = arith.constant 1.000000e+00 : f32
    %296 = vector.broadcast %cst_167 : f32 to vector<8x32xf32>
    %297 = arith.addf %296, %295 : vector<8x32xf32>
    %298 = arith.divf %296, %297 : vector<8x32xf32>
    %299 = math.tanh %284 : vector<8x32xf32>
    %300 = arith.negf %288 : vector<8x32xf32>
    %301 = math.exp %300 : vector<8x32xf32>
    %cst_168 = arith.constant 1.000000e+00 : f32
    %302 = vector.broadcast %cst_168 : f32 to vector<8x32xf32>
    %303 = arith.addf %302, %301 : vector<8x32xf32>
    %304 = arith.divf %302, %303 : vector<8x32xf32>
    %c0_169 = arith.constant 0 : index
    %c0_170 = arith.constant 0 : index
    %305 = vector.load %arg25[%c0_169, %c0_170] : memref<8x32xf32, #tpu.memory_space<vmem>>, vector<8x32xf32>
    %306 = arith.mulf %298, %305 : vector<8x32xf32>
    %307 = arith.mulf %293, %299 : vector<8x32xf32>
    %308 = arith.addf %306, %307 : vector<8x32xf32>
    %309 = math.tanh %308 : vector<8x32xf32>
    %310 = arith.mulf %304, %309 : vector<8x32xf32>
    %c0_171 = arith.constant 0 : index
    %c0_172 = arith.constant 0 : index
    %311 = vector.load %arg25[%c0_171, %c0_172] : memref<8x32xf32, #tpu.memory_space<vmem>>, vector<8x32xf32>
    tpu.vector_store %arg25[%c0_171, %c0_172], %308 {strides = array<i32>} : memref<8x32xf32, #tpu.memory_space<vmem>>, vector<8x32xf32>,
    %c0_173 = arith.constant 0 : index
    %c0_174 = arith.constant 0 : index
    %312 = vector.load %arg24[%c0_173, %c0_174] : memref<8x32xf32, #tpu.memory_space<vmem>>, vector<8x32xf32>
    tpu.vector_store %arg24[%c0_173, %c0_174], %310 {strides = array<i32>} : memref<8x32xf32, #tpu.memory_space<vmem>>, vector<8x32xf32>,
    %313 = arith.index_cast %271 : i32 to index
    %c0_175 = arith.constant 0 : index
    %314 = vector.load %arg23[%313, %c0_175] : memref<64x32xf32, #tpu.memory_space<vmem>>, vector<8x32xf32>
    tpu.vector_store %arg23[%313, %c0_175], %310 {strides = array<i32>} : memref<64x32xf32, #tpu.memory_space<vmem>>, vector<8x32xf32>,
    %c6_i32 = arith.constant 6 : i32
    %c8_i32_176 = arith.constant 8 : i32
    %315 = arith.muli %c6_i32, %c8_i32_176 : i32
    %316 = tpu.assume_multiple %315, 8 : i32
    %c0_177 = arith.constant 0 : index
    %c0_178 = arith.constant 0 : index
    %317 = vector.load %arg24[%c0_177, %c0_178] : memref<8x32xf32, #tpu.memory_space<vmem>>, vector<8x32xf32>
    %318 = arith.index_cast %316 : i32 to index
    %c0_179 = arith.constant 0 : index
    %319 = vector.load %arg19[%318, %c0_179] : memref<64x32xf32, #tpu.memory_space<vmem>>, vector<8x32xf32>
    %cst_180 = arith.constant dense<0.000000e+00> : vector<8x32xf32>
    %320 = tpu.matmul %317, %34, %cst_180 {dimension_numbers = #tpu.dot_dimension_numbers<[1], [0], [0], [1], [0, 0, 1, 1], [], []>} : vector<8x32xf32>, vector<32x32xf32>, vector<8x32xf32> -> vector<8x32xf32>
    %321 = arith.addf %319, %320 : vector<8x32xf32>
    %322 = arith.index_cast %316 : i32 to index
    %c0_181 = arith.constant 0 : index
    %323 = vector.load %arg20[%322, %c0_181] : memref<64x32xf32, #tpu.memory_space<vmem>>, vector<8x32xf32>
    %cst_182 = arith.constant dense<0.000000e+00> : vector<8x32xf32>
    %324 = tpu.matmul %317, %36, %cst_182 {dimension_numbers = #tpu.dot_dimension_numbers<[1], [0], [0], [1], [0, 0, 1, 1], [], []>} : vector<8x32xf32>, vector<32x32xf32>, vector<8x32xf32> -> vector<8x32xf32>
    %325 = arith.addf %323, %324 : vector<8x32xf32>
    %326 = arith.index_cast %316 : i32 to index
    %c0_183 = arith.constant 0 : index
    %327 = vector.load %arg21[%326, %c0_183] : memref<64x32xf32, #tpu.memory_space<vmem>>, vector<8x32xf32>
    %cst_184 = arith.constant dense<0.000000e+00> : vector<8x32xf32>
    %328 = tpu.matmul %317, %38, %cst_184 {dimension_numbers = #tpu.dot_dimension_numbers<[1], [0], [0], [1], [0, 0, 1, 1], [], []>} : vector<8x32xf32>, vector<32x32xf32>, vector<8x32xf32> -> vector<8x32xf32>
    %329 = arith.addf %327, %328 : vector<8x32xf32>
    %330 = arith.index_cast %316 : i32 to index
    %c0_185 = arith.constant 0 : index
    %331 = vector.load %arg22[%330, %c0_185] : memref<64x32xf32, #tpu.memory_space<vmem>>, vector<8x32xf32>
    %cst_186 = arith.constant dense<0.000000e+00> : vector<8x32xf32>
    %332 = tpu.matmul %317, %40, %cst_186 {dimension_numbers = #tpu.dot_dimension_numbers<[1], [0], [0], [1], [0, 0, 1, 1], [], []>} : vector<8x32xf32>, vector<32x32xf32>, vector<8x32xf32> -> vector<8x32xf32>
    %333 = arith.addf %331, %332 : vector<8x32xf32>
    %334 = arith.negf %321 : vector<8x32xf32>
    %335 = math.exp %334 : vector<8x32xf32>
    %cst_187 = arith.constant 1.000000e+00 : f32
    %336 = vector.broadcast %cst_187 : f32 to vector<8x32xf32>
    %337 = arith.addf %336, %335 : vector<8x32xf32>
    %338 = arith.divf %336, %337 : vector<8x32xf32>
    %339 = arith.negf %325 : vector<8x32xf32>
    %340 = math.exp %339 : vector<8x32xf32>
    %cst_188 = arith.constant 1.000000e+00 : f32
    %341 = vector.broadcast %cst_188 : f32 to vector<8x32xf32>
    %342 = arith.addf %341, %340 : vector<8x32xf32>
    %343 = arith.divf %341, %342 : vector<8x32xf32>
    %344 = math.tanh %329 : vector<8x32xf32>
    %345 = arith.negf %333 : vector<8x32xf32>
    %346 = math.exp %345 : vector<8x32xf32>
    %cst_189 = arith.constant 1.000000e+00 : f32
    %347 = vector.broadcast %cst_189 : f32 to vector<8x32xf32>
    %348 = arith.addf %347, %346 : vector<8x32xf32>
    %349 = arith.divf %347, %348 : vector<8x32xf32>
    %c0_190 = arith.constant 0 : index
    %c0_191 = arith.constant 0 : index
    %350 = vector.load %arg25[%c0_190, %c0_191] : memref<8x32xf32, #tpu.memory_space<vmem>>, vector<8x32xf32>
    %351 = arith.mulf %343, %350 : vector<8x32xf32>
    %352 = arith.mulf %338, %344 : vector<8x32xf32>
    %353 = arith.addf %351, %352 : vector<8x32xf32>
    %354 = math.tanh %353 : vector<8x32xf32>
    %355 = arith.mulf %349, %354 : vector<8x32xf32>
    %c0_192 = arith.constant 0 : index
    %c0_193 = arith.constant 0 : index
    %356 = vector.load %arg25[%c0_192, %c0_193] : memref<8x32xf32, #tpu.memory_space<vmem>>, vector<8x32xf32>
    tpu.vector_store %arg25[%c0_192, %c0_193], %353 {strides = array<i32>} : memref<8x32xf32, #tpu.memory_space<vmem>>, vector<8x32xf32>,
    %c0_194 = arith.constant 0 : index
    %c0_195 = arith.constant 0 : index
    %357 = vector.load %arg24[%c0_194, %c0_195] : memref<8x32xf32, #tpu.memory_space<vmem>>, vector<8x32xf32>
    tpu.vector_store %arg24[%c0_194, %c0_195], %355 {strides = array<i32>} : memref<8x32xf32, #tpu.memory_space<vmem>>, vector<8x32xf32>,
    %358 = arith.index_cast %316 : i32 to index
    %c0_196 = arith.constant 0 : index
    %359 = vector.load %arg23[%358, %c0_196] : memref<64x32xf32, #tpu.memory_space<vmem>>, vector<8x32xf32>
    tpu.vector_store %arg23[%358, %c0_196], %355 {strides = array<i32>} : memref<64x32xf32, #tpu.memory_space<vmem>>, vector<8x32xf32>,
    %c7_i32 = arith.constant 7 : i32
    %c8_i32_197 = arith.constant 8 : i32
    %360 = arith.muli %c7_i32, %c8_i32_197 : i32
    %361 = tpu.assume_multiple %360, 8 : i32
    %c0_198 = arith.constant 0 : index
    %c0_199 = arith.constant 0 : index
    %362 = vector.load %arg24[%c0_198, %c0_199] : memref<8x32xf32, #tpu.memory_space<vmem>>, vector<8x32xf32>
    %363 = arith.index_cast %361 : i32 to index
    %c0_200 = arith.constant 0 : index
    %364 = vector.load %arg19[%363, %c0_200] : memref<64x32xf32, #tpu.memory_space<vmem>>, vector<8x32xf32>
    %cst_201 = arith.constant dense<0.000000e+00> : vector<8x32xf32>
    %365 = tpu.matmul %362, %34, %cst_201 {dimension_numbers = #tpu.dot_dimension_numbers<[1], [0], [0], [1], [0, 0, 1, 1], [], []>} : vector<8x32xf32>, vector<32x32xf32>, vector<8x32xf32> -> vector<8x32xf32>
    %366 = arith.addf %364, %365 : vector<8x32xf32>
    %367 = arith.index_cast %361 : i32 to index
    %c0_202 = arith.constant 0 : index
    %368 = vector.load %arg20[%367, %c0_202] : memref<64x32xf32, #tpu.memory_space<vmem>>, vector<8x32xf32>
    %cst_203 = arith.constant dense<0.000000e+00> : vector<8x32xf32>
    %369 = tpu.matmul %362, %36, %cst_203 {dimension_numbers = #tpu.dot_dimension_numbers<[1], [0], [0], [1], [0, 0, 1, 1], [], []>} : vector<8x32xf32>, vector<32x32xf32>, vector<8x32xf32> -> vector<8x32xf32>
    %370 = arith.addf %368, %369 : vector<8x32xf32>
    %371 = arith.index_cast %361 : i32 to index
    %c0_204 = arith.constant 0 : index
    %372 = vector.load %arg21[%371, %c0_204] : memref<64x32xf32, #tpu.memory_space<vmem>>, vector<8x32xf32>
    %cst_205 = arith.constant dense<0.000000e+00> : vector<8x32xf32>
    %373 = tpu.matmul %362, %38, %cst_205 {dimension_numbers = #tpu.dot_dimension_numbers<[1], [0], [0], [1], [0, 0, 1, 1], [], []>} : vector<8x32xf32>, vector<32x32xf32>, vector<8x32xf32> -> vector<8x32xf32>
    %374 = arith.addf %372, %373 : vector<8x32xf32>
    %375 = arith.index_cast %361 : i32 to index
    %c0_206 = arith.constant 0 : index
    %376 = vector.load %arg22[%375, %c0_206] : memref<64x32xf32, #tpu.memory_space<vmem>>, vector<8x32xf32>
    %cst_207 = arith.constant dense<0.000000e+00> : vector<8x32xf32>
    %377 = tpu.matmul %362, %40, %cst_207 {dimension_numbers = #tpu.dot_dimension_numbers<[1], [0], [0], [1], [0, 0, 1, 1], [], []>} : vector<8x32xf32>, vector<32x32xf32>, vector<8x32xf32> -> vector<8x32xf32>
    %378 = arith.addf %376, %377 : vector<8x32xf32>
    %379 = arith.negf %366 : vector<8x32xf32>
    %380 = math.exp %379 : vector<8x32xf32>
    %cst_208 = arith.constant 1.000000e+00 : f32
    %381 = vector.broadcast %cst_208 : f32 to vector<8x32xf32>
    %382 = arith.addf %381, %380 : vector<8x32xf32>
    %383 = arith.divf %381, %382 : vector<8x32xf32>
    %384 = arith.negf %370 : vector<8x32xf32>
    %385 = math.exp %384 : vector<8x32xf32>
    %cst_209 = arith.constant 1.000000e+00 : f32
    %386 = vector.broadcast %cst_209 : f32 to vector<8x32xf32>
    %387 = arith.addf %386, %385 : vector<8x32xf32>
    %388 = arith.divf %386, %387 : vector<8x32xf32>
    %389 = math.tanh %374 : vector<8x32xf32>
    %390 = arith.negf %378 : vector<8x32xf32>
    %391 = math.exp %390 : vector<8x32xf32>
    %cst_210 = arith.constant 1.000000e+00 : f32
    %392 = vector.broadcast %cst_210 : f32 to vector<8x32xf32>
    %393 = arith.addf %392, %391 : vector<8x32xf32>
    %394 = arith.divf %392, %393 : vector<8x32xf32>
    %c0_211 = arith.constant 0 : index
    %c0_212 = arith.constant 0 : index
    %395 = vector.load %arg25[%c0_211, %c0_212] : memref<8x32xf32, #tpu.memory_space<vmem>>, vector<8x32xf32>
    %396 = arith.mulf %388, %395 : vector<8x32xf32>
    %397 = arith.mulf %383, %389 : vector<8x32xf32>
    %398 = arith.addf %396, %397 : vector<8x32xf32>
    %399 = math.tanh %398 : vector<8x32xf32>
    %400 = arith.mulf %394, %399 : vector<8x32xf32>
    %c0_213 = arith.constant 0 : index
    %c0_214 = arith.constant 0 : index
    %401 = vector.load %arg25[%c0_213, %c0_214] : memref<8x32xf32, #tpu.memory_space<vmem>>, vector<8x32xf32>
    tpu.vector_store %arg25[%c0_213, %c0_214], %398 {strides = array<i32>} : memref<8x32xf32, #tpu.memory_space<vmem>>, vector<8x32xf32>,
    %c0_215 = arith.constant 0 : index
    %c0_216 = arith.constant 0 : index
    %402 = vector.load %arg24[%c0_215, %c0_216] : memref<8x32xf32, #tpu.memory_space<vmem>>, vector<8x32xf32>
    tpu.vector_store %arg24[%c0_215, %c0_216], %400 {strides = array<i32>} : memref<8x32xf32, #tpu.memory_space<vmem>>, vector<8x32xf32>,
    %403 = arith.index_cast %361 : i32 to index
    %c0_217 = arith.constant 0 : index
    %404 = vector.load %arg23[%403, %c0_217] : memref<64x32xf32, #tpu.memory_space<vmem>>, vector<8x32xf32>
    tpu.vector_store %arg23[%403, %c0_217], %400 {strides = array<i32>} : memref<64x32xf32, #tpu.memory_space<vmem>>, vector<8x32xf32>,
    %c8_i32_218 = arith.constant 8 : i32
    %c0_219 = arith.constant 0 : index
    %c0_220 = arith.constant 0 : index
    %405 = vector.load %arg23[%c0_219, %c0_220] : memref<64x32xf32, #tpu.memory_space<vmem>>, vector<64x32xf32>
    %c0_221 = arith.constant 0 : index
    %c0_222 = arith.constant 0 : index
    %406 = vector.load %arg5[%c0_221, %c0_222] : memref<32x16xf32, #tpu.memory_space<vmem>>, vector<32x16xf32>
    %cst_223 = arith.constant dense<0.000000e+00> : vector<64x16xf32>
    %407 = tpu.matmul %405, %406, %cst_223 {dimension_numbers = #tpu.dot_dimension_numbers<[1], [0], [0], [1], [0, 0, 1, 1], [], []>} : vector<64x32xf32>, vector<32x16xf32>, vector<64x16xf32> -> vector<64x16xf32>
    %c0_224 = arith.constant 0 : index
    %c0_225 = arith.constant 0 : index
    %408 = vector.load %arg6[%c0_224, %c0_225] : memref<1x16xf32, #tpu.memory_space<vmem>>, vector<1x16xf32>
    %409 = vector.broadcast %408 : vector<1x16xf32> to vector<64x16xf32>
    %410 = arith.addf %407, %409 : vector<64x16xf32>
    %c0_226 = arith.constant 0 : index
    %c0_227 = arith.constant 0 : index
    %c0_228 = arith.constant 0 : index
    %411 = vector.load %arg7[%c0_226, %c0_227, %c0_228] : memref<4x16x32xf32, #tpu.memory_space<vmem>>, vector<1x16x32xf32>
    %412 = vector.shape_cast %411 : vector<1x16x32xf32> to vector<16x32xf32>
    %cst_229 = arith.constant dense<0.000000e+00> : vector<64x32xf32>
    %413 = tpu.matmul %410, %412, %cst_229 {dimension_numbers = #tpu.dot_dimension_numbers<[1], [0], [0], [1], [0, 0, 1, 1], [], []>} : vector<64x16xf32>, vector<16x32xf32>, vector<64x32xf32> -> vector<64x32xf32>
    %c0_230 = arith.constant 0 : index
    %c0_231 = arith.constant 0 : index
    %c0_232 = arith.constant 0 : index
    %414 = vector.load %arg9[%c0_230, %c0_231, %c0_232] : memref<4x1x32xf32, #tpu.memory_space<vmem>>, vector<1x1x32xf32>
    %415 = vector.shape_cast %414 : vector<1x1x32xf32> to vector<1x32xf32>
    %416 = vector.broadcast %415 : vector<1x32xf32> to vector<64x32xf32>
    %417 = arith.addf %413, %416 : vector<64x32xf32>
    %c0_233 = arith.constant 0 : index
    %c0_234 = arith.constant 0 : index
    %418 = vector.load %arg19[%c0_233, %c0_234] : memref<64x32xf32, #tpu.memory_space<vmem>>, vector<64x32xf32>
    tpu.vector_store %arg19[%c0_233, %c0_234], %417 {strides = array<i32>} : memref<64x32xf32, #tpu.memory_space<vmem>>, vector<64x32xf32>,
    %c1_235 = arith.constant 1 : index
    %c0_236 = arith.constant 0 : index
    %c0_237 = arith.constant 0 : index
    %419 = vector.load %arg7[%c1_235, %c0_236, %c0_237] : memref<4x16x32xf32, #tpu.memory_space<vmem>>, vector<1x16x32xf32>
    %420 = vector.shape_cast %419 : vector<1x16x32xf32> to vector<16x32xf32>
    %cst_238 = arith.constant dense<0.000000e+00> : vector<64x32xf32>
    %421 = tpu.matmul %410, %420, %cst_238 {dimension_numbers = #tpu.dot_dimension_numbers<[1], [0], [0], [1], [0, 0, 1, 1], [], []>} : vector<64x16xf32>, vector<16x32xf32>, vector<64x32xf32> -> vector<64x32xf32>
    %c1_239 = arith.constant 1 : index
    %c0_240 = arith.constant 0 : index
    %c0_241 = arith.constant 0 : index
    %422 = vector.load %arg9[%c1_239, %c0_240, %c0_241] : memref<4x1x32xf32, #tpu.memory_space<vmem>>, vector<1x1x32xf32>
    %423 = vector.shape_cast %422 : vector<1x1x32xf32> to vector<1x32xf32>
    %424 = vector.broadcast %423 : vector<1x32xf32> to vector<64x32xf32>
    %425 = arith.addf %421, %424 : vector<64x32xf32>
    %c0_242 = arith.constant 0 : index
    %c0_243 = arith.constant 0 : index
    %426 = vector.load %arg20[%c0_242, %c0_243] : memref<64x32xf32, #tpu.memory_space<vmem>>, vector<64x32xf32>
    tpu.vector_store %arg20[%c0_242, %c0_243], %425 {strides = array<i32>} : memref<64x32xf32, #tpu.memory_space<vmem>>, vector<64x32xf32>,
    %c2_244 = arith.constant 2 : index
    %c0_245 = arith.constant 0 : index
    %c0_246 = arith.constant 0 : index
    %427 = vector.load %arg7[%c2_244, %c0_245, %c0_246] : memref<4x16x32xf32, #tpu.memory_space<vmem>>, vector<1x16x32xf32>
    %428 = vector.shape_cast %427 : vector<1x16x32xf32> to vector<16x32xf32>
    %cst_247 = arith.constant dense<0.000000e+00> : vector<64x32xf32>
    %429 = tpu.matmul %410, %428, %cst_247 {dimension_numbers = #tpu.dot_dimension_numbers<[1], [0], [0], [1], [0, 0, 1, 1], [], []>} : vector<64x16xf32>, vector<16x32xf32>, vector<64x32xf32> -> vector<64x32xf32>
    %c2_248 = arith.constant 2 : index
    %c0_249 = arith.constant 0 : index
    %c0_250 = arith.constant 0 : index
    %430 = vector.load %arg9[%c2_248, %c0_249, %c0_250] : memref<4x1x32xf32, #tpu.memory_space<vmem>>, vector<1x1x32xf32>
    %431 = vector.shape_cast %430 : vector<1x1x32xf32> to vector<1x32xf32>
    %432 = vector.broadcast %431 : vector<1x32xf32> to vector<64x32xf32>
    %433 = arith.addf %429, %432 : vector<64x32xf32>
    %c0_251 = arith.constant 0 : index
    %c0_252 = arith.constant 0 : index
    %434 = vector.load %arg21[%c0_251, %c0_252] : memref<64x32xf32, #tpu.memory_space<vmem>>, vector<64x32xf32>
    tpu.vector_store %arg21[%c0_251, %c0_252], %433 {strides = array<i32>} : memref<64x32xf32, #tpu.memory_space<vmem>>, vector<64x32xf32>,
    %c3_253 = arith.constant 3 : index
    %c0_254 = arith.constant 0 : index
    %c0_255 = arith.constant 0 : index
    %435 = vector.load %arg7[%c3_253, %c0_254, %c0_255] : memref<4x16x32xf32, #tpu.memory_space<vmem>>, vector<1x16x32xf32>
    %436 = vector.shape_cast %435 : vector<1x16x32xf32> to vector<16x32xf32>
    %cst_256 = arith.constant dense<0.000000e+00> : vector<64x32xf32>
    %437 = tpu.matmul %410, %436, %cst_256 {dimension_numbers = #tpu.dot_dimension_numbers<[1], [0], [0], [1], [0, 0, 1, 1], [], []>} : vector<64x16xf32>, vector<16x32xf32>, vector<64x32xf32> -> vector<64x32xf32>
    %c3_257 = arith.constant 3 : index
    %c0_258 = arith.constant 0 : index
    %c0_259 = arith.constant 0 : index
    %438 = vector.load %arg9[%c3_257, %c0_258, %c0_259] : memref<4x1x32xf32, #tpu.memory_space<vmem>>, vector<1x1x32xf32>
    %439 = vector.shape_cast %438 : vector<1x1x32xf32> to vector<1x32xf32>
    %440 = vector.broadcast %439 : vector<1x32xf32> to vector<64x32xf32>
    %441 = arith.addf %437, %440 : vector<64x32xf32>
    %c0_260 = arith.constant 0 : index
    %c0_261 = arith.constant 0 : index
    %442 = vector.load %arg22[%c0_260, %c0_261] : memref<64x32xf32, #tpu.memory_space<vmem>>, vector<64x32xf32>
    tpu.vector_store %arg22[%c0_260, %c0_261], %441 {strides = array<i32>} : memref<64x32xf32, #tpu.memory_space<vmem>>, vector<64x32xf32>,
    %c0_262 = arith.constant 0 : index
    %c0_263 = arith.constant 0 : index
    %c0_264 = arith.constant 0 : index
    %443 = vector.load %arg8[%c0_262, %c0_263, %c0_264] : memref<4x32x32xf32, #tpu.memory_space<vmem>>, vector<1x32x32xf32>
    %444 = vector.shape_cast %443 : vector<1x32x32xf32> to vector<32x32xf32>
    %c1_265 = arith.constant 1 : index
    %c0_266 = arith.constant 0 : index
    %c0_267 = arith.constant 0 : index
    %445 = vector.load %arg8[%c1_265, %c0_266, %c0_267] : memref<4x32x32xf32, #tpu.memory_space<vmem>>, vector<1x32x32xf32>
    %446 = vector.shape_cast %445 : vector<1x32x32xf32> to vector<32x32xf32>
    %c2_268 = arith.constant 2 : index
    %c0_269 = arith.constant 0 : index
    %c0_270 = arith.constant 0 : index
    %447 = vector.load %arg8[%c2_268, %c0_269, %c0_270] : memref<4x32x32xf32, #tpu.memory_space<vmem>>, vector<1x32x32xf32>
    %448 = vector.shape_cast %447 : vector<1x32x32xf32> to vector<32x32xf32>
    %c3_271 = arith.constant 3 : index
    %c0_272 = arith.constant 0 : index
    %c0_273 = arith.constant 0 : index
    %449 = vector.load %arg8[%c3_271, %c0_272, %c0_273] : memref<4x32x32xf32, #tpu.memory_space<vmem>>, vector<1x32x32xf32>
    %450 = vector.shape_cast %449 : vector<1x32x32xf32> to vector<32x32xf32>
    %cst_274 = arith.constant 0.000000e+00 : f32
    %451 = vector.broadcast %cst_274 : f32 to vector<8x32xf32>
    %c0_275 = arith.constant 0 : index
    %c0_276 = arith.constant 0 : index
    %452 = vector.load %arg24[%c0_275, %c0_276] : memref<8x32xf32, #tpu.memory_space<vmem>>, vector<8x32xf32>
    tpu.vector_store %arg24[%c0_275, %c0_276], %451 {strides = array<i32>} : memref<8x32xf32, #tpu.memory_space<vmem>>, vector<8x32xf32>,
    %cst_277 = arith.constant 0.000000e+00 : f32
    %453 = vector.broadcast %cst_277 : f32 to vector<8x32xf32>
    %c0_278 = arith.constant 0 : index
    %c0_279 = arith.constant 0 : index
    %454 = vector.load %arg25[%c0_278, %c0_279] : memref<8x32xf32, #tpu.memory_space<vmem>>, vector<8x32xf32>
    tpu.vector_store %arg25[%c0_278, %c0_279], %453 {strides = array<i32>} : memref<8x32xf32, #tpu.memory_space<vmem>>, vector<8x32xf32>,
    %c0_i32_280 = arith.constant 0 : i32
    %c8_i32_281 = arith.constant 8 : i32
    %455 = arith.muli %c0_i32_280, %c8_i32_281 : i32
    %456 = tpu.assume_multiple %455, 8 : i32
    %c0_282 = arith.constant 0 : index
    %c0_283 = arith.constant 0 : index
    %457 = vector.load %arg24[%c0_282, %c0_283] : memref<8x32xf32, #tpu.memory_space<vmem>>, vector<8x32xf32>
    %458 = arith.index_cast %456 : i32 to index
    %c0_284 = arith.constant 0 : index
    %459 = vector.load %arg19[%458, %c0_284] : memref<64x32xf32, #tpu.memory_space<vmem>>, vector<8x32xf32>
    %cst_285 = arith.constant dense<0.000000e+00> : vector<8x32xf32>
    %460 = tpu.matmul %457, %444, %cst_285 {dimension_numbers = #tpu.dot_dimension_numbers<[1], [0], [0], [1], [0, 0, 1, 1], [], []>} : vector<8x32xf32>, vector<32x32xf32>, vector<8x32xf32> -> vector<8x32xf32>
    %461 = arith.addf %459, %460 : vector<8x32xf32>
    %462 = arith.index_cast %456 : i32 to index
    %c0_286 = arith.constant 0 : index
    %463 = vector.load %arg20[%462, %c0_286] : memref<64x32xf32, #tpu.memory_space<vmem>>, vector<8x32xf32>
    %cst_287 = arith.constant dense<0.000000e+00> : vector<8x32xf32>
    %464 = tpu.matmul %457, %446, %cst_287 {dimension_numbers = #tpu.dot_dimension_numbers<[1], [0], [0], [1], [0, 0, 1, 1], [], []>} : vector<8x32xf32>, vector<32x32xf32>, vector<8x32xf32> -> vector<8x32xf32>
    %465 = arith.addf %463, %464 : vector<8x32xf32>
    %466 = arith.index_cast %456 : i32 to index
    %c0_288 = arith.constant 0 : index
    %467 = vector.load %arg21[%466, %c0_288] : memref<64x32xf32, #tpu.memory_space<vmem>>, vector<8x32xf32>
    %cst_289 = arith.constant dense<0.000000e+00> : vector<8x32xf32>
    %468 = tpu.matmul %457, %448, %cst_289 {dimension_numbers = #tpu.dot_dimension_numbers<[1], [0], [0], [1], [0, 0, 1, 1], [], []>} : vector<8x32xf32>, vector<32x32xf32>, vector<8x32xf32> -> vector<8x32xf32>
    %469 = arith.addf %467, %468 : vector<8x32xf32>
    %470 = arith.index_cast %456 : i32 to index
    %c0_290 = arith.constant 0 : index
    %471 = vector.load %arg22[%470, %c0_290] : memref<64x32xf32, #tpu.memory_space<vmem>>, vector<8x32xf32>
    %cst_291 = arith.constant dense<0.000000e+00> : vector<8x32xf32>
    %472 = tpu.matmul %457, %450, %cst_291 {dimension_numbers = #tpu.dot_dimension_numbers<[1], [0], [0], [1], [0, 0, 1, 1], [], []>} : vector<8x32xf32>, vector<32x32xf32>, vector<8x32xf32> -> vector<8x32xf32>
    %473 = arith.addf %471, %472 : vector<8x32xf32>
    %474 = arith.negf %461 : vector<8x32xf32>
    %475 = math.exp %474 : vector<8x32xf32>
    %cst_292 = arith.constant 1.000000e+00 : f32
    %476 = vector.broadcast %cst_292 : f32 to vector<8x32xf32>
    %477 = arith.addf %476, %475 : vector<8x32xf32>
    %478 = arith.divf %476, %477 : vector<8x32xf32>
    %479 = arith.negf %465 : vector<8x32xf32>
    %480 = math.exp %479 : vector<8x32xf32>
    %cst_293 = arith.constant 1.000000e+00 : f32
    %481 = vector.broadcast %cst_293 : f32 to vector<8x32xf32>
    %482 = arith.addf %481, %480 : vector<8x32xf32>
    %483 = arith.divf %481, %482 : vector<8x32xf32>
    %484 = math.tanh %469 : vector<8x32xf32>
    %485 = arith.negf %473 : vector<8x32xf32>
    %486 = math.exp %485 : vector<8x32xf32>
    %cst_294 = arith.constant 1.000000e+00 : f32
    %487 = vector.broadcast %cst_294 : f32 to vector<8x32xf32>
    %488 = arith.addf %487, %486 : vector<8x32xf32>
    %489 = arith.divf %487, %488 : vector<8x32xf32>
    %c0_295 = arith.constant 0 : index
    %c0_296 = arith.constant 0 : index
    %490 = vector.load %arg25[%c0_295, %c0_296] : memref<8x32xf32, #tpu.memory_space<vmem>>, vector<8x32xf32>
    %491 = arith.mulf %483, %490 : vector<8x32xf32>
    %492 = arith.mulf %478, %484 : vector<8x32xf32>
    %493 = arith.addf %491, %492 : vector<8x32xf32>
    %494 = math.tanh %493 : vector<8x32xf32>
    %495 = arith.mulf %489, %494 : vector<8x32xf32>
    %c0_297 = arith.constant 0 : index
    %c0_298 = arith.constant 0 : index
    %496 = vector.load %arg25[%c0_297, %c0_298] : memref<8x32xf32, #tpu.memory_space<vmem>>, vector<8x32xf32>
    tpu.vector_store %arg25[%c0_297, %c0_298], %493 {strides = array<i32>} : memref<8x32xf32, #tpu.memory_space<vmem>>, vector<8x32xf32>,
    %c0_299 = arith.constant 0 : index
    %c0_300 = arith.constant 0 : index
    %497 = vector.load %arg24[%c0_299, %c0_300] : memref<8x32xf32, #tpu.memory_space<vmem>>, vector<8x32xf32>
    tpu.vector_store %arg24[%c0_299, %c0_300], %495 {strides = array<i32>} : memref<8x32xf32, #tpu.memory_space<vmem>>, vector<8x32xf32>,
    %498 = arith.index_cast %456 : i32 to index
    %c0_301 = arith.constant 0 : index
    %499 = vector.load %arg23[%498, %c0_301] : memref<64x32xf32, #tpu.memory_space<vmem>>, vector<8x32xf32>
    tpu.vector_store %arg23[%498, %c0_301], %495 {strides = array<i32>} : memref<64x32xf32, #tpu.memory_space<vmem>>, vector<8x32xf32>,
    %c1_i32_302 = arith.constant 1 : i32
    %c8_i32_303 = arith.constant 8 : i32
    %500 = arith.muli %c1_i32_302, %c8_i32_303 : i32
    %501 = tpu.assume_multiple %500, 8 : i32
    %c0_304 = arith.constant 0 : index
    %c0_305 = arith.constant 0 : index
    %502 = vector.load %arg24[%c0_304, %c0_305] : memref<8x32xf32, #tpu.memory_space<vmem>>, vector<8x32xf32>
    %503 = arith.index_cast %501 : i32 to index
    %c0_306 = arith.constant 0 : index
    %504 = vector.load %arg19[%503, %c0_306] : memref<64x32xf32, #tpu.memory_space<vmem>>, vector<8x32xf32>
    %cst_307 = arith.constant dense<0.000000e+00> : vector<8x32xf32>
    %505 = tpu.matmul %502, %444, %cst_307 {dimension_numbers = #tpu.dot_dimension_numbers<[1], [0], [0], [1], [0, 0, 1, 1], [], []>} : vector<8x32xf32>, vector<32x32xf32>, vector<8x32xf32> -> vector<8x32xf32>
    %506 = arith.addf %504, %505 : vector<8x32xf32>
    %507 = arith.index_cast %501 : i32 to index
    %c0_308 = arith.constant 0 : index
    %508 = vector.load %arg20[%507, %c0_308] : memref<64x32xf32, #tpu.memory_space<vmem>>, vector<8x32xf32>
    %cst_309 = arith.constant dense<0.000000e+00> : vector<8x32xf32>
    %509 = tpu.matmul %502, %446, %cst_309 {dimension_numbers = #tpu.dot_dimension_numbers<[1], [0], [0], [1], [0, 0, 1, 1], [], []>} : vector<8x32xf32>, vector<32x32xf32>, vector<8x32xf32> -> vector<8x32xf32>
    %510 = arith.addf %508, %509 : vector<8x32xf32>
    %511 = arith.index_cast %501 : i32 to index
    %c0_310 = arith.constant 0 : index
    %512 = vector.load %arg21[%511, %c0_310] : memref<64x32xf32, #tpu.memory_space<vmem>>, vector<8x32xf32>
    %cst_311 = arith.constant dense<0.000000e+00> : vector<8x32xf32>
    %513 = tpu.matmul %502, %448, %cst_311 {dimension_numbers = #tpu.dot_dimension_numbers<[1], [0], [0], [1], [0, 0, 1, 1], [], []>} : vector<8x32xf32>, vector<32x32xf32>, vector<8x32xf32> -> vector<8x32xf32>
    %514 = arith.addf %512, %513 : vector<8x32xf32>
    %515 = arith.index_cast %501 : i32 to index
    %c0_312 = arith.constant 0 : index
    %516 = vector.load %arg22[%515, %c0_312] : memref<64x32xf32, #tpu.memory_space<vmem>>, vector<8x32xf32>
    %cst_313 = arith.constant dense<0.000000e+00> : vector<8x32xf32>
    %517 = tpu.matmul %502, %450, %cst_313 {dimension_numbers = #tpu.dot_dimension_numbers<[1], [0], [0], [1], [0, 0, 1, 1], [], []>} : vector<8x32xf32>, vector<32x32xf32>, vector<8x32xf32> -> vector<8x32xf32>
    %518 = arith.addf %516, %517 : vector<8x32xf32>
    %519 = arith.negf %506 : vector<8x32xf32>
    %520 = math.exp %519 : vector<8x32xf32>
    %cst_314 = arith.constant 1.000000e+00 : f32
    %521 = vector.broadcast %cst_314 : f32 to vector<8x32xf32>
    %522 = arith.addf %521, %520 : vector<8x32xf32>
    %523 = arith.divf %521, %522 : vector<8x32xf32>
    %524 = arith.negf %510 : vector<8x32xf32>
    %525 = math.exp %524 : vector<8x32xf32>
    %cst_315 = arith.constant 1.000000e+00 : f32
    %526 = vector.broadcast %cst_315 : f32 to vector<8x32xf32>
    %527 = arith.addf %526, %525 : vector<8x32xf32>
    %528 = arith.divf %526, %527 : vector<8x32xf32>
    %529 = math.tanh %514 : vector<8x32xf32>
    %530 = arith.negf %518 : vector<8x32xf32>
    %531 = math.exp %530 : vector<8x32xf32>
    %cst_316 = arith.constant 1.000000e+00 : f32
    %532 = vector.broadcast %cst_316 : f32 to vector<8x32xf32>
    %533 = arith.addf %532, %531 : vector<8x32xf32>
    %534 = arith.divf %532, %533 : vector<8x32xf32>
    %c0_317 = arith.constant 0 : index
    %c0_318 = arith.constant 0 : index
    %535 = vector.load %arg25[%c0_317, %c0_318] : memref<8x32xf32, #tpu.memory_space<vmem>>, vector<8x32xf32>
    %536 = arith.mulf %528, %535 : vector<8x32xf32>
    %537 = arith.mulf %523, %529 : vector<8x32xf32>
    %538 = arith.addf %536, %537 : vector<8x32xf32>
    %539 = math.tanh %538 : vector<8x32xf32>
    %540 = arith.mulf %534, %539 : vector<8x32xf32>
    %c0_319 = arith.constant 0 : index
    %c0_320 = arith.constant 0 : index
    %541 = vector.load %arg25[%c0_319, %c0_320] : memref<8x32xf32, #tpu.memory_space<vmem>>, vector<8x32xf32>
    tpu.vector_store %arg25[%c0_319, %c0_320], %538 {strides = array<i32>} : memref<8x32xf32, #tpu.memory_space<vmem>>, vector<8x32xf32>,
    %c0_321 = arith.constant 0 : index
    %c0_322 = arith.constant 0 : index
    %542 = vector.load %arg24[%c0_321, %c0_322] : memref<8x32xf32, #tpu.memory_space<vmem>>, vector<8x32xf32>
    tpu.vector_store %arg24[%c0_321, %c0_322], %540 {strides = array<i32>} : memref<8x32xf32, #tpu.memory_space<vmem>>, vector<8x32xf32>,
    %543 = arith.index_cast %501 : i32 to index
    %c0_323 = arith.constant 0 : index
    %544 = vector.load %arg23[%543, %c0_323] : memref<64x32xf32, #tpu.memory_space<vmem>>, vector<8x32xf32>
    tpu.vector_store %arg23[%543, %c0_323], %540 {strides = array<i32>} : memref<64x32xf32, #tpu.memory_space<vmem>>, vector<8x32xf32>,
    %c2_i32_324 = arith.constant 2 : i32
    %c8_i32_325 = arith.constant 8 : i32
    %545 = arith.muli %c2_i32_324, %c8_i32_325 : i32
    %546 = tpu.assume_multiple %545, 8 : i32
    %c0_326 = arith.constant 0 : index
    %c0_327 = arith.constant 0 : index
    %547 = vector.load %arg24[%c0_326, %c0_327] : memref<8x32xf32, #tpu.memory_space<vmem>>, vector<8x32xf32>
    %548 = arith.index_cast %546 : i32 to index
    %c0_328 = arith.constant 0 : index
    %549 = vector.load %arg19[%548, %c0_328] : memref<64x32xf32, #tpu.memory_space<vmem>>, vector<8x32xf32>
    %cst_329 = arith.constant dense<0.000000e+00> : vector<8x32xf32>
    %550 = tpu.matmul %547, %444, %cst_329 {dimension_numbers = #tpu.dot_dimension_numbers<[1], [0], [0], [1], [0, 0, 1, 1], [], []>} : vector<8x32xf32>, vector<32x32xf32>, vector<8x32xf32> -> vector<8x32xf32>
    %551 = arith.addf %549, %550 : vector<8x32xf32>
    %552 = arith.index_cast %546 : i32 to index
    %c0_330 = arith.constant 0 : index
    %553 = vector.load %arg20[%552, %c0_330] : memref<64x32xf32, #tpu.memory_space<vmem>>, vector<8x32xf32>
    %cst_331 = arith.constant dense<0.000000e+00> : vector<8x32xf32>
    %554 = tpu.matmul %547, %446, %cst_331 {dimension_numbers = #tpu.dot_dimension_numbers<[1], [0], [0], [1], [0, 0, 1, 1], [], []>} : vector<8x32xf32>, vector<32x32xf32>, vector<8x32xf32> -> vector<8x32xf32>
    %555 = arith.addf %553, %554 : vector<8x32xf32>
    %556 = arith.index_cast %546 : i32 to index
    %c0_332 = arith.constant 0 : index
    %557 = vector.load %arg21[%556, %c0_332] : memref<64x32xf32, #tpu.memory_space<vmem>>, vector<8x32xf32>
    %cst_333 = arith.constant dense<0.000000e+00> : vector<8x32xf32>
    %558 = tpu.matmul %547, %448, %cst_333 {dimension_numbers = #tpu.dot_dimension_numbers<[1], [0], [0], [1], [0, 0, 1, 1], [], []>} : vector<8x32xf32>, vector<32x32xf32>, vector<8x32xf32> -> vector<8x32xf32>
    %559 = arith.addf %557, %558 : vector<8x32xf32>
    %560 = arith.index_cast %546 : i32 to index
    %c0_334 = arith.constant 0 : index
    %561 = vector.load %arg22[%560, %c0_334] : memref<64x32xf32, #tpu.memory_space<vmem>>, vector<8x32xf32>
    %cst_335 = arith.constant dense<0.000000e+00> : vector<8x32xf32>
    %562 = tpu.matmul %547, %450, %cst_335 {dimension_numbers = #tpu.dot_dimension_numbers<[1], [0], [0], [1], [0, 0, 1, 1], [], []>} : vector<8x32xf32>, vector<32x32xf32>, vector<8x32xf32> -> vector<8x32xf32>
    %563 = arith.addf %561, %562 : vector<8x32xf32>
    %564 = arith.negf %551 : vector<8x32xf32>
    %565 = math.exp %564 : vector<8x32xf32>
    %cst_336 = arith.constant 1.000000e+00 : f32
    %566 = vector.broadcast %cst_336 : f32 to vector<8x32xf32>
    %567 = arith.addf %566, %565 : vector<8x32xf32>
    %568 = arith.divf %566, %567 : vector<8x32xf32>
    %569 = arith.negf %555 : vector<8x32xf32>
    %570 = math.exp %569 : vector<8x32xf32>
    %cst_337 = arith.constant 1.000000e+00 : f32
    %571 = vector.broadcast %cst_337 : f32 to vector<8x32xf32>
    %572 = arith.addf %571, %570 : vector<8x32xf32>
    %573 = arith.divf %571, %572 : vector<8x32xf32>
    %574 = math.tanh %559 : vector<8x32xf32>
    %575 = arith.negf %563 : vector<8x32xf32>
    %576 = math.exp %575 : vector<8x32xf32>
    %cst_338 = arith.constant 1.000000e+00 : f32
    %577 = vector.broadcast %cst_338 : f32 to vector<8x32xf32>
    %578 = arith.addf %577, %576 : vector<8x32xf32>
    %579 = arith.divf %577, %578 : vector<8x32xf32>
    %c0_339 = arith.constant 0 : index
    %c0_340 = arith.constant 0 : index
    %580 = vector.load %arg25[%c0_339, %c0_340] : memref<8x32xf32, #tpu.memory_space<vmem>>, vector<8x32xf32>
    %581 = arith.mulf %573, %580 : vector<8x32xf32>
    %582 = arith.mulf %568, %574 : vector<8x32xf32>
    %583 = arith.addf %581, %582 : vector<8x32xf32>
    %584 = math.tanh %583 : vector<8x32xf32>
    %585 = arith.mulf %579, %584 : vector<8x32xf32>
    %c0_341 = arith.constant 0 : index
    %c0_342 = arith.constant 0 : index
    %586 = vector.load %arg25[%c0_341, %c0_342] : memref<8x32xf32, #tpu.memory_space<vmem>>, vector<8x32xf32>
    tpu.vector_store %arg25[%c0_341, %c0_342], %583 {strides = array<i32>} : memref<8x32xf32, #tpu.memory_space<vmem>>, vector<8x32xf32>,
    %c0_343 = arith.constant 0 : index
    %c0_344 = arith.constant 0 : index
    %587 = vector.load %arg24[%c0_343, %c0_344] : memref<8x32xf32, #tpu.memory_space<vmem>>, vector<8x32xf32>
    tpu.vector_store %arg24[%c0_343, %c0_344], %585 {strides = array<i32>} : memref<8x32xf32, #tpu.memory_space<vmem>>, vector<8x32xf32>,
    %588 = arith.index_cast %546 : i32 to index
    %c0_345 = arith.constant 0 : index
    %589 = vector.load %arg23[%588, %c0_345] : memref<64x32xf32, #tpu.memory_space<vmem>>, vector<8x32xf32>
    tpu.vector_store %arg23[%588, %c0_345], %585 {strides = array<i32>} : memref<64x32xf32, #tpu.memory_space<vmem>>, vector<8x32xf32>,
    %c3_i32_346 = arith.constant 3 : i32
    %c8_i32_347 = arith.constant 8 : i32
    %590 = arith.muli %c3_i32_346, %c8_i32_347 : i32
    %591 = tpu.assume_multiple %590, 8 : i32
    %c0_348 = arith.constant 0 : index
    %c0_349 = arith.constant 0 : index
    %592 = vector.load %arg24[%c0_348, %c0_349] : memref<8x32xf32, #tpu.memory_space<vmem>>, vector<8x32xf32>
    %593 = arith.index_cast %591 : i32 to index
    %c0_350 = arith.constant 0 : index
    %594 = vector.load %arg19[%593, %c0_350] : memref<64x32xf32, #tpu.memory_space<vmem>>, vector<8x32xf32>
    %cst_351 = arith.constant dense<0.000000e+00> : vector<8x32xf32>
    %595 = tpu.matmul %592, %444, %cst_351 {dimension_numbers = #tpu.dot_dimension_numbers<[1], [0], [0], [1], [0, 0, 1, 1], [], []>} : vector<8x32xf32>, vector<32x32xf32>, vector<8x32xf32> -> vector<8x32xf32>
    %596 = arith.addf %594, %595 : vector<8x32xf32>
    %597 = arith.index_cast %591 : i32 to index
    %c0_352 = arith.constant 0 : index
    %598 = vector.load %arg20[%597, %c0_352] : memref<64x32xf32, #tpu.memory_space<vmem>>, vector<8x32xf32>
    %cst_353 = arith.constant dense<0.000000e+00> : vector<8x32xf32>
    %599 = tpu.matmul %592, %446, %cst_353 {dimension_numbers = #tpu.dot_dimension_numbers<[1], [0], [0], [1], [0, 0, 1, 1], [], []>} : vector<8x32xf32>, vector<32x32xf32>, vector<8x32xf32> -> vector<8x32xf32>
    %600 = arith.addf %598, %599 : vector<8x32xf32>
    %601 = arith.index_cast %591 : i32 to index
    %c0_354 = arith.constant 0 : index
    %602 = vector.load %arg21[%601, %c0_354] : memref<64x32xf32, #tpu.memory_space<vmem>>, vector<8x32xf32>
    %cst_355 = arith.constant dense<0.000000e+00> : vector<8x32xf32>
    %603 = tpu.matmul %592, %448, %cst_355 {dimension_numbers = #tpu.dot_dimension_numbers<[1], [0], [0], [1], [0, 0, 1, 1], [], []>} : vector<8x32xf32>, vector<32x32xf32>, vector<8x32xf32> -> vector<8x32xf32>
    %604 = arith.addf %602, %603 : vector<8x32xf32>
    %605 = arith.index_cast %591 : i32 to index
    %c0_356 = arith.constant 0 : index
    %606 = vector.load %arg22[%605, %c0_356] : memref<64x32xf32, #tpu.memory_space<vmem>>, vector<8x32xf32>
    %cst_357 = arith.constant dense<0.000000e+00> : vector<8x32xf32>
    %607 = tpu.matmul %592, %450, %cst_357 {dimension_numbers = #tpu.dot_dimension_numbers<[1], [0], [0], [1], [0, 0, 1, 1], [], []>} : vector<8x32xf32>, vector<32x32xf32>, vector<8x32xf32> -> vector<8x32xf32>
    %608 = arith.addf %606, %607 : vector<8x32xf32>
    %609 = arith.negf %596 : vector<8x32xf32>
    %610 = math.exp %609 : vector<8x32xf32>
    %cst_358 = arith.constant 1.000000e+00 : f32
    %611 = vector.broadcast %cst_358 : f32 to vector<8x32xf32>
    %612 = arith.addf %611, %610 : vector<8x32xf32>
    %613 = arith.divf %611, %612 : vector<8x32xf32>
    %614 = arith.negf %600 : vector<8x32xf32>
    %615 = math.exp %614 : vector<8x32xf32>
    %cst_359 = arith.constant 1.000000e+00 : f32
    %616 = vector.broadcast %cst_359 : f32 to vector<8x32xf32>
    %617 = arith.addf %616, %615 : vector<8x32xf32>
    %618 = arith.divf %616, %617 : vector<8x32xf32>
    %619 = math.tanh %604 : vector<8x32xf32>
    %620 = arith.negf %608 : vector<8x32xf32>
    %621 = math.exp %620 : vector<8x32xf32>
    %cst_360 = arith.constant 1.000000e+00 : f32
    %622 = vector.broadcast %cst_360 : f32 to vector<8x32xf32>
    %623 = arith.addf %622, %621 : vector<8x32xf32>
    %624 = arith.divf %622, %623 : vector<8x32xf32>
    %c0_361 = arith.constant 0 : index
    %c0_362 = arith.constant 0 : index
    %625 = vector.load %arg25[%c0_361, %c0_362] : memref<8x32xf32, #tpu.memory_space<vmem>>, vector<8x32xf32>
    %626 = arith.mulf %618, %625 : vector<8x32xf32>
    %627 = arith.mulf %613, %619 : vector<8x32xf32>
    %628 = arith.addf %626, %627 : vector<8x32xf32>
    %629 = math.tanh %628 : vector<8x32xf32>
    %630 = arith.mulf %624, %629 : vector<8x32xf32>
    %c0_363 = arith.constant 0 : index
    %c0_364 = arith.constant 0 : index
    %631 = vector.load %arg25[%c0_363, %c0_364] : memref<8x32xf32, #tpu.memory_space<vmem>>, vector<8x32xf32>
    tpu.vector_store %arg25[%c0_363, %c0_364], %628 {strides = array<i32>} : memref<8x32xf32, #tpu.memory_space<vmem>>, vector<8x32xf32>,
    %c0_365 = arith.constant 0 : index
    %c0_366 = arith.constant 0 : index
    %632 = vector.load %arg24[%c0_365, %c0_366] : memref<8x32xf32, #tpu.memory_space<vmem>>, vector<8x32xf32>
    tpu.vector_store %arg24[%c0_365, %c0_366], %630 {strides = array<i32>} : memref<8x32xf32, #tpu.memory_space<vmem>>, vector<8x32xf32>,
    %633 = arith.index_cast %591 : i32 to index
    %c0_367 = arith.constant 0 : index
    %634 = vector.load %arg23[%633, %c0_367] : memref<64x32xf32, #tpu.memory_space<vmem>>, vector<8x32xf32>
    tpu.vector_store %arg23[%633, %c0_367], %630 {strides = array<i32>} : memref<64x32xf32, #tpu.memory_space<vmem>>, vector<8x32xf32>,
    %c4_i32_368 = arith.constant 4 : i32
    %c8_i32_369 = arith.constant 8 : i32
    %635 = arith.muli %c4_i32_368, %c8_i32_369 : i32
    %636 = tpu.assume_multiple %635, 8 : i32
    %c0_370 = arith.constant 0 : index
    %c0_371 = arith.constant 0 : index
    %637 = vector.load %arg24[%c0_370, %c0_371] : memref<8x32xf32, #tpu.memory_space<vmem>>, vector<8x32xf32>
    %638 = arith.index_cast %636 : i32 to index
    %c0_372 = arith.constant 0 : index
    %639 = vector.load %arg19[%638, %c0_372] : memref<64x32xf32, #tpu.memory_space<vmem>>, vector<8x32xf32>
    %cst_373 = arith.constant dense<0.000000e+00> : vector<8x32xf32>
    %640 = tpu.matmul %637, %444, %cst_373 {dimension_numbers = #tpu.dot_dimension_numbers<[1], [0], [0], [1], [0, 0, 1, 1], [], []>} : vector<8x32xf32>, vector<32x32xf32>, vector<8x32xf32> -> vector<8x32xf32>
    %641 = arith.addf %639, %640 : vector<8x32xf32>
    %642 = arith.index_cast %636 : i32 to index
    %c0_374 = arith.constant 0 : index
    %643 = vector.load %arg20[%642, %c0_374] : memref<64x32xf32, #tpu.memory_space<vmem>>, vector<8x32xf32>
    %cst_375 = arith.constant dense<0.000000e+00> : vector<8x32xf32>
    %644 = tpu.matmul %637, %446, %cst_375 {dimension_numbers = #tpu.dot_dimension_numbers<[1], [0], [0], [1], [0, 0, 1, 1], [], []>} : vector<8x32xf32>, vector<32x32xf32>, vector<8x32xf32> -> vector<8x32xf32>
    %645 = arith.addf %643, %644 : vector<8x32xf32>
    %646 = arith.index_cast %636 : i32 to index
    %c0_376 = arith.constant 0 : index
    %647 = vector.load %arg21[%646, %c0_376] : memref<64x32xf32, #tpu.memory_space<vmem>>, vector<8x32xf32>
    %cst_377 = arith.constant dense<0.000000e+00> : vector<8x32xf32>
    %648 = tpu.matmul %637, %448, %cst_377 {dimension_numbers = #tpu.dot_dimension_numbers<[1], [0], [0], [1], [0, 0, 1, 1], [], []>} : vector<8x32xf32>, vector<32x32xf32>, vector<8x32xf32> -> vector<8x32xf32>
    %649 = arith.addf %647, %648 : vector<8x32xf32>
    %650 = arith.index_cast %636 : i32 to index
    %c0_378 = arith.constant 0 : index
    %651 = vector.load %arg22[%650, %c0_378] : memref<64x32xf32, #tpu.memory_space<vmem>>, vector<8x32xf32>
    %cst_379 = arith.constant dense<0.000000e+00> : vector<8x32xf32>
    %652 = tpu.matmul %637, %450, %cst_379 {dimension_numbers = #tpu.dot_dimension_numbers<[1], [0], [0], [1], [0, 0, 1, 1], [], []>} : vector<8x32xf32>, vector<32x32xf32>, vector<8x32xf32> -> vector<8x32xf32>
    %653 = arith.addf %651, %652 : vector<8x32xf32>
    %654 = arith.negf %641 : vector<8x32xf32>
    %655 = math.exp %654 : vector<8x32xf32>
    %cst_380 = arith.constant 1.000000e+00 : f32
    %656 = vector.broadcast %cst_380 : f32 to vector<8x32xf32>
    %657 = arith.addf %656, %655 : vector<8x32xf32>
    %658 = arith.divf %656, %657 : vector<8x32xf32>
    %659 = arith.negf %645 : vector<8x32xf32>
    %660 = math.exp %659 : vector<8x32xf32>
    %cst_381 = arith.constant 1.000000e+00 : f32
    %661 = vector.broadcast %cst_381 : f32 to vector<8x32xf32>
    %662 = arith.addf %661, %660 : vector<8x32xf32>
    %663 = arith.divf %661, %662 : vector<8x32xf32>
    %664 = math.tanh %649 : vector<8x32xf32>
    %665 = arith.negf %653 : vector<8x32xf32>
    %666 = math.exp %665 : vector<8x32xf32>
    %cst_382 = arith.constant 1.000000e+00 : f32
    %667 = vector.broadcast %cst_382 : f32 to vector<8x32xf32>
    %668 = arith.addf %667, %666 : vector<8x32xf32>
    %669 = arith.divf %667, %668 : vector<8x32xf32>
    %c0_383 = arith.constant 0 : index
    %c0_384 = arith.constant 0 : index
    %670 = vector.load %arg25[%c0_383, %c0_384] : memref<8x32xf32, #tpu.memory_space<vmem>>, vector<8x32xf32>
    %671 = arith.mulf %663, %670 : vector<8x32xf32>
    %672 = arith.mulf %658, %664 : vector<8x32xf32>
    %673 = arith.addf %671, %672 : vector<8x32xf32>
    %674 = math.tanh %673 : vector<8x32xf32>
    %675 = arith.mulf %669, %674 : vector<8x32xf32>
    %c0_385 = arith.constant 0 : index
    %c0_386 = arith.constant 0 : index
    %676 = vector.load %arg25[%c0_385, %c0_386] : memref<8x32xf32, #tpu.memory_space<vmem>>, vector<8x32xf32>
    tpu.vector_store %arg25[%c0_385, %c0_386], %673 {strides = array<i32>} : memref<8x32xf32, #tpu.memory_space<vmem>>, vector<8x32xf32>,
    %c0_387 = arith.constant 0 : index
    %c0_388 = arith.constant 0 : index
    %677 = vector.load %arg24[%c0_387, %c0_388] : memref<8x32xf32, #tpu.memory_space<vmem>>, vector<8x32xf32>
    tpu.vector_store %arg24[%c0_387, %c0_388], %675 {strides = array<i32>} : memref<8x32xf32, #tpu.memory_space<vmem>>, vector<8x32xf32>,
    %678 = arith.index_cast %636 : i32 to index
    %c0_389 = arith.constant 0 : index
    %679 = vector.load %arg23[%678, %c0_389] : memref<64x32xf32, #tpu.memory_space<vmem>>, vector<8x32xf32>
    tpu.vector_store %arg23[%678, %c0_389], %675 {strides = array<i32>} : memref<64x32xf32, #tpu.memory_space<vmem>>, vector<8x32xf32>,
    %c5_i32_390 = arith.constant 5 : i32
    %c8_i32_391 = arith.constant 8 : i32
    %680 = arith.muli %c5_i32_390, %c8_i32_391 : i32
    %681 = tpu.assume_multiple %680, 8 : i32
    %c0_392 = arith.constant 0 : index
    %c0_393 = arith.constant 0 : index
    %682 = vector.load %arg24[%c0_392, %c0_393] : memref<8x32xf32, #tpu.memory_space<vmem>>, vector<8x32xf32>
    %683 = arith.index_cast %681 : i32 to index
    %c0_394 = arith.constant 0 : index
    %684 = vector.load %arg19[%683, %c0_394] : memref<64x32xf32, #tpu.memory_space<vmem>>, vector<8x32xf32>
    %cst_395 = arith.constant dense<0.000000e+00> : vector<8x32xf32>
    %685 = tpu.matmul %682, %444, %cst_395 {dimension_numbers = #tpu.dot_dimension_numbers<[1], [0], [0], [1], [0, 0, 1, 1], [], []>} : vector<8x32xf32>, vector<32x32xf32>, vector<8x32xf32> -> vector<8x32xf32>
    %686 = arith.addf %684, %685 : vector<8x32xf32>
    %687 = arith.index_cast %681 : i32 to index
    %c0_396 = arith.constant 0 : index
    %688 = vector.load %arg20[%687, %c0_396] : memref<64x32xf32, #tpu.memory_space<vmem>>, vector<8x32xf32>
    %cst_397 = arith.constant dense<0.000000e+00> : vector<8x32xf32>
    %689 = tpu.matmul %682, %446, %cst_397 {dimension_numbers = #tpu.dot_dimension_numbers<[1], [0], [0], [1], [0, 0, 1, 1], [], []>} : vector<8x32xf32>, vector<32x32xf32>, vector<8x32xf32> -> vector<8x32xf32>
    %690 = arith.addf %688, %689 : vector<8x32xf32>
    %691 = arith.index_cast %681 : i32 to index
    %c0_398 = arith.constant 0 : index
    %692 = vector.load %arg21[%691, %c0_398] : memref<64x32xf32, #tpu.memory_space<vmem>>, vector<8x32xf32>
    %cst_399 = arith.constant dense<0.000000e+00> : vector<8x32xf32>
    %693 = tpu.matmul %682, %448, %cst_399 {dimension_numbers = #tpu.dot_dimension_numbers<[1], [0], [0], [1], [0, 0, 1, 1], [], []>} : vector<8x32xf32>, vector<32x32xf32>, vector<8x32xf32> -> vector<8x32xf32>
    %694 = arith.addf %692, %693 : vector<8x32xf32>
    %695 = arith.index_cast %681 : i32 to index
    %c0_400 = arith.constant 0 : index
    %696 = vector.load %arg22[%695, %c0_400] : memref<64x32xf32, #tpu.memory_space<vmem>>, vector<8x32xf32>
    %cst_401 = arith.constant dense<0.000000e+00> : vector<8x32xf32>
    %697 = tpu.matmul %682, %450, %cst_401 {dimension_numbers = #tpu.dot_dimension_numbers<[1], [0], [0], [1], [0, 0, 1, 1], [], []>} : vector<8x32xf32>, vector<32x32xf32>, vector<8x32xf32> -> vector<8x32xf32>
    %698 = arith.addf %696, %697 : vector<8x32xf32>
    %699 = arith.negf %686 : vector<8x32xf32>
    %700 = math.exp %699 : vector<8x32xf32>
    %cst_402 = arith.constant 1.000000e+00 : f32
    %701 = vector.broadcast %cst_402 : f32 to vector<8x32xf32>
    %702 = arith.addf %701, %700 : vector<8x32xf32>
    %703 = arith.divf %701, %702 : vector<8x32xf32>
    %704 = arith.negf %690 : vector<8x32xf32>
    %705 = math.exp %704 : vector<8x32xf32>
    %cst_403 = arith.constant 1.000000e+00 : f32
    %706 = vector.broadcast %cst_403 : f32 to vector<8x32xf32>
    %707 = arith.addf %706, %705 : vector<8x32xf32>
    %708 = arith.divf %706, %707 : vector<8x32xf32>
    %709 = math.tanh %694 : vector<8x32xf32>
    %710 = arith.negf %698 : vector<8x32xf32>
    %711 = math.exp %710 : vector<8x32xf32>
    %cst_404 = arith.constant 1.000000e+00 : f32
    %712 = vector.broadcast %cst_404 : f32 to vector<8x32xf32>
    %713 = arith.addf %712, %711 : vector<8x32xf32>
    %714 = arith.divf %712, %713 : vector<8x32xf32>
    %c0_405 = arith.constant 0 : index
    %c0_406 = arith.constant 0 : index
    %715 = vector.load %arg25[%c0_405, %c0_406] : memref<8x32xf32, #tpu.memory_space<vmem>>, vector<8x32xf32>
    %716 = arith.mulf %708, %715 : vector<8x32xf32>
    %717 = arith.mulf %703, %709 : vector<8x32xf32>
    %718 = arith.addf %716, %717 : vector<8x32xf32>
    %719 = math.tanh %718 : vector<8x32xf32>
    %720 = arith.mulf %714, %719 : vector<8x32xf32>
    %c0_407 = arith.constant 0 : index
    %c0_408 = arith.constant 0 : index
    %721 = vector.load %arg25[%c0_407, %c0_408] : memref<8x32xf32, #tpu.memory_space<vmem>>, vector<8x32xf32>
    tpu.vector_store %arg25[%c0_407, %c0_408], %718 {strides = array<i32>} : memref<8x32xf32, #tpu.memory_space<vmem>>, vector<8x32xf32>,
    %c0_409 = arith.constant 0 : index
    %c0_410 = arith.constant 0 : index
    %722 = vector.load %arg24[%c0_409, %c0_410] : memref<8x32xf32, #tpu.memory_space<vmem>>, vector<8x32xf32>
    tpu.vector_store %arg24[%c0_409, %c0_410], %720 {strides = array<i32>} : memref<8x32xf32, #tpu.memory_space<vmem>>, vector<8x32xf32>,
    %723 = arith.index_cast %681 : i32 to index
    %c0_411 = arith.constant 0 : index
    %724 = vector.load %arg23[%723, %c0_411] : memref<64x32xf32, #tpu.memory_space<vmem>>, vector<8x32xf32>
    tpu.vector_store %arg23[%723, %c0_411], %720 {strides = array<i32>} : memref<64x32xf32, #tpu.memory_space<vmem>>, vector<8x32xf32>,
    %c6_i32_412 = arith.constant 6 : i32
    %c8_i32_413 = arith.constant 8 : i32
    %725 = arith.muli %c6_i32_412, %c8_i32_413 : i32
    %726 = tpu.assume_multiple %725, 8 : i32
    %c0_414 = arith.constant 0 : index
    %c0_415 = arith.constant 0 : index
    %727 = vector.load %arg24[%c0_414, %c0_415] : memref<8x32xf32, #tpu.memory_space<vmem>>, vector<8x32xf32>
    %728 = arith.index_cast %726 : i32 to index
    %c0_416 = arith.constant 0 : index
    %729 = vector.load %arg19[%728, %c0_416] : memref<64x32xf32, #tpu.memory_space<vmem>>, vector<8x32xf32>
    %cst_417 = arith.constant dense<0.000000e+00> : vector<8x32xf32>
    %730 = tpu.matmul %727, %444, %cst_417 {dimension_numbers = #tpu.dot_dimension_numbers<[1], [0], [0], [1], [0, 0, 1, 1], [], []>} : vector<8x32xf32>, vector<32x32xf32>, vector<8x32xf32> -> vector<8x32xf32>
    %731 = arith.addf %729, %730 : vector<8x32xf32>
    %732 = arith.index_cast %726 : i32 to index
    %c0_418 = arith.constant 0 : index
    %733 = vector.load %arg20[%732, %c0_418] : memref<64x32xf32, #tpu.memory_space<vmem>>, vector<8x32xf32>
    %cst_419 = arith.constant dense<0.000000e+00> : vector<8x32xf32>
    %734 = tpu.matmul %727, %446, %cst_419 {dimension_numbers = #tpu.dot_dimension_numbers<[1], [0], [0], [1], [0, 0, 1, 1], [], []>} : vector<8x32xf32>, vector<32x32xf32>, vector<8x32xf32> -> vector<8x32xf32>
    %735 = arith.addf %733, %734 : vector<8x32xf32>
    %736 = arith.index_cast %726 : i32 to index
    %c0_420 = arith.constant 0 : index
    %737 = vector.load %arg21[%736, %c0_420] : memref<64x32xf32, #tpu.memory_space<vmem>>, vector<8x32xf32>
    %cst_421 = arith.constant dense<0.000000e+00> : vector<8x32xf32>
    %738 = tpu.matmul %727, %448, %cst_421 {dimension_numbers = #tpu.dot_dimension_numbers<[1], [0], [0], [1], [0, 0, 1, 1], [], []>} : vector<8x32xf32>, vector<32x32xf32>, vector<8x32xf32> -> vector<8x32xf32>
    %739 = arith.addf %737, %738 : vector<8x32xf32>
    %740 = arith.index_cast %726 : i32 to index
    %c0_422 = arith.constant 0 : index
    %741 = vector.load %arg22[%740, %c0_422] : memref<64x32xf32, #tpu.memory_space<vmem>>, vector<8x32xf32>
    %cst_423 = arith.constant dense<0.000000e+00> : vector<8x32xf32>
    %742 = tpu.matmul %727, %450, %cst_423 {dimension_numbers = #tpu.dot_dimension_numbers<[1], [0], [0], [1], [0, 0, 1, 1], [], []>} : vector<8x32xf32>, vector<32x32xf32>, vector<8x32xf32> -> vector<8x32xf32>
    %743 = arith.addf %741, %742 : vector<8x32xf32>
    %744 = arith.negf %731 : vector<8x32xf32>
    %745 = math.exp %744 : vector<8x32xf32>
    %cst_424 = arith.constant 1.000000e+00 : f32
    %746 = vector.broadcast %cst_424 : f32 to vector<8x32xf32>
    %747 = arith.addf %746, %745 : vector<8x32xf32>
    %748 = arith.divf %746, %747 : vector<8x32xf32>
    %749 = arith.negf %735 : vector<8x32xf32>
    %750 = math.exp %749 : vector<8x32xf32>
    %cst_425 = arith.constant 1.000000e+00 : f32
    %751 = vector.broadcast %cst_425 : f32 to vector<8x32xf32>
    %752 = arith.addf %751, %750 : vector<8x32xf32>
    %753 = arith.divf %751, %752 : vector<8x32xf32>
    %754 = math.tanh %739 : vector<8x32xf32>
    %755 = arith.negf %743 : vector<8x32xf32>
    %756 = math.exp %755 : vector<8x32xf32>
    %cst_426 = arith.constant 1.000000e+00 : f32
    %757 = vector.broadcast %cst_426 : f32 to vector<8x32xf32>
    %758 = arith.addf %757, %756 : vector<8x32xf32>
    %759 = arith.divf %757, %758 : vector<8x32xf32>
    %c0_427 = arith.constant 0 : index
    %c0_428 = arith.constant 0 : index
    %760 = vector.load %arg25[%c0_427, %c0_428] : memref<8x32xf32, #tpu.memory_space<vmem>>, vector<8x32xf32>
    %761 = arith.mulf %753, %760 : vector<8x32xf32>
    %762 = arith.mulf %748, %754 : vector<8x32xf32>
    %763 = arith.addf %761, %762 : vector<8x32xf32>
    %764 = math.tanh %763 : vector<8x32xf32>
    %765 = arith.mulf %759, %764 : vector<8x32xf32>
    %c0_429 = arith.constant 0 : index
    %c0_430 = arith.constant 0 : index
    %766 = vector.load %arg25[%c0_429, %c0_430] : memref<8x32xf32, #tpu.memory_space<vmem>>, vector<8x32xf32>
    tpu.vector_store %arg25[%c0_429, %c0_430], %763 {strides = array<i32>} : memref<8x32xf32, #tpu.memory_space<vmem>>, vector<8x32xf32>,
    %c0_431 = arith.constant 0 : index
    %c0_432 = arith.constant 0 : index
    %767 = vector.load %arg24[%c0_431, %c0_432] : memref<8x32xf32, #tpu.memory_space<vmem>>, vector<8x32xf32>
    tpu.vector_store %arg24[%c0_431, %c0_432], %765 {strides = array<i32>} : memref<8x32xf32, #tpu.memory_space<vmem>>, vector<8x32xf32>,
    %768 = arith.index_cast %726 : i32 to index
    %c0_433 = arith.constant 0 : index
    %769 = vector.load %arg23[%768, %c0_433] : memref<64x32xf32, #tpu.memory_space<vmem>>, vector<8x32xf32>
    tpu.vector_store %arg23[%768, %c0_433], %765 {strides = array<i32>} : memref<64x32xf32, #tpu.memory_space<vmem>>, vector<8x32xf32>,
    %c7_i32_434 = arith.constant 7 : i32
    %c8_i32_435 = arith.constant 8 : i32
    %770 = arith.muli %c7_i32_434, %c8_i32_435 : i32
    %771 = tpu.assume_multiple %770, 8 : i32
    %c0_436 = arith.constant 0 : index
    %c0_437 = arith.constant 0 : index
    %772 = vector.load %arg24[%c0_436, %c0_437] : memref<8x32xf32, #tpu.memory_space<vmem>>, vector<8x32xf32>
    %773 = arith.index_cast %771 : i32 to index
    %c0_438 = arith.constant 0 : index
    %774 = vector.load %arg19[%773, %c0_438] : memref<64x32xf32, #tpu.memory_space<vmem>>, vector<8x32xf32>
    %cst_439 = arith.constant dense<0.000000e+00> : vector<8x32xf32>
    %775 = tpu.matmul %772, %444, %cst_439 {dimension_numbers = #tpu.dot_dimension_numbers<[1], [0], [0], [1], [0, 0, 1, 1], [], []>} : vector<8x32xf32>, vector<32x32xf32>, vector<8x32xf32> -> vector<8x32xf32>
    %776 = arith.addf %774, %775 : vector<8x32xf32>
    %777 = arith.index_cast %771 : i32 to index
    %c0_440 = arith.constant 0 : index
    %778 = vector.load %arg20[%777, %c0_440] : memref<64x32xf32, #tpu.memory_space<vmem>>, vector<8x32xf32>
    %cst_441 = arith.constant dense<0.000000e+00> : vector<8x32xf32>
    %779 = tpu.matmul %772, %446, %cst_441 {dimension_numbers = #tpu.dot_dimension_numbers<[1], [0], [0], [1], [0, 0, 1, 1], [], []>} : vector<8x32xf32>, vector<32x32xf32>, vector<8x32xf32> -> vector<8x32xf32>
    %780 = arith.addf %778, %779 : vector<8x32xf32>
    %781 = arith.index_cast %771 : i32 to index
    %c0_442 = arith.constant 0 : index
    %782 = vector.load %arg21[%781, %c0_442] : memref<64x32xf32, #tpu.memory_space<vmem>>, vector<8x32xf32>
    %cst_443 = arith.constant dense<0.000000e+00> : vector<8x32xf32>
    %783 = tpu.matmul %772, %448, %cst_443 {dimension_numbers = #tpu.dot_dimension_numbers<[1], [0], [0], [1], [0, 0, 1, 1], [], []>} : vector<8x32xf32>, vector<32x32xf32>, vector<8x32xf32> -> vector<8x32xf32>
    %784 = arith.addf %782, %783 : vector<8x32xf32>
    %785 = arith.index_cast %771 : i32 to index
    %c0_444 = arith.constant 0 : index
    %786 = vector.load %arg22[%785, %c0_444] : memref<64x32xf32, #tpu.memory_space<vmem>>, vector<8x32xf32>
    %cst_445 = arith.constant dense<0.000000e+00> : vector<8x32xf32>
    %787 = tpu.matmul %772, %450, %cst_445 {dimension_numbers = #tpu.dot_dimension_numbers<[1], [0], [0], [1], [0, 0, 1, 1], [], []>} : vector<8x32xf32>, vector<32x32xf32>, vector<8x32xf32> -> vector<8x32xf32>
    %788 = arith.addf %786, %787 : vector<8x32xf32>
    %789 = arith.negf %776 : vector<8x32xf32>
    %790 = math.exp %789 : vector<8x32xf32>
    %cst_446 = arith.constant 1.000000e+00 : f32
    %791 = vector.broadcast %cst_446 : f32 to vector<8x32xf32>
    %792 = arith.addf %791, %790 : vector<8x32xf32>
    %793 = arith.divf %791, %792 : vector<8x32xf32>
    %794 = arith.negf %780 : vector<8x32xf32>
    %795 = math.exp %794 : vector<8x32xf32>
    %cst_447 = arith.constant 1.000000e+00 : f32
    %796 = vector.broadcast %cst_447 : f32 to vector<8x32xf32>
    %797 = arith.addf %796, %795 : vector<8x32xf32>
    %798 = arith.divf %796, %797 : vector<8x32xf32>
    %799 = math.tanh %784 : vector<8x32xf32>
    %800 = arith.negf %788 : vector<8x32xf32>
    %801 = math.exp %800 : vector<8x32xf32>
    %cst_448 = arith.constant 1.000000e+00 : f32
    %802 = vector.broadcast %cst_448 : f32 to vector<8x32xf32>
    %803 = arith.addf %802, %801 : vector<8x32xf32>
    %804 = arith.divf %802, %803 : vector<8x32xf32>
    %c0_449 = arith.constant 0 : index
    %c0_450 = arith.constant 0 : index
    %805 = vector.load %arg25[%c0_449, %c0_450] : memref<8x32xf32, #tpu.memory_space<vmem>>, vector<8x32xf32>
    %806 = arith.mulf %798, %805 : vector<8x32xf32>
    %807 = arith.mulf %793, %799 : vector<8x32xf32>
    %808 = arith.addf %806, %807 : vector<8x32xf32>
    %809 = math.tanh %808 : vector<8x32xf32>
    %810 = arith.mulf %804, %809 : vector<8x32xf32>
    %c0_451 = arith.constant 0 : index
    %c0_452 = arith.constant 0 : index
    %811 = vector.load %arg25[%c0_451, %c0_452] : memref<8x32xf32, #tpu.memory_space<vmem>>, vector<8x32xf32>
    tpu.vector_store %arg25[%c0_451, %c0_452], %808 {strides = array<i32>} : memref<8x32xf32, #tpu.memory_space<vmem>>, vector<8x32xf32>,
    %c0_453 = arith.constant 0 : index
    %c0_454 = arith.constant 0 : index
    %812 = vector.load %arg24[%c0_453, %c0_454] : memref<8x32xf32, #tpu.memory_space<vmem>>, vector<8x32xf32>
    tpu.vector_store %arg24[%c0_453, %c0_454], %810 {strides = array<i32>} : memref<8x32xf32, #tpu.memory_space<vmem>>, vector<8x32xf32>,
    %813 = arith.index_cast %771 : i32 to index
    %c0_455 = arith.constant 0 : index
    %814 = vector.load %arg23[%813, %c0_455] : memref<64x32xf32, #tpu.memory_space<vmem>>, vector<8x32xf32>
    tpu.vector_store %arg23[%813, %c0_455], %810 {strides = array<i32>} : memref<64x32xf32, #tpu.memory_space<vmem>>, vector<8x32xf32>,
    %c8_i32_456 = arith.constant 8 : i32
    %c0_457 = arith.constant 0 : index
    %c0_458 = arith.constant 0 : index
    %815 = vector.load %arg23[%c0_457, %c0_458] : memref<64x32xf32, #tpu.memory_space<vmem>>, vector<64x32xf32>
    %c0_459 = arith.constant 0 : index
    %c0_460 = arith.constant 0 : index
    %816 = vector.load %arg10[%c0_459, %c0_460] : memref<32x16xf32, #tpu.memory_space<vmem>>, vector<32x16xf32>
    %cst_461 = arith.constant dense<0.000000e+00> : vector<64x16xf32>
    %817 = tpu.matmul %815, %816, %cst_461 {dimension_numbers = #tpu.dot_dimension_numbers<[1], [0], [0], [1], [0, 0, 1, 1], [], []>} : vector<64x32xf32>, vector<32x16xf32>, vector<64x16xf32> -> vector<64x16xf32>
    %c0_462 = arith.constant 0 : index
    %c0_463 = arith.constant 0 : index
    %818 = vector.load %arg11[%c0_462, %c0_463] : memref<1x16xf32, #tpu.memory_space<vmem>>, vector<1x16xf32>
    %819 = vector.broadcast %818 : vector<1x16xf32> to vector<64x16xf32>
    %820 = arith.addf %817, %819 : vector<64x16xf32>
    %c0_464 = arith.constant 0 : index
    %c0_465 = arith.constant 0 : index
    %c0_466 = arith.constant 0 : index
    %821 = vector.load %arg12[%c0_464, %c0_465, %c0_466] : memref<4x16x32xf32, #tpu.memory_space<vmem>>, vector<1x16x32xf32>
    %822 = vector.shape_cast %821 : vector<1x16x32xf32> to vector<16x32xf32>
    %cst_467 = arith.constant dense<0.000000e+00> : vector<64x32xf32>
    %823 = tpu.matmul %820, %822, %cst_467 {dimension_numbers = #tpu.dot_dimension_numbers<[1], [0], [0], [1], [0, 0, 1, 1], [], []>} : vector<64x16xf32>, vector<16x32xf32>, vector<64x32xf32> -> vector<64x32xf32>
    %c0_468 = arith.constant 0 : index
    %c0_469 = arith.constant 0 : index
    %c0_470 = arith.constant 0 : index
    %824 = vector.load %arg14[%c0_468, %c0_469, %c0_470] : memref<4x1x32xf32, #tpu.memory_space<vmem>>, vector<1x1x32xf32>
    %825 = vector.shape_cast %824 : vector<1x1x32xf32> to vector<1x32xf32>
    %826 = vector.broadcast %825 : vector<1x32xf32> to vector<64x32xf32>
    %827 = arith.addf %823, %826 : vector<64x32xf32>
    %c0_471 = arith.constant 0 : index
    %c0_472 = arith.constant 0 : index
    %828 = vector.load %arg19[%c0_471, %c0_472] : memref<64x32xf32, #tpu.memory_space<vmem>>, vector<64x32xf32>
    tpu.vector_store %arg19[%c0_471, %c0_472], %827 {strides = array<i32>} : memref<64x32xf32, #tpu.memory_space<vmem>>, vector<64x32xf32>,
    %c1_473 = arith.constant 1 : index
    %c0_474 = arith.constant 0 : index
    %c0_475 = arith.constant 0 : index
    %829 = vector.load %arg12[%c1_473, %c0_474, %c0_475] : memref<4x16x32xf32, #tpu.memory_space<vmem>>, vector<1x16x32xf32>
    %830 = vector.shape_cast %829 : vector<1x16x32xf32> to vector<16x32xf32>
    %cst_476 = arith.constant dense<0.000000e+00> : vector<64x32xf32>
    %831 = tpu.matmul %820, %830, %cst_476 {dimension_numbers = #tpu.dot_dimension_numbers<[1], [0], [0], [1], [0, 0, 1, 1], [], []>} : vector<64x16xf32>, vector<16x32xf32>, vector<64x32xf32> -> vector<64x32xf32>
    %c1_477 = arith.constant 1 : index
    %c0_478 = arith.constant 0 : index
    %c0_479 = arith.constant 0 : index
    %832 = vector.load %arg14[%c1_477, %c0_478, %c0_479] : memref<4x1x32xf32, #tpu.memory_space<vmem>>, vector<1x1x32xf32>
    %833 = vector.shape_cast %832 : vector<1x1x32xf32> to vector<1x32xf32>
    %834 = vector.broadcast %833 : vector<1x32xf32> to vector<64x32xf32>
    %835 = arith.addf %831, %834 : vector<64x32xf32>
    %c0_480 = arith.constant 0 : index
    %c0_481 = arith.constant 0 : index
    %836 = vector.load %arg20[%c0_480, %c0_481] : memref<64x32xf32, #tpu.memory_space<vmem>>, vector<64x32xf32>
    tpu.vector_store %arg20[%c0_480, %c0_481], %835 {strides = array<i32>} : memref<64x32xf32, #tpu.memory_space<vmem>>, vector<64x32xf32>,
    %c2_482 = arith.constant 2 : index
    %c0_483 = arith.constant 0 : index
    %c0_484 = arith.constant 0 : index
    %837 = vector.load %arg12[%c2_482, %c0_483, %c0_484] : memref<4x16x32xf32, #tpu.memory_space<vmem>>, vector<1x16x32xf32>
    %838 = vector.shape_cast %837 : vector<1x16x32xf32> to vector<16x32xf32>
    %cst_485 = arith.constant dense<0.000000e+00> : vector<64x32xf32>
    %839 = tpu.matmul %820, %838, %cst_485 {dimension_numbers = #tpu.dot_dimension_numbers<[1], [0], [0], [1], [0, 0, 1, 1], [], []>} : vector<64x16xf32>, vector<16x32xf32>, vector<64x32xf32> -> vector<64x32xf32>
    %c2_486 = arith.constant 2 : index
    %c0_487 = arith.constant 0 : index
    %c0_488 = arith.constant 0 : index
    %840 = vector.load %arg14[%c2_486, %c0_487, %c0_488] : memref<4x1x32xf32, #tpu.memory_space<vmem>>, vector<1x1x32xf32>
    %841 = vector.shape_cast %840 : vector<1x1x32xf32> to vector<1x32xf32>
    %842 = vector.broadcast %841 : vector<1x32xf32> to vector<64x32xf32>
    %843 = arith.addf %839, %842 : vector<64x32xf32>
    %c0_489 = arith.constant 0 : index
    %c0_490 = arith.constant 0 : index
    %844 = vector.load %arg21[%c0_489, %c0_490] : memref<64x32xf32, #tpu.memory_space<vmem>>, vector<64x32xf32>
    tpu.vector_store %arg21[%c0_489, %c0_490], %843 {strides = array<i32>} : memref<64x32xf32, #tpu.memory_space<vmem>>, vector<64x32xf32>,
    %c3_491 = arith.constant 3 : index
    %c0_492 = arith.constant 0 : index
    %c0_493 = arith.constant 0 : index
    %845 = vector.load %arg12[%c3_491, %c0_492, %c0_493] : memref<4x16x32xf32, #tpu.memory_space<vmem>>, vector<1x16x32xf32>
    %846 = vector.shape_cast %845 : vector<1x16x32xf32> to vector<16x32xf32>
    %cst_494 = arith.constant dense<0.000000e+00> : vector<64x32xf32>
    %847 = tpu.matmul %820, %846, %cst_494 {dimension_numbers = #tpu.dot_dimension_numbers<[1], [0], [0], [1], [0, 0, 1, 1], [], []>} : vector<64x16xf32>, vector<16x32xf32>, vector<64x32xf32> -> vector<64x32xf32>
    %c3_495 = arith.constant 3 : index
    %c0_496 = arith.constant 0 : index
    %c0_497 = arith.constant 0 : index
    %848 = vector.load %arg14[%c3_495, %c0_496, %c0_497] : memref<4x1x32xf32, #tpu.memory_space<vmem>>, vector<1x1x32xf32>
    %849 = vector.shape_cast %848 : vector<1x1x32xf32> to vector<1x32xf32>
    %850 = vector.broadcast %849 : vector<1x32xf32> to vector<64x32xf32>
    %851 = arith.addf %847, %850 : vector<64x32xf32>
    %c0_498 = arith.constant 0 : index
    %c0_499 = arith.constant 0 : index
    %852 = vector.load %arg22[%c0_498, %c0_499] : memref<64x32xf32, #tpu.memory_space<vmem>>, vector<64x32xf32>
    tpu.vector_store %arg22[%c0_498, %c0_499], %851 {strides = array<i32>} : memref<64x32xf32, #tpu.memory_space<vmem>>, vector<64x32xf32>,
    %c0_500 = arith.constant 0 : index
    %c0_501 = arith.constant 0 : index
    %c0_502 = arith.constant 0 : index
    %853 = vector.load %arg13[%c0_500, %c0_501, %c0_502] : memref<4x32x32xf32, #tpu.memory_space<vmem>>, vector<1x32x32xf32>
    %854 = vector.shape_cast %853 : vector<1x32x32xf32> to vector<32x32xf32>
    %c1_503 = arith.constant 1 : index
    %c0_504 = arith.constant 0 : index
    %c0_505 = arith.constant 0 : index
    %855 = vector.load %arg13[%c1_503, %c0_504, %c0_505] : memref<4x32x32xf32, #tpu.memory_space<vmem>>, vector<1x32x32xf32>
    %856 = vector.shape_cast %855 : vector<1x32x32xf32> to vector<32x32xf32>
    %c2_506 = arith.constant 2 : index
    %c0_507 = arith.constant 0 : index
    %c0_508 = arith.constant 0 : index
    %857 = vector.load %arg13[%c2_506, %c0_507, %c0_508] : memref<4x32x32xf32, #tpu.memory_space<vmem>>, vector<1x32x32xf32>
    %858 = vector.shape_cast %857 : vector<1x32x32xf32> to vector<32x32xf32>
    %c3_509 = arith.constant 3 : index
    %c0_510 = arith.constant 0 : index
    %c0_511 = arith.constant 0 : index
    %859 = vector.load %arg13[%c3_509, %c0_510, %c0_511] : memref<4x32x32xf32, #tpu.memory_space<vmem>>, vector<1x32x32xf32>
    %860 = vector.shape_cast %859 : vector<1x32x32xf32> to vector<32x32xf32>
    %cst_512 = arith.constant 0.000000e+00 : f32
    %861 = vector.broadcast %cst_512 : f32 to vector<8x32xf32>
    %c0_513 = arith.constant 0 : index
    %c0_514 = arith.constant 0 : index
    %862 = vector.load %arg24[%c0_513, %c0_514] : memref<8x32xf32, #tpu.memory_space<vmem>>, vector<8x32xf32>
    tpu.vector_store %arg24[%c0_513, %c0_514], %861 {strides = array<i32>} : memref<8x32xf32, #tpu.memory_space<vmem>>, vector<8x32xf32>,
    %cst_515 = arith.constant 0.000000e+00 : f32
    %863 = vector.broadcast %cst_515 : f32 to vector<8x32xf32>
    %c0_516 = arith.constant 0 : index
    %c0_517 = arith.constant 0 : index
    %864 = vector.load %arg25[%c0_516, %c0_517] : memref<8x32xf32, #tpu.memory_space<vmem>>, vector<8x32xf32>
    tpu.vector_store %arg25[%c0_516, %c0_517], %863 {strides = array<i32>} : memref<8x32xf32, #tpu.memory_space<vmem>>, vector<8x32xf32>,
    %c0_i32_518 = arith.constant 0 : i32
    %c8_i32_519 = arith.constant 8 : i32
    %865 = arith.muli %c0_i32_518, %c8_i32_519 : i32
    %866 = tpu.assume_multiple %865, 8 : i32
    %c0_520 = arith.constant 0 : index
    %c0_521 = arith.constant 0 : index
    %867 = vector.load %arg24[%c0_520, %c0_521] : memref<8x32xf32, #tpu.memory_space<vmem>>, vector<8x32xf32>
    %868 = arith.index_cast %866 : i32 to index
    %c0_522 = arith.constant 0 : index
    %869 = vector.load %arg19[%868, %c0_522] : memref<64x32xf32, #tpu.memory_space<vmem>>, vector<8x32xf32>
    %cst_523 = arith.constant dense<0.000000e+00> : vector<8x32xf32>
    %870 = tpu.matmul %867, %854, %cst_523 {dimension_numbers = #tpu.dot_dimension_numbers<[1], [0], [0], [1], [0, 0, 1, 1], [], []>} : vector<8x32xf32>, vector<32x32xf32>, vector<8x32xf32> -> vector<8x32xf32>
    %871 = arith.addf %869, %870 : vector<8x32xf32>
    %872 = arith.index_cast %866 : i32 to index
    %c0_524 = arith.constant 0 : index
    %873 = vector.load %arg20[%872, %c0_524] : memref<64x32xf32, #tpu.memory_space<vmem>>, vector<8x32xf32>
    %cst_525 = arith.constant dense<0.000000e+00> : vector<8x32xf32>
    %874 = tpu.matmul %867, %856, %cst_525 {dimension_numbers = #tpu.dot_dimension_numbers<[1], [0], [0], [1], [0, 0, 1, 1], [], []>} : vector<8x32xf32>, vector<32x32xf32>, vector<8x32xf32> -> vector<8x32xf32>
    %875 = arith.addf %873, %874 : vector<8x32xf32>
    %876 = arith.index_cast %866 : i32 to index
    %c0_526 = arith.constant 0 : index
    %877 = vector.load %arg21[%876, %c0_526] : memref<64x32xf32, #tpu.memory_space<vmem>>, vector<8x32xf32>
    %cst_527 = arith.constant dense<0.000000e+00> : vector<8x32xf32>
    %878 = tpu.matmul %867, %858, %cst_527 {dimension_numbers = #tpu.dot_dimension_numbers<[1], [0], [0], [1], [0, 0, 1, 1], [], []>} : vector<8x32xf32>, vector<32x32xf32>, vector<8x32xf32> -> vector<8x32xf32>
    %879 = arith.addf %877, %878 : vector<8x32xf32>
    %880 = arith.index_cast %866 : i32 to index
    %c0_528 = arith.constant 0 : index
    %881 = vector.load %arg22[%880, %c0_528] : memref<64x32xf32, #tpu.memory_space<vmem>>, vector<8x32xf32>
    %cst_529 = arith.constant dense<0.000000e+00> : vector<8x32xf32>
    %882 = tpu.matmul %867, %860, %cst_529 {dimension_numbers = #tpu.dot_dimension_numbers<[1], [0], [0], [1], [0, 0, 1, 1], [], []>} : vector<8x32xf32>, vector<32x32xf32>, vector<8x32xf32> -> vector<8x32xf32>
    %883 = arith.addf %881, %882 : vector<8x32xf32>
    %884 = arith.negf %871 : vector<8x32xf32>
    %885 = math.exp %884 : vector<8x32xf32>
    %cst_530 = arith.constant 1.000000e+00 : f32
    %886 = vector.broadcast %cst_530 : f32 to vector<8x32xf32>
    %887 = arith.addf %886, %885 : vector<8x32xf32>
    %888 = arith.divf %886, %887 : vector<8x32xf32>
    %889 = arith.negf %875 : vector<8x32xf32>
    %890 = math.exp %889 : vector<8x32xf32>
    %cst_531 = arith.constant 1.000000e+00 : f32
    %891 = vector.broadcast %cst_531 : f32 to vector<8x32xf32>
    %892 = arith.addf %891, %890 : vector<8x32xf32>
    %893 = arith.divf %891, %892 : vector<8x32xf32>
    %894 = math.tanh %879 : vector<8x32xf32>
    %895 = arith.negf %883 : vector<8x32xf32>
    %896 = math.exp %895 : vector<8x32xf32>
    %cst_532 = arith.constant 1.000000e+00 : f32
    %897 = vector.broadcast %cst_532 : f32 to vector<8x32xf32>
    %898 = arith.addf %897, %896 : vector<8x32xf32>
    %899 = arith.divf %897, %898 : vector<8x32xf32>
    %c0_533 = arith.constant 0 : index
    %c0_534 = arith.constant 0 : index
    %900 = vector.load %arg25[%c0_533, %c0_534] : memref<8x32xf32, #tpu.memory_space<vmem>>, vector<8x32xf32>
    %901 = arith.mulf %893, %900 : vector<8x32xf32>
    %902 = arith.mulf %888, %894 : vector<8x32xf32>
    %903 = arith.addf %901, %902 : vector<8x32xf32>
    %904 = math.tanh %903 : vector<8x32xf32>
    %905 = arith.mulf %899, %904 : vector<8x32xf32>
    %c0_535 = arith.constant 0 : index
    %c0_536 = arith.constant 0 : index
    %906 = vector.load %arg25[%c0_535, %c0_536] : memref<8x32xf32, #tpu.memory_space<vmem>>, vector<8x32xf32>
    tpu.vector_store %arg25[%c0_535, %c0_536], %903 {strides = array<i32>} : memref<8x32xf32, #tpu.memory_space<vmem>>, vector<8x32xf32>,
    %c0_537 = arith.constant 0 : index
    %c0_538 = arith.constant 0 : index
    %907 = vector.load %arg24[%c0_537, %c0_538] : memref<8x32xf32, #tpu.memory_space<vmem>>, vector<8x32xf32>
    tpu.vector_store %arg24[%c0_537, %c0_538], %905 {strides = array<i32>} : memref<8x32xf32, #tpu.memory_space<vmem>>, vector<8x32xf32>,
    %908 = arith.index_cast %866 : i32 to index
    %c0_539 = arith.constant 0 : index
    %909 = vector.load %arg23[%908, %c0_539] : memref<64x32xf32, #tpu.memory_space<vmem>>, vector<8x32xf32>
    tpu.vector_store %arg23[%908, %c0_539], %905 {strides = array<i32>} : memref<64x32xf32, #tpu.memory_space<vmem>>, vector<8x32xf32>,
    %c1_i32_540 = arith.constant 1 : i32
    %c8_i32_541 = arith.constant 8 : i32
    %910 = arith.muli %c1_i32_540, %c8_i32_541 : i32
    %911 = tpu.assume_multiple %910, 8 : i32
    %c0_542 = arith.constant 0 : index
    %c0_543 = arith.constant 0 : index
    %912 = vector.load %arg24[%c0_542, %c0_543] : memref<8x32xf32, #tpu.memory_space<vmem>>, vector<8x32xf32>
    %913 = arith.index_cast %911 : i32 to index
    %c0_544 = arith.constant 0 : index
    %914 = vector.load %arg19[%913, %c0_544] : memref<64x32xf32, #tpu.memory_space<vmem>>, vector<8x32xf32>
    %cst_545 = arith.constant dense<0.000000e+00> : vector<8x32xf32>
    %915 = tpu.matmul %912, %854, %cst_545 {dimension_numbers = #tpu.dot_dimension_numbers<[1], [0], [0], [1], [0, 0, 1, 1], [], []>} : vector<8x32xf32>, vector<32x32xf32>, vector<8x32xf32> -> vector<8x32xf32>
    %916 = arith.addf %914, %915 : vector<8x32xf32>
    %917 = arith.index_cast %911 : i32 to index
    %c0_546 = arith.constant 0 : index
    %918 = vector.load %arg20[%917, %c0_546] : memref<64x32xf32, #tpu.memory_space<vmem>>, vector<8x32xf32>
    %cst_547 = arith.constant dense<0.000000e+00> : vector<8x32xf32>
    %919 = tpu.matmul %912, %856, %cst_547 {dimension_numbers = #tpu.dot_dimension_numbers<[1], [0], [0], [1], [0, 0, 1, 1], [], []>} : vector<8x32xf32>, vector<32x32xf32>, vector<8x32xf32> -> vector<8x32xf32>
    %920 = arith.addf %918, %919 : vector<8x32xf32>
    %921 = arith.index_cast %911 : i32 to index
    %c0_548 = arith.constant 0 : index
    %922 = vector.load %arg21[%921, %c0_548] : memref<64x32xf32, #tpu.memory_space<vmem>>, vector<8x32xf32>
    %cst_549 = arith.constant dense<0.000000e+00> : vector<8x32xf32>
    %923 = tpu.matmul %912, %858, %cst_549 {dimension_numbers = #tpu.dot_dimension_numbers<[1], [0], [0], [1], [0, 0, 1, 1], [], []>} : vector<8x32xf32>, vector<32x32xf32>, vector<8x32xf32> -> vector<8x32xf32>
    %924 = arith.addf %922, %923 : vector<8x32xf32>
    %925 = arith.index_cast %911 : i32 to index
    %c0_550 = arith.constant 0 : index
    %926 = vector.load %arg22[%925, %c0_550] : memref<64x32xf32, #tpu.memory_space<vmem>>, vector<8x32xf32>
    %cst_551 = arith.constant dense<0.000000e+00> : vector<8x32xf32>
    %927 = tpu.matmul %912, %860, %cst_551 {dimension_numbers = #tpu.dot_dimension_numbers<[1], [0], [0], [1], [0, 0, 1, 1], [], []>} : vector<8x32xf32>, vector<32x32xf32>, vector<8x32xf32> -> vector<8x32xf32>
    %928 = arith.addf %926, %927 : vector<8x32xf32>
    %929 = arith.negf %916 : vector<8x32xf32>
    %930 = math.exp %929 : vector<8x32xf32>
    %cst_552 = arith.constant 1.000000e+00 : f32
    %931 = vector.broadcast %cst_552 : f32 to vector<8x32xf32>
    %932 = arith.addf %931, %930 : vector<8x32xf32>
    %933 = arith.divf %931, %932 : vector<8x32xf32>
    %934 = arith.negf %920 : vector<8x32xf32>
    %935 = math.exp %934 : vector<8x32xf32>
    %cst_553 = arith.constant 1.000000e+00 : f32
    %936 = vector.broadcast %cst_553 : f32 to vector<8x32xf32>
    %937 = arith.addf %936, %935 : vector<8x32xf32>
    %938 = arith.divf %936, %937 : vector<8x32xf32>
    %939 = math.tanh %924 : vector<8x32xf32>
    %940 = arith.negf %928 : vector<8x32xf32>
    %941 = math.exp %940 : vector<8x32xf32>
    %cst_554 = arith.constant 1.000000e+00 : f32
    %942 = vector.broadcast %cst_554 : f32 to vector<8x32xf32>
    %943 = arith.addf %942, %941 : vector<8x32xf32>
    %944 = arith.divf %942, %943 : vector<8x32xf32>
    %c0_555 = arith.constant 0 : index
    %c0_556 = arith.constant 0 : index
    %945 = vector.load %arg25[%c0_555, %c0_556] : memref<8x32xf32, #tpu.memory_space<vmem>>, vector<8x32xf32>
    %946 = arith.mulf %938, %945 : vector<8x32xf32>
    %947 = arith.mulf %933, %939 : vector<8x32xf32>
    %948 = arith.addf %946, %947 : vector<8x32xf32>
    %949 = math.tanh %948 : vector<8x32xf32>
    %950 = arith.mulf %944, %949 : vector<8x32xf32>
    %c0_557 = arith.constant 0 : index
    %c0_558 = arith.constant 0 : index
    %951 = vector.load %arg25[%c0_557, %c0_558] : memref<8x32xf32, #tpu.memory_space<vmem>>, vector<8x32xf32>
    tpu.vector_store %arg25[%c0_557, %c0_558], %948 {strides = array<i32>} : memref<8x32xf32, #tpu.memory_space<vmem>>, vector<8x32xf32>,
    %c0_559 = arith.constant 0 : index
    %c0_560 = arith.constant 0 : index
    %952 = vector.load %arg24[%c0_559, %c0_560] : memref<8x32xf32, #tpu.memory_space<vmem>>, vector<8x32xf32>
    tpu.vector_store %arg24[%c0_559, %c0_560], %950 {strides = array<i32>} : memref<8x32xf32, #tpu.memory_space<vmem>>, vector<8x32xf32>,
    %953 = arith.index_cast %911 : i32 to index
    %c0_561 = arith.constant 0 : index
    %954 = vector.load %arg23[%953, %c0_561] : memref<64x32xf32, #tpu.memory_space<vmem>>, vector<8x32xf32>
    tpu.vector_store %arg23[%953, %c0_561], %950 {strides = array<i32>} : memref<64x32xf32, #tpu.memory_space<vmem>>, vector<8x32xf32>,
    %c2_i32_562 = arith.constant 2 : i32
    %c8_i32_563 = arith.constant 8 : i32
    %955 = arith.muli %c2_i32_562, %c8_i32_563 : i32
    %956 = tpu.assume_multiple %955, 8 : i32
    %c0_564 = arith.constant 0 : index
    %c0_565 = arith.constant 0 : index
    %957 = vector.load %arg24[%c0_564, %c0_565] : memref<8x32xf32, #tpu.memory_space<vmem>>, vector<8x32xf32>
    %958 = arith.index_cast %956 : i32 to index
    %c0_566 = arith.constant 0 : index
    %959 = vector.load %arg19[%958, %c0_566] : memref<64x32xf32, #tpu.memory_space<vmem>>, vector<8x32xf32>
    %cst_567 = arith.constant dense<0.000000e+00> : vector<8x32xf32>
    %960 = tpu.matmul %957, %854, %cst_567 {dimension_numbers = #tpu.dot_dimension_numbers<[1], [0], [0], [1], [0, 0, 1, 1], [], []>} : vector<8x32xf32>, vector<32x32xf32>, vector<8x32xf32> -> vector<8x32xf32>
    %961 = arith.addf %959, %960 : vector<8x32xf32>
    %962 = arith.index_cast %956 : i32 to index
    %c0_568 = arith.constant 0 : index
    %963 = vector.load %arg20[%962, %c0_568] : memref<64x32xf32, #tpu.memory_space<vmem>>, vector<8x32xf32>
    %cst_569 = arith.constant dense<0.000000e+00> : vector<8x32xf32>
    %964 = tpu.matmul %957, %856, %cst_569 {dimension_numbers = #tpu.dot_dimension_numbers<[1], [0], [0], [1], [0, 0, 1, 1], [], []>} : vector<8x32xf32>, vector<32x32xf32>, vector<8x32xf32> -> vector<8x32xf32>
    %965 = arith.addf %963, %964 : vector<8x32xf32>
    %966 = arith.index_cast %956 : i32 to index
    %c0_570 = arith.constant 0 : index
    %967 = vector.load %arg21[%966, %c0_570] : memref<64x32xf32, #tpu.memory_space<vmem>>, vector<8x32xf32>
    %cst_571 = arith.constant dense<0.000000e+00> : vector<8x32xf32>
    %968 = tpu.matmul %957, %858, %cst_571 {dimension_numbers = #tpu.dot_dimension_numbers<[1], [0], [0], [1], [0, 0, 1, 1], [], []>} : vector<8x32xf32>, vector<32x32xf32>, vector<8x32xf32> -> vector<8x32xf32>
    %969 = arith.addf %967, %968 : vector<8x32xf32>
    %970 = arith.index_cast %956 : i32 to index
    %c0_572 = arith.constant 0 : index
    %971 = vector.load %arg22[%970, %c0_572] : memref<64x32xf32, #tpu.memory_space<vmem>>, vector<8x32xf32>
    %cst_573 = arith.constant dense<0.000000e+00> : vector<8x32xf32>
    %972 = tpu.matmul %957, %860, %cst_573 {dimension_numbers = #tpu.dot_dimension_numbers<[1], [0], [0], [1], [0, 0, 1, 1], [], []>} : vector<8x32xf32>, vector<32x32xf32>, vector<8x32xf32> -> vector<8x32xf32>
    %973 = arith.addf %971, %972 : vector<8x32xf32>
    %974 = arith.negf %961 : vector<8x32xf32>
    %975 = math.exp %974 : vector<8x32xf32>
    %cst_574 = arith.constant 1.000000e+00 : f32
    %976 = vector.broadcast %cst_574 : f32 to vector<8x32xf32>
    %977 = arith.addf %976, %975 : vector<8x32xf32>
    %978 = arith.divf %976, %977 : vector<8x32xf32>
    %979 = arith.negf %965 : vector<8x32xf32>
    %980 = math.exp %979 : vector<8x32xf32>
    %cst_575 = arith.constant 1.000000e+00 : f32
    %981 = vector.broadcast %cst_575 : f32 to vector<8x32xf32>
    %982 = arith.addf %981, %980 : vector<8x32xf32>
    %983 = arith.divf %981, %982 : vector<8x32xf32>
    %984 = math.tanh %969 : vector<8x32xf32>
    %985 = arith.negf %973 : vector<8x32xf32>
    %986 = math.exp %985 : vector<8x32xf32>
    %cst_576 = arith.constant 1.000000e+00 : f32
    %987 = vector.broadcast %cst_576 : f32 to vector<8x32xf32>
    %988 = arith.addf %987, %986 : vector<8x32xf32>
    %989 = arith.divf %987, %988 : vector<8x32xf32>
    %c0_577 = arith.constant 0 : index
    %c0_578 = arith.constant 0 : index
    %990 = vector.load %arg25[%c0_577, %c0_578] : memref<8x32xf32, #tpu.memory_space<vmem>>, vector<8x32xf32>
    %991 = arith.mulf %983, %990 : vector<8x32xf32>
    %992 = arith.mulf %978, %984 : vector<8x32xf32>
    %993 = arith.addf %991, %992 : vector<8x32xf32>
    %994 = math.tanh %993 : vector<8x32xf32>
    %995 = arith.mulf %989, %994 : vector<8x32xf32>
    %c0_579 = arith.constant 0 : index
    %c0_580 = arith.constant 0 : index
    %996 = vector.load %arg25[%c0_579, %c0_580] : memref<8x32xf32, #tpu.memory_space<vmem>>, vector<8x32xf32>
    tpu.vector_store %arg25[%c0_579, %c0_580], %993 {strides = array<i32>} : memref<8x32xf32, #tpu.memory_space<vmem>>, vector<8x32xf32>,
    %c0_581 = arith.constant 0 : index
    %c0_582 = arith.constant 0 : index
    %997 = vector.load %arg24[%c0_581, %c0_582] : memref<8x32xf32, #tpu.memory_space<vmem>>, vector<8x32xf32>
    tpu.vector_store %arg24[%c0_581, %c0_582], %995 {strides = array<i32>} : memref<8x32xf32, #tpu.memory_space<vmem>>, vector<8x32xf32>,
    %998 = arith.index_cast %956 : i32 to index
    %c0_583 = arith.constant 0 : index
    %999 = vector.load %arg23[%998, %c0_583] : memref<64x32xf32, #tpu.memory_space<vmem>>, vector<8x32xf32>
    tpu.vector_store %arg23[%998, %c0_583], %995 {strides = array<i32>} : memref<64x32xf32, #tpu.memory_space<vmem>>, vector<8x32xf32>,
    %c3_i32_584 = arith.constant 3 : i32
    %c8_i32_585 = arith.constant 8 : i32
    %1000 = arith.muli %c3_i32_584, %c8_i32_585 : i32
    %1001 = tpu.assume_multiple %1000, 8 : i32
    %c0_586 = arith.constant 0 : index
    %c0_587 = arith.constant 0 : index
    %1002 = vector.load %arg24[%c0_586, %c0_587] : memref<8x32xf32, #tpu.memory_space<vmem>>, vector<8x32xf32>
    %1003 = arith.index_cast %1001 : i32 to index
    %c0_588 = arith.constant 0 : index
    %1004 = vector.load %arg19[%1003, %c0_588] : memref<64x32xf32, #tpu.memory_space<vmem>>, vector<8x32xf32>
    %cst_589 = arith.constant dense<0.000000e+00> : vector<8x32xf32>
    %1005 = tpu.matmul %1002, %854, %cst_589 {dimension_numbers = #tpu.dot_dimension_numbers<[1], [0], [0], [1], [0, 0, 1, 1], [], []>} : vector<8x32xf32>, vector<32x32xf32>, vector<8x32xf32> -> vector<8x32xf32>
    %1006 = arith.addf %1004, %1005 : vector<8x32xf32>
    %1007 = arith.index_cast %1001 : i32 to index
    %c0_590 = arith.constant 0 : index
    %1008 = vector.load %arg20[%1007, %c0_590] : memref<64x32xf32, #tpu.memory_space<vmem>>, vector<8x32xf32>
    %cst_591 = arith.constant dense<0.000000e+00> : vector<8x32xf32>
    %1009 = tpu.matmul %1002, %856, %cst_591 {dimension_numbers = #tpu.dot_dimension_numbers<[1], [0], [0], [1], [0, 0, 1, 1], [], []>} : vector<8x32xf32>, vector<32x32xf32>, vector<8x32xf32> -> vector<8x32xf32>
    %1010 = arith.addf %1008, %1009 : vector<8x32xf32>
    %1011 = arith.index_cast %1001 : i32 to index
    %c0_592 = arith.constant 0 : index
    %1012 = vector.load %arg21[%1011, %c0_592] : memref<64x32xf32, #tpu.memory_space<vmem>>, vector<8x32xf32>
    %cst_593 = arith.constant dense<0.000000e+00> : vector<8x32xf32>
    %1013 = tpu.matmul %1002, %858, %cst_593 {dimension_numbers = #tpu.dot_dimension_numbers<[1], [0], [0], [1], [0, 0, 1, 1], [], []>} : vector<8x32xf32>, vector<32x32xf32>, vector<8x32xf32> -> vector<8x32xf32>
    %1014 = arith.addf %1012, %1013 : vector<8x32xf32>
    %1015 = arith.index_cast %1001 : i32 to index
    %c0_594 = arith.constant 0 : index
    %1016 = vector.load %arg22[%1015, %c0_594] : memref<64x32xf32, #tpu.memory_space<vmem>>, vector<8x32xf32>
    %cst_595 = arith.constant dense<0.000000e+00> : vector<8x32xf32>
    %1017 = tpu.matmul %1002, %860, %cst_595 {dimension_numbers = #tpu.dot_dimension_numbers<[1], [0], [0], [1], [0, 0, 1, 1], [], []>} : vector<8x32xf32>, vector<32x32xf32>, vector<8x32xf32> -> vector<8x32xf32>
    %1018 = arith.addf %1016, %1017 : vector<8x32xf32>
    %1019 = arith.negf %1006 : vector<8x32xf32>
    %1020 = math.exp %1019 : vector<8x32xf32>
    %cst_596 = arith.constant 1.000000e+00 : f32
    %1021 = vector.broadcast %cst_596 : f32 to vector<8x32xf32>
    %1022 = arith.addf %1021, %1020 : vector<8x32xf32>
    %1023 = arith.divf %1021, %1022 : vector<8x32xf32>
    %1024 = arith.negf %1010 : vector<8x32xf32>
    %1025 = math.exp %1024 : vector<8x32xf32>
    %cst_597 = arith.constant 1.000000e+00 : f32
    %1026 = vector.broadcast %cst_597 : f32 to vector<8x32xf32>
    %1027 = arith.addf %1026, %1025 : vector<8x32xf32>
    %1028 = arith.divf %1026, %1027 : vector<8x32xf32>
    %1029 = math.tanh %1014 : vector<8x32xf32>
    %1030 = arith.negf %1018 : vector<8x32xf32>
    %1031 = math.exp %1030 : vector<8x32xf32>
    %cst_598 = arith.constant 1.000000e+00 : f32
    %1032 = vector.broadcast %cst_598 : f32 to vector<8x32xf32>
    %1033 = arith.addf %1032, %1031 : vector<8x32xf32>
    %1034 = arith.divf %1032, %1033 : vector<8x32xf32>
    %c0_599 = arith.constant 0 : index
    %c0_600 = arith.constant 0 : index
    %1035 = vector.load %arg25[%c0_599, %c0_600] : memref<8x32xf32, #tpu.memory_space<vmem>>, vector<8x32xf32>
    %1036 = arith.mulf %1028, %1035 : vector<8x32xf32>
    %1037 = arith.mulf %1023, %1029 : vector<8x32xf32>
    %1038 = arith.addf %1036, %1037 : vector<8x32xf32>
    %1039 = math.tanh %1038 : vector<8x32xf32>
    %1040 = arith.mulf %1034, %1039 : vector<8x32xf32>
    %c0_601 = arith.constant 0 : index
    %c0_602 = arith.constant 0 : index
    %1041 = vector.load %arg25[%c0_601, %c0_602] : memref<8x32xf32, #tpu.memory_space<vmem>>, vector<8x32xf32>
    tpu.vector_store %arg25[%c0_601, %c0_602], %1038 {strides = array<i32>} : memref<8x32xf32, #tpu.memory_space<vmem>>, vector<8x32xf32>,
    %c0_603 = arith.constant 0 : index
    %c0_604 = arith.constant 0 : index
    %1042 = vector.load %arg24[%c0_603, %c0_604] : memref<8x32xf32, #tpu.memory_space<vmem>>, vector<8x32xf32>
    tpu.vector_store %arg24[%c0_603, %c0_604], %1040 {strides = array<i32>} : memref<8x32xf32, #tpu.memory_space<vmem>>, vector<8x32xf32>,
    %1043 = arith.index_cast %1001 : i32 to index
    %c0_605 = arith.constant 0 : index
    %1044 = vector.load %arg23[%1043, %c0_605] : memref<64x32xf32, #tpu.memory_space<vmem>>, vector<8x32xf32>
    tpu.vector_store %arg23[%1043, %c0_605], %1040 {strides = array<i32>} : memref<64x32xf32, #tpu.memory_space<vmem>>, vector<8x32xf32>,
    %c4_i32_606 = arith.constant 4 : i32
    %c8_i32_607 = arith.constant 8 : i32
    %1045 = arith.muli %c4_i32_606, %c8_i32_607 : i32
    %1046 = tpu.assume_multiple %1045, 8 : i32
    %c0_608 = arith.constant 0 : index
    %c0_609 = arith.constant 0 : index
    %1047 = vector.load %arg24[%c0_608, %c0_609] : memref<8x32xf32, #tpu.memory_space<vmem>>, vector<8x32xf32>
    %1048 = arith.index_cast %1046 : i32 to index
    %c0_610 = arith.constant 0 : index
    %1049 = vector.load %arg19[%1048, %c0_610] : memref<64x32xf32, #tpu.memory_space<vmem>>, vector<8x32xf32>
    %cst_611 = arith.constant dense<0.000000e+00> : vector<8x32xf32>
    %1050 = tpu.matmul %1047, %854, %cst_611 {dimension_numbers = #tpu.dot_dimension_numbers<[1], [0], [0], [1], [0, 0, 1, 1], [], []>} : vector<8x32xf32>, vector<32x32xf32>, vector<8x32xf32> -> vector<8x32xf32>
    %1051 = arith.addf %1049, %1050 : vector<8x32xf32>
    %1052 = arith.index_cast %1046 : i32 to index
    %c0_612 = arith.constant 0 : index
    %1053 = vector.load %arg20[%1052, %c0_612] : memref<64x32xf32, #tpu.memory_space<vmem>>, vector<8x32xf32>
    %cst_613 = arith.constant dense<0.000000e+00> : vector<8x32xf32>
    %1054 = tpu.matmul %1047, %856, %cst_613 {dimension_numbers = #tpu.dot_dimension_numbers<[1], [0], [0], [1], [0, 0, 1, 1], [], []>} : vector<8x32xf32>, vector<32x32xf32>, vector<8x32xf32> -> vector<8x32xf32>
    %1055 = arith.addf %1053, %1054 : vector<8x32xf32>
    %1056 = arith.index_cast %1046 : i32 to index
    %c0_614 = arith.constant 0 : index
    %1057 = vector.load %arg21[%1056, %c0_614] : memref<64x32xf32, #tpu.memory_space<vmem>>, vector<8x32xf32>
    %cst_615 = arith.constant dense<0.000000e+00> : vector<8x32xf32>
    %1058 = tpu.matmul %1047, %858, %cst_615 {dimension_numbers = #tpu.dot_dimension_numbers<[1], [0], [0], [1], [0, 0, 1, 1], [], []>} : vector<8x32xf32>, vector<32x32xf32>, vector<8x32xf32> -> vector<8x32xf32>
    %1059 = arith.addf %1057, %1058 : vector<8x32xf32>
    %1060 = arith.index_cast %1046 : i32 to index
    %c0_616 = arith.constant 0 : index
    %1061 = vector.load %arg22[%1060, %c0_616] : memref<64x32xf32, #tpu.memory_space<vmem>>, vector<8x32xf32>
    %cst_617 = arith.constant dense<0.000000e+00> : vector<8x32xf32>
    %1062 = tpu.matmul %1047, %860, %cst_617 {dimension_numbers = #tpu.dot_dimension_numbers<[1], [0], [0], [1], [0, 0, 1, 1], [], []>} : vector<8x32xf32>, vector<32x32xf32>, vector<8x32xf32> -> vector<8x32xf32>
    %1063 = arith.addf %1061, %1062 : vector<8x32xf32>
    %1064 = arith.negf %1051 : vector<8x32xf32>
    %1065 = math.exp %1064 : vector<8x32xf32>
    %cst_618 = arith.constant 1.000000e+00 : f32
    %1066 = vector.broadcast %cst_618 : f32 to vector<8x32xf32>
    %1067 = arith.addf %1066, %1065 : vector<8x32xf32>
    %1068 = arith.divf %1066, %1067 : vector<8x32xf32>
    %1069 = arith.negf %1055 : vector<8x32xf32>
    %1070 = math.exp %1069 : vector<8x32xf32>
    %cst_619 = arith.constant 1.000000e+00 : f32
    %1071 = vector.broadcast %cst_619 : f32 to vector<8x32xf32>
    %1072 = arith.addf %1071, %1070 : vector<8x32xf32>
    %1073 = arith.divf %1071, %1072 : vector<8x32xf32>
    %1074 = math.tanh %1059 : vector<8x32xf32>
    %1075 = arith.negf %1063 : vector<8x32xf32>
    %1076 = math.exp %1075 : vector<8x32xf32>
    %cst_620 = arith.constant 1.000000e+00 : f32
    %1077 = vector.broadcast %cst_620 : f32 to vector<8x32xf32>
    %1078 = arith.addf %1077, %1076 : vector<8x32xf32>
    %1079 = arith.divf %1077, %1078 : vector<8x32xf32>
    %c0_621 = arith.constant 0 : index
    %c0_622 = arith.constant 0 : index
    %1080 = vector.load %arg25[%c0_621, %c0_622] : memref<8x32xf32, #tpu.memory_space<vmem>>, vector<8x32xf32>
    %1081 = arith.mulf %1073, %1080 : vector<8x32xf32>
    %1082 = arith.mulf %1068, %1074 : vector<8x32xf32>
    %1083 = arith.addf %1081, %1082 : vector<8x32xf32>
    %1084 = math.tanh %1083 : vector<8x32xf32>
    %1085 = arith.mulf %1079, %1084 : vector<8x32xf32>
    %c0_623 = arith.constant 0 : index
    %c0_624 = arith.constant 0 : index
    %1086 = vector.load %arg25[%c0_623, %c0_624] : memref<8x32xf32, #tpu.memory_space<vmem>>, vector<8x32xf32>
    tpu.vector_store %arg25[%c0_623, %c0_624], %1083 {strides = array<i32>} : memref<8x32xf32, #tpu.memory_space<vmem>>, vector<8x32xf32>,
    %c0_625 = arith.constant 0 : index
    %c0_626 = arith.constant 0 : index
    %1087 = vector.load %arg24[%c0_625, %c0_626] : memref<8x32xf32, #tpu.memory_space<vmem>>, vector<8x32xf32>
    tpu.vector_store %arg24[%c0_625, %c0_626], %1085 {strides = array<i32>} : memref<8x32xf32, #tpu.memory_space<vmem>>, vector<8x32xf32>,
    %1088 = arith.index_cast %1046 : i32 to index
    %c0_627 = arith.constant 0 : index
    %1089 = vector.load %arg23[%1088, %c0_627] : memref<64x32xf32, #tpu.memory_space<vmem>>, vector<8x32xf32>
    tpu.vector_store %arg23[%1088, %c0_627], %1085 {strides = array<i32>} : memref<64x32xf32, #tpu.memory_space<vmem>>, vector<8x32xf32>,
    %c5_i32_628 = arith.constant 5 : i32
    %c8_i32_629 = arith.constant 8 : i32
    %1090 = arith.muli %c5_i32_628, %c8_i32_629 : i32
    %1091 = tpu.assume_multiple %1090, 8 : i32
    %c0_630 = arith.constant 0 : index
    %c0_631 = arith.constant 0 : index
    %1092 = vector.load %arg24[%c0_630, %c0_631] : memref<8x32xf32, #tpu.memory_space<vmem>>, vector<8x32xf32>
    %1093 = arith.index_cast %1091 : i32 to index
    %c0_632 = arith.constant 0 : index
    %1094 = vector.load %arg19[%1093, %c0_632] : memref<64x32xf32, #tpu.memory_space<vmem>>, vector<8x32xf32>
    %cst_633 = arith.constant dense<0.000000e+00> : vector<8x32xf32>
    %1095 = tpu.matmul %1092, %854, %cst_633 {dimension_numbers = #tpu.dot_dimension_numbers<[1], [0], [0], [1], [0, 0, 1, 1], [], []>} : vector<8x32xf32>, vector<32x32xf32>, vector<8x32xf32> -> vector<8x32xf32>
    %1096 = arith.addf %1094, %1095 : vector<8x32xf32>
    %1097 = arith.index_cast %1091 : i32 to index
    %c0_634 = arith.constant 0 : index
    %1098 = vector.load %arg20[%1097, %c0_634] : memref<64x32xf32, #tpu.memory_space<vmem>>, vector<8x32xf32>
    %cst_635 = arith.constant dense<0.000000e+00> : vector<8x32xf32>
    %1099 = tpu.matmul %1092, %856, %cst_635 {dimension_numbers = #tpu.dot_dimension_numbers<[1], [0], [0], [1], [0, 0, 1, 1], [], []>} : vector<8x32xf32>, vector<32x32xf32>, vector<8x32xf32> -> vector<8x32xf32>
    %1100 = arith.addf %1098, %1099 : vector<8x32xf32>
    %1101 = arith.index_cast %1091 : i32 to index
    %c0_636 = arith.constant 0 : index
    %1102 = vector.load %arg21[%1101, %c0_636] : memref<64x32xf32, #tpu.memory_space<vmem>>, vector<8x32xf32>
    %cst_637 = arith.constant dense<0.000000e+00> : vector<8x32xf32>
    %1103 = tpu.matmul %1092, %858, %cst_637 {dimension_numbers = #tpu.dot_dimension_numbers<[1], [0], [0], [1], [0, 0, 1, 1], [], []>} : vector<8x32xf32>, vector<32x32xf32>, vector<8x32xf32> -> vector<8x32xf32>
    %1104 = arith.addf %1102, %1103 : vector<8x32xf32>
    %1105 = arith.index_cast %1091 : i32 to index
    %c0_638 = arith.constant 0 : index
    %1106 = vector.load %arg22[%1105, %c0_638] : memref<64x32xf32, #tpu.memory_space<vmem>>, vector<8x32xf32>
    %cst_639 = arith.constant dense<0.000000e+00> : vector<8x32xf32>
    %1107 = tpu.matmul %1092, %860, %cst_639 {dimension_numbers = #tpu.dot_dimension_numbers<[1], [0], [0], [1], [0, 0, 1, 1], [], []>} : vector<8x32xf32>, vector<32x32xf32>, vector<8x32xf32> -> vector<8x32xf32>
    %1108 = arith.addf %1106, %1107 : vector<8x32xf32>
    %1109 = arith.negf %1096 : vector<8x32xf32>
    %1110 = math.exp %1109 : vector<8x32xf32>
    %cst_640 = arith.constant 1.000000e+00 : f32
    %1111 = vector.broadcast %cst_640 : f32 to vector<8x32xf32>
    %1112 = arith.addf %1111, %1110 : vector<8x32xf32>
    %1113 = arith.divf %1111, %1112 : vector<8x32xf32>
    %1114 = arith.negf %1100 : vector<8x32xf32>
    %1115 = math.exp %1114 : vector<8x32xf32>
    %cst_641 = arith.constant 1.000000e+00 : f32
    %1116 = vector.broadcast %cst_641 : f32 to vector<8x32xf32>
    %1117 = arith.addf %1116, %1115 : vector<8x32xf32>
    %1118 = arith.divf %1116, %1117 : vector<8x32xf32>
    %1119 = math.tanh %1104 : vector<8x32xf32>
    %1120 = arith.negf %1108 : vector<8x32xf32>
    %1121 = math.exp %1120 : vector<8x32xf32>
    %cst_642 = arith.constant 1.000000e+00 : f32
    %1122 = vector.broadcast %cst_642 : f32 to vector<8x32xf32>
    %1123 = arith.addf %1122, %1121 : vector<8x32xf32>
    %1124 = arith.divf %1122, %1123 : vector<8x32xf32>
    %c0_643 = arith.constant 0 : index
    %c0_644 = arith.constant 0 : index
    %1125 = vector.load %arg25[%c0_643, %c0_644] : memref<8x32xf32, #tpu.memory_space<vmem>>, vector<8x32xf32>
    %1126 = arith.mulf %1118, %1125 : vector<8x32xf32>
    %1127 = arith.mulf %1113, %1119 : vector<8x32xf32>
    %1128 = arith.addf %1126, %1127 : vector<8x32xf32>
    %1129 = math.tanh %1128 : vector<8x32xf32>
    %1130 = arith.mulf %1124, %1129 : vector<8x32xf32>
    %c0_645 = arith.constant 0 : index
    %c0_646 = arith.constant 0 : index
    %1131 = vector.load %arg25[%c0_645, %c0_646] : memref<8x32xf32, #tpu.memory_space<vmem>>, vector<8x32xf32>
    tpu.vector_store %arg25[%c0_645, %c0_646], %1128 {strides = array<i32>} : memref<8x32xf32, #tpu.memory_space<vmem>>, vector<8x32xf32>,
    %c0_647 = arith.constant 0 : index
    %c0_648 = arith.constant 0 : index
    %1132 = vector.load %arg24[%c0_647, %c0_648] : memref<8x32xf32, #tpu.memory_space<vmem>>, vector<8x32xf32>
    tpu.vector_store %arg24[%c0_647, %c0_648], %1130 {strides = array<i32>} : memref<8x32xf32, #tpu.memory_space<vmem>>, vector<8x32xf32>,
    %1133 = arith.index_cast %1091 : i32 to index
    %c0_649 = arith.constant 0 : index
    %1134 = vector.load %arg23[%1133, %c0_649] : memref<64x32xf32, #tpu.memory_space<vmem>>, vector<8x32xf32>
    tpu.vector_store %arg23[%1133, %c0_649], %1130 {strides = array<i32>} : memref<64x32xf32, #tpu.memory_space<vmem>>, vector<8x32xf32>,
    %c6_i32_650 = arith.constant 6 : i32
    %c8_i32_651 = arith.constant 8 : i32
    %1135 = arith.muli %c6_i32_650, %c8_i32_651 : i32
    %1136 = tpu.assume_multiple %1135, 8 : i32
    %c0_652 = arith.constant 0 : index
    %c0_653 = arith.constant 0 : index
    %1137 = vector.load %arg24[%c0_652, %c0_653] : memref<8x32xf32, #tpu.memory_space<vmem>>, vector<8x32xf32>
    %1138 = arith.index_cast %1136 : i32 to index
    %c0_654 = arith.constant 0 : index
    %1139 = vector.load %arg19[%1138, %c0_654] : memref<64x32xf32, #tpu.memory_space<vmem>>, vector<8x32xf32>
    %cst_655 = arith.constant dense<0.000000e+00> : vector<8x32xf32>
    %1140 = tpu.matmul %1137, %854, %cst_655 {dimension_numbers = #tpu.dot_dimension_numbers<[1], [0], [0], [1], [0, 0, 1, 1], [], []>} : vector<8x32xf32>, vector<32x32xf32>, vector<8x32xf32> -> vector<8x32xf32>
    %1141 = arith.addf %1139, %1140 : vector<8x32xf32>
    %1142 = arith.index_cast %1136 : i32 to index
    %c0_656 = arith.constant 0 : index
    %1143 = vector.load %arg20[%1142, %c0_656] : memref<64x32xf32, #tpu.memory_space<vmem>>, vector<8x32xf32>
    %cst_657 = arith.constant dense<0.000000e+00> : vector<8x32xf32>
    %1144 = tpu.matmul %1137, %856, %cst_657 {dimension_numbers = #tpu.dot_dimension_numbers<[1], [0], [0], [1], [0, 0, 1, 1], [], []>} : vector<8x32xf32>, vector<32x32xf32>, vector<8x32xf32> -> vector<8x32xf32>
    %1145 = arith.addf %1143, %1144 : vector<8x32xf32>
    %1146 = arith.index_cast %1136 : i32 to index
    %c0_658 = arith.constant 0 : index
    %1147 = vector.load %arg21[%1146, %c0_658] : memref<64x32xf32, #tpu.memory_space<vmem>>, vector<8x32xf32>
    %cst_659 = arith.constant dense<0.000000e+00> : vector<8x32xf32>
    %1148 = tpu.matmul %1137, %858, %cst_659 {dimension_numbers = #tpu.dot_dimension_numbers<[1], [0], [0], [1], [0, 0, 1, 1], [], []>} : vector<8x32xf32>, vector<32x32xf32>, vector<8x32xf32> -> vector<8x32xf32>
    %1149 = arith.addf %1147, %1148 : vector<8x32xf32>
    %1150 = arith.index_cast %1136 : i32 to index
    %c0_660 = arith.constant 0 : index
    %1151 = vector.load %arg22[%1150, %c0_660] : memref<64x32xf32, #tpu.memory_space<vmem>>, vector<8x32xf32>
    %cst_661 = arith.constant dense<0.000000e+00> : vector<8x32xf32>
    %1152 = tpu.matmul %1137, %860, %cst_661 {dimension_numbers = #tpu.dot_dimension_numbers<[1], [0], [0], [1], [0, 0, 1, 1], [], []>} : vector<8x32xf32>, vector<32x32xf32>, vector<8x32xf32> -> vector<8x32xf32>
    %1153 = arith.addf %1151, %1152 : vector<8x32xf32>
    %1154 = arith.negf %1141 : vector<8x32xf32>
    %1155 = math.exp %1154 : vector<8x32xf32>
    %cst_662 = arith.constant 1.000000e+00 : f32
    %1156 = vector.broadcast %cst_662 : f32 to vector<8x32xf32>
    %1157 = arith.addf %1156, %1155 : vector<8x32xf32>
    %1158 = arith.divf %1156, %1157 : vector<8x32xf32>
    %1159 = arith.negf %1145 : vector<8x32xf32>
    %1160 = math.exp %1159 : vector<8x32xf32>
    %cst_663 = arith.constant 1.000000e+00 : f32
    %1161 = vector.broadcast %cst_663 : f32 to vector<8x32xf32>
    %1162 = arith.addf %1161, %1160 : vector<8x32xf32>
    %1163 = arith.divf %1161, %1162 : vector<8x32xf32>
    %1164 = math.tanh %1149 : vector<8x32xf32>
    %1165 = arith.negf %1153 : vector<8x32xf32>
    %1166 = math.exp %1165 : vector<8x32xf32>
    %cst_664 = arith.constant 1.000000e+00 : f32
    %1167 = vector.broadcast %cst_664 : f32 to vector<8x32xf32>
    %1168 = arith.addf %1167, %1166 : vector<8x32xf32>
    %1169 = arith.divf %1167, %1168 : vector<8x32xf32>
    %c0_665 = arith.constant 0 : index
    %c0_666 = arith.constant 0 : index
    %1170 = vector.load %arg25[%c0_665, %c0_666] : memref<8x32xf32, #tpu.memory_space<vmem>>, vector<8x32xf32>
    %1171 = arith.mulf %1163, %1170 : vector<8x32xf32>
    %1172 = arith.mulf %1158, %1164 : vector<8x32xf32>
    %1173 = arith.addf %1171, %1172 : vector<8x32xf32>
    %1174 = math.tanh %1173 : vector<8x32xf32>
    %1175 = arith.mulf %1169, %1174 : vector<8x32xf32>
    %c0_667 = arith.constant 0 : index
    %c0_668 = arith.constant 0 : index
    %1176 = vector.load %arg25[%c0_667, %c0_668] : memref<8x32xf32, #tpu.memory_space<vmem>>, vector<8x32xf32>
    tpu.vector_store %arg25[%c0_667, %c0_668], %1173 {strides = array<i32>} : memref<8x32xf32, #tpu.memory_space<vmem>>, vector<8x32xf32>,
    %c0_669 = arith.constant 0 : index
    %c0_670 = arith.constant 0 : index
    %1177 = vector.load %arg24[%c0_669, %c0_670] : memref<8x32xf32, #tpu.memory_space<vmem>>, vector<8x32xf32>
    tpu.vector_store %arg24[%c0_669, %c0_670], %1175 {strides = array<i32>} : memref<8x32xf32, #tpu.memory_space<vmem>>, vector<8x32xf32>,
    %1178 = arith.index_cast %1136 : i32 to index
    %c0_671 = arith.constant 0 : index
    %1179 = vector.load %arg23[%1178, %c0_671] : memref<64x32xf32, #tpu.memory_space<vmem>>, vector<8x32xf32>
    tpu.vector_store %arg23[%1178, %c0_671], %1175 {strides = array<i32>} : memref<64x32xf32, #tpu.memory_space<vmem>>, vector<8x32xf32>,
    %c7_i32_672 = arith.constant 7 : i32
    %c8_i32_673 = arith.constant 8 : i32
    %1180 = arith.muli %c7_i32_672, %c8_i32_673 : i32
    %1181 = tpu.assume_multiple %1180, 8 : i32
    %c0_674 = arith.constant 0 : index
    %c0_675 = arith.constant 0 : index
    %1182 = vector.load %arg24[%c0_674, %c0_675] : memref<8x32xf32, #tpu.memory_space<vmem>>, vector<8x32xf32>
    %1183 = arith.index_cast %1181 : i32 to index
    %c0_676 = arith.constant 0 : index
    %1184 = vector.load %arg19[%1183, %c0_676] : memref<64x32xf32, #tpu.memory_space<vmem>>, vector<8x32xf32>
    %cst_677 = arith.constant dense<0.000000e+00> : vector<8x32xf32>
    %1185 = tpu.matmul %1182, %854, %cst_677 {dimension_numbers = #tpu.dot_dimension_numbers<[1], [0], [0], [1], [0, 0, 1, 1], [], []>} : vector<8x32xf32>, vector<32x32xf32>, vector<8x32xf32> -> vector<8x32xf32>
    %1186 = arith.addf %1184, %1185 : vector<8x32xf32>
    %1187 = arith.index_cast %1181 : i32 to index
    %c0_678 = arith.constant 0 : index
    %1188 = vector.load %arg20[%1187, %c0_678] : memref<64x32xf32, #tpu.memory_space<vmem>>, vector<8x32xf32>
    %cst_679 = arith.constant dense<0.000000e+00> : vector<8x32xf32>
    %1189 = tpu.matmul %1182, %856, %cst_679 {dimension_numbers = #tpu.dot_dimension_numbers<[1], [0], [0], [1], [0, 0, 1, 1], [], []>} : vector<8x32xf32>, vector<32x32xf32>, vector<8x32xf32> -> vector<8x32xf32>
    %1190 = arith.addf %1188, %1189 : vector<8x32xf32>
    %1191 = arith.index_cast %1181 : i32 to index
    %c0_680 = arith.constant 0 : index
    %1192 = vector.load %arg21[%1191, %c0_680] : memref<64x32xf32, #tpu.memory_space<vmem>>, vector<8x32xf32>
    %cst_681 = arith.constant dense<0.000000e+00> : vector<8x32xf32>
    %1193 = tpu.matmul %1182, %858, %cst_681 {dimension_numbers = #tpu.dot_dimension_numbers<[1], [0], [0], [1], [0, 0, 1, 1], [], []>} : vector<8x32xf32>, vector<32x32xf32>, vector<8x32xf32> -> vector<8x32xf32>
    %1194 = arith.addf %1192, %1193 : vector<8x32xf32>
    %1195 = arith.index_cast %1181 : i32 to index
    %c0_682 = arith.constant 0 : index
    %1196 = vector.load %arg22[%1195, %c0_682] : memref<64x32xf32, #tpu.memory_space<vmem>>, vector<8x32xf32>
    %cst_683 = arith.constant dense<0.000000e+00> : vector<8x32xf32>
    %1197 = tpu.matmul %1182, %860, %cst_683 {dimension_numbers = #tpu.dot_dimension_numbers<[1], [0], [0], [1], [0, 0, 1, 1], [], []>} : vector<8x32xf32>, vector<32x32xf32>, vector<8x32xf32> -> vector<8x32xf32>
    %1198 = arith.addf %1196, %1197 : vector<8x32xf32>
    %1199 = arith.negf %1186 : vector<8x32xf32>
    %1200 = math.exp %1199 : vector<8x32xf32>
    %cst_684 = arith.constant 1.000000e+00 : f32
    %1201 = vector.broadcast %cst_684 : f32 to vector<8x32xf32>
    %1202 = arith.addf %1201, %1200 : vector<8x32xf32>
    %1203 = arith.divf %1201, %1202 : vector<8x32xf32>
    %1204 = arith.negf %1190 : vector<8x32xf32>
    %1205 = math.exp %1204 : vector<8x32xf32>
    %cst_685 = arith.constant 1.000000e+00 : f32
    %1206 = vector.broadcast %cst_685 : f32 to vector<8x32xf32>
    %1207 = arith.addf %1206, %1205 : vector<8x32xf32>
    %1208 = arith.divf %1206, %1207 : vector<8x32xf32>
    %1209 = math.tanh %1194 : vector<8x32xf32>
    %1210 = arith.negf %1198 : vector<8x32xf32>
    %1211 = math.exp %1210 : vector<8x32xf32>
    %cst_686 = arith.constant 1.000000e+00 : f32
    %1212 = vector.broadcast %cst_686 : f32 to vector<8x32xf32>
    %1213 = arith.addf %1212, %1211 : vector<8x32xf32>
    %1214 = arith.divf %1212, %1213 : vector<8x32xf32>
    %c0_687 = arith.constant 0 : index
    %c0_688 = arith.constant 0 : index
    %1215 = vector.load %arg25[%c0_687, %c0_688] : memref<8x32xf32, #tpu.memory_space<vmem>>, vector<8x32xf32>
    %1216 = arith.mulf %1208, %1215 : vector<8x32xf32>
    %1217 = arith.mulf %1203, %1209 : vector<8x32xf32>
    %1218 = arith.addf %1216, %1217 : vector<8x32xf32>
    %1219 = math.tanh %1218 : vector<8x32xf32>
    %1220 = arith.mulf %1214, %1219 : vector<8x32xf32>
    %c0_689 = arith.constant 0 : index
    %c0_690 = arith.constant 0 : index
    %1221 = vector.load %arg25[%c0_689, %c0_690] : memref<8x32xf32, #tpu.memory_space<vmem>>, vector<8x32xf32>
    tpu.vector_store %arg25[%c0_689, %c0_690], %1218 {strides = array<i32>} : memref<8x32xf32, #tpu.memory_space<vmem>>, vector<8x32xf32>,
    %c0_691 = arith.constant 0 : index
    %c0_692 = arith.constant 0 : index
    %1222 = vector.load %arg24[%c0_691, %c0_692] : memref<8x32xf32, #tpu.memory_space<vmem>>, vector<8x32xf32>
    tpu.vector_store %arg24[%c0_691, %c0_692], %1220 {strides = array<i32>} : memref<8x32xf32, #tpu.memory_space<vmem>>, vector<8x32xf32>,
    %1223 = arith.index_cast %1181 : i32 to index
    %c0_693 = arith.constant 0 : index
    %1224 = vector.load %arg23[%1223, %c0_693] : memref<64x32xf32, #tpu.memory_space<vmem>>, vector<8x32xf32>
    tpu.vector_store %arg23[%1223, %c0_693], %1220 {strides = array<i32>} : memref<64x32xf32, #tpu.memory_space<vmem>>, vector<8x32xf32>,
    %c8_i32_694 = arith.constant 8 : i32
    %c0_695 = arith.constant 0 : index
    %c0_696 = arith.constant 0 : index
    %1225 = vector.load %arg23[%c0_695, %c0_696] : memref<64x32xf32, #tpu.memory_space<vmem>>, vector<64x32xf32>
    %c0_697 = arith.constant 0 : index
    %c0_698 = arith.constant 0 : index
    %1226 = vector.load %arg15[%c0_697, %c0_698] : memref<32x16xf32, #tpu.memory_space<vmem>>, vector<32x16xf32>
    %cst_699 = arith.constant dense<0.000000e+00> : vector<64x16xf32>
    %1227 = tpu.matmul %1225, %1226, %cst_699 {dimension_numbers = #tpu.dot_dimension_numbers<[1], [0], [0], [1], [0, 0, 1, 1], [], []>} : vector<64x32xf32>, vector<32x16xf32>, vector<64x16xf32> -> vector<64x16xf32>
    %c0_700 = arith.constant 0 : index
    %c0_701 = arith.constant 0 : index
    %1228 = vector.load %arg16[%c0_700, %c0_701] : memref<1x16xf32, #tpu.memory_space<vmem>>, vector<1x16xf32>
    %1229 = vector.broadcast %1228 : vector<1x16xf32> to vector<64x16xf32>
    %1230 = arith.addf %1227, %1229 : vector<64x16xf32>
    %1231 = vector.extract_strided_slice %1230 {offsets = [56, 0], sizes = [8, 16], strides = [1, 1]} : vector<64x16xf32> to vector<8x16xf32>
    %1232 = tpu.iota {dimensions = array<i32: 0>} : vector<8x16xi32>
    %c6_i32_702 = arith.constant 6 : i32
    %1233 = vector.broadcast %c6_i32_702 : i32 to vector<8x16xi32>
    %1234 = arith.cmpi slt, %1232, %1233 : vector<8x16xi32>
    %1235 = arith.mulf %1231, %1231 : vector<8x16xf32>
    %cst_703 = arith.constant 0.000000e+00 : f32
    %1236 = vector.broadcast %cst_703 : f32 to vector<8x16xf32>
    %1237 = arith.select %1234, %1235, %1236 : vector<8x16xi1>, vector<8x16xf32>
    %1238 = vector.shape_cast %1237 : vector<8x16xf32> to vector<1x8x16xf32>
    %cst_704 = arith.constant dense<0.000000e+00> : vector<1xf32>
    %1239 = vector.multi_reduction <add>, %1238, %cst_704 [1, 2] : vector<1x8x16xf32> to vector<1xf32>
    %1240 = vector.shape_cast %1239 : vector<1xf32> to vector<1x1x1xf32>
    %1241 = vector.extract %1240[0, 0, 0] : f32 from vector<1x1x1xf32>
    %1242 = vector.broadcast %1241 : f32 to vector<1x1xf32>
    %1243 = math.sqrt %1242 : vector<1x1xf32>
    %1244 = vector.broadcast %1243 : vector<1x1xf32> to vector<8x16xf32>
    %1245 = arith.divf %1231, %1244 : vector<8x16xf32>
    %c0_705 = arith.constant 0 : index
    %c0_706 = arith.constant 0 : index
    %1246 = vector.load %arg17[%c0_705, %c0_706] : memref<8x16xf32, #tpu.memory_space<vmem>>, vector<8x16xf32>
    tpu.vector_store %arg17[%c0_705, %c0_706], %1245 {strides = array<i32>} : memref<8x16xf32, #tpu.memory_space<vmem>>, vector<8x16xf32>,
    %1247 = tpu.iota {dimensions = array<i32: 1>} : vector<2x8xi32>
    %1248 = tpu.iota {dimensions = array<i32: 0>} : vector<2x8xi32>
    %c3_i32_707 = arith.constant 3 : i32
    %1249 = vector.broadcast %c3_i32_707 : i32 to vector<2x8xi32>
    %1250 = arith.muli %1248, %1249 : vector<2x8xi32>
    %1251 = arith.cmpi sge, %1247, %1250 : vector<2x8xi32>
    %c1_i32_708 = arith.constant 1 : i32
    %1252 = vector.broadcast %c1_i32_708 : i32 to vector<2x8xi32>
    %1253 = arith.addi %1248, %1252 : vector<2x8xi32>
    %c3_i32_709 = arith.constant 3 : i32
    %1254 = vector.broadcast %c3_i32_709 : i32 to vector<2x8xi32>
    %1255 = arith.muli %1253, %1254 : vector<2x8xi32>
    %1256 = arith.cmpi slt, %1247, %1255 : vector<2x8xi32>
    %1257 = arith.andi %1251, %1256 : vector<2x8xi1>
    %cst_710 = arith.constant 0.333333343 : f32
    %cst_711 = arith.constant 0.000000e+00 : f32
    %1258 = vector.broadcast %cst_710 : f32 to vector<2x8xf32>
    %1259 = vector.broadcast %cst_711 : f32 to vector<2x8xf32>
    %1260 = arith.select %1257, %1258, %1259 : vector<2x8xi1>, vector<2x8xf32>
    %cst_712 = arith.constant dense<0.000000e+00> : vector<2x16xf32>
    %1261 = tpu.matmul %1260, %1245, %cst_712 {dimension_numbers = #tpu.dot_dimension_numbers<[1], [0], [0], [1], [0, 0, 1, 1], [], []>} : vector<2x8xf32>, vector<8x16xf32>, vector<2x16xf32> -> vector<2x16xf32>
    %1262 = arith.mulf %1245, %1245 : vector<8x16xf32>
    %cst_713 = arith.constant dense<0.000000e+00> : vector<8xf32>
    %1263 = vector.multi_reduction <add>, %1262, %cst_713 [1] : vector<8x16xf32> to vector<8xf32>
    %1264 = vector.shape_cast %1263 : vector<8xf32> to vector<8x1xf32>
    %1265 = math.sqrt %1264 : vector<8x1xf32>
    %1266 = arith.mulf %1261, %1261 : vector<2x16xf32>
    %cst_714 = arith.constant dense<0.000000e+00> : vector<2xf32>
    %1267 = vector.multi_reduction <add>, %1266, %cst_714 [1] : vector<2x16xf32> to vector<2xf32>
    %1268 = vector.shape_cast %1267 : vector<2xf32> to vector<2x1xf32>
    %1269 = math.sqrt %1268 : vector<2x1xf32>
    %cst_715 = arith.constant 9.99999993E-9 : f32
    %1270 = vector.broadcast %cst_715 : f32 to vector<8x1xf32>
    %1271 = arith.maximumf %1265, %1270 : vector<8x1xf32>
    %1272 = vector.broadcast %1271 : vector<8x1xf32> to vector<8x16xf32>
    %1273 = arith.divf %1245, %1272 : vector<8x16xf32>
    %cst_716 = arith.constant 9.99999993E-9 : f32
    %1274 = vector.broadcast %cst_716 : f32 to vector<2x1xf32>
    %1275 = arith.maximumf %1269, %1274 : vector<2x1xf32>
    %1276 = vector.broadcast %1275 : vector<2x1xf32> to vector<2x16xf32>
    %1277 = arith.divf %1261, %1276 : vector<2x16xf32>
    %cst_717 = arith.constant dense<0.000000e+00> : vector<8x2xf32>
    %1278 = tpu.matmul %1273, %1277, %cst_717 {dimension_numbers = #tpu.dot_dimension_numbers<[1], [1], [0], [0], [0, 0, 1, 0], [], []>} : vector<8x16xf32>, vector<2x16xf32>, vector<8x2xf32> -> vector<8x2xf32>
    %cst_718 = arith.constant 1.000000e+01 : f32
    %1279 = vector.broadcast %cst_718 : f32 to vector<8x2xf32>
    %1280 = arith.mulf %1279, %1278 : vector<8x2xf32>
    %cst_719 = arith.constant -5.000000e+00 : f32
    %1281 = vector.broadcast %cst_719 : f32 to vector<8x2xf32>
    %1282 = arith.addf %1280, %1281 : vector<8x2xf32>
    %c0_720 = arith.constant 0 : index
    %c0_721 = arith.constant 0 : index
    %1283 = vector.load %arg18[%c0_720, %c0_721] : memref<8x2xf32, #tpu.memory_space<vmem>>, vector<8x2xf32>
    tpu.vector_store %arg18[%c0_720, %c0_721], %1282 {strides = array<i32>} : memref<8x2xf32, #tpu.memory_space<vmem>>, vector<8x2xf32>,
    return
  }
  func.func @transform_0(%arg0: i32) -> (i32, i32) {
    %c0_i32 = arith.constant 0 : i32
    %c0_i32_0 = arith.constant 0 : i32
    %c0_i32_1 = arith.constant 0 : i32
    return %c0_i32, %c0_i32_0 : i32, i32
  }
  func.func @transform_1(%arg0: i32) -> (i32, i32, i32) {
    %c0_i32 = arith.constant 0 : i32
    %c0_i32_0 = arith.constant 0 : i32
    %c0_i32_1 = arith.constant 0 : i32
    %c0_i32_2 = arith.constant 0 : i32
    return %c0_i32, %c0_i32_0, %c0_i32_1 : i32, i32, i32
  }
  func.func @transform_2(%arg0: i32) -> (i32, i32, i32) {
    %c0_i32 = arith.constant 0 : i32
    %c0_i32_0 = arith.constant 0 : i32
    %c0_i32_1 = arith.constant 0 : i32
    %c0_i32_2 = arith.constant 0 : i32
    return %c0_i32, %c0_i32_0, %c0_i32_1 : i32, i32, i32
  }
  func.func @transform_3(%arg0: i32) -> (i32, i32, i32) {
    %c0_i32 = arith.constant 0 : i32
    %c0_i32_0 = arith.constant 0 : i32
    %c0_i32_1 = arith.constant 0 : i32
    %c0_i32_2 = arith.constant 0 : i32
    return %c0_i32, %c0_i32_0, %c0_i32_1 : i32, i32, i32
  }
  func.func @transform_4(%arg0: i32) -> (i32, i32) {
    %c0_i32 = arith.constant 0 : i32
    %c0_i32_0 = arith.constant 0 : i32
    %c0_i32_1 = arith.constant 0 : i32
    return %c0_i32, %c0_i32_0 : i32, i32
  }
  func.func @transform_5(%arg0: i32) -> (i32, i32) {
    %c0_i32 = arith.constant 0 : i32
    %c0_i32_0 = arith.constant 0 : i32
    %c0_i32_1 = arith.constant 0 : i32
    return %c0_i32, %c0_i32_0 : i32, i32
  }
  func.func @transform_6(%arg0: i32) -> (i32, i32, i32) {
    %c0_i32 = arith.constant 0 : i32
    %c0_i32_0 = arith.constant 0 : i32
    %c0_i32_1 = arith.constant 0 : i32
    %c0_i32_2 = arith.constant 0 : i32
    return %c0_i32, %c0_i32_0, %c0_i32_1 : i32, i32, i32
  }
  func.func @transform_7(%arg0: i32) -> (i32, i32, i32) {
    %c0_i32 = arith.constant 0 : i32
    %c0_i32_0 = arith.constant 0 : i32
    %c0_i32_1 = arith.constant 0 : i32
    %c0_i32_2 = arith.constant 0 : i32
    return %c0_i32, %c0_i32_0, %c0_i32_1 : i32, i32, i32
  }
  func.func @transform_8(%arg0: i32) -> (i32, i32, i32) {
    %c0_i32 = arith.constant 0 : i32
    %c0_i32_0 = arith.constant 0 : i32
    %c0_i32_1 = arith.constant 0 : i32
    %c0_i32_2 = arith.constant 0 : i32
    return %c0_i32, %c0_i32_0, %c0_i32_1 : i32, i32, i32
  }
  func.func @transform_9(%arg0: i32) -> (i32, i32) {
    %c0_i32 = arith.constant 0 : i32
    %c0_i32_0 = arith.constant 0 : i32
    %c0_i32_1 = arith.constant 0 : i32
    return %c0_i32, %c0_i32_0 : i32, i32
  }
  func.func @transform_10(%arg0: i32) -> (i32, i32) {
    %c0_i32 = arith.constant 0 : i32
    %c0_i32_0 = arith.constant 0 : i32
    %c0_i32_1 = arith.constant 0 : i32
    return %c0_i32, %c0_i32_0 : i32, i32
  }
  func.func @transform_11(%arg0: i32) -> (i32, i32, i32) {
    %c0_i32 = arith.constant 0 : i32
    %c0_i32_0 = arith.constant 0 : i32
    %c0_i32_1 = arith.constant 0 : i32
    %c0_i32_2 = arith.constant 0 : i32
    return %c0_i32, %c0_i32_0, %c0_i32_1 : i32, i32, i32
  }
  func.func @transform_12(%arg0: i32) -> (i32, i32, i32) {
    %c0_i32 = arith.constant 0 : i32
    %c0_i32_0 = arith.constant 0 : i32
    %c0_i32_1 = arith.constant 0 : i32
    %c0_i32_2 = arith.constant 0 : i32
    return %c0_i32, %c0_i32_0, %c0_i32_1 : i32, i32, i32
  }
  func.func @transform_13(%arg0: i32) -> (i32, i32, i32) {
    %c0_i32 = arith.constant 0 : i32
    %c0_i32_0 = arith.constant 0 : i32
    %c0_i32_1 = arith.constant 0 : i32
    %c0_i32_2 = arith.constant 0 : i32
    return %c0_i32, %c0_i32_0, %c0_i32_1 : i32, i32, i32
  }
  func.func @transform_14(%arg0: i32) -> (i32, i32) {
    %c0_i32 = arith.constant 0 : i32
    %c0_i32_0 = arith.constant 0 : i32
    %c0_i32_1 = arith.constant 0 : i32
    return %c0_i32, %c0_i32_0 : i32, i32
  }
  func.func @transform_15(%arg0: i32) -> (i32, i32) {
    %c0_i32 = arith.constant 0 : i32
    %c0_i32_0 = arith.constant 0 : i32
    %c0_i32_1 = arith.constant 0 : i32
    return %c0_i32, %c0_i32_0 : i32, i32
  }
  func.func @transform_16(%arg0: i32) -> (i32, i32) {
    %c0_i32 = arith.constant 0 : i32
    %c0_i32_0 = arith.constant 0 : i32
    %c0_i32_1 = arith.constant 0 : i32
    return %c0_i32, %c0_i32_0 : i32, i32
  }
  func.func @transform_17(%arg0: i32) -> (i32, i32) {
    %c0_i32 = arith.constant 0 : i32
    %c0_i32_0 = arith.constant 0 : i32
    %c0_i32_1 = arith.constant 0 : i32
    return %c0_i32, %c0_i32_0 : i32, i32
  }
}

</mosaic_0001>

<bundles_post_ra>
// kernel: tpu_custom_call.1
= control target key start
LH: loop header
LB: loop body
LE: loop exit
PB: predicated region body
PF: predicated region fallthrough
CT: control target
= control target key end

     0   :  { %s15372_s0 = inlined_call_operand.vmem [shape: f32[64,24], index: 0, kind: input, shape index: {}]   ;;  %s15373_s1 = inlined_call_operand.hbm [shape: f32[4,24,32], index: 1, kind: input, shape index: {}]   ;;  %s15374_s2 = inlined_call_operand.vmem [shape: f32[4,32,32], index: 2, kind: input, shape index: {}]   ;;  %s15375_s3 = inlined_call_operand.hbm [shape: f32[4,1,32], index: 3, kind: input, shape index: {}]   ;;  %s15376_s4 = inlined_call_operand.vmem [shape: f32[32,16], index: 4, kind: input, shape index: {}]   ;;  %s15377_s5 = inlined_call_operand.vmem [shape: f32[1,16], index: 5, kind: input, shape index: {}]   ;;  %s15378_s6 = inlined_call_operand.hbm [shape: f32[4,16,32], index: 6, kind: input, shape index: {}]   ;;  %s15379_s7 = inlined_call_operand.vmem [shape: f32[4,32,32], index: 7, kind: input, shape index: {}]   ;;  %s15380_s8 = inlined_call_operand.hbm [shape: f32[4,1,32], index: 8, kind: input, shape index: {}]   ;;  %s15381_s9 = inlined_call_operand.vmem [shape: f32[32,16], index: 9, kind: input, shape index: {}]   ;;  %s15382_s10 = inlined_call_operand.hbm [shape: f32[1,16], index: 10, kind: input, shape index: {}]   ;;  %s15383_s11 = inlined_call_operand.hbm [shape: f32[4,16,32], index: 11, kind: input, shape index: {}]   ;;  %s15384_s12 = inlined_call_operand.hbm [shape: f32[4,32,32], index: 12, kind: input, shape index: {}]   ;;  %s15385_s13 = inlined_call_operand.vmem [shape: f32[4,1,32], index: 13, kind: input, shape index: {}]   ;;  %s15386_s14 = inlined_call_operand.vmem [shape: f32[32,16], index: 14, kind: input, shape index: {}]   ;;  %s15387_s15 = inlined_call_operand.vmem [shape: f32[1,16], index: 15, kind: input, shape index: {}]   ;;  %s15388_s16 = inlined_call_operand.hbm [shape: f32[8,16], index: 16, kind: output, shape index: {0}]   ;;  %s15389_s17 = inlined_call_operand.vmem [shape: f32[8,2], index: 17, kind: output, shape index: {1}]  }
   0x1   :  { %15392 = sst [smem:[#allocation27_spill]] %s15372_s0 }
   0x2   :  { %15393 = sst [smem:[#allocation28_spill]] %s15373_s1 }
   0x3   :  { %23 = vsyncpa [#allocation10], 0 }
   0x4   :  { %24 = vsyncpa [#allocation13], 0 }
   0x5   :  { %25 = vsyncpa [#allocation16], 0 }
   0x6   :  { %26 = vsyncpa [#allocation19], 0 }
   0x7   :  { %27 = vsyncpa [#allocation11], 0  ;;  %s13727_s24 = smov [#allocation12]   ;;  %s13541_s28 = scalar_lea.hbm %s15375_s3, 64 }
   0x8   :  { %s49_s25 = sshll.u32 %s13727_s24, 4  ;;  %p13542_p0 = scmp.ne.s32.totalorder %s15375_s3, %s13541_s28  ;;  %s50_s25 = int_to_ptr.vmem [resolvable:$true] %s49_s25 }
   0x9   :  { %p13545_p1 = scmp.lt.u32.totalorder %s13541_s28, %s15375_s3 }
   0xb   :  { %p13547_p2 = pnand %p13545_p1, %p13542_p0 }
   0xd   :  { %13550 = shalt.err (!%p13547_p2)
}
   0xe   :  { %s13551_s19 = scalar_lea.vmem %s50_s25, 64  ;;  %p13556_p4 = scmp.lt.s32.totalorder %s50_s25, %s50_s25 }
   0xf   :  { %p13552_p3 = scmp.ne.s32.totalorder %s50_s25, %s13551_s19  ;;  %p13557_p5 = scmp.lt.s32.totalorder %s13551_s19, %s13551_s19 }
  0x11   :  { %p13558_p6 = por %p13557_p5, %p13556_p4 }
  0x13   :  { %p13559_p7 = pnand %p13558_p6, %p13552_p3 }
  0x15   :  { %13562 = shalt.err (!%p13559_p7)
}
  0x16   :  { %s13728_s1 = smov 16   ;;  %s13729_s20 = smov 1  }
  0x17   :  { %55 = dma.hbm_to_vmem [thread:$0]  %s15375_s3, 64, %s50_s25, [#allocation13], %s13728_s1, %s13728_s1, %s13729_s20  }
  0x18   :  { %s13730_s23 = smov [#allocation15]   ;;  %s13563_s28 = scalar_lea.hbm %s15380_s8, 64 }
  0x19   :  { %s79_s24 = sshll.u32 %s13730_s23, 4  ;;  %p13564_p8 = scmp.ne.s32.totalorder %s15380_s8, %s13563_s28  ;;  %s80_s24 = int_to_ptr.vmem [resolvable:$true] %s79_s24 }
  0x1a   :  { %p13567_p9 = scmp.lt.u32.totalorder %s13563_s28, %s15380_s8 }
  0x1c   :  { %p13569_p10 = pnand %p13567_p9, %p13564_p8 }
  0x1e   :  { %13572 = shalt.err (!%p13569_p10)
}
  0x1f   :  { %s13573_s19 = scalar_lea.vmem %s80_s24, 64  ;;  %p13578_p12 = scmp.lt.s32.totalorder %s80_s24, %s80_s24 }
  0x20   :  { %p13574_p11 = scmp.ne.s32.totalorder %s80_s24, %s13573_s19  ;;  %p13579_p13 = scmp.lt.s32.totalorder %s13573_s19, %s13573_s19 }
  0x22   :  { %p13580_p0 = por %p13579_p13, %p13578_p12 }
  0x24   :  { %p13581_p1 = pnand %p13580_p0, %p13574_p11 }
  0x26   :  { %13584 = shalt.err (!%p13581_p1)
}
  0x27   :  { %85 = dma.hbm_to_vmem [thread:$0]  %s15380_s8, 64, %s80_s24, [#allocation16], %s13728_s1, %s13728_s1, %s13729_s20  }
  0x28   :  { %s13731_s21 = smov [#allocation18]   ;;  %s13732_s23 = smov [#allocation9]  }
  0x29   :  { %s103_s22 = sshll.u32 %s13731_s21, 4  ;;  %s35_s26 = sshll.u32 %s13732_s23, 4  ;;  %s104_s22 = int_to_ptr.vmem [resolvable:$true] %s103_s22  ;;  %s13856_s26 = int_to_ptr.vmem [resolvable:$true] %s35_s26 }
  0x2a   :  { %s13585_s29 = scalar_lea.hbm %s15383_s11, 1024 }
  0x2b   :  { %p13586_p2 = scmp.ne.s32.totalorder %s15383_s11, %s13585_s29  ;;  %p13589_p3 = scmp.lt.u32.totalorder %s13585_s29, %s15383_s11 }
  0x2d   :  { %p13591_p4 = pnand %p13589_p3, %p13586_p2 }
  0x2f   :  { %13594 = shalt.err (!%p13591_p4)
}
  0x30   :  { %s13595_s8 = scalar_lea.vmem %s104_s22, 1024  ;;  %p13600_p6 = scmp.lt.s32.totalorder %s104_s22, %s104_s22 }
  0x31   :  { %p13596_p5 = scmp.ne.s32.totalorder %s104_s22, %s13595_s8  ;;  %p13601_p7 = scmp.lt.s32.totalorder %s13595_s8, %s13595_s8 }
  0x33   :  { %p13602_p8 = por %p13601_p7, %p13600_p6 }
  0x35   :  { %p13603_p9 = pnand %p13602_p8, %p13596_p5 }
  0x37   :  { %13606 = shalt.err (!%p13603_p9)
}
  0x38   :  { %s13733_s1 = smov 128   ;;  %s13734_s20 = smov 8  }
  0x39   :  { %109 = dma.hbm_to_vmem [thread:$0]  %s15383_s11, 1024, %s104_s22, [#allocation19], %s13733_s1, %s13733_s1, %s13734_s20  }
  0x3a   :  { %s15394_s23 = sld [smem:[#allocation28_spill]] }
  0x40   :  { %s13607_s27 = scalar_lea.hbm %s15394_s23, 1536 }
  0x41   :  { %p13608_p10 = scmp.ne.s32.totalorder %s15394_s23, %s13607_s27  ;;  %p13611_p11 = scmp.lt.u32.totalorder %s13607_s27, %s15394_s23 }
  0x43   :  { %p13613_p12 = pnand %p13611_p11, %p13608_p10 }
  0x45   :  { %13616 = shalt.err (!%p13613_p12)
}
  0x46   :  { %s13617_s18 = scalar_lea.vmem %s13856_s26, 1536  ;;  %p13622_p0 = scmp.lt.s32.totalorder %s13856_s26, %s13856_s26 }
  0x47   :  { %p13618_p13 = scmp.ne.s32.totalorder %s13856_s26, %s13617_s18  ;;  %p13623_p1 = scmp.lt.s32.totalorder %s13617_s18, %s13617_s18 }
  0x49   :  { %p13624_p2 = por %p13623_p1, %p13622_p0 }
  0x4b   :  { %p13625_p3 = pnand %p13624_p2, %p13618_p13 }
  0x4d   :  { %13628 = shalt.err (!%p13625_p3)
}
  0x4e   :  { %41 = dma.hbm_to_vmem [thread:$0]  %s15394_s23, 1536, %s13856_s26, [#allocation10], %s13733_s1, %s13733_s1, %s13734_s20  }
  0x4f   :  { %s13735_s19 = smov [#allocation14]   ;;  %s13736_s24 = smov [#allocation17]  }
  0x50   :  { %s65_s8 = sshll.u32 %s13735_s19, 4  ;;  %s94_s3 = sshll.u32 %s13736_s24, 4  ;;  %s66_s8 = int_to_ptr.vmem [resolvable:$true] %s65_s8  ;;  %s95_s3 = int_to_ptr.vmem [resolvable:$true] %s94_s3 }
  0x51   :  { %s13629_s27 = scalar_lea.hbm %s15378_s6, 1024 }
  0x52   :  { %p13630_p4 = scmp.ne.s32.totalorder %s15378_s6, %s13629_s27  ;;  %p13633_p5 = scmp.lt.u32.totalorder %s13629_s27, %s15378_s6 }
  0x54   :  { %p13635_p6 = pnand %p13633_p5, %p13630_p4 }
  0x56   :  { %13638 = shalt.err (!%p13635_p6)
}
  0x57   :  { %s13639_s26 = scalar_lea.vmem %s66_s8, 1024  ;;  %p13644_p8 = scmp.lt.s32.totalorder %s66_s8, %s66_s8 }
  0x58   :  { %p13640_p7 = scmp.ne.s32.totalorder %s66_s8, %s13639_s26  ;;  %p13645_p9 = scmp.lt.s32.totalorder %s13639_s26, %s13639_s26 }
  0x5a   :  { %p13646_p10 = por %p13645_p9, %p13644_p8 }
  0x5c   :  { %p13647_p11 = pnand %p13646_p10, %p13640_p7 }
  0x5e   :  { %13650 = shalt.err (!%p13647_p11)
}
  0x5f   :  { %71 = dma.hbm_to_vmem [thread:$0]  %s15378_s6, 1024, %s66_s8, [#allocation13], %s13733_s1, %s13733_s1, %s13734_s20  }
  0x60   :  { %s13651_s19 = scalar_lea.hbm %s15382_s10, 16 }
  0x61   :  { %p13652_p12 = scmp.ne.s32.totalorder %s15382_s10, %s13651_s19  ;;  %p13655_p13 = scmp.lt.u32.totalorder %s13651_s19, %s15382_s10 }
  0x63   :  { %p13657_p0 = pnand %p13655_p13, %p13652_p12 }
  0x65   :  { %13660 = shalt.err (!%p13657_p0)
}
  0x66   :  { %s13661_s28 = scalar_lea.vmem %s95_s3, 16  ;;  %s13665_s29 = scalar_lea.vmem %s95_s3, 32 }
  0x67   :  { %p13662_p1 = scmp.ne.s32.totalorder %s95_s3, %s13661_s28  ;;  %p13666_p2 = scmp.lt.s32.totalorder %s95_s3, %s95_s3 }
  0x68   :  { %p13667_p3 = scmp.lt.s32.totalorder %s13665_s29, %s13661_s28 }
  0x6a   :  { %p13668_p4 = por %p13667_p3, %p13666_p2 }
  0x6c   :  { %p13669_p5 = pnand %p13668_p4, %p13662_p1 }
  0x6e   :  { %13672 = shalt.err (!%p13669_p5)
}
  0x6f   :  { %97 = dma.hbm_to_vmem [thread:$0]  %s15382_s10, 16, %s95_s3, [#allocation16]  }
  0x70   :  { %s13737_s0 = smov [#allocation20]   ;;  %s13673_s18 = scalar_lea.hbm %s15384_s12, 2048 }
  0x71   :  { %s115_s30 = sshll.u32 %s13737_s0, 4  ;;  %p13674_p6 = scmp.ne.s32.totalorder %s15384_s12, %s13673_s18  ;;  %s116_s30 = int_to_ptr.vmem [resolvable:$true] %s115_s30 }
  0x72   :  { %p13677_p7 = scmp.lt.u32.totalorder %s13673_s18, %s15384_s12 }
  0x74   :  { %p13679_p8 = pnand %p13677_p7, %p13674_p6 }
  0x76   :  { %13682 = shalt.err (!%p13679_p8)
}
  0x77   :  { %s13683_s25 = scalar_lea.vmem %s116_s30, 2048  ;;  %p13688_p10 = scmp.lt.s32.totalorder %s116_s30, %s116_s30 }
  0x78   :  { %p13684_p9 = scmp.ne.s32.totalorder %s116_s30, %s13683_s25  ;;  %p13689_p11 = scmp.lt.s32.totalorder %s13683_s25, %s13683_s25 }
  0x7a   :  { %p13690_p12 = por %p13689_p11, %p13688_p10 }
  0x7c   :  { %p13691_p13 = pnand %p13690_p12, %p13684_p9 }
  0x7e   :  { %13694 = shalt.err (!%p13691_p13)
}
  0x7f   :  { %121 = dma.hbm_to_vmem [thread:$0]  %s15384_s12, 2048, %s116_s30, [#allocation19], %s13733_s1, %s13733_s1, %s13734_s20  }
  0x80   :  { %13717 = dma.done.wait [#allocation10], 1536  }
  0x81   :  { %13718 = vsyncadd [#allocation10], 4294965760 }
  0x82   :  { %13719 = dma.done.wait [#allocation13], 1088  }
  0x83   :  { %13720 = vsyncadd [#allocation13], 4294966208 }
  0x84   :  { %13721 = dma.done.wait [#allocation16], 80  }
  0x85   :  { %13722 = vsyncadd [#allocation16], 4294967216 }
  0x86   :  { %13723 = dma.done.wait [#allocation19], 3072  }
  0x87   :  { %13724 = vsyncadd [#allocation19], 4294964224  ;;  %vm297_vm0 = vcmask 261120   ;;  %v13738_v0 = vmov 0.0   ;;  %vm167_vm1 = vcmask 195584   ;;  %v157_v1 = vld [vmem:[#allocation9] sm:$0xff] }
  0x88   :  { %700 = vst.msk [vmem:[#allocation7] sm:$0xff] %vm297_vm0, %v13738_v0  ;;  %701 = vst.msk [vmem:[#allocation8] sm:$0xff] %vm297_vm0, %v13738_v0  ;;  %v158_v2 = vld [vmem:[#allocation9 + $0x8] sm:$0xff]  ;;  %s15395_s20 = sld [smem:[#allocation27_spill]]  ;;  %v159_v6 = vld [vmem:[#allocation9 + $0x10] sm:$0xff]  ;;  %v13739_v28 = vmov 0.0|0.0  }
  0x89   :  { %v12476_v3 = vpack.c.bf16 %v158_v2, %v157_v1  ;;  %v307_v7 = vld [vmem:[#allocation9 + $0x18] sm:$0xff]  ;;  %v308_v8 = vld [vmem:[#allocation9 + $0x20] sm:$0xff]  ;;  %v432_v9 = vld [vmem:[#allocation9 + $0x30] sm:$0xff]  ;;  %vm13740_vm2 = vmmov 0   ;;  %vm3454_vm3 = vcmask 130048   ;;  %vm9968_vm10 = vcmask 64512  }
  0x8a   :  { %v433_v10 = vld [vmem:[#allocation9 + $0x38] sm:$0xff]  ;;  %v12480_v13 = vpack.c.bf16 %v308_v8, %v307_v7  ;;  %v309_v19 = vld [vmem:[#allocation9 + $0x28] sm:$0xff]  ;;  %v434_v20 = vld [vmem:[#allocation9 + $0x40] sm:$0xff]  ;;  %vm10054_vm11 = vcmask 123904  }
  0x8b   :  { %12477 = vmatprep.subr.bf16.mxu0 %v12476_v3  ;;  %13124 = vmatprep.subr.bf16.mxu1 %v12476_v3  ;;  %v12484_v14 = vpack.c.bf16 %v433_v10, %v432_v9  ;;  %v557_v21 = vld [vmem:[#allocation9 + $0x48] sm:$0xff]  ;;  %v558_v22 = vld [vmem:[#allocation9 + $0x50] sm:$0xff]  ;;  %v682_v25 = vld [vmem:[%s15374_s2 + $0x8] sm:$0xff] }
  0x8c   :  { %12479 = vmatpush3.bf16.msra.mxu0 %v12476_v3  ;;  %13126 = vmatpush3.bf16.msra.mxu1 %v12476_v3  ;;  %v12488_v23 = vpack.c.bf16 %v558_v22, %v557_v21  ;;  %v681_v24 = vld [vmem:[%s15374_s2] sm:$0xff]  ;;  %v559_v26 = vld [vmem:[#allocation9 + $0x58] sm:$0xff]  ;;  %v683_v29 = vld [vmem:[%s15374_s2 + $0x10] sm:$0xff] }
  0x8d   :  { %11154 = vmatprep.subr.mxu0 %v159_v6  ;;  %13125 = vmatprep.subr.mxu1 %v159_v6  ;;  %v14013_v27 = vpack.c.bf16 %v682_v25, %v681_v24  ;;  %v684_v30 = vld [vmem:[%s15374_s2 + $0x18] sm:$0xff]  ;;  %v10209_v32 = vld [vmem:[%s15374_s2 + $0x20] sm:$0xff]  ;;  %v10210_v33 = vld [vmem:[%s15374_s2 + $0x28] sm:$0xff] }
  0x8e   :  { %v13942_v4 = vld [vmem:[%s15395_s20] sm:$0xff]  ;;  %v13956_v11 = vld [vmem:[%s15395_s20 + $0x8] sm:$0xff]  ;;  %v13966_v15 = vld [vmem:[%s15395_s20 + $0x10] sm:$0xff]  ;;  %v14031_v31 = vpack.c.bf16 %v684_v30, %v683_v29  ;;  %v14065_v37 = vpack.c.bf16 %v10210_v33, %v10209_v32 }
  0x8f   :  { %v13947_v5 = vld [vmem:[%s15395_s20 + $0x20] sm:$0xff]  ;;  %11156 = vmatprep.mubr.msk.f32.mxu0 %vm167_vm1, %v13942_v4  ;;  %v13961_v12 = vld [vmem:[%s15395_s20 + $0x28] sm:$0xff]  ;;  %v13971_v16 = vld [vmem:[%s15395_s20 + $0x30] sm:$0xff] }
  0x90   :  { %11162 = vmatprep.mubr.msk.f32.mxu1 %vm167_vm1, %v13947_v5  ;;  %11155 = vmatpush3.msra.mxu0 %v159_v6  ;;  %v13980_v17 = vld [vmem:[%s15395_s20 + $0x18] sm:$0xff]  ;;  %v10213_v34 = vld [vmem:[%s15374_s2 + $0x40] sm:$0xff]  ;;  %v10214_v35 = vld [vmem:[%s15374_s2 + $0x48] sm:$0xff] }
  0x91   :  { %13127 = vmatpush3.msra.mxu1 %v159_v6  ;;  %11157 = vmatmul.mubr.msk.f32.vlgmr.msra.gmra.mrb[0].mxu0 %vm167_vm1, %v13956_v11  ;;  %v13985_v18 = vld [vmem:[%s15395_s20 + $0x38] sm:$0xff]  ;;  %v702_v36 = vld [vmem:[#allocation7] sm:$0xff]  ;;  %v14067_v38 = vpack.c.bf16 %v10214_v35, %v10213_v34  ;;  %v10211_v39 = vld [vmem:[%s15374_s2 + $0x30] sm:$0xff] }
  0x92   :  { %11163 = vmatmul.mubr.msk.f32.vlgmr.msra.gmra.mrb[0].mxu1 %vm167_vm1, %v13961_v12  ;;  %12481 = vmatprep.subr.bf16.mxu1 %v12480_v13  ;;  %v10212_v40 = vld [vmem:[%s15374_s2 + $0x38] sm:$0xff]  ;;  %v10215_v41 = vld [vmem:[%s15374_s2 + $0x50] sm:$0xff]  ;;  %v10217_v45 = vld [vmem:[%s15374_s2 + $0x60] sm:$0xff] }
  0x93   :  { %12485 = vmatprep.subr.bf16.mxu0 %v12484_v14  ;;  %11159 = vmatprep.mubr.msk.f32.mxu0 %vm167_vm1, %v13966_v15  ;;  %v10216_v42 = vld [vmem:[%s15374_s2 + $0x58] sm:$0xff]  ;;  %v14087_v43 = vpack.c.bf16 %v10212_v40, %v10211_v39  ;;  %v10218_v46 = vld [vmem:[%s15374_s2 + $0x68] sm:$0xff]  ;;  %v10219_v48 = vld [vmem:[%s15374_s2 + $0x70] sm:$0xff] }
  0x94   :  { %11165 = vmatprep.mubr.msk.f32.mxu1 %vm167_vm1, %v13971_v16  ;;  %12483 = vmatpush3.bf16.msra.mxu1 %v12480_v13  ;;  %v14090_v44 = vpack.c.bf16 %v10216_v42, %v10215_v41  ;;  %v14123_v47 = vpack.c.bf16 %v10218_v46, %v10217_v45  ;;  %v10220_v49 = vld [vmem:[%s15374_s2 + $0x78] sm:$0xff]  ;;  %v10173_v51 = vld [vmem:[#allocation12] ss:$0 sm:$0xff]  ;;  %v10191_v6 = vld [vmem:[#allocation12 + $0x2] ss:$0 sm:$0xff] }
  0x95   :  { %12487 = vmatpush3.bf16.msra.mxu0 %v12484_v14  ;;  %11172 = vmatprep.subr.mxu1 %v309_v19  ;;  %v14135_v50 = vpack.c.bf16 %v10220_v49, %v10219_v48  ;;  %v10200_v46 = vld [vmem:[#allocation12 + $0x3] ss:$0 sm:$0xff] }
  0x96   :  { %11160 = vmatmul.mubr.msk.f32.gmra.mrb[2].mxu0 %vm167_vm1, %v13980_v17  ;;  %11166 = vmatmul.mubr.msk.f32.gmra.mrb[2].mxu1 %vm167_vm1, %v13985_v18 }
  0x97   :  { %11190 = vmatprep.subr.mxu0 %v434_v20  ;;  %11174 = vmatprep.mubr.msk.f32.mxu1 %vm167_vm1, %v13942_v4 }
  0x98   :  { %11192 = vmatprep.mubr.msk.f32.mxu0 %vm167_vm1, %v13942_v4  ;;  %11173 = vmatpush3.msra.mxu1 %v309_v19 }
  0x99   :  { %11191 = vmatpush3.msra.mxu0 %v434_v20  ;;  %12489 = vmatprep.subr.bf16.mxu1 %v12488_v23 }
  0x9a   :  { %11175 = vmatmul.mubr.msk.f32.vlgmr.msra.gmra.mrb[4].mxu1 %vm167_vm1, %v13956_v11  ;;  %11193 = vmatmul.mubr.msk.f32.vlgmr.msra.gmra.mrb[4].mxu0 %vm167_vm1, %v13956_v11 }
  0x9b   :  { %11177 = vmatprep.mubr.msk.f32.mxu1 %vm167_vm1, %v13966_v15  ;;  %11195 = vmatprep.mubr.msk.f32.mxu0 %vm167_vm1, %v13966_v15 }
  0x9c   :  { %12491 = vmatpush3.bf16.msra.mxu1 %v12488_v23  ;;  %12492 = vmatprep.subr.bf16.mxu0 %v13739_v28 }
  0x9d   :  { %11208 = vmatprep.subr.mxu1 %v559_v26  ;;  %12494 = vmatpush3.bf16.msra.mxu0 %v14013_v27 }
  0x9e   :  { %11178 = vmatmul.mubr.msk.f32.gmra.mrb[6].mxu1 %vm167_vm1, %v13980_v17  ;;  %11196 = vmatmul.mubr.msk.f32.gmra.mrb[6].mxu0 %vm167_vm1, %v13980_v17 }
  0x9f   :  { %11180 = vmatprep.mubr.msk.f32.mxu1 %vm167_vm1, %v13947_v5  ;;  %11198 = vmatprep.mubr.msk.f32.mxu0 %vm167_vm1, %v13947_v5 }
  0xa0   :  { %11209 = vmatpush3.msra.mxu1 %v559_v26  ;;  %12495 = vmatprep.subr.bf16.mxu0 %v13739_v28 }
  0xa1   :  { %12498 = vmatprep.subr.bf16.mxu1 %v13739_v28  ;;  %12497 = vmatpush3.bf16.msra.mxu0 %v14031_v31 }
  0xa2   :  { %11181 = vmatmul.mubr.msk.f32.gmra.mrb[8].mxu1 %vm167_vm1, %v13961_v12  ;;  %11199 = vmatmul.mubr.msk.f32.gmra.mrb[8].mxu0 %vm167_vm1, %v13961_v12 }
  0xa3   :  { %11183 = vmatprep.mubr.msk.f32.mxu1 %vm167_vm1, %v13971_v16  ;;  %11201 = vmatprep.mubr.msk.f32.mxu0 %vm167_vm1, %v13971_v16 }
  0xa4   :  { %12504 = vmatprep.subr.bf16.mxu0 %v13739_v28 }
  0xa6   :  { %11184 = vmatmul.mubr.msk.f32.gmra.mrb[10].mxu1 %vm167_vm1, %v13985_v18  ;;  %11202 = vmatmul.mubr.msk.f32.gmra.mrb[10].mxu0 %vm167_vm1, %v13985_v18 }
  0xa7   :  { %11210 = vmatprep.mubr.msk.f32.mxu1 %vm167_vm1, %v13942_v4  ;;  %11230 = vmatprep.mubr.msk.f32.mxu0 %vm13740_vm2, %v13738_v0  ;;  %v10182_v4 = vld [vmem:[#allocation12 + $0x1] ss:$0 sm:$0xff] }
  0xaa   :  { %11211 = vmatmul.mubr.msk.f32.vlgmr.msra.gmra.mrb[12].mxu1 %vm167_vm1, %v13956_v11  ;;  %11231 = vmatmul.mubr.msk.f32.vlgmr.msra.gmra.mrb[12].mxu0 %vm297_vm0, %v702_v36 }
  0xab   :  { %11213 = vmatprep.mubr.msk.f32.mxu1 %vm167_vm1, %v13966_v15  ;;  %12500 = vmatpush3.bf16.msra.mxu1 %v14065_v37 }
  0xac   :  { %12506 = vmatpush3.bf16.msra.mxu0 %v14067_v38  ;;  %11252 = vmatprep.mubr.msk.f32.mxu0 %vm13740_vm2, %v13738_v0 }
  0xad   :  { %12507 = vmatprep.subr.bf16.mxu0 %v13739_v28  ;;  %12501 = vmatprep.subr.bf16.mxu1 %v13739_v28 }
  0xae   :  { %11214 = vmatmul.mubr.msk.f32.gmra.mrb[14].mxu1 %vm167_vm1, %v13980_v17 }
  0xaf   :  { %11216 = vmatprep.mubr.msk.f32.mxu1 %vm167_vm1, %v13947_v5  ;;  %12503 = vmatpush3.bf16.msra.mxu1 %v14087_v43 }
  0xb0   :  { %12509 = vmatpush3.bf16.msra.mxu0 %v14090_v44  ;;  %12510 = vmatprep.subr.bf16.mxu1 %v13739_v28 }
  0xb1   :  { %12516 = vmatprep.subr.bf16.mxu0 %v13739_v28 }
  0xb2   :  { %11217 = vmatmul.mubr.msk.f32.gmra.mrb[16].mxu1 %vm167_vm1, %v13961_v12 }
  0xb3   :  { %11253 = vmatmul.mubr.msk.f32.vlgmr.msra.gmra.mrb[14].mxu0 %vm297_vm0, %v702_v36  ;;  %11219 = vmatprep.mubr.msk.f32.mxu1 %vm167_vm1, %v13971_v16 }
  0xb4   :  { %12518 = vmatpush3.bf16.msra.mxu0 %v14013_v27  ;;  %11274 = vmatprep.mubr.msk.f32.mxu0 %vm13740_vm2, %v13738_v0 }
  0xb5   :  { %12519 = vmatprep.subr.bf16.mxu0 %v13739_v28 }
  0xb6   :  { %11220 = vmatmul.mubr.msk.f32.gmra.mrb[18].mxu1 %vm167_vm1, %v13985_v18 }
  0xb7   :  { %11241 = vmatprep.mubr.msk.f32.mxu1 %vm13740_vm2, %v13738_v0 }
  0xb8   :  { %12521 = vmatpush3.bf16.msra.mxu0 %v14031_v31 }
  0xb9   :  { %12528 = vmatprep.subr.bf16.mxu0 %v13739_v28 }
  0xba   :  { %11242 = vmatmul.mubr.msk.f32.vlgmr.msra.gmra.mrb[20].mxu1 %vm297_vm0, %v702_v36 }
  0xbb   :  { %12512 = vmatpush3.bf16.msra.mxu1 %v14123_v47  ;;  %11263 = vmatprep.mubr.msk.f32.mxu1 %vm13740_vm2, %v13738_v0 }
  0xbc   :  { %12513 = vmatprep.subr.bf16.mxu1 %v13739_v28 }
  0xbf   :  { %12515 = vmatpush3.bf16.msra.mxu1 %v14135_v50 }
  0xc0   :  { %12522 = vmatprep.subr.bf16.mxu1 %v13739_v28 }
  0xc2   :  { %11264 = vmatmul.mubr.msk.f32.vlgmr.msra.gmra.mrb[22].mxu1 %vm297_vm0, %v702_v36 }
  0xc3   :  { %12524 = vmatpush3.bf16.msra.mxu1 %v14065_v37  ;;  %11285 = vmatprep.mubr.msk.f32.mxu1 %vm13740_vm2, %v13738_v0 }
  0xc4   :  { %12525 = vmatprep.subr.bf16.mxu1 %v13739_v28 }
  0xc7   :  { %12527 = vmatpush3.bf16.msra.mxu1 %v14087_v43 }
  0xc8   :  { %12534 = vmatprep.subr.bf16.mxu1 %v13739_v28 }
 0x164   :  { %v11158_v53 = vpop.f32.mrb[0].mxu0 }
 0x165   :  { %v11164_v52 = vpop.f32.mrb[0].mxu1  ;;  %v264_v56 = vadd.f32 %v11158_v53, %v10173_v51  ;;  %v258_v57 = vpop.f32.mrb[1].mxu0 }
 0x166   :  { %v284_v54 = vadd.f32 %v11164_v52, %v10173_v51  ;;  %v278_v55 = vpop.f32.mrb[1].mxu1  ;;  %v259_v59 = vadd.f32 %v10173_v51, %v258_v57 }
 0x167   :  { %v279_v58 = vadd.f32 %v10173_v51, %v278_v55  ;;  %299 = vst.msk [vmem:[#allocation2 + $0x8] sm:$0xff] %vm297_vm0, %v264_v56 }
 0x168   :  { %303 = vst.msk [vmem:[#allocation2 + $0x28] sm:$0xff] %vm297_vm0, %v284_v54  ;;  %298 = vst.msk [vmem:[#allocation2] sm:$0xff] %vm297_vm0, %v259_v59 }
 0x169   :  { %302 = vst.msk [vmem:[#allocation2 + $0x20] sm:$0xff] %vm297_vm0, %v279_v58  ;;  %v11167_v60 = vpop.f32.mrb[2].mxu1  ;;  %v11161_v61 = vpop.f32.mrb[2].mxu0 }
 0x16a   :  { %v294_v62 = vadd.f32 %v11167_v60, %v10173_v51  ;;  %v288_v63 = vpop.f32.mrb[3].mxu1  ;;  %v274_v1 = vadd.f32 %v11161_v61, %v10173_v51  ;;  %v268_v2 = vpop.f32.mrb[3].mxu0 }
 0x16b   :  { %v289_v3 = vadd.f32 %v10173_v51, %v288_v63  ;;  %v269_v5 = vadd.f32 %v10173_v51, %v268_v2 }
 0x16c   :  { %305 = vst.msk [vmem:[#allocation2 + $0x38] sm:$0xff] %vm297_vm0, %v294_v62  ;;  %301 = vst.msk [vmem:[#allocation2 + $0x18] sm:$0xff] %vm297_vm0, %v274_v1 }
 0x16d   :  { %304 = vst.msk [vmem:[#allocation2 + $0x30] sm:$0xff] %vm297_vm0, %v289_v3  ;;  %v11176_v7 = vpop.f32.mrb[4].mxu1  ;;  %300 = vst.msk [vmem:[#allocation2 + $0x10] sm:$0xff] %vm297_vm0, %v269_v5  ;;  %v11194_v8 = vpop.f32.mrb[4].mxu0 }
 0x16e   :  { %v390_v9 = vadd.f32 %v11176_v7, %v10182_v4  ;;  %v384_v10 = vpop.f32.mrb[5].mxu1  ;;  %v515_v11 = vadd.f32 %v11194_v8, %v10191_v6  ;;  %v509_v12 = vpop.f32.mrb[5].mxu0 }
 0x16f   :  { %v385_v13 = vadd.f32 %v10182_v4, %v384_v10  ;;  %v510_v14 = vadd.f32 %v10191_v6, %v509_v12  ;;  %v703_v48 = vld [vmem:[#allocation2] sm:$0xff] }
 0x170   :  { %424 = vst.msk [vmem:[#allocation3 + $0x8] sm:$0xff] %vm297_vm0, %v390_v9  ;;  %549 = vst.msk [vmem:[#allocation4 + $0x8] sm:$0xff] %vm297_vm0, %v515_v11 }
 0x171   :  { %423 = vst.msk [vmem:[#allocation3] sm:$0xff] %vm297_vm0, %v385_v13  ;;  %v11179_v15 = vpop.f32.mrb[6].mxu1  ;;  %548 = vst.msk [vmem:[#allocation4] sm:$0xff] %vm297_vm0, %v510_v14  ;;  %v11197_v16 = vpop.f32.mrb[6].mxu0 }
 0x172   :  { %v400_v17 = vadd.f32 %v11179_v15, %v10182_v4  ;;  %v394_v18 = vpop.f32.mrb[7].mxu1  ;;  %v525_v19 = vadd.f32 %v11197_v16, %v10191_v6  ;;  %v519_v20 = vpop.f32.mrb[7].mxu0 }
 0x173   :  { %v395_v21 = vadd.f32 %v10182_v4, %v394_v18  ;;  %v520_v22 = vadd.f32 %v10191_v6, %v519_v20 }
 0x174   :  { %426 = vst.msk [vmem:[#allocation3 + $0x18] sm:$0xff] %vm297_vm0, %v400_v17  ;;  %551 = vst.msk [vmem:[#allocation4 + $0x18] sm:$0xff] %vm297_vm0, %v525_v19 }
 0x175   :  { %425 = vst.msk [vmem:[#allocation3 + $0x10] sm:$0xff] %vm297_vm0, %v395_v21  ;;  %v11182_v23 = vpop.f32.mrb[8].mxu1  ;;  %550 = vst.msk [vmem:[#allocation4 + $0x10] sm:$0xff] %vm297_vm0, %v520_v22  ;;  %v11200_v24 = vpop.f32.mrb[8].mxu0 }
 0x176   :  { %v410_v25 = vadd.f32 %v11182_v23, %v10182_v4  ;;  %v404_v26 = vpop.f32.mrb[9].mxu1  ;;  %v535_v29 = vadd.f32 %v11200_v24, %v10191_v6  ;;  %v529_v30 = vpop.f32.mrb[9].mxu0 }
 0x177   :  { %v405_v32 = vadd.f32 %v10182_v4, %v404_v26  ;;  %v530_v33 = vadd.f32 %v10191_v6, %v529_v30 }
 0x178   :  { %428 = vst.msk [vmem:[#allocation3 + $0x28] sm:$0xff] %vm297_vm0, %v410_v25  ;;  %553 = vst.msk [vmem:[#allocation4 + $0x28] sm:$0xff] %vm297_vm0, %v535_v29  ;;  %v778_v13 = vld [vmem:[#allocation3] sm:$0xff] }
 0x179   :  { %427 = vst.msk [vmem:[#allocation3 + $0x20] sm:$0xff] %vm297_vm0, %v405_v32  ;;  %v11185_v34 = vpop.f32.mrb[10].mxu1  ;;  %552 = vst.msk [vmem:[#allocation4 + $0x20] sm:$0xff] %vm297_vm0, %v530_v33  ;;  %v11203_v35 = vpop.f32.mrb[10].mxu0  ;;  %v1013_v32 = vld [vmem:[#allocation8] sm:$0xff] }
 0x17a   :  { %v420_v36 = vadd.f32 %v11185_v34, %v10182_v4  ;;  %v414_v39 = vpop.f32.mrb[11].mxu1  ;;  %v545_v40 = vadd.f32 %v11203_v35, %v10191_v6  ;;  %v539_v41 = vpop.f32.mrb[11].mxu0 }
 0x17b   :  { %v415_v42 = vadd.f32 %v10182_v4, %v414_v39  ;;  %v540_v45 = vadd.f32 %v10191_v6, %v539_v41  ;;  %v850_v4 = vld [vmem:[#allocation4] sm:$0xff] }
 0x17c   :  { %430 = vst.msk [vmem:[#allocation3 + $0x38] sm:$0xff] %vm297_vm0, %v420_v36  ;;  %555 = vst.msk [vmem:[#allocation4 + $0x38] sm:$0xff] %vm297_vm0, %v545_v40 }
 0x17d   :  { %429 = vst.msk [vmem:[#allocation3 + $0x30] sm:$0xff] %vm297_vm0, %v415_v42  ;;  %554 = vst.msk [vmem:[#allocation4 + $0x30] sm:$0xff] %vm297_vm0, %v540_v45  ;;  %v11212_v49 = vpop.f32.mrb[12].mxu1  ;;  %v773_v51 = vpop.f32.mrb[12].mxu0  ;;  %v1024_v45 = vld [vmem:[#allocation2 + $0x8] sm:$0xff] }
 0x17e   :  { %v640_v52 = vadd.f32 %v11212_v49, %v10200_v46  ;;  %v777_v53 = vadd.f32 %v773_v51, %v703_v48  ;;  %v634_v54 = vpop.f32.mrb[13].mxu1  ;;  %v11232_v55 = vpop.f32.mrb[13].mxu0  ;;  %v1100_v48 = vld [vmem:[#allocation3 + $0x8] sm:$0xff] }
 0x17f   :  { %v635_v56 = vadd.f32 %v10200_v46, %v634_v54 }
 0x180   :  { %674 = vst.msk [vmem:[#allocation5 + $0x8] sm:$0xff] %vm297_vm0, %v640_v52  ;;  %v10225_v57 = vmul.f32 -1.442695, %v777_v53 }
 0x181   :  { %673 = vst.msk [vmem:[#allocation5] sm:$0xff] %vm297_vm0, %v635_v56  ;;  %v11215_v58 = vpop.f32.mrb[14].mxu1 }
 0x182   :  { %13145 = vpow2.f32 %v10225_v57  ;;  %v650_v59 = vadd.f32 %v11215_v58, %v10200_v46  ;;  %v644_v60 = vpop.f32.mrb[15].mxu1 }
 0x183   :  { %v645_v61 = vadd.f32 %v10200_v46, %v644_v60 }
 0x184   :  { %676 = vst.msk [vmem:[#allocation5 + $0x18] sm:$0xff] %vm297_vm0, %v650_v59 }
 0x185   :  { %675 = vst.msk [vmem:[#allocation5 + $0x10] sm:$0xff] %vm297_vm0, %v645_v61  ;;  %v11218_v62 = vpop.f32.mrb[16].mxu1 }
 0x186   :  { %v660_v63 = vadd.f32 %v11218_v62, %v10200_v46  ;;  %v654_v1 = vpop.f32.mrb[17].mxu1  ;;  %v917_v2 = vpop.f32.mrb[14].mxu0 }
 0x187   :  { %v655_v3 = vadd.f32 %v10200_v46, %v654_v1  ;;  %v11254_v5 = vpop.f32.mrb[15].mxu0  ;;  %v921_v7 = vadd.f32 %v917_v2, %v850_v4  ;;  %v1246_v58 = vld [vmem:[#allocation5 + $0x8] sm:$0xff] }
 0x188   :  { %678 = vst.msk [vmem:[#allocation5 + $0x28] sm:$0xff] %vm297_vm0, %v660_v63  ;;  %v922_v18 = vld [vmem:[#allocation5] sm:$0xff]  ;;  %v1173_v63 = vld [vmem:[#allocation4 + $0x8] sm:$0xff] }
 0x189   :  { %677 = vst.msk [vmem:[#allocation5 + $0x20] sm:$0xff] %vm297_vm0, %v655_v3  ;;  %v11221_v6 = vpop.f32.mrb[18].mxu1  ;;  %13147 = vtanh.f32 %v921_v7 }
 0x18a   :  { %v670_v8 = vadd.f32 %v11221_v6, %v10200_v46  ;;  %v664_v9 = vpop.f32.mrb[19].mxu1 }
 0x18b   :  { %v665_v10 = vadd.f32 %v10200_v46, %v664_v9 }
 0x18c   :  { %v13146_v11 = vpop.eup %13145  ;;  %680 = vst.msk [vmem:[#allocation5 + $0x38] sm:$0xff] %vm297_vm0, %v670_v8 }
 0x18d   :  { %v997_v12 = vadd.f32 1.0, %v13146_v11  ;;  %679 = vst.msk [vmem:[#allocation5 + $0x30] sm:$0xff] %vm297_vm0, %v665_v10  ;;  %v845_v14 = vpop.f32.mrb[20].mxu1 }
 0x18e   :  { %v849_v15 = vadd.f32 %v845_v14, %v778_v13  ;;  %v11243_v16 = vpop.f32.mrb[21].mxu1 }
 0x18f   :  { %13149 = vrcp.f32 %v997_v12 }
 0x190   :  { %v10226_v17 = vmul.f32 -1.442695, %v849_v15 }
 0x192   :  { %13151 = vpow2.f32 %v10226_v17 }
 0x193   :  { %v13148_v22 = vpop.eup %13147 }
 0x195   :  { %v989_v19 = vpop.f32.mrb[22].mxu1 }
 0x196   :  { %v993_v20 = vadd.f32 %v989_v19, %v922_v18  ;;  %v11265_v21 = vpop.f32.mrb[23].mxu1 }
 0x198   :  { %v10227_v23 = vmul.f32 -1.442695, %v993_v20  ;;  %v1349_v20 = vld [vmem:[#allocation2 + $0x10] sm:$0xff] }
 0x199   :  { %v13150_v24 = vpop.eup %13149 }
 0x19a   :  { %v1015_v25 = vmul.f32 %v13150_v24, %v13148_v22  ;;  %13153 = vpow2.f32 %v10227_v23  ;;  %v1425_v22 = vld [vmem:[#allocation3 + $0x10] sm:$0xff] }
 0x19c   :  { %v13152_v26 = vpop.eup %13151 }
 0x19d   :  { %v1003_v29 = vadd.f32 1.0, %v13152_v26 }
 0x19f   :  { %13155 = vrcp.f32 %v1003_v29 }
 0x1a4   :  { %v13154_v30 = vpop.eup %13153 }
 0x1a5   :  { %v1010_v34 = vadd.f32 1.0, %v13154_v30 }
 0x1a7   :  { %13157 = vrcp.f32 %v1010_v34  ;;  %v1571_v34 = vld [vmem:[#allocation5 + $0x10] sm:$0xff] }
 0x1a9   :  { %v13156_v33 = vpop.eup %13155 }
 0x1aa   :  { %v1014_v35 = vmul.f32 %v13156_v33, %v1013_v32 }
 0x1ac   :  { %v1016_v36 = vadd.f32 %v1015_v25, %v1014_v35 }
 0x1ae   :  { %13159 = vtanh.f32 %v1016_v36  ;;  %1019 = vst.msk [vmem:[#allocation8] sm:$0xff] %vm297_vm0, %v1016_v36 }
 0x1b1   :  { %v13158_v39 = vpop.eup %13157 }
 0x1b5   :  { %v1337_v11 = vld [vmem:[#allocation8] sm:$0xff] }
 0x1b8   :  { %v13160_v40 = vpop.eup %13159 }
 0x1b9   :  { %v1018_v41 = vmul.f32 %v13160_v40, %v13158_v39 }
 0x1bb   :  { %1020 = vst.msk [vmem:[#allocation7] sm:$0xff] %vm297_vm0, %v1018_v41  ;;  %1021 = vst.msk [vmem:[#allocation6] sm:$0xff] %vm297_vm0, %v1018_v41  ;;  %v1498_v41 = vld [vmem:[#allocation4 + $0x10] sm:$0xff] }
 0x1c2   :  { %v1022_v42 = vld [vmem:[#allocation7] sm:$0xff] }
 0x1c3   :  { %11275 = vmatmul.mubr.msk.f32.vlgmr.msra.gmra.mrb[16].mxu0 %vm297_vm0, %v1022_v42  ;;  %11286 = vmatmul.mubr.msk.f32.vlgmr.msra.gmra.mrb[24].mxu1 %vm297_vm0, %v1022_v42 }
 0x1c4   :  { %12530 = vmatpush3.bf16.msra.mxu0 %v14067_v38  ;;  %12536 = vmatpush3.bf16.msra.mxu1 %v14123_v47 }
 0x1c5   :  { %12531 = vmatprep.subr.bf16.mxu0 %v13739_v28  ;;  %12537 = vmatprep.subr.bf16.mxu1 %v13739_v28 }
 0x1c6   :  { %11296 = vmatprep.mubr.msk.f32.mxu0 %vm13740_vm2, %v13738_v0  ;;  %11307 = vmatprep.mubr.msk.f32.mxu1 %vm13740_vm2, %v13738_v0 }
 0x1c8   :  { %12533 = vmatpush3.bf16.msra.mxu0 %v14090_v44  ;;  %12539 = vmatpush3.bf16.msra.mxu1 %v14135_v50 }
 0x1c9   :  { %12540 = vmatprep.subr.bf16.mxu0 %v13739_v28  ;;  %12546 = vmatprep.subr.bf16.mxu1 %v13739_v28 }
 0x1cb   :  { %11297 = vmatmul.mubr.msk.f32.vlgmr.msra.gmra.mrb[18].mxu0 %vm297_vm0, %v1022_v42  ;;  %11308 = vmatmul.mubr.msk.f32.vlgmr.msra.gmra.mrb[26].mxu1 %vm297_vm0, %v1022_v42 }
 0x1cc   :  { %12542 = vmatpush3.bf16.msra.mxu0 %v14013_v27  ;;  %12548 = vmatpush3.bf16.msra.mxu1 %v14065_v37 }
 0x1cd   :  { %12543 = vmatprep.subr.bf16.mxu0 %v13739_v28  ;;  %12549 = vmatprep.subr.bf16.mxu1 %v13739_v28 }
 0x1ce   :  { %11318 = vmatprep.mubr.msk.f32.mxu0 %vm13740_vm2, %v13738_v0  ;;  %11329 = vmatprep.mubr.msk.f32.mxu1 %vm13740_vm2, %v13738_v0 }
 0x1d0   :  { %12545 = vmatpush3.bf16.msra.mxu0 %v14031_v31  ;;  %12551 = vmatpush3.bf16.msra.mxu1 %v14087_v43 }
 0x1d1   :  { %12552 = vmatprep.subr.bf16.mxu0 %v13739_v28  ;;  %12558 = vmatprep.subr.bf16.mxu1 %v13739_v28 }
 0x296   :  { %v1094_v46 = vpop.f32.mrb[16].mxu0  ;;  %v1167_v49 = vpop.f32.mrb[24].mxu1 }
 0x297   :  { %v1098_v51 = vadd.f32 %v1094_v46, %v1024_v45  ;;  %v1171_v52 = vadd.f32 %v1167_v49, %v1100_v48  ;;  %v11276_v53 = vpop.f32.mrb[17].mxu0  ;;  %v11287_v54 = vpop.f32.mrb[25].mxu1 }
 0x299   :  { %v10232_v55 = vmul.f32 -1.442695, %v1098_v51  ;;  %v10233_v56 = vmul.f32 -1.442695, %v1171_v52 }
 0x29b   :  { %13161 = vpow2.f32 %v10232_v55 }
 0x29c   :  { %13163 = vpow2.f32 %v10233_v56 }
 0x29e   :  { %v1240_v57 = vpop.f32.mrb[18].mxu0  ;;  %v1313_v59 = vpop.f32.mrb[26].mxu1 }
 0x29f   :  { %v1317_v60 = vadd.f32 %v1313_v59, %v1246_v58  ;;  %v11298_v61 = vpop.f32.mrb[19].mxu0  ;;  %v11309_v62 = vpop.f32.mrb[27].mxu1  ;;  %v1244_v2 = vadd.f32 %v1240_v57, %v1173_v63 }
 0x2a1   :  { %v10234_v1 = vmul.f32 -1.442695, %v1317_v60 }
 0x2a3   :  { %13165 = vpow2.f32 %v10234_v1 }
 0x2a4   :  { %13167 = vtanh.f32 %v1244_v2  ;;  %v1674_v2 = vld [vmem:[#allocation2 + $0x18] sm:$0xff] }
 0x2a5   :  { %v13162_v3 = vpop.eup %13161 }
 0x2a6   :  { %v13164_v4 = vpop.eup %13163  ;;  %v1321_v5 = vadd.f32 1.0, %v13162_v3 }
 0x2a7   :  { %v1327_v6 = vadd.f32 1.0, %v13164_v4  ;;  %v1750_v4 = vld [vmem:[#allocation3 + $0x18] sm:$0xff] }
 0x2a8   :  { %13169 = vrcp.f32 %v1321_v5 }
 0x2a9   :  { %13171 = vrcp.f32 %v1327_v6 }
 0x2ad   :  { %v13166_v7 = vpop.eup %13165 }
 0x2ae   :  { %v13168_v8 = vpop.eup %13167  ;;  %v1334_v13 = vadd.f32 1.0, %v13166_v7 }
 0x2b0   :  { %13173 = vrcp.f32 %v1334_v13  ;;  %v1896_v13 = vld [vmem:[#allocation5 + $0x18] sm:$0xff] }
 0x2b2   :  { %v13170_v9 = vpop.eup %13169 }
 0x2b3   :  { %v13172_v10 = vpop.eup %13171  ;;  %v1339_v12 = vmul.f32 %v13170_v9, %v13168_v8 }
 0x2b4   :  { %v1338_v14 = vmul.f32 %v13172_v10, %v1337_v11 }
 0x2b6   :  { %v1340_v15 = vadd.f32 %v1339_v12, %v1338_v14 }
 0x2b8   :  { %13175 = vtanh.f32 %v1340_v15  ;;  %1343 = vst.msk [vmem:[#allocation8] sm:$0xff] %vm297_vm0, %v1340_v15 }
 0x2ba   :  { %v13174_v16 = vpop.eup %13173 }
 0x2bf   :  { %v1662_v56 = vld [vmem:[#allocation8] sm:$0xff] }
 0x2c2   :  { %v13176_v17 = vpop.eup %13175 }
 0x2c3   :  { %v1342_v18 = vmul.f32 %v13176_v17, %v13174_v16 }
 0x2c5   :  { %1344 = vst.msk [vmem:[#allocation7] sm:$0xff] %vm297_vm0, %v1342_v18  ;;  %1346 = vst.msk [vmem:[#allocation6 + $0x8] sm:$0xff] %vm297_vm0, %v1342_v18  ;;  %v1823_v18 = vld [vmem:[#allocation4 + $0x18] sm:$0xff] }
 0x2cc   :  { %v1347_v19 = vld [vmem:[#allocation7] sm:$0xff] }
 0x2cd   :  { %11319 = vmatmul.mubr.msk.f32.vlgmr.msra.gmra.mrb[20].mxu0 %vm297_vm0, %v1347_v19  ;;  %11330 = vmatmul.mubr.msk.f32.vlgmr.msra.gmra.mrb[28].mxu1 %vm297_vm0, %v1347_v19 }
 0x2ce   :  { %12554 = vmatpush3.bf16.msra.mxu0 %v14067_v38  ;;  %12560 = vmatpush3.bf16.msra.mxu1 %v14123_v47 }
 0x2cf   :  { %12555 = vmatprep.subr.bf16.mxu0 %v13739_v28  ;;  %12561 = vmatprep.subr.bf16.mxu1 %v13739_v28 }
 0x2d0   :  { %11340 = vmatprep.mubr.msk.f32.mxu0 %vm13740_vm2, %v13738_v0  ;;  %11351 = vmatprep.mubr.msk.f32.mxu1 %vm13740_vm2, %v13738_v0 }
 0x2d2   :  { %12557 = vmatpush3.bf16.msra.mxu0 %v14090_v44  ;;  %12563 = vmatpush3.bf16.msra.mxu1 %v14135_v50 }
 0x2d3   :  { %12564 = vmatprep.subr.bf16.mxu0 %v13739_v28  ;;  %12570 = vmatprep.subr.bf16.mxu1 %v13739_v28 }
 0x2d5   :  { %11341 = vmatmul.mubr.msk.f32.vlgmr.msra.gmra.mrb[22].mxu0 %vm297_vm0, %v1347_v19  ;;  %11352 = vmatmul.mubr.msk.f32.vlgmr.msra.gmra.mrb[30].mxu1 %vm297_vm0, %v1347_v19 }
 0x2d6   :  { %12566 = vmatpush3.bf16.msra.mxu0 %v14013_v27  ;;  %12572 = vmatpush3.bf16.msra.mxu1 %v14065_v37 }
 0x2d7   :  { %12567 = vmatprep.subr.bf16.mxu0 %v13739_v28  ;;  %12573 = vmatprep.subr.bf16.mxu1 %v13739_v28 }
 0x2d8   :  { %11362 = vmatprep.mubr.msk.f32.mxu0 %vm13740_vm2, %v13738_v0  ;;  %11373 = vmatprep.mubr.msk.f32.mxu1 %vm13740_vm2, %v13738_v0 }
 0x2da   :  { %12569 = vmatpush3.bf16.msra.mxu0 %v14031_v31  ;;  %12575 = vmatpush3.bf16.msra.mxu1 %v14087_v43 }
 0x2db   :  { %12576 = vmatprep.subr.bf16.mxu0 %v13739_v28  ;;  %12582 = vmatprep.subr.bf16.mxu1 %v13739_v28 }
 0x3a0   :  { %v1419_v21 = vpop.f32.mrb[20].mxu0  ;;  %v1492_v23 = vpop.f32.mrb[28].mxu1 }
 0x3a1   :  { %v1423_v24 = vadd.f32 %v1419_v21, %v1349_v20  ;;  %v1496_v25 = vadd.f32 %v1492_v23, %v1425_v22  ;;  %v11320_v26 = vpop.f32.mrb[21].mxu0  ;;  %v11331_v29 = vpop.f32.mrb[29].mxu1 }
 0x3a3   :  { %v10239_v30 = vmul.f32 -1.442695, %v1423_v24  ;;  %v10240_v32 = vmul.f32 -1.442695, %v1496_v25 }
 0x3a5   :  { %13177 = vpow2.f32 %v10239_v30 }
 0x3a6   :  { %13179 = vpow2.f32 %v10240_v32 }
 0x3a8   :  { %v1565_v33 = vpop.f32.mrb[22].mxu0  ;;  %v1638_v35 = vpop.f32.mrb[30].mxu1 }
 0x3a9   :  { %v1642_v36 = vadd.f32 %v1638_v35, %v1571_v34  ;;  %v11342_v39 = vpop.f32.mrb[23].mxu0  ;;  %v11353_v40 = vpop.f32.mrb[31].mxu1  ;;  %v1569_v45 = vadd.f32 %v1565_v33, %v1498_v41 }
 0x3ab   :  { %v10241_v42 = vmul.f32 -1.442695, %v1642_v36 }
 0x3ad   :  { %13181 = vpow2.f32 %v10241_v42 }
 0x3ae   :  { %13183 = vtanh.f32 %v1569_v45  ;;  %v1999_v45 = vld [vmem:[#allocation2 + $0x20] sm:$0xff] }
 0x3af   :  { %v13178_v46 = vpop.eup %13177 }
 0x3b0   :  { %v13180_v48 = vpop.eup %13179  ;;  %v1646_v49 = vadd.f32 1.0, %v13178_v46 }
 0x3b1   :  { %v1652_v51 = vadd.f32 1.0, %v13180_v48  ;;  %v2075_v48 = vld [vmem:[#allocation3 + $0x20] sm:$0xff] }
 0x3b2   :  { %13185 = vrcp.f32 %v1646_v49 }
 0x3b3   :  { %13187 = vrcp.f32 %v1652_v51 }
 0x3b7   :  { %v13182_v52 = vpop.eup %13181 }
 0x3b8   :  { %v13184_v53 = vpop.eup %13183  ;;  %v1659_v58 = vadd.f32 1.0, %v13182_v52 }
 0x3ba   :  { %13189 = vrcp.f32 %v1659_v58  ;;  %v2221_v58 = vld [vmem:[#allocation5 + $0x20] sm:$0xff] }
 0x3bc   :  { %v13186_v54 = vpop.eup %13185 }
 0x3bd   :  { %v13188_v55 = vpop.eup %13187  ;;  %v1664_v57 = vmul.f32 %v13186_v54, %v13184_v53 }
 0x3be   :  { %v1663_v59 = vmul.f32 %v13188_v55, %v1662_v56 }
 0x3c0   :  { %v1665_v60 = vadd.f32 %v1664_v57, %v1663_v59 }
 0x3c2   :  { %13191 = vtanh.f32 %v1665_v60  ;;  %1668 = vst.msk [vmem:[#allocation8] sm:$0xff] %vm297_vm0, %v1665_v60 }
 0x3c4   :  { %v13190_v61 = vpop.eup %13189 }
 0x3c9   :  { %v1987_v32 = vld [vmem:[#allocation8] sm:$0xff] }
 0x3cc   :  { %v13192_v62 = vpop.eup %13191 }
 0x3cd   :  { %v1667_v63 = vmul.f32 %v13192_v62, %v13190_v61 }
 0x3cf   :  { %1669 = vst.msk [vmem:[#allocation7] sm:$0xff] %vm297_vm0, %v1667_v63  ;;  %1671 = vst.msk [vmem:[#allocation6 + $0x10] sm:$0xff] %vm297_vm0, %v1667_v63  ;;  %v2148_v63 = vld [vmem:[#allocation4 + $0x20] sm:$0xff] }
 0x3d6   :  { %v1672_v1 = vld [vmem:[#allocation7] sm:$0xff] }
 0x3d7   :  { %11363 = vmatmul.mubr.msk.f32.vlgmr.msra.gmra.mrb[24].mxu0 %vm297_vm0, %v1672_v1  ;;  %11374 = vmatmul.mubr.msk.f32.vlgmr.msra.gmra.mrb[32].mxu1 %vm297_vm0, %v1672_v1 }
 0x3d8   :  { %12578 = vmatpush3.bf16.msra.mxu0 %v14067_v38  ;;  %12584 = vmatpush3.bf16.msra.mxu1 %v14123_v47 }
 0x3d9   :  { %12579 = vmatprep.subr.bf16.mxu0 %v13739_v28  ;;  %12585 = vmatprep.subr.bf16.mxu1 %v13739_v28 }
 0x3da   :  { %11384 = vmatprep.mubr.msk.f32.mxu0 %vm13740_vm2, %v13738_v0  ;;  %11395 = vmatprep.mubr.msk.f32.mxu1 %vm13740_vm2, %v13738_v0 }
 0x3dc   :  { %12581 = vmatpush3.bf16.msra.mxu0 %v14090_v44  ;;  %12587 = vmatpush3.bf16.msra.mxu1 %v14135_v50 }
 0x3dd   :  { %12588 = vmatprep.subr.bf16.mxu0 %v13739_v28  ;;  %12594 = vmatprep.subr.bf16.mxu1 %v13739_v28 }
 0x3df   :  { %11385 = vmatmul.mubr.msk.f32.vlgmr.msra.gmra.mrb[26].mxu0 %vm297_vm0, %v1672_v1  ;;  %11396 = vmatmul.mubr.msk.f32.vlgmr.msra.gmra.mrb[34].mxu1 %vm297_vm0, %v1672_v1 }
 0x3e0   :  { %12590 = vmatpush3.bf16.msra.mxu0 %v14013_v27  ;;  %12596 = vmatpush3.bf16.msra.mxu1 %v14065_v37 }
 0x3e1   :  { %12591 = vmatprep.subr.bf16.mxu0 %v13739_v28  ;;  %12597 = vmatprep.subr.bf16.mxu1 %v13739_v28 }
 0x3e2   :  { %11406 = vmatprep.mubr.msk.f32.mxu0 %vm13740_vm2, %v13738_v0  ;;  %11417 = vmatprep.mubr.msk.f32.mxu1 %vm13740_vm2, %v13738_v0 }
 0x3e4   :  { %12593 = vmatpush3.bf16.msra.mxu0 %v14031_v31  ;;  %12599 = vmatpush3.bf16.msra.mxu1 %v14087_v43 }
 0x3e5   :  { %12600 = vmatprep.subr.bf16.mxu0 %v13739_v28  ;;  %12606 = vmatprep.subr.bf16.mxu1 %v13739_v28 }
 0x4aa   :  { %v1744_v3 = vpop.f32.mrb[24].mxu0  ;;  %v1817_v5 = vpop.f32.mrb[32].mxu1 }
 0x4ab   :  { %v1748_v6 = vadd.f32 %v1744_v3, %v1674_v2  ;;  %v1821_v7 = vadd.f32 %v1817_v5, %v1750_v4  ;;  %v11364_v8 = vpop.f32.mrb[25].mxu0  ;;  %v11375_v9 = vpop.f32.mrb[33].mxu1 }
 0x4ad   :  { %v10246_v10 = vmul.f32 -1.442695, %v1748_v6  ;;  %v10247_v11 = vmul.f32 -1.442695, %v1821_v7 }
 0x4af   :  { %13193 = vpow2.f32 %v10246_v10 }
 0x4b0   :  { %13195 = vpow2.f32 %v10247_v11 }
 0x4b2   :  { %v1890_v12 = vpop.f32.mrb[26].mxu0  ;;  %v1963_v14 = vpop.f32.mrb[34].mxu1 }
 0x4b3   :  { %v1967_v15 = vadd.f32 %v1963_v14, %v1896_v13  ;;  %v11386_v16 = vpop.f32.mrb[27].mxu0  ;;  %v11397_v17 = vpop.f32.mrb[35].mxu1  ;;  %v1894_v20 = vadd.f32 %v1890_v12, %v1823_v18 }
 0x4b5   :  { %v10248_v19 = vmul.f32 -1.442695, %v1967_v15 }
 0x4b7   :  { %13197 = vpow2.f32 %v10248_v19 }
 0x4b8   :  { %13199 = vtanh.f32 %v1894_v20  ;;  %v2324_v20 = vld [vmem:[#allocation2 + $0x28] sm:$0xff] }
 0x4b9   :  { %v13194_v21 = vpop.eup %13193 }
 0x4ba   :  { %v13196_v22 = vpop.eup %13195  ;;  %v1971_v23 = vadd.f32 1.0, %v13194_v21 }
 0x4bb   :  { %v1977_v24 = vadd.f32 1.0, %v13196_v22  ;;  %v2400_v22 = vld [vmem:[#allocation3 + $0x28] sm:$0xff] }
 0x4bc   :  { %13201 = vrcp.f32 %v1971_v23 }
 0x4bd   :  { %13203 = vrcp.f32 %v1977_v24 }
 0x4c1   :  { %v13198_v25 = vpop.eup %13197 }
 0x4c2   :  { %v13200_v26 = vpop.eup %13199  ;;  %v1984_v34 = vadd.f32 1.0, %v13198_v25 }
 0x4c4   :  { %13205 = vrcp.f32 %v1984_v34  ;;  %v2546_v34 = vld [vmem:[#allocation5 + $0x28] sm:$0xff] }
 0x4c6   :  { %v13202_v29 = vpop.eup %13201 }
 0x4c7   :  { %v13204_v30 = vpop.eup %13203  ;;  %v1989_v33 = vmul.f32 %v13202_v29, %v13200_v26 }
 0x4c8   :  { %v1988_v35 = vmul.f32 %v13204_v30, %v1987_v32 }
 0x4ca   :  { %v1990_v36 = vadd.f32 %v1989_v33, %v1988_v35 }
 0x4cc   :  { %13207 = vtanh.f32 %v1990_v36  ;;  %1993 = vst.msk [vmem:[#allocation8] sm:$0xff] %vm297_vm0, %v1990_v36 }
 0x4ce   :  { %v13206_v39 = vpop.eup %13205 }
 0x4d3   :  { %v2312_v11 = vld [vmem:[#allocation8] sm:$0xff] }
 0x4d6   :  { %v13208_v40 = vpop.eup %13207 }
 0x4d7   :  { %v1992_v41 = vmul.f32 %v13208_v40, %v13206_v39 }
 0x4d9   :  { %1994 = vst.msk [vmem:[#allocation7] sm:$0xff] %vm297_vm0, %v1992_v41  ;;  %1996 = vst.msk [vmem:[#allocation6 + $0x18] sm:$0xff] %vm297_vm0, %v1992_v41  ;;  %v2473_v41 = vld [vmem:[#allocation4 + $0x28] sm:$0xff] }
 0x4e0   :  { %v1997_v42 = vld [vmem:[#allocation7] sm:$0xff] }
 0x4e1   :  { %11407 = vmatmul.mubr.msk.f32.vlgmr.msra.gmra.mrb[28].mxu0 %vm297_vm0, %v1997_v42  ;;  %11418 = vmatmul.mubr.msk.f32.vlgmr.msra.gmra.mrb[36].mxu1 %vm297_vm0, %v1997_v42 }
 0x4e2   :  { %12602 = vmatpush3.bf16.msra.mxu0 %v14067_v38  ;;  %12608 = vmatpush3.bf16.msra.mxu1 %v14123_v47 }
 0x4e3   :  { %12603 = vmatprep.subr.bf16.mxu0 %v13739_v28  ;;  %12609 = vmatprep.subr.bf16.mxu1 %v13739_v28 }
 0x4e4   :  { %11428 = vmatprep.mubr.msk.f32.mxu0 %vm13740_vm2, %v13738_v0  ;;  %11439 = vmatprep.mubr.msk.f32.mxu1 %vm13740_vm2, %v13738_v0 }
 0x4e6   :  { %12605 = vmatpush3.bf16.msra.mxu0 %v14090_v44  ;;  %12611 = vmatpush3.bf16.msra.mxu1 %v14135_v50 }
 0x4e7   :  { %12612 = vmatprep.subr.bf16.mxu0 %v13739_v28  ;;  %12618 = vmatprep.subr.bf16.mxu1 %v13739_v28 }
 0x4e9   :  { %11429 = vmatmul.mubr.msk.f32.vlgmr.msra.gmra.mrb[30].mxu0 %vm297_vm0, %v1997_v42  ;;  %11440 = vmatmul.mubr.msk.f32.vlgmr.msra.gmra.mrb[38].mxu1 %vm297_vm0, %v1997_v42 }
 0x4ea   :  { %12614 = vmatpush3.bf16.msra.mxu0 %v14013_v27  ;;  %12620 = vmatpush3.bf16.msra.mxu1 %v14065_v37 }
 0x4eb   :  { %12615 = vmatprep.subr.bf16.mxu0 %v13739_v28  ;;  %12621 = vmatprep.subr.bf16.mxu1 %v13739_v28 }
 0x4ec   :  { %11450 = vmatprep.mubr.msk.f32.mxu0 %vm13740_vm2, %v13738_v0  ;;  %11461 = vmatprep.mubr.msk.f32.mxu1 %vm13740_vm2, %v13738_v0 }
 0x4ee   :  { %12617 = vmatpush3.bf16.msra.mxu0 %v14031_v31  ;;  %12623 = vmatpush3.bf16.msra.mxu1 %v14087_v43 }
 0x4ef   :  { %12624 = vmatprep.subr.bf16.mxu0 %v13739_v28  ;;  %12630 = vmatprep.subr.bf16.mxu1 %v13739_v28 }
 0x5b4   :  { %v2069_v46 = vpop.f32.mrb[28].mxu0  ;;  %v2142_v49 = vpop.f32.mrb[36].mxu1 }
 0x5b5   :  { %v2073_v51 = vadd.f32 %v2069_v46, %v1999_v45  ;;  %v2146_v52 = vadd.f32 %v2142_v49, %v2075_v48  ;;  %v11408_v53 = vpop.f32.mrb[29].mxu0  ;;  %v11419_v54 = vpop.f32.mrb[37].mxu1 }
 0x5b7   :  { %v10253_v55 = vmul.f32 -1.442695, %v2073_v51  ;;  %v10254_v56 = vmul.f32 -1.442695, %v2146_v52 }
 0x5b9   :  { %13209 = vpow2.f32 %v10253_v55 }
 0x5ba   :  { %13211 = vpow2.f32 %v10254_v56 }
 0x5bc   :  { %v2215_v57 = vpop.f32.mrb[30].mxu0  ;;  %v2288_v59 = vpop.f32.mrb[38].mxu1 }
 0x5bd   :  { %v2292_v60 = vadd.f32 %v2288_v59, %v2221_v58  ;;  %v11430_v61 = vpop.f32.mrb[31].mxu0  ;;  %v11441_v62 = vpop.f32.mrb[39].mxu1  ;;  %v2219_v2 = vadd.f32 %v2215_v57, %v2148_v63 }
 0x5bf   :  { %v10255_v1 = vmul.f32 -1.442695, %v2292_v60 }
 0x5c1   :  { %13213 = vpow2.f32 %v10255_v1 }
 0x5c2   :  { %13215 = vtanh.f32 %v2219_v2  ;;  %v2725_v2 = vld [vmem:[#allocation3 + $0x30] sm:$0xff] }
 0x5c3   :  { %v13210_v3 = vpop.eup %13209 }
 0x5c4   :  { %v13212_v4 = vpop.eup %13211  ;;  %v2296_v5 = vadd.f32 1.0, %v13210_v3 }
 0x5c5   :  { %v2302_v6 = vadd.f32 1.0, %v13212_v4 }
 0x5c6   :  { %13217 = vrcp.f32 %v2296_v5 }
 0x5c7   :  { %13219 = vrcp.f32 %v2302_v6 }
 0x5cb   :  { %v13214_v7 = vpop.eup %13213 }
 0x5cc   :  { %v13216_v8 = vpop.eup %13215  ;;  %v2309_v13 = vadd.f32 1.0, %v13214_v7 }
 0x5ce   :  { %13221 = vrcp.f32 %v2309_v13 }
 0x5d0   :  { %v13218_v9 = vpop.eup %13217 }
 0x5d1   :  { %v13220_v10 = vpop.eup %13219  ;;  %v2314_v12 = vmul.f32 %v13218_v9, %v13216_v8 }
 0x5d2   :  { %v2313_v14 = vmul.f32 %v13220_v10, %v2312_v11 }
 0x5d4   :  { %v2315_v15 = vadd.f32 %v2314_v12, %v2313_v14  ;;  %v2798_v14 = vld [vmem:[#allocation4 + $0x30] sm:$0xff] }
 0x5d6   :  { %13223 = vtanh.f32 %v2315_v15  ;;  %2318 = vst.msk [vmem:[#allocation8] sm:$0xff] %vm297_vm0, %v2315_v15 }
 0x5d8   :  { %v13222_v16 = vpop.eup %13221 }
 0x5dd   :  { %v2637_v56 = vld [vmem:[#allocation8] sm:$0xff] }
 0x5e0   :  { %v13224_v17 = vpop.eup %13223 }
 0x5e1   :  { %v2317_v18 = vmul.f32 %v13224_v17, %v13222_v16 }
 0x5e3   :  { %2319 = vst.msk [vmem:[#allocation7] sm:$0xff] %vm297_vm0, %v2317_v18  ;;  %2321 = vst.msk [vmem:[#allocation6 + $0x20] sm:$0xff] %vm297_vm0, %v2317_v18 }
 0x5ea   :  { %v2322_v19 = vld [vmem:[#allocation7] sm:$0xff] }
 0x5eb   :  { %11451 = vmatmul.mubr.msk.f32.vlgmr.msra.gmra.mrb[32].mxu0 %vm297_vm0, %v2322_v19  ;;  %11462 = vmatmul.mubr.msk.f32.vlgmr.msra.gmra.mrb[40].mxu1 %vm297_vm0, %v2322_v19 }
 0x5ec   :  { %12626 = vmatpush3.bf16.msra.mxu0 %v14067_v38  ;;  %12632 = vmatpush3.bf16.msra.mxu1 %v14123_v47 }
 0x5ed   :  { %12627 = vmatprep.subr.bf16.mxu0 %v13739_v28  ;;  %12633 = vmatprep.subr.bf16.mxu1 %v13739_v28 }
 0x5ee   :  { %11472 = vmatprep.mubr.msk.f32.mxu0 %vm13740_vm2, %v13738_v0  ;;  %11483 = vmatprep.mubr.msk.f32.mxu1 %vm13740_vm2, %v13738_v0 }
 0x5f0   :  { %12629 = vmatpush3.bf16.msra.mxu0 %v14090_v44  ;;  %12635 = vmatpush3.bf16.msra.mxu1 %v14135_v50 }
 0x5f1   :  { %12636 = vmatprep.subr.bf16.mxu0 %v13739_v28  ;;  %12642 = vmatprep.subr.bf16.mxu1 %v13739_v28 }
 0x5f3   :  { %11473 = vmatmul.mubr.msk.f32.vlgmr.msra.gmra.mrb[34].mxu0 %vm297_vm0, %v2322_v19  ;;  %11484 = vmatmul.mubr.msk.f32.vlgmr.msra.gmra.mrb[42].mxu1 %vm297_vm0, %v2322_v19 }
 0x5f4   :  { %12638 = vmatpush3.bf16.msra.mxu0 %v14013_v27  ;;  %12644 = vmatpush3.bf16.msra.mxu1 %v14065_v37 }
 0x5f5   :  { %12639 = vmatprep.subr.bf16.mxu0 %v13739_v28  ;;  %12645 = vmatprep.subr.bf16.mxu1 %v13739_v28 }
 0x5f6   :  { %11494 = vmatprep.mubr.msk.f32.mxu0 %vm13740_vm2, %v13738_v0  ;;  %11505 = vmatprep.mubr.msk.f32.mxu1 %vm13740_vm2, %v13738_v0 }
 0x5f8   :  { %12641 = vmatpush3.bf16.msra.mxu0 %v14031_v31  ;;  %12647 = vmatpush3.bf16.msra.mxu1 %v14087_v43 }
 0x5f9   :  { %12648 = vmatprep.subr.bf16.mxu0 %v13739_v28  ;;  %12654 = vmatprep.subr.bf16.mxu1 %v13739_v28 }
 0x6be   :  { %v2394_v21 = vpop.f32.mrb[32].mxu0  ;;  %v2467_v23 = vpop.f32.mrb[40].mxu1 }
 0x6bf   :  { %v2398_v24 = vadd.f32 %v2394_v21, %v2324_v20  ;;  %v2471_v25 = vadd.f32 %v2467_v23, %v2400_v22  ;;  %v11452_v26 = vpop.f32.mrb[33].mxu0  ;;  %v11463_v29 = vpop.f32.mrb[41].mxu1 }
 0x6c1   :  { %v10260_v30 = vmul.f32 -1.442695, %v2398_v24  ;;  %v10261_v32 = vmul.f32 -1.442695, %v2471_v25 }
 0x6c3   :  { %13225 = vpow2.f32 %v10260_v30 }
 0x6c4   :  { %13227 = vpow2.f32 %v10261_v32 }
 0x6c6   :  { %v2540_v33 = vpop.f32.mrb[34].mxu0  ;;  %v2613_v35 = vpop.f32.mrb[42].mxu1 }
 0x6c7   :  { %v2617_v36 = vadd.f32 %v2613_v35, %v2546_v34  ;;  %v11474_v39 = vpop.f32.mrb[35].mxu0  ;;  %v11485_v40 = vpop.f32.mrb[43].mxu1  ;;  %v2544_v45 = vadd.f32 %v2540_v33, %v2473_v41 }
 0x6c8   :  { %v3305_v39 = vld [vmem:[%s15376_s4] sm:$0xff]  ;;  %v3306_v40 = vld [vmem:[%s15376_s4 + $0x8] sm:$0xff] }
 0x6c9   :  { %v10262_v42 = vmul.f32 -1.442695, %v2617_v36  ;;  %v12684_v41 = vpack.c.bf16 %v3306_v40, %v3305_v39 }
 0x6cb   :  { %13229 = vpow2.f32 %v10262_v42  ;;  %v3307_v42 = vld [vmem:[%s15376_s4 + $0x10] sm:$0xff] }
 0x6cc   :  { %13231 = vtanh.f32 %v2544_v45  ;;  %v3297_v45 = vld [vmem:[#allocation6] sm:$0xff] }
 0x6cd   :  { %v13226_v46 = vpop.eup %13225 }
 0x6ce   :  { %v13228_v48 = vpop.eup %13227  ;;  %v2621_v49 = vadd.f32 1.0, %v13226_v46  ;;  %v3298_v46 = vld [vmem:[#allocation6 + $0x8] sm:$0xff] }
 0x6cf   :  { %v2627_v51 = vadd.f32 1.0, %v13228_v48  ;;  %v3299_v48 = vld [vmem:[#allocation6 + $0x10] sm:$0xff] }
 0x6d0   :  { %13233 = vrcp.f32 %v2621_v49 }
 0x6d1   :  { %13235 = vrcp.f32 %v2627_v51 }
 0x6d5   :  { %v13230_v52 = vpop.eup %13229 }
 0x6d6   :  { %v13232_v53 = vpop.eup %13231  ;;  %v2634_v58 = vadd.f32 1.0, %v13230_v52  ;;  %v3445_v52 = vld [vmem:[#allocation14] sm:$0xff] }
 0x6d8   :  { %13237 = vrcp.f32 %v2634_v58  ;;  %v2974_v58 = vld [vmem:[#allocation2 + $0x38] sm:$0xff] }
 0x6da   :  { %v13234_v54 = vpop.eup %13233 }
 0x6db   :  { %v13236_v55 = vpop.eup %13235  ;;  %v2639_v57 = vmul.f32 %v13234_v54, %v13232_v53  ;;  %v3446_v53 = vld [vmem:[#allocation14 + $0x8] sm:$0xff] }
 0x6dc   :  { %v2638_v59 = vmul.f32 %v13236_v55, %v2637_v56  ;;  %v12692_v54 = vpack.c.bf16 %v3446_v53, %v3445_v52  ;;  %v3717_v55 = vld [vmem:[#allocation14 + $0x20] sm:$0xff]  ;;  %v3718_v56 = vld [vmem:[#allocation14 + $0x28] sm:$0xff] }
 0x6dd   :  { %v3967_v52 = vld [vmem:[%s15379_s7 + $0x18] sm:$0xff] }
 0x6de   :  { %v2640_v60 = vadd.f32 %v2639_v57, %v2638_v59  ;;  %v12700_v57 = vpack.c.bf16 %v3718_v56, %v3717_v55  ;;  %v3842_v55 = vld [vmem:[#allocation14 + $0x38] sm:$0xff] }
 0x6e0   :  { %13239 = vtanh.f32 %v2640_v60  ;;  %2643 = vst.msk [vmem:[#allocation8] sm:$0xff] %vm297_vm0, %v2640_v60  ;;  %v3050_v60 = vld [vmem:[#allocation3 + $0x38] sm:$0xff] }
 0x6e2   :  { %v13238_v61 = vpop.eup %13237 }
 0x6e7   :  { %v2962_v25 = vld [vmem:[#allocation8] sm:$0xff] }
 0x6ea   :  { %v13240_v62 = vpop.eup %13239 }
 0x6eb   :  { %v2642_v63 = vmul.f32 %v13240_v62, %v13238_v61 }
 0x6ed   :  { %2644 = vst.msk [vmem:[#allocation7] sm:$0xff] %vm297_vm0, %v2642_v63  ;;  %2646 = vst.msk [vmem:[#allocation6 + $0x28] sm:$0xff] %vm297_vm0, %v2642_v63 }
 0x6f4   :  { %v2647_v1 = vld [vmem:[#allocation7] sm:$0xff]  ;;  %v3302_v49 = vld [vmem:[#allocation6 + $0x28] sm:$0xff] }
 0x6f5   :  { %11495 = vmatmul.mubr.msk.f32.vlgmr.msra.gmra.mrb[36].mxu0 %vm297_vm0, %v2647_v1  ;;  %11506 = vmatmul.mubr.msk.f32.vlgmr.msra.gmra.mrb[44].mxu1 %vm297_vm0, %v2647_v1 }
 0x6f6   :  { %12650 = vmatpush3.bf16.msra.mxu0 %v14067_v38  ;;  %12656 = vmatpush3.bf16.msra.mxu1 %v14123_v47 }
 0x6f7   :  { %12651 = vmatprep.subr.bf16.mxu0 %v13739_v28  ;;  %12657 = vmatprep.subr.bf16.mxu1 %v13739_v28 }
 0x6f8   :  { %11516 = vmatprep.mubr.msk.f32.mxu0 %vm13740_vm2, %v13738_v0  ;;  %11527 = vmatprep.mubr.msk.f32.mxu1 %vm13740_vm2, %v13738_v0 }
 0x6fa   :  { %12653 = vmatpush3.bf16.msra.mxu0 %v14090_v44  ;;  %12659 = vmatpush3.bf16.msra.mxu1 %v14135_v50 }
 0x6fb   :  { %12660 = vmatprep.subr.bf16.mxu0 %v13739_v28  ;;  %12666 = vmatprep.subr.bf16.mxu1 %v13739_v28 }
 0x6fd   :  { %11517 = vmatmul.mubr.msk.f32.vlgmr.msra.gmra.mrb[38].mxu0 %vm297_vm0, %v2647_v1  ;;  %11528 = vmatmul.mubr.msk.f32.vlgmr.msra.gmra.mrb[46].mxu1 %vm297_vm0, %v2647_v1 }
 0x6fe   :  { %12662 = vmatpush3.bf16.msra.mxu0 %v14013_v27  ;;  %12668 = vmatpush3.bf16.msra.mxu1 %v14065_v37  ;;  %v2649_v27 = vld [vmem:[#allocation2 + $0x30] sm:$0xff] }
 0x6ff   :  { %12663 = vmatprep.subr.bf16.mxu0 %v13739_v28  ;;  %12669 = vmatprep.subr.bf16.mxu1 %v13739_v28 }
 0x700   :  { %11538 = vmatprep.mubr.msk.f32.mxu0 %vm13740_vm2, %v13738_v0  ;;  %11549 = vmatprep.mubr.msk.f32.mxu1 %vm13740_vm2, %v13738_v0 }
 0x702   :  { %12665 = vmatpush3.bf16.msra.mxu0 %v14031_v31  ;;  %12671 = vmatpush3.bf16.msra.mxu1 %v14087_v43  ;;  %v2871_v31 = vld [vmem:[#allocation5 + $0x30] sm:$0xff] }
 0x703   :  { %12672 = vmatprep.subr.bf16.mxu0 %v13739_v28  ;;  %12678 = vmatprep.subr.bf16.mxu1 %v13739_v28 }
 0x7c8   :  { %v2719_v37 = vpop.f32.mrb[36].mxu0  ;;  %v2792_v3 = vpop.f32.mrb[44].mxu1 }
 0x7c9   :  { %v2723_v4 = vadd.f32 %v2719_v37, %v2649_v27  ;;  %v2796_v5 = vadd.f32 %v2792_v3, %v2725_v2  ;;  %v11496_v6 = vpop.f32.mrb[37].mxu0  ;;  %v11507_v7 = vpop.f32.mrb[45].mxu1 }
 0x7cb   :  { %v10267_v8 = vmul.f32 -1.442695, %v2723_v4  ;;  %v10268_v9 = vmul.f32 -1.442695, %v2796_v5  ;;  %v3196_v4 = vld [vmem:[#allocation5 + $0x38] sm:$0xff] }
 0x7cd   :  { %13241 = vpow2.f32 %v10267_v8 }
 0x7ce   :  { %13243 = vpow2.f32 %v10268_v9  ;;  %v3123_v9 = vld [vmem:[#allocation4 + $0x38] sm:$0xff] }
 0x7d0   :  { %v2865_v10 = vpop.f32.mrb[38].mxu0  ;;  %v2938_v11 = vpop.f32.mrb[46].mxu1 }
 0x7d1   :  { %v2942_v43 = vadd.f32 %v2938_v11, %v2871_v31  ;;  %v11518_v12 = vpop.f32.mrb[39].mxu0  ;;  %v11529_v13 = vpop.f32.mrb[47].mxu1  ;;  %v2869_v16 = vadd.f32 %v2865_v10, %v2798_v14 }
 0x7d3   :  { %v10269_v15 = vmul.f32 -1.442695, %v2942_v43  ;;  %v14407_v43 = vld [vmem:[%s15377_s5] ss:$0 sm:$0xff] }
 0x7d5   :  { %13245 = vpow2.f32 %v10269_v15 }
 0x7d6   :  { %13247 = vtanh.f32 %v2869_v16 }
 0x7d7   :  { %v13242_v17 = vpop.eup %13241 }
 0x7d8   :  { %v13244_v18 = vpop.eup %13243  ;;  %v2946_v19 = vadd.f32 1.0, %v13242_v17 }
 0x7d9   :  { %v2952_v20 = vadd.f32 1.0, %v13244_v18 }
 0x7da   :  { %13249 = vrcp.f32 %v2946_v19 }
 0x7db   :  { %13251 = vrcp.f32 %v2952_v20 }
 0x7df   :  { %v13246_v21 = vpop.eup %13245 }
 0x7e0   :  { %v13248_v22 = vpop.eup %13247  ;;  %v2959_v29 = vadd.f32 1.0, %v13246_v21 }
 0x7e2   :  { %13253 = vrcp.f32 %v2959_v29 }
 0x7e4   :  { %v13250_v23 = vpop.eup %13249 }
 0x7e5   :  { %v13252_v24 = vpop.eup %13251  ;;  %v2964_v26 = vmul.f32 %v13250_v23, %v13248_v22 }
 0x7e6   :  { %v2963_v30 = vmul.f32 %v13252_v24, %v2962_v25 }
 0x7e8   :  { %v2965_v32 = vadd.f32 %v2964_v26, %v2963_v30 }
 0x7ea   :  { %13255 = vtanh.f32 %v2965_v32  ;;  %2968 = vst.msk [vmem:[#allocation8] sm:$0xff] %vm297_vm0, %v2965_v32 }
 0x7ec   :  { %v13254_v33 = vpop.eup %13253 }
 0x7f4   :  { %v13256_v34 = vpop.eup %13255 }
 0x7f5   :  { %v2967_v35 = vmul.f32 %v13256_v34, %v13254_v33  ;;  %v3287_v34 = vld [vmem:[#allocation8] sm:$0xff] }
 0x7f7   :  { %2969 = vst.msk [vmem:[#allocation7] sm:$0xff] %vm297_vm0, %v2967_v35  ;;  %2971 = vst.msk [vmem:[#allocation6 + $0x30] sm:$0xff] %vm297_vm0, %v2967_v35 }
 0x7fe   :  { %v2972_v36 = vld [vmem:[#allocation7] sm:$0xff]  ;;  %v3303_v51 = vld [vmem:[#allocation6 + $0x30] sm:$0xff] }
 0x7ff   :  { %11539 = vmatmul.mubr.msk.f32.vlgmr.msra.gmra.mrb[40].mxu0 %vm297_vm0, %v2972_v36  ;;  %11550 = vmatmul.mubr.msk.f32.vlgmr.msra.gmra.mrb[48].mxu1 %vm297_vm0, %v2972_v36 }
 0x800   :  { %12674 = vmatpush3.bf16.msra.mxu0 %v14067_v38  ;;  %12680 = vmatpush3.bf16.msra.mxu1 %v14123_v47  ;;  %v3308_v38 = vld [vmem:[%s15376_s4 + $0x18] sm:$0xff] }
 0x801   :  { %12675 = vmatprep.subr.bf16.mxu0 %v13739_v28  ;;  %12681 = vmatprep.subr.bf16.mxu1 %v13739_v28  ;;  %v12688_v47 = vpack.c.bf16 %v3308_v38, %v3307_v42 }
 0x802   :  { %11560 = vmatprep.mubr.msk.f32.mxu0 %vm13740_vm2, %v13738_v0  ;;  %11571 = vmatprep.mubr.msk.f32.mxu1 %vm13740_vm2, %v13738_v0 }
 0x804   :  { %12677 = vmatpush3.bf16.msra.mxu0 %v14090_v44  ;;  %12683 = vmatpush3.bf16.msra.mxu1 %v14135_v50  ;;  %v3300_v44 = vld [vmem:[#allocation6 + $0x18] sm:$0xff]  ;;  %v3301_v50 = vld [vmem:[#allocation6 + $0x20] sm:$0xff] }
 0x805   :  { %12685 = vmatprep.subr.bf16.mxu0 %v12684_v41  ;;  %12693 = vmatprep.subr.bf16.mxu1 %v12692_v54 }
 0x807   :  { %11561 = vmatmul.mubr.msk.f32.vlgmr.msra.gmra.mrb[42].mxu0 %vm297_vm0, %v2972_v36  ;;  %11572 = vmatmul.mubr.msk.f32.vlgmr.msra.gmra.mrb[50].mxu1 %vm297_vm0, %v2972_v36 }
 0x808   :  { %12687 = vmatpush3.bf16.msra.mxu0 %v12684_v41  ;;  %11582 = vmatprep.mubr.msk.f32.mxu0 %vm297_vm0, %v3297_v45  ;;  %v3593_v45 = vld [vmem:[#allocation14 + $0x10] sm:$0xff] }
 0x809   :  { %12689 = vmatprep.subr.bf16.mxu0 %v12688_v47  ;;  %12695 = vmatpush3.bf16.msra.mxu1 %v12692_v54  ;;  %v3841_v54 = vld [vmem:[#allocation14 + $0x30] sm:$0xff] }
 0x80a   :  { %v12704_v56 = vpack.c.bf16 %v3842_v55, %v3841_v54  ;;  %v10295_v54 = vld [vmem:[#allocation15 + $0x1] ss:$0 sm:$0xff] }
 0x80c   :  { %12691 = vmatpush3.bf16.msra.mxu0 %v12688_v47 }
 0x80d   :  { %12701 = vmatprep.subr.bf16.mxu0 %v12700_v57 }
 0x80f   :  { %11583 = vmatmul.mubr.msk.f32.vlgmr.msra.gmra.mrb[44].mxu0 %vm297_vm0, %v3298_v46  ;;  %v3594_v46 = vld [vmem:[#allocation14 + $0x18] sm:$0xff] }
 0x810   :  { %11585 = vmatprep.mubr.msk.f32.mxu0 %vm297_vm0, %v3299_v48  ;;  %12703 = vmatpush3.bf16.msra.mxu0 %v12700_v57  ;;  %v12696_v48 = vpack.c.bf16 %v3594_v46, %v3593_v45  ;;  %v14479_v57 = vld [vmem:[#allocation15] ss:$0 sm:$0xff] }
 0x811   :  { %12708 = vmatprep.subr.bf16.mxu0 %v13739_v28 }
 0x812   :  { %12697 = vmatprep.subr.bf16.mxu1 %v12696_v48 }
 0x813   :  { %11586 = vmatmul.mubr.msk.f32.gmra.mrb[46].mxu0 %vm297_vm0, %v3300_v44  ;;  %v3964_v44 = vld [vmem:[%s15379_s7] sm:$0xff] }
 0x814   :  { %11588 = vmatprep.mubr.msk.f32.mxu0 %vm297_vm0, %v3301_v50  ;;  %v3965_v50 = vld [vmem:[%s15379_s7 + $0x8] sm:$0xff] }
 0x817   :  { %11589 = vmatmul.mubr.msk.f32.gmra.mrb[48].mxu0 %vm297_vm0, %v3302_v49  ;;  %v14465_v49 = vpack.c.bf16 %v3965_v50, %v3964_v44  ;;  %v10329_v44 = vld [vmem:[%s15379_s7 + $0x58] sm:$0xff] }
 0x818   :  { %11591 = vmatprep.mubr.msk.f32.mxu0 %vm297_vm0, %v3303_v51  ;;  %v3966_v51 = vld [vmem:[%s15379_s7 + $0x10] sm:$0xff] }
 0x819   :  { %v14475_v53 = vpack.c.bf16 %v3967_v52, %v3966_v51 }
 0x8d2   :  { %v3044_v59 = vpop.f32.mrb[40].mxu0  ;;  %v3117_v61 = vpop.f32.mrb[48].mxu1 }
 0x8d3   :  { %v3048_v62 = vadd.f32 %v3044_v59, %v2974_v58  ;;  %v3121_v63 = vadd.f32 %v3117_v61, %v3050_v60  ;;  %v11540_v1 = vpop.f32.mrb[41].mxu0  ;;  %v11551_v27 = vpop.f32.mrb[49].mxu1 }
 0x8d5   :  { %v10274_v37 = vmul.f32 -1.442695, %v3048_v62  ;;  %v10275_v2 = vmul.f32 -1.442695, %v3121_v63 }
 0x8d7   :  { %13257 = vpow2.f32 %v10274_v37 }
 0x8d8   :  { %13259 = vpow2.f32 %v10275_v2 }
 0x8da   :  { %v3190_v3 = vpop.f32.mrb[42].mxu0  ;;  %v3263_v5 = vpop.f32.mrb[50].mxu1 }
 0x8db   :  { %v3267_v6 = vadd.f32 %v3263_v5, %v3196_v4  ;;  %v11562_v7 = vpop.f32.mrb[43].mxu0  ;;  %v11573_v8 = vpop.f32.mrb[51].mxu1  ;;  %v3194_v31 = vadd.f32 %v3190_v3, %v3123_v9 }
 0x8dc   :  { %v14496_v8 = vld [vmem:[#allocation15 + $0x2] ss:$0 sm:$0xff] }
 0x8dd   :  { %v10276_v10 = vmul.f32 -1.442695, %v3267_v6 }
 0x8df   :  { %13261 = vpow2.f32 %v10276_v10 }
 0x8e0   :  { %13263 = vtanh.f32 %v3194_v31  ;;  %v10322_v31 = vld [vmem:[%s15379_s7 + $0x20] sm:$0xff] }
 0x8e1   :  { %v13258_v11 = vpop.eup %13257 }
 0x8e2   :  { %v13260_v12 = vpop.eup %13259  ;;  %v3271_v13 = vadd.f32 1.0, %v13258_v11  ;;  %v11584_v14 = vpop.f32.mrb[44].mxu0  ;;  %v10323_v11 = vld [vmem:[%s15379_s7 + $0x28] sm:$0xff] }
 0x8e3   :  { %v3277_v15 = vadd.f32 1.0, %v13260_v12  ;;  %v3406_v16 = vpop.f32.mrb[45].mxu0  ;;  %v14413_v18 = vadd.f32 %v11584_v14, %v14407_v43 }
 0x8e4   :  { %13265 = vrcp.f32 %v3271_v13  ;;  %v14410_v17 = vadd.f32 %v14407_v43, %v3406_v16 }
 0x8e5   :  { %13267 = vrcp.f32 %v3277_v15  ;;  %v14524_v15 = vpack.c.bf16 %v10323_v11, %v10322_v31 }
 0x8e6   :  { %v11587_v19 = vpop.f32.mrb[46].mxu0  ;;  %11598 = vmatprep.mubr.msk.f32.mxu1 %vm3454_vm3, %v14410_v17 }
 0x8e7   :  { %v3416_v20 = vpop.f32.mrb[47].mxu0  ;;  %11599 = vmatmul.mubr.msk.f32.vlgmr.msra.gmra.mrb[52].mxu1 %vm3454_vm3, %v14413_v18  ;;  %v14423_v22 = vadd.f32 %v11587_v19, %v14407_v43  ;;  %v10324_v19 = vld [vmem:[%s15379_s7 + $0x30] sm:$0xff] }
 0x8e8   :  { %v14420_v21 = vadd.f32 %v14407_v43, %v3416_v20  ;;  %12699 = vmatpush3.bf16.msra.mxu1 %v12696_v48  ;;  %v10325_v20 = vld [vmem:[%s15379_s7 + $0x38] sm:$0xff]  ;;  %v10328_v48 = vld [vmem:[%s15379_s7 + $0x50] sm:$0xff] }
 0x8e9   :  { %v13262_v25 = vpop.eup %13261  ;;  %12705 = vmatprep.subr.bf16.mxu1 %v12704_v56 }
 0x8ea   :  { %v11590_v23 = vpop.f32.mrb[48].mxu0  ;;  %11601 = vmatprep.mubr.msk.f32.mxu1 %vm3454_vm3, %v14420_v21  ;;  %v13264_v29 = vpop.eup %13263  ;;  %v3284_v36 = vadd.f32 1.0, %v13262_v25 }
 0x8eb   :  { %v3426_v24 = vpop.f32.mrb[49].mxu0  ;;  %11602 = vmatmul.mubr.msk.f32.gmra.mrb[54].mxu1 %vm3454_vm3, %v14423_v22  ;;  %v14433_v30 = vadd.f32 %v11590_v23, %v14407_v43 }
 0x8ec   :  { %v14430_v26 = vadd.f32 %v14407_v43, %v3426_v24  ;;  %13269 = vrcp.f32 %v3284_v36 }
 0x8ee   :  { %v13266_v32 = vpop.eup %13265  ;;  %11604 = vmatprep.mubr.msk.f32.mxu1 %vm3454_vm3, %v14430_v26 }
 0x8ef   :  { %v13268_v33 = vpop.eup %13267  ;;  %v3289_v35 = vmul.f32 %v13266_v32, %v13264_v29  ;;  %11605 = vmatmul.mubr.msk.f32.gmra.mrb[56].mxu1 %vm3454_vm3, %v14433_v30  ;;  %v14543_v29 = vpack.c.bf16 %v10325_v20, %v10324_v19 }
 0x8f0   :  { %v3288_v39 = vmul.f32 %v13268_v33, %v3287_v34  ;;  %v10330_v33 = vld [vmem:[%s15379_s7 + $0x60] sm:$0xff]  ;;  %v10331_v34 = vld [vmem:[%s15379_s7 + $0x68] sm:$0xff] }
 0x8f2   :  { %v3290_v40 = vadd.f32 %v3289_v35, %v3288_v39 }
 0x8f4   :  { %13271 = vtanh.f32 %v3290_v40  ;;  %3293 = vst.msk [vmem:[#allocation8] sm:$0xff] %vm297_vm0, %v3290_v40  ;;  %v14564_v40 = vpack.c.bf16 %v10331_v34, %v10330_v33 }
 0x8f5   :  { %3984 = vst.msk [vmem:[#allocation8] sm:$0xff] %vm297_vm0, %v13738_v0 }
 0x8f6   :  { %v13270_v41 = vpop.eup %13269 }
 0x8fe   :  { %v13272_v42 = vpop.eup %13271 }
 0x8ff   :  { %v3292_v38 = vmul.f32 %v13272_v42, %v13270_v41  ;;  %v10332_v41 = vld [vmem:[%s15379_s7 + $0x70] sm:$0xff]  ;;  %v10333_v42 = vld [vmem:[%s15379_s7 + $0x78] sm:$0xff] }
 0x900   :  { %v14587_v45 = vpack.c.bf16 %v10333_v42, %v10332_v41 }
 0x901   :  { %3294 = vst.msk [vmem:[#allocation7] sm:$0xff] %vm297_vm0, %v3292_v38  ;;  %3296 = vst.msk [vmem:[#allocation6 + $0x38] sm:$0xff] %vm297_vm0, %v3292_v38  ;;  %v10326_v38 = vld [vmem:[%s15379_s7 + $0x40] sm:$0xff] }
 0x902   :  { %3983 = vst.msk [vmem:[#allocation7] sm:$0xff] %vm297_vm0, %v13738_v0 }
 0x908   :  { %v3304_v47 = vld [vmem:[#allocation6 + $0x38] sm:$0xff] }
 0x909   :  { %11592 = vmatmul.mubr.msk.f32.gmra.mrb[50].mxu0 %vm297_vm0, %v3304_v47  ;;  %v14521_v14 = vld [vmem:[#allocation7] sm:$0xff]  ;;  %v10327_v47 = vld [vmem:[%s15379_s7 + $0x48] sm:$0xff] }
 0x90a   :  { %11630 = vmatprep.mubr.msk.f32.mxu0 %vm3454_vm3, %v14410_v17  ;;  %v14596_v46 = vpack.c.bf16 %v10327_v47, %v10326_v38 }
 0x90d   :  { %11631 = vmatmul.mubr.msk.f32.vlgmr.msra.gmra.mrb[52].mxu0 %vm3454_vm3, %v14413_v18 }
 0x90e   :  { %11633 = vmatprep.mubr.msk.f32.mxu0 %vm3454_vm3, %v14420_v21  ;;  %12710 = vmatpush3.bf16.msra.mxu0 %v14465_v49 }
 0x90f   :  { %12711 = vmatprep.subr.bf16.mxu0 %v13739_v28 }
 0x911   :  { %11634 = vmatmul.mubr.msk.f32.gmra.mrb[54].mxu0 %vm3454_vm3, %v14423_v22 }
 0x912   :  { %11636 = vmatprep.mubr.msk.f32.mxu0 %vm3454_vm3, %v14430_v26  ;;  %12713 = vmatpush3.bf16.msra.mxu0 %v14475_v53 }
 0x913   :  { %12714 = vmatprep.subr.bf16.mxu0 %v13739_v28 }
 0x915   :  { %11637 = vmatmul.mubr.msk.f32.gmra.mrb[56].mxu0 %vm3454_vm3, %v14433_v30 }
 0x9ba   :  { %v11600_v58 = vpop.f32.mrb[52].mxu1 }
 0x9bb   :  { %v3551_v59 = vadd.f32 %v11600_v58, %v14479_v57  ;;  %v3545_v60 = vpop.f32.mrb[53].mxu1 }
 0x9bc   :  { %v3546_v61 = vadd.f32 %v14479_v57, %v3545_v60 }
 0x9bd   :  { %3585 = vst.msk [vmem:[#allocation2 + $0x8] sm:$0xff] %vm297_vm0, %v3551_v59 }
 0x9be   :  { %3584 = vst.msk [vmem:[#allocation2] sm:$0xff] %vm297_vm0, %v3546_v61  ;;  %v11603_v62 = vpop.f32.mrb[54].mxu1 }
 0x9bf   :  { %v3561_v63 = vadd.f32 %v11603_v62, %v14479_v57  ;;  %v3555_v1 = vpop.f32.mrb[55].mxu1 }
 0x9c0   :  { %v3556_v27 = vadd.f32 %v14479_v57, %v3555_v1 }
 0x9c1   :  { %3587 = vst.msk [vmem:[#allocation2 + $0x18] sm:$0xff] %vm297_vm0, %v3561_v63 }
 0x9c2   :  { %3586 = vst.msk [vmem:[#allocation2 + $0x10] sm:$0xff] %vm297_vm0, %v3556_v27  ;;  %v11606_v37 = vpop.f32.mrb[56].mxu1 }
 0x9c3   :  { %v3571_v2 = vadd.f32 %v11606_v37, %v14479_v57  ;;  %v3565_v3 = vpop.f32.mrb[57].mxu1 }
 0x9c4   :  { %v3566_v4 = vadd.f32 %v14479_v57, %v3565_v3 }
 0x9c5   :  { %3589 = vst.msk [vmem:[#allocation2 + $0x28] sm:$0xff] %vm297_vm0, %v3571_v2  ;;  %v3986_v27 = vld [vmem:[#allocation2] sm:$0xff] }
 0x9c6   :  { %3588 = vst.msk [vmem:[#allocation2 + $0x20] sm:$0xff] %vm297_vm0, %v3566_v4 }
 0x9dc   :  { %v11593_v5 = vpop.f32.mrb[50].mxu0 }
 0x9dd   :  { %v3436_v6 = vpop.f32.mrb[51].mxu0  ;;  %v14499_v9 = vadd.f32 %v11593_v5, %v14407_v43 }
 0x9de   :  { %v14494_v7 = vadd.f32 %v14407_v43, %v3436_v6 }
 0x9e0   :  { %11607 = vmatprep.mubr.msk.f32.mxu1 %vm3454_vm3, %v14494_v7  ;;  %v11632_v10 = vpop.f32.mrb[52].mxu0  ;;  %11639 = vmatprep.mubr.msk.f32.mxu0 %vm3454_vm3, %v14494_v7 }
 0x9e1   :  { %v3799_v12 = vadd.f32 %v11632_v10, %v14496_v8  ;;  %11608 = vmatmul.mubr.msk.f32.gmra.mrb[58].mxu1 %vm3454_vm3, %v14499_v9  ;;  %v3793_v43 = vpop.f32.mrb[53].mxu0  ;;  %11640 = vmatmul.mubr.msk.f32.gmra.mrb[58].mxu0 %vm3454_vm3, %v14499_v9 }
 0x9e2   :  { %v3794_v13 = vadd.f32 %v14496_v8, %v3793_v43  ;;  %11614 = vmatprep.mubr.msk.f32.mxu1 %vm3454_vm3, %v14410_v17  ;;  %11666 = vmatprep.mubr.msk.f32.mxu0 %vm13740_vm2, %v13738_v0 }
 0x9e3   :  { %3833 = vst.msk [vmem:[#allocation4 + $0x8] sm:$0xff] %vm297_vm0, %v3799_v12 }
 0x9e4   :  { %3832 = vst.msk [vmem:[#allocation4] sm:$0xff] %vm297_vm0, %v3794_v13  ;;  %v11635_v16 = vpop.f32.mrb[54].mxu0 }
 0x9e5   :  { %v3809_v23 = vadd.f32 %v11635_v16, %v14496_v8  ;;  %11615 = vmatmul.mubr.msk.f32.vlgmr.msra.gmra.mrb[60].mxu1 %vm3454_vm3, %v14413_v18  ;;  %v3803_v24 = vpop.f32.mrb[55].mxu0  ;;  %11667 = vmatmul.mubr.msk.f32.vlgmr.msra.gmra.mrb[60].mxu0 %vm297_vm0, %v14521_v14 }
 0x9e6   :  { %v3804_v25 = vadd.f32 %v14496_v8, %v3803_v24  ;;  %11617 = vmatprep.mubr.msk.f32.mxu1 %vm3454_vm3, %v14420_v21  ;;  %12707 = vmatpush3.bf16.msra.mxu1 %v12704_v56 }
 0x9e7   :  { %3835 = vst.msk [vmem:[#allocation4 + $0x18] sm:$0xff] %vm297_vm0, %v3809_v23  ;;  %12716 = vmatpush3.bf16.msra.mxu0 %v14524_v15  ;;  %11677 = vmatprep.mubr.msk.f32.mxu0 %vm13740_vm2, %v13738_v0 }
 0x9e8   :  { %3834 = vst.msk [vmem:[#allocation4 + $0x10] sm:$0xff] %vm297_vm0, %v3804_v25  ;;  %v11638_v32 = vpop.f32.mrb[56].mxu0  ;;  %12717 = vmatprep.subr.bf16.mxu0 %v13739_v28  ;;  %12720 = vmatprep.subr.bf16.mxu1 %v13739_v28 }
 0x9e9   :  { %v3819_v35 = vadd.f32 %v11638_v32, %v14496_v8  ;;  %11618 = vmatmul.mubr.msk.f32.gmra.mrb[62].mxu1 %vm3454_vm3, %v14423_v22  ;;  %v3813_v36 = vpop.f32.mrb[57].mxu0 }
 0x9ea   :  { %v3814_v39 = vadd.f32 %v14496_v8, %v3813_v36  ;;  %11620 = vmatprep.mubr.msk.f32.mxu1 %vm3454_vm3, %v14430_v26 }
 0x9eb   :  { %3837 = vst.msk [vmem:[#allocation4 + $0x28] sm:$0xff] %vm297_vm0, %v3819_v35  ;;  %12719 = vmatpush3.bf16.msra.mxu0 %v14543_v29 }
 0x9ec   :  { %3836 = vst.msk [vmem:[#allocation4 + $0x20] sm:$0xff] %vm297_vm0, %v3814_v39  ;;  %12726 = vmatprep.subr.bf16.mxu0 %v13739_v28 }
 0x9ed   :  { %11621 = vmatmul.mubr.msk.f32.gmra.mrb[64].mxu1 %vm3454_vm3, %v14433_v30 }
 0x9ee   :  { %11623 = vmatprep.mubr.msk.f32.mxu1 %vm3454_vm3, %v14494_v7  ;;  %11678 = vmatmul.mubr.msk.f32.vlgmr.msra.gmra.mrb[62].mxu0 %vm297_vm0, %v14521_v14 }
 0x9ef   :  { %12728 = vmatpush3.bf16.msra.mxu0 %v14564_v40  ;;  %11699 = vmatprep.mubr.msk.f32.mxu0 %vm13740_vm2, %v13738_v0 }
 0x9f0   :  { %12729 = vmatprep.subr.bf16.mxu0 %v13739_v28 }
 0x9f1   :  { %11624 = vmatmul.mubr.msk.f32.gmra.mrb[66].mxu1 %vm3454_vm3, %v14499_v9 }
 0x9f2   :  { %11646 = vmatprep.mubr.msk.f32.mxu1 %vm3454_vm3, %v14410_v17  ;;  %v14611_v17 = vpack.c.bf16 %v10329_v44, %v10328_v48 }
 0x9f3   :  { %12731 = vmatpush3.bf16.msra.mxu0 %v14587_v45 }
 0x9f4   :  { %12738 = vmatprep.subr.bf16.mxu0 %v13739_v28 }
 0x9f5   :  { %11647 = vmatmul.mubr.msk.f32.vlgmr.msra.gmra.mrb[68].mxu1 %vm3454_vm3, %v14413_v18 }
 0x9f6   :  { %11649 = vmatprep.mubr.msk.f32.mxu1 %vm3454_vm3, %v14420_v21  ;;  %12722 = vmatpush3.bf16.msra.mxu1 %v14596_v46 }
 0x9f7   :  { %12723 = vmatprep.subr.bf16.mxu1 %v13739_v28  ;;  %11700 = vmatmul.mubr.msk.f32.vlgmr.msra.gmra.mrb[64].mxu0 %vm297_vm0, %v14521_v14 }
 0x9f8   :  { %12740 = vmatpush3.bf16.msra.mxu0 %v14524_v15  ;;  %11721 = vmatprep.mubr.msk.f32.mxu0 %vm13740_vm2, %v13738_v0 }
 0x9f9   :  { %11650 = vmatmul.mubr.msk.f32.gmra.mrb[70].mxu1 %vm3454_vm3, %v14423_v22  ;;  %12741 = vmatprep.subr.bf16.mxu0 %v13739_v28 }
 0x9fa   :  { %11652 = vmatprep.mubr.msk.f32.mxu1 %vm3454_vm3, %v14430_v26  ;;  %12725 = vmatpush3.bf16.msra.mxu1 %v14611_v17 }
 0x9fb   :  { %12732 = vmatprep.subr.bf16.mxu1 %v13739_v28 }
 0x9fc   :  { %12743 = vmatpush3.bf16.msra.mxu0 %v14543_v29 }
 0x9fd   :  { %11653 = vmatmul.mubr.msk.f32.gmra.mrb[72].mxu1 %vm3454_vm3, %v14433_v30  ;;  %12750 = vmatprep.subr.bf16.mxu0 %v13739_v28 }
 0x9fe   :  { %11655 = vmatprep.mubr.msk.f32.mxu1 %vm3454_vm3, %v14494_v7 }
 0xa01   :  { %11656 = vmatmul.mubr.msk.f32.gmra.mrb[74].mxu1 %vm3454_vm3, %v14499_v9 }
 0xa02   :  { %11688 = vmatprep.mubr.msk.f32.mxu1 %vm13740_vm2, %v13738_v0 }
 0xa05   :  { %11689 = vmatmul.mubr.msk.f32.vlgmr.msra.gmra.mrb[76].mxu1 %vm297_vm0, %v14521_v14  ;;  %v10313_v14 = vld [vmem:[#allocation15 + $0x3] ss:$0 sm:$0xff] }
 0xa06   :  { %12734 = vmatpush3.bf16.msra.mxu1 %v14465_v49  ;;  %11710 = vmatprep.mubr.msk.f32.mxu1 %vm13740_vm2, %v13738_v0 }
 0xa07   :  { %12735 = vmatprep.subr.bf16.mxu1 %v13739_v28 }
 0xa0a   :  { %12737 = vmatpush3.bf16.msra.mxu1 %v14475_v53 }
 0xa0b   :  { %12744 = vmatprep.subr.bf16.mxu1 %v13739_v28 }
 0xab4   :  { %v11609_v18 = vpop.f32.mrb[58].mxu1  ;;  %v11641_v21 = vpop.f32.mrb[58].mxu0 }
 0xab5   :  { %v3581_v22 = vadd.f32 %v11609_v18, %v14479_v57  ;;  %v3829_v26 = vadd.f32 %v11641_v21, %v14496_v8  ;;  %v3575_v30 = vpop.f32.mrb[59].mxu1  ;;  %v3823_v50 = vpop.f32.mrb[59].mxu0 }
 0xab6   :  { %v3576_v51 = vadd.f32 %v14479_v57, %v3575_v30  ;;  %v3824_v52 = vadd.f32 %v14496_v8, %v3823_v50 }
 0xab7   :  { %3591 = vst.msk [vmem:[#allocation2 + $0x38] sm:$0xff] %vm297_vm0, %v3581_v22  ;;  %3839 = vst.msk [vmem:[#allocation4 + $0x38] sm:$0xff] %vm297_vm0, %v3829_v26 }
 0xab8   :  { %3590 = vst.msk [vmem:[#allocation2 + $0x30] sm:$0xff] %vm297_vm0, %v3576_v51  ;;  %3838 = vst.msk [vmem:[#allocation4 + $0x30] sm:$0xff] %vm297_vm0, %v3824_v52  ;;  %v11616_v55 = vpop.f32.mrb[60].mxu1  ;;  %v4056_v56 = vpop.f32.mrb[60].mxu0  ;;  %v4133_v52 = vld [vmem:[#allocation4] sm:$0xff] }
 0xab9   :  { %v3675_v58 = vadd.f32 %v11616_v55, %v10295_v54  ;;  %v3669_v59 = vpop.f32.mrb[61].mxu1  ;;  %v11668_v60 = vpop.f32.mrb[61].mxu0  ;;  %v4060_v2 = vadd.f32 %v4056_v56, %v3986_v27 }
 0xaba   :  { %v3670_v61 = vadd.f32 %v10295_v54, %v3669_v59  ;;  %v4296_v60 = vld [vmem:[#allocation8] sm:$0xff] }
 0xabb   :  { %3709 = vst.msk [vmem:[#allocation3 + $0x8] sm:$0xff] %vm297_vm0, %v3675_v58  ;;  %v10338_v31 = vmul.f32 -1.442695, %v4060_v2 }
 0xabc   :  { %3708 = vst.msk [vmem:[#allocation3] sm:$0xff] %vm297_vm0, %v3670_v61  ;;  %v11619_v57 = vpop.f32.mrb[62].mxu1 }
 0xabd   :  { %v3685_v62 = vadd.f32 %v11619_v57, %v10295_v54  ;;  %v3679_v63 = vpop.f32.mrb[63].mxu1 }
 0xabe   :  { %v3680_v1 = vadd.f32 %v10295_v54, %v3679_v63 }
 0xabf   :  { %3711 = vst.msk [vmem:[#allocation3 + $0x18] sm:$0xff] %vm297_vm0, %v3685_v62 }
 0xac0   :  { %3710 = vst.msk [vmem:[#allocation3 + $0x10] sm:$0xff] %vm297_vm0, %v3680_v1  ;;  %v11622_v37 = vpop.f32.mrb[64].mxu1 }
 0xac1   :  { %v3695_v3 = vadd.f32 %v11622_v37, %v10295_v54  ;;  %v3689_v4 = vpop.f32.mrb[65].mxu1  ;;  %v4128_v5 = vpop.f32.mrb[62].mxu0 }
 0xac2   :  { %v3690_v6 = vadd.f32 %v10295_v54, %v3689_v4  ;;  %v11679_v7 = vpop.f32.mrb[63].mxu0 }
 0xac3   :  { %3713 = vst.msk [vmem:[#allocation3 + $0x28] sm:$0xff] %vm297_vm0, %v3695_v3  ;;  %v4061_v8 = vld [vmem:[#allocation3] sm:$0xff]  ;;  %v4381_v7 = vld [vmem:[#allocation3 + $0x8] sm:$0xff] }
 0xac4   :  { %3712 = vst.msk [vmem:[#allocation3 + $0x20] sm:$0xff] %vm297_vm0, %v3690_v6  ;;  %v4132_v9 = vadd.f32 %v4128_v5, %v4061_v8  ;;  %v11625_v10 = vpop.f32.mrb[66].mxu1  ;;  %v4306_v5 = vld [vmem:[#allocation2 + $0x8] sm:$0xff] }
 0xac5   :  { %v3705_v11 = vadd.f32 %v11625_v10, %v10295_v54  ;;  %v3699_v12 = vpop.f32.mrb[67].mxu1 }
 0xac6   :  { %v10339_v43 = vmul.f32 -1.442695, %v4132_v9  ;;  %v3700_v13 = vadd.f32 %v10295_v54, %v3699_v12 }
 0xac7   :  { %3715 = vst.msk [vmem:[#allocation3 + $0x38] sm:$0xff] %vm297_vm0, %v3705_v11 }
 0xac8   :  { %13273 = vpow2.f32 %v10339_v43  ;;  %3714 = vst.msk [vmem:[#allocation3 + $0x30] sm:$0xff] %vm297_vm0, %v3700_v13  ;;  %v11648_v16 = vpop.f32.mrb[68].mxu1 }
 0xac9   :  { %13275 = vpow2.f32 %v10338_v31  ;;  %v3923_v19 = vadd.f32 %v11648_v16, %v10313_v14  ;;  %v3917_v20 = vpop.f32.mrb[69].mxu1 }
 0xaca   :  { %v3918_v23 = vadd.f32 %v10313_v14, %v3917_v20  ;;  %v4272_v24 = vpop.f32.mrb[64].mxu0 }
 0xacb   :  { %3957 = vst.msk [vmem:[#allocation5 + $0x8] sm:$0xff] %vm297_vm0, %v3923_v19  ;;  %v11701_v25 = vpop.f32.mrb[65].mxu0 }
 0xacc   :  { %3956 = vst.msk [vmem:[#allocation5] sm:$0xff] %vm297_vm0, %v3918_v23  ;;  %v11651_v32 = vpop.f32.mrb[70].mxu1 }
 0xacd   :  { %v3933_v33 = vadd.f32 %v11651_v32, %v10313_v14  ;;  %v3927_v34 = vpop.f32.mrb[71].mxu1 }
 0xace   :  { %v3928_v35 = vadd.f32 %v10313_v14, %v3927_v34 }
 0xacf   :  { %3959 = vst.msk [vmem:[#allocation5 + $0x18] sm:$0xff] %vm297_vm0, %v3933_v33 }
 0xad0   :  { %3958 = vst.msk [vmem:[#allocation5 + $0x10] sm:$0xff] %vm297_vm0, %v3928_v35  ;;  %v11654_v36 = vpop.f32.mrb[72].mxu1 }
 0xad1   :  { %v3943_v39 = vadd.f32 %v11654_v36, %v10313_v14  ;;  %v3937_v41 = vpop.f32.mrb[73].mxu1 }
 0xad2   :  { %v13274_v42 = vpop.eup %13273  ;;  %v3938_v38 = vadd.f32 %v10313_v14, %v3937_v41 }
 0xad3   :  { %v13276_v47 = vpop.eup %13275  ;;  %3961 = vst.msk [vmem:[#allocation5 + $0x28] sm:$0xff] %vm297_vm0, %v3943_v39  ;;  %v4205_v48 = vld [vmem:[#allocation5] sm:$0xff]  ;;  %v4286_v21 = vadd.f32 1.0, %v13274_v42 }
 0xad4   :  { %3960 = vst.msk [vmem:[#allocation5 + $0x20] sm:$0xff] %vm297_vm0, %v3938_v38  ;;  %v4276_v44 = vadd.f32 %v4272_v24, %v4205_v48  ;;  %v11657_v18 = vpop.f32.mrb[74].mxu1  ;;  %v4280_v30 = vadd.f32 1.0, %v13276_v47  ;;  %v4453_v24 = vld [vmem:[#allocation4 + $0x8] sm:$0xff] }
 0xad5   :  { %v3953_v22 = vadd.f32 %v11657_v18, %v10313_v14  ;;  %v3947_v26 = vpop.f32.mrb[75].mxu1 }
 0xad6   :  { %v10340_v50 = vmul.f32 -1.442695, %v4276_v44  ;;  %v3948_v51 = vadd.f32 %v10313_v14, %v3947_v26  ;;  %v4525_v14 = vld [vmem:[#allocation5 + $0x8] sm:$0xff] }
 0xad7   :  { %3963 = vst.msk [vmem:[#allocation5 + $0x38] sm:$0xff] %vm297_vm0, %v3953_v22 }
 0xad8   :  { %13277 = vpow2.f32 %v10340_v50  ;;  %3962 = vst.msk [vmem:[#allocation5 + $0x30] sm:$0xff] %vm297_vm0, %v3948_v51  ;;  %v4200_v54 = vpop.f32.mrb[76].mxu1  ;;  %v4626_v51 = vld [vmem:[#allocation2 + $0x10] sm:$0xff] }
 0xad9   :  { %13279 = vrcp.f32 %v4286_v21  ;;  %v4204_v55 = vadd.f32 %v4200_v54, %v4133_v52  ;;  %v11690_v56 = vpop.f32.mrb[77].mxu1  ;;  %v4701_v54 = vld [vmem:[#allocation3 + $0x10] sm:$0xff] }
 0xada   :  { %13281 = vrcp.f32 %v4280_v30 }
 0xadb   :  { %13283 = vtanh.f32 %v4204_v55 }
 0xae2   :  { %v13278_v58 = vpop.eup %13277 }
 0xae3   :  { %v13280_v59 = vpop.eup %13279  ;;  %v4293_v62 = vadd.f32 1.0, %v13278_v58 }
 0xae4   :  { %v13282_v61 = vpop.eup %13281  ;;  %v4297_v63 = vmul.f32 %v13280_v59, %v4296_v60 }
 0xae5   :  { %v13284_v57 = vpop.eup %13283  ;;  %13285 = vrcp.f32 %v4293_v62 }
 0xae6   :  { %v4298_v1 = vmul.f32 %v13284_v57, %v13282_v61 }
 0xae8   :  { %v4299_v27 = vadd.f32 %v4298_v1, %v4297_v63  ;;  %v4845_v63 = vld [vmem:[#allocation5 + $0x10] sm:$0xff] }
 0xaea   :  { %13287 = vtanh.f32 %v4299_v27  ;;  %4302 = vst.msk [vmem:[#allocation8] sm:$0xff] %vm297_vm0, %v4299_v27 }
 0xaef   :  { %v13286_v37 = vpop.eup %13285 }
 0xaf1   :  { %v4616_v47 = vld [vmem:[#allocation8] sm:$0xff] }
 0xaf4   :  { %v13288_v2 = vpop.eup %13287 }
 0xaf5   :  { %v4301_v3 = vmul.f32 %v13288_v2, %v13286_v37 }
 0xaf7   :  { %4303 = vst.msk [vmem:[#allocation7] sm:$0xff] %vm297_vm0, %v4301_v3  ;;  %4304 = vst.msk [vmem:[#allocation6] sm:$0xff] %vm297_vm0, %v4301_v3  ;;  %v4773_v3 = vld [vmem:[#allocation4 + $0x10] sm:$0xff] }
 0xafe   :  { %v4305_v4 = vld [vmem:[#allocation7] sm:$0xff] }
 0xaff   :  { %11711 = vmatmul.mubr.msk.f32.vlgmr.msra.gmra.mrb[78].mxu1 %vm297_vm0, %v4305_v4  ;;  %11722 = vmatmul.mubr.msk.f32.vlgmr.msra.gmra.mrb[66].mxu0 %vm297_vm0, %v4305_v4 }
 0xb00   :  { %12746 = vmatpush3.bf16.msra.mxu1 %v14596_v46  ;;  %12752 = vmatpush3.bf16.msra.mxu0 %v14564_v40 }
 0xb01   :  { %12747 = vmatprep.subr.bf16.mxu1 %v13739_v28  ;;  %12753 = vmatprep.subr.bf16.mxu0 %v13739_v28 }
 0xb02   :  { %11732 = vmatprep.mubr.msk.f32.mxu1 %vm13740_vm2, %v13738_v0  ;;  %11743 = vmatprep.mubr.msk.f32.mxu0 %vm13740_vm2, %v13738_v0 }
 0xb04   :  { %12749 = vmatpush3.bf16.msra.mxu1 %v14611_v17  ;;  %12755 = vmatpush3.bf16.msra.mxu0 %v14587_v45 }
 0xb05   :  { %12756 = vmatprep.subr.bf16.mxu1 %v13739_v28  ;;  %12762 = vmatprep.subr.bf16.mxu0 %v13739_v28 }
 0xb07   :  { %11733 = vmatmul.mubr.msk.f32.vlgmr.msra.gmra.mrb[80].mxu1 %vm297_vm0, %v4305_v4  ;;  %11744 = vmatmul.mubr.msk.f32.vlgmr.msra.gmra.mrb[68].mxu0 %vm297_vm0, %v4305_v4 }
 0xb08   :  { %12758 = vmatpush3.bf16.msra.mxu1 %v14465_v49  ;;  %12764 = vmatpush3.bf16.msra.mxu0 %v14524_v15 }
 0xb09   :  { %12759 = vmatprep.subr.bf16.mxu1 %v13739_v28  ;;  %12765 = vmatprep.subr.bf16.mxu0 %v13739_v28 }
 0xb0a   :  { %11754 = vmatprep.mubr.msk.f32.mxu1 %vm13740_vm2, %v13738_v0  ;;  %11765 = vmatprep.mubr.msk.f32.mxu0 %vm13740_vm2, %v13738_v0 }
 0xb0c   :  { %12761 = vmatpush3.bf16.msra.mxu1 %v14475_v53  ;;  %12767 = vmatpush3.bf16.msra.mxu0 %v14543_v29 }
 0xb0d   :  { %12768 = vmatprep.subr.bf16.mxu1 %v13739_v28  ;;  %12774 = vmatprep.subr.bf16.mxu0 %v13739_v28 }
 0xbd2   :  { %v4376_v6 = vpop.f32.mrb[78].mxu1  ;;  %v4448_v8 = vpop.f32.mrb[66].mxu0 }
 0xbd3   :  { %v4380_v9 = vadd.f32 %v4376_v6, %v4306_v5  ;;  %v4452_v10 = vadd.f32 %v4448_v8, %v4381_v7  ;;  %v11712_v31 = vpop.f32.mrb[79].mxu1  ;;  %v11723_v11 = vpop.f32.mrb[67].mxu0 }
 0xbd5   :  { %v10345_v12 = vmul.f32 -1.442695, %v4380_v9  ;;  %v10346_v43 = vmul.f32 -1.442695, %v4452_v10 }
 0xbd7   :  { %13289 = vpow2.f32 %v10345_v12 }
 0xbd8   :  { %13291 = vpow2.f32 %v10346_v43 }
 0xbda   :  { %v4520_v13 = vpop.f32.mrb[80].mxu1  ;;  %v4592_v16 = vpop.f32.mrb[68].mxu0 }
 0xbdb   :  { %v4596_v19 = vadd.f32 %v4592_v16, %v4525_v14  ;;  %v11734_v20 = vpop.f32.mrb[81].mxu1  ;;  %v11745_v23 = vpop.f32.mrb[69].mxu0  ;;  %v4524_v32 = vadd.f32 %v4520_v13, %v4453_v24 }
 0xbdd   :  { %v10347_v25 = vmul.f32 -1.442695, %v4596_v19 }
 0xbdf   :  { %13293 = vpow2.f32 %v10347_v25 }
 0xbe0   :  { %13295 = vtanh.f32 %v4524_v32  ;;  %v4946_v32 = vld [vmem:[#allocation2 + $0x18] sm:$0xff] }
 0xbe1   :  { %v13290_v33 = vpop.eup %13289 }
 0xbe2   :  { %v13292_v34 = vpop.eup %13291  ;;  %v4600_v35 = vadd.f32 1.0, %v13290_v33 }
 0xbe3   :  { %v4606_v36 = vadd.f32 1.0, %v13292_v34  ;;  %v5021_v34 = vld [vmem:[#allocation3 + $0x18] sm:$0xff] }
 0xbe4   :  { %13297 = vrcp.f32 %v4600_v35 }
 0xbe5   :  { %13299 = vrcp.f32 %v4606_v36 }
 0xbe9   :  { %v13294_v39 = vpop.eup %13293 }
 0xbea   :  { %v13296_v41 = vpop.eup %13295  ;;  %v4613_v44 = vadd.f32 1.0, %v13294_v39 }
 0xbec   :  { %13301 = vrcp.f32 %v4613_v44  ;;  %v5165_v44 = vld [vmem:[#allocation5 + $0x18] sm:$0xff] }
 0xbee   :  { %v13298_v42 = vpop.eup %13297 }
 0xbef   :  { %v13300_v38 = vpop.eup %13299  ;;  %v4618_v48 = vmul.f32 %v13298_v42, %v13296_v41 }
 0xbf0   :  { %v4617_v18 = vmul.f32 %v13300_v38, %v4616_v47 }
 0xbf2   :  { %v4619_v21 = vadd.f32 %v4618_v48, %v4617_v18 }
 0xbf4   :  { %13303 = vtanh.f32 %v4619_v21  ;;  %4622 = vst.msk [vmem:[#allocation8] sm:$0xff] %vm297_vm0, %v4619_v21 }
 0xbf6   :  { %v13302_v22 = vpop.eup %13301 }
 0xbfb   :  { %v4936_v43 = vld [vmem:[#allocation8] sm:$0xff] }
 0xbfe   :  { %v13304_v26 = vpop.eup %13303 }
 0xbff   :  { %v4621_v30 = vmul.f32 %v13304_v26, %v13302_v22 }
 0xc01   :  { %4623 = vst.msk [vmem:[#allocation7] sm:$0xff] %vm297_vm0, %v4621_v30  ;;  %4624 = vst.msk [vmem:[#allocation6 + $0x8] sm:$0xff] %vm297_vm0, %v4621_v30  ;;  %v5093_v30 = vld [vmem:[#allocation4 + $0x18] sm:$0xff] }
 0xc08   :  { %v4625_v50 = vld [vmem:[#allocation7] sm:$0xff] }
 0xc09   :  { %11755 = vmatmul.mubr.msk.f32.vlgmr.msra.gmra.mrb[82].mxu1 %vm297_vm0, %v4625_v50  ;;  %11766 = vmatmul.mubr.msk.f32.vlgmr.msra.gmra.mrb[70].mxu0 %vm297_vm0, %v4625_v50 }
 0xc0a   :  { %12770 = vmatpush3.bf16.msra.mxu1 %v14596_v46  ;;  %12776 = vmatpush3.bf16.msra.mxu0 %v14564_v40 }
 0xc0b   :  { %12771 = vmatprep.subr.bf16.mxu1 %v13739_v28  ;;  %12777 = vmatprep.subr.bf16.mxu0 %v13739_v28 }
 0xc0c   :  { %11776 = vmatprep.mubr.msk.f32.mxu1 %vm13740_vm2, %v13738_v0  ;;  %11787 = vmatprep.mubr.msk.f32.mxu0 %vm13740_vm2, %v13738_v0 }
 0xc0e   :  { %12773 = vmatpush3.bf16.msra.mxu1 %v14611_v17  ;;  %12779 = vmatpush3.bf16.msra.mxu0 %v14587_v45 }
 0xc0f   :  { %12780 = vmatprep.subr.bf16.mxu1 %v13739_v28  ;;  %12786 = vmatprep.subr.bf16.mxu0 %v13739_v28 }
 0xc11   :  { %11777 = vmatmul.mubr.msk.f32.vlgmr.msra.gmra.mrb[84].mxu1 %vm297_vm0, %v4625_v50  ;;  %11788 = vmatmul.mubr.msk.f32.vlgmr.msra.gmra.mrb[72].mxu0 %vm297_vm0, %v4625_v50 }
 0xc12   :  { %12782 = vmatpush3.bf16.msra.mxu1 %v14465_v49  ;;  %12788 = vmatpush3.bf16.msra.mxu0 %v14524_v15 }
 0xc13   :  { %12783 = vmatprep.subr.bf16.mxu1 %v13739_v28  ;;  %12789 = vmatprep.subr.bf16.mxu0 %v13739_v28 }
 0xc14   :  { %11798 = vmatprep.mubr.msk.f32.mxu1 %vm13740_vm2, %v13738_v0  ;;  %11809 = vmatprep.mubr.msk.f32.mxu0 %vm13740_vm2, %v13738_v0 }
 0xc16   :  { %12785 = vmatpush3.bf16.msra.mxu1 %v14475_v53  ;;  %12791 = vmatpush3.bf16.msra.mxu0 %v14543_v29 }
 0xc17   :  { %12792 = vmatprep.subr.bf16.mxu1 %v13739_v28  ;;  %12798 = vmatprep.subr.bf16.mxu0 %v13739_v28 }
 0xcdc   :  { %v4696_v52 = vpop.f32.mrb[82].mxu1  ;;  %v4768_v55 = vpop.f32.mrb[70].mxu0 }
 0xcdd   :  { %v4700_v56 = vadd.f32 %v4696_v52, %v4626_v51  ;;  %v4772_v58 = vadd.f32 %v4768_v55, %v4701_v54  ;;  %v11756_v59 = vpop.f32.mrb[83].mxu1  ;;  %v11767_v60 = vpop.f32.mrb[71].mxu0 }
 0xcdf   :  { %v10352_v61 = vmul.f32 -1.442695, %v4700_v56  ;;  %v10353_v57 = vmul.f32 -1.442695, %v4772_v58 }
 0xce1   :  { %13305 = vpow2.f32 %v10352_v61 }
 0xce2   :  { %13307 = vpow2.f32 %v10353_v57 }
 0xce4   :  { %v4840_v62 = vpop.f32.mrb[84].mxu1  ;;  %v4912_v1 = vpop.f32.mrb[72].mxu0 }
 0xce5   :  { %v4916_v27 = vadd.f32 %v4912_v1, %v4845_v63  ;;  %v11778_v37 = vpop.f32.mrb[85].mxu1  ;;  %v11789_v2 = vpop.f32.mrb[73].mxu0  ;;  %v4844_v5 = vadd.f32 %v4840_v62, %v4773_v3 }
 0xce7   :  { %v10354_v4 = vmul.f32 -1.442695, %v4916_v27 }
 0xce9   :  { %13309 = vpow2.f32 %v10354_v4 }
 0xcea   :  { %13311 = vtanh.f32 %v4844_v5  ;;  %v5266_v5 = vld [vmem:[#allocation2 + $0x20] sm:$0xff] }
 0xceb   :  { %v13306_v6 = vpop.eup %13305 }
 0xcec   :  { %v13308_v7 = vpop.eup %13307  ;;  %v4920_v8 = vadd.f32 1.0, %v13306_v6 }
 0xced   :  { %v4926_v9 = vadd.f32 1.0, %v13308_v7  ;;  %v5341_v7 = vld [vmem:[#allocation3 + $0x20] sm:$0xff] }
 0xcee   :  { %13313 = vrcp.f32 %v4920_v8 }
 0xcef   :  { %13315 = vrcp.f32 %v4926_v9 }
 0xcf3   :  { %v13310_v10 = vpop.eup %13309 }
 0xcf4   :  { %v13312_v31 = vpop.eup %13311  ;;  %v4933_v14 = vadd.f32 1.0, %v13310_v10 }
 0xcf6   :  { %13317 = vrcp.f32 %v4933_v14  ;;  %v5485_v14 = vld [vmem:[#allocation5 + $0x20] sm:$0xff] }
 0xcf8   :  { %v13314_v11 = vpop.eup %13313 }
 0xcf9   :  { %v13316_v12 = vpop.eup %13315  ;;  %v4938_v13 = vmul.f32 %v13314_v11, %v13312_v31 }
 0xcfa   :  { %v4937_v16 = vmul.f32 %v13316_v12, %v4936_v43 }
 0xcfc   :  { %v4939_v19 = vadd.f32 %v4938_v13, %v4937_v16 }
 0xcfe   :  { %13319 = vtanh.f32 %v4939_v19  ;;  %4942 = vst.msk [vmem:[#allocation8] sm:$0xff] %vm297_vm0, %v4939_v19 }
 0xd00   :  { %v13318_v20 = vpop.eup %13317 }
 0xd05   :  { %v5256_v57 = vld [vmem:[#allocation8] sm:$0xff] }
 0xd08   :  { %v13320_v23 = vpop.eup %13319 }
 0xd09   :  { %v4941_v24 = vmul.f32 %v13320_v23, %v13318_v20 }
 0xd0b   :  { %4943 = vst.msk [vmem:[#allocation7] sm:$0xff] %vm297_vm0, %v4941_v24  ;;  %4944 = vst.msk [vmem:[#allocation6 + $0x10] sm:$0xff] %vm297_vm0, %v4941_v24  ;;  %v5413_v24 = vld [vmem:[#allocation4 + $0x20] sm:$0xff] }
 0xd12   :  { %v4945_v25 = vld [vmem:[#allocation7] sm:$0xff] }
 0xd13   :  { %11799 = vmatmul.mubr.msk.f32.vlgmr.msra.gmra.mrb[86].mxu1 %vm297_vm0, %v4945_v25  ;;  %11810 = vmatmul.mubr.msk.f32.vlgmr.msra.gmra.mrb[74].mxu0 %vm297_vm0, %v4945_v25 }
 0xd14   :  { %12794 = vmatpush3.bf16.msra.mxu1 %v14596_v46  ;;  %12800 = vmatpush3.bf16.msra.mxu0 %v14564_v40 }
 0xd15   :  { %12795 = vmatprep.subr.bf16.mxu1 %v13739_v28  ;;  %12801 = vmatprep.subr.bf16.mxu0 %v13739_v28 }
 0xd16   :  { %11820 = vmatprep.mubr.msk.f32.mxu1 %vm13740_vm2, %v13738_v0  ;;  %11831 = vmatprep.mubr.msk.f32.mxu0 %vm13740_vm2, %v13738_v0 }
 0xd18   :  { %12797 = vmatpush3.bf16.msra.mxu1 %v14611_v17  ;;  %12803 = vmatpush3.bf16.msra.mxu0 %v14587_v45 }
 0xd19   :  { %12804 = vmatprep.subr.bf16.mxu1 %v13739_v28  ;;  %12810 = vmatprep.subr.bf16.mxu0 %v13739_v28 }
 0xd1b   :  { %11821 = vmatmul.mubr.msk.f32.vlgmr.msra.gmra.mrb[88].mxu1 %vm297_vm0, %v4945_v25  ;;  %11832 = vmatmul.mubr.msk.f32.vlgmr.msra.gmra.mrb[76].mxu0 %vm297_vm0, %v4945_v25 }
 0xd1c   :  { %12806 = vmatpush3.bf16.msra.mxu1 %v14465_v49  ;;  %12812 = vmatpush3.bf16.msra.mxu0 %v14524_v15 }
 0xd1d   :  { %12807 = vmatprep.subr.bf16.mxu1 %v13739_v28  ;;  %12813 = vmatprep.subr.bf16.mxu0 %v13739_v28 }
 0xd1e   :  { %11842 = vmatprep.mubr.msk.f32.mxu1 %vm13740_vm2, %v13738_v0  ;;  %11853 = vmatprep.mubr.msk.f32.mxu0 %vm13740_vm2, %v13738_v0 }
 0xd20   :  { %12809 = vmatpush3.bf16.msra.mxu1 %v14475_v53  ;;  %12815 = vmatpush3.bf16.msra.mxu0 %v14543_v29 }
 0xd21   :  { %12816 = vmatprep.subr.bf16.mxu1 %v13739_v28  ;;  %12822 = vmatprep.subr.bf16.mxu0 %v13739_v28 }
 0xde6   :  { %v5016_v33 = vpop.f32.mrb[86].mxu1  ;;  %v5088_v35 = vpop.f32.mrb[74].mxu0 }
 0xde7   :  { %v5020_v36 = vadd.f32 %v5016_v33, %v4946_v32  ;;  %v5092_v39 = vadd.f32 %v5088_v35, %v5021_v34  ;;  %v11800_v41 = vpop.f32.mrb[87].mxu1  ;;  %v11811_v42 = vpop.f32.mrb[75].mxu0 }
 0xde9   :  { %v10359_v38 = vmul.f32 -1.442695, %v5020_v36  ;;  %v10360_v47 = vmul.f32 -1.442695, %v5092_v39 }
 0xdeb   :  { %13321 = vpow2.f32 %v10359_v38 }
 0xdec   :  { %13323 = vpow2.f32 %v10360_v47 }
 0xdee   :  { %v5160_v48 = vpop.f32.mrb[88].mxu1  ;;  %v5232_v18 = vpop.f32.mrb[76].mxu0 }
 0xdef   :  { %v5236_v21 = vadd.f32 %v5232_v18, %v5165_v44  ;;  %v11822_v22 = vpop.f32.mrb[89].mxu1  ;;  %v11833_v26 = vpop.f32.mrb[77].mxu0  ;;  %v5164_v51 = vadd.f32 %v5160_v48, %v5093_v30 }
 0xdf1   :  { %v10361_v50 = vmul.f32 -1.442695, %v5236_v21 }
 0xdf3   :  { %13325 = vpow2.f32 %v10361_v50 }
 0xdf4   :  { %13327 = vtanh.f32 %v5164_v51  ;;  %v5586_v51 = vld [vmem:[#allocation2 + $0x28] sm:$0xff] }
 0xdf5   :  { %v13322_v52 = vpop.eup %13321 }
 0xdf6   :  { %v13324_v54 = vpop.eup %13323  ;;  %v5240_v55 = vadd.f32 1.0, %v13322_v52 }
 0xdf7   :  { %v5246_v56 = vadd.f32 1.0, %v13324_v54  ;;  %v5661_v54 = vld [vmem:[#allocation3 + $0x28] sm:$0xff] }
 0xdf8   :  { %13329 = vrcp.f32 %v5240_v55 }
 0xdf9   :  { %13331 = vrcp.f32 %v5246_v56 }
 0xdfd   :  { %v13326_v58 = vpop.eup %13325 }
 0xdfe   :  { %v13328_v59 = vpop.eup %13327  ;;  %v5253_v63 = vadd.f32 1.0, %v13326_v58 }
 0xe00   :  { %13333 = vrcp.f32 %v5253_v63  ;;  %v5805_v63 = vld [vmem:[#allocation5 + $0x28] sm:$0xff] }
 0xe02   :  { %v13330_v60 = vpop.eup %13329 }
 0xe03   :  { %v13332_v61 = vpop.eup %13331  ;;  %v5258_v62 = vmul.f32 %v13330_v60, %v13328_v59 }
 0xe04   :  { %v5257_v1 = vmul.f32 %v13332_v61, %v5256_v57 }
 0xe06   :  { %v5259_v27 = vadd.f32 %v5258_v62, %v5257_v1 }
 0xe08   :  { %13335 = vtanh.f32 %v5259_v27  ;;  %5262 = vst.msk [vmem:[#allocation8] sm:$0xff] %vm297_vm0, %v5259_v27 }
 0xe0a   :  { %v13334_v37 = vpop.eup %13333 }
 0xe0f   :  { %v5576_v47 = vld [vmem:[#allocation8] sm:$0xff] }
 0xe12   :  { %v13336_v2 = vpop.eup %13335 }
 0xe13   :  { %v5261_v3 = vmul.f32 %v13336_v2, %v13334_v37 }
 0xe15   :  { %5263 = vst.msk [vmem:[#allocation7] sm:$0xff] %vm297_vm0, %v5261_v3  ;;  %5264 = vst.msk [vmem:[#allocation6 + $0x18] sm:$0xff] %vm297_vm0, %v5261_v3  ;;  %v5733_v3 = vld [vmem:[#allocation4 + $0x28] sm:$0xff] }
 0xe1c   :  { %v5265_v4 = vld [vmem:[#allocation7] sm:$0xff] }
 0xe1d   :  { %11843 = vmatmul.mubr.msk.f32.vlgmr.msra.gmra.mrb[90].mxu1 %vm297_vm0, %v5265_v4  ;;  %11854 = vmatmul.mubr.msk.f32.vlgmr.msra.gmra.mrb[78].mxu0 %vm297_vm0, %v5265_v4 }
 0xe1e   :  { %12818 = vmatpush3.bf16.msra.mxu1 %v14596_v46  ;;  %12824 = vmatpush3.bf16.msra.mxu0 %v14564_v40 }
 0xe1f   :  { %12819 = vmatprep.subr.bf16.mxu1 %v13739_v28  ;;  %12825 = vmatprep.subr.bf16.mxu0 %v13739_v28 }
 0xe20   :  { %11864 = vmatprep.mubr.msk.f32.mxu1 %vm13740_vm2, %v13738_v0  ;;  %11875 = vmatprep.mubr.msk.f32.mxu0 %vm13740_vm2, %v13738_v0 }
 0xe22   :  { %12821 = vmatpush3.bf16.msra.mxu1 %v14611_v17  ;;  %12827 = vmatpush3.bf16.msra.mxu0 %v14587_v45 }
 0xe23   :  { %12828 = vmatprep.subr.bf16.mxu1 %v13739_v28  ;;  %12834 = vmatprep.subr.bf16.mxu0 %v13739_v28 }
 0xe25   :  { %11865 = vmatmul.mubr.msk.f32.vlgmr.msra.gmra.mrb[92].mxu1 %vm297_vm0, %v5265_v4  ;;  %11876 = vmatmul.mubr.msk.f32.vlgmr.msra.gmra.mrb[80].mxu0 %vm297_vm0, %v5265_v4 }
 0xe26   :  { %12830 = vmatpush3.bf16.msra.mxu1 %v14465_v49  ;;  %12836 = vmatpush3.bf16.msra.mxu0 %v14524_v15 }
 0xe27   :  { %12831 = vmatprep.subr.bf16.mxu1 %v13739_v28  ;;  %12837 = vmatprep.subr.bf16.mxu0 %v13739_v28 }
 0xe28   :  { %11886 = vmatprep.mubr.msk.f32.mxu1 %vm13740_vm2, %v13738_v0  ;;  %11897 = vmatprep.mubr.msk.f32.mxu0 %vm13740_vm2, %v13738_v0 }
 0xe2a   :  { %12833 = vmatpush3.bf16.msra.mxu1 %v14475_v53  ;;  %12839 = vmatpush3.bf16.msra.mxu0 %v14543_v29 }
 0xe2b   :  { %12840 = vmatprep.subr.bf16.mxu1 %v13739_v28  ;;  %12846 = vmatprep.subr.bf16.mxu0 %v13739_v28 }
 0xef0   :  { %v5336_v6 = vpop.f32.mrb[90].mxu1  ;;  %v5408_v8 = vpop.f32.mrb[78].mxu0 }
 0xef1   :  { %v5340_v9 = vadd.f32 %v5336_v6, %v5266_v5  ;;  %v5412_v10 = vadd.f32 %v5408_v8, %v5341_v7  ;;  %v11844_v31 = vpop.f32.mrb[91].mxu1  ;;  %v11855_v11 = vpop.f32.mrb[79].mxu0 }
 0xef3   :  { %v10366_v12 = vmul.f32 -1.442695, %v5340_v9  ;;  %v10367_v43 = vmul.f32 -1.442695, %v5412_v10 }
 0xef5   :  { %13337 = vpow2.f32 %v10366_v12 }
 0xef6   :  { %13339 = vpow2.f32 %v10367_v43 }
 0xef8   :  { %v5480_v13 = vpop.f32.mrb[92].mxu1  ;;  %v5552_v16 = vpop.f32.mrb[80].mxu0 }
 0xef9   :  { %v5556_v19 = vadd.f32 %v5552_v16, %v5485_v14  ;;  %v11866_v20 = vpop.f32.mrb[93].mxu1  ;;  %v11877_v23 = vpop.f32.mrb[81].mxu0  ;;  %v5484_v32 = vadd.f32 %v5480_v13, %v5413_v24 }
 0xefb   :  { %v10368_v25 = vmul.f32 -1.442695, %v5556_v19 }
 0xefd   :  { %13341 = vpow2.f32 %v10368_v25 }
 0xefe   :  { %13343 = vtanh.f32 %v5484_v32  ;;  %v5981_v32 = vld [vmem:[#allocation3 + $0x30] sm:$0xff] }
 0xeff   :  { %v13338_v33 = vpop.eup %13337 }
 0xf00   :  { %v13340_v34 = vpop.eup %13339  ;;  %v5560_v35 = vadd.f32 1.0, %v13338_v33 }
 0xf01   :  { %v5566_v36 = vadd.f32 1.0, %v13340_v34 }
 0xf02   :  { %13345 = vrcp.f32 %v5560_v35 }
 0xf03   :  { %13347 = vrcp.f32 %v5566_v36 }
 0xf07   :  { %v13342_v39 = vpop.eup %13341 }
 0xf08   :  { %v13344_v41 = vpop.eup %13343  ;;  %v5573_v44 = vadd.f32 1.0, %v13342_v39 }
 0xf0a   :  { %13349 = vrcp.f32 %v5573_v44 }
 0xf0c   :  { %v13346_v42 = vpop.eup %13345 }
 0xf0d   :  { %v13348_v38 = vpop.eup %13347  ;;  %v5578_v48 = vmul.f32 %v13346_v42, %v13344_v41 }
 0xf0e   :  { %v5577_v18 = vmul.f32 %v13348_v38, %v5576_v47 }
 0xf10   :  { %v5579_v21 = vadd.f32 %v5578_v48, %v5577_v18  ;;  %v6053_v18 = vld [vmem:[#allocation4 + $0x30] sm:$0xff] }
 0xf12   :  { %13351 = vtanh.f32 %v5579_v21  ;;  %5582 = vst.msk [vmem:[#allocation8] sm:$0xff] %vm297_vm0, %v5579_v21 }
 0xf14   :  { %v13350_v22 = vpop.eup %13349 }
 0xf19   :  { %v5896_v43 = vld [vmem:[#allocation8] sm:$0xff] }
 0xf1c   :  { %v13352_v26 = vpop.eup %13351 }
 0xf1d   :  { %v5581_v30 = vmul.f32 %v13352_v26, %v13350_v22 }
 0xf1f   :  { %5583 = vst.msk [vmem:[#allocation7] sm:$0xff] %vm297_vm0, %v5581_v30  ;;  %5584 = vst.msk [vmem:[#allocation6 + $0x20] sm:$0xff] %vm297_vm0, %v5581_v30 }
 0xf26   :  { %v5585_v50 = vld [vmem:[#allocation7] sm:$0xff] }
 0xf27   :  { %11887 = vmatmul.mubr.msk.f32.vlgmr.msra.gmra.mrb[94].mxu1 %vm297_vm0, %v5585_v50  ;;  %11898 = vmatmul.mubr.msk.f32.vlgmr.msra.gmra.mrb[82].mxu0 %vm297_vm0, %v5585_v50 }
 0xf28   :  { %12842 = vmatpush3.bf16.msra.mxu1 %v14596_v46  ;;  %12848 = vmatpush3.bf16.msra.mxu0 %v14564_v40 }
 0xf29   :  { %12843 = vmatprep.subr.bf16.mxu1 %v13739_v28  ;;  %12849 = vmatprep.subr.bf16.mxu0 %v13739_v28 }
 0xf2a   :  { %11908 = vmatprep.mubr.msk.f32.mxu1 %vm13740_vm2, %v13738_v0  ;;  %11919 = vmatprep.mubr.msk.f32.mxu0 %vm13740_vm2, %v13738_v0 }
 0xf2c   :  { %12845 = vmatpush3.bf16.msra.mxu1 %v14611_v17  ;;  %12851 = vmatpush3.bf16.msra.mxu0 %v14587_v45 }
 0xf2d   :  { %12852 = vmatprep.subr.bf16.mxu1 %v13739_v28  ;;  %12858 = vmatprep.subr.bf16.mxu0 %v13739_v28 }
 0xf2f   :  { %11909 = vmatmul.mubr.msk.f32.vlgmr.msra.gmra.mrb[96].mxu1 %vm297_vm0, %v5585_v50  ;;  %11920 = vmatmul.mubr.msk.f32.vlgmr.msra.gmra.mrb[84].mxu0 %vm297_vm0, %v5585_v50 }
 0xf30   :  { %12854 = vmatpush3.bf16.msra.mxu1 %v14465_v49  ;;  %12860 = vmatpush3.bf16.msra.mxu0 %v14524_v15 }
 0xf31   :  { %12855 = vmatprep.subr.bf16.mxu1 %v13739_v28  ;;  %12861 = vmatprep.subr.bf16.mxu0 %v13739_v28 }
 0xf32   :  { %11930 = vmatprep.mubr.msk.f32.mxu1 %vm13740_vm2, %v13738_v0  ;;  %11941 = vmatprep.mubr.msk.f32.mxu0 %vm13740_vm2, %v13738_v0 }
 0xf34   :  { %12857 = vmatpush3.bf16.msra.mxu1 %v14475_v53  ;;  %12863 = vmatpush3.bf16.msra.mxu0 %v14543_v29 }
 0xf35   :  { %12864 = vmatprep.subr.bf16.mxu1 %v13739_v28  ;;  %12870 = vmatprep.subr.bf16.mxu0 %v13739_v28 }
 0xffa   :  { %v5656_v52 = vpop.f32.mrb[94].mxu1  ;;  %v5728_v55 = vpop.f32.mrb[82].mxu0 }
 0xffb   :  { %v5660_v56 = vadd.f32 %v5656_v52, %v5586_v51  ;;  %v5732_v58 = vadd.f32 %v5728_v55, %v5661_v54  ;;  %v11888_v59 = vpop.f32.mrb[95].mxu1  ;;  %v11899_v60 = vpop.f32.mrb[83].mxu0 }
 0xffd   :  { %v10373_v61 = vmul.f32 -1.442695, %v5660_v56  ;;  %v10374_v57 = vmul.f32 -1.442695, %v5732_v58 }
 0xfff   :  { %13353 = vpow2.f32 %v10373_v61 }
0x1000   :  { %13355 = vpow2.f32 %v10374_v57 }
0x1002   :  { %v5800_v62 = vpop.f32.mrb[96].mxu1  ;;  %v5872_v1 = vpop.f32.mrb[84].mxu0 }
0x1003   :  { %v5876_v27 = vadd.f32 %v5872_v1, %v5805_v63  ;;  %v11910_v37 = vpop.f32.mrb[97].mxu1  ;;  %v11921_v2 = vpop.f32.mrb[85].mxu0  ;;  %v5804_v5 = vadd.f32 %v5800_v62, %v5733_v3 }
0x1004   :  { %v6553_v37 = vld [vmem:[%s15381_s9] sm:$0xff]  ;;  %v6554_v2 = vld [vmem:[%s15381_s9 + $0x8] sm:$0xff] }
0x1005   :  { %v10375_v4 = vmul.f32 -1.442695, %v5876_v27  ;;  %v12900_v3 = vpack.c.bf16 %v6554_v2, %v6553_v37 }
0x1007   :  { %13357 = vpow2.f32 %v10375_v4  ;;  %v6555_v4 = vld [vmem:[%s15381_s9 + $0x10] sm:$0xff] }
0x1008   :  { %13359 = vtanh.f32 %v5804_v5  ;;  %v6545_v5 = vld [vmem:[#allocation6] sm:$0xff] }
0x1009   :  { %v13354_v6 = vpop.eup %13353 }
0x100a   :  { %v13356_v7 = vpop.eup %13355  ;;  %v5880_v8 = vadd.f32 1.0, %v13354_v6  ;;  %v6546_v6 = vld [vmem:[#allocation6 + $0x8] sm:$0xff] }
0x100b   :  { %v5886_v9 = vadd.f32 1.0, %v13356_v7  ;;  %v6547_v7 = vld [vmem:[#allocation6 + $0x10] sm:$0xff] }
0x100c   :  { %13361 = vrcp.f32 %v5880_v8 }
0x100d   :  { %13363 = vrcp.f32 %v5886_v9 }
0x1011   :  { %v13358_v10 = vpop.eup %13357 }
0x1012   :  { %v13360_v31 = vpop.eup %13359  ;;  %v5893_v14 = vadd.f32 1.0, %v13358_v10  ;;  %v6693_v10 = vld [vmem:[#allocation18] sm:$0xff] }
0x1014   :  { %13365 = vrcp.f32 %v5893_v14  ;;  %v6226_v14 = vld [vmem:[#allocation2 + $0x38] sm:$0xff] }
0x1016   :  { %v13362_v11 = vpop.eup %13361 }
0x1017   :  { %v13364_v12 = vpop.eup %13363  ;;  %v5898_v13 = vmul.f32 %v13362_v11, %v13360_v31  ;;  %v6694_v31 = vld [vmem:[#allocation18 + $0x8] sm:$0xff] }
0x1018   :  { %v5897_v16 = vmul.f32 %v13364_v12, %v5896_v43  ;;  %v12908_v11 = vpack.c.bf16 %v6694_v31, %v6693_v10  ;;  %v6964_v12 = vld [vmem:[#allocation18 + $0x20] sm:$0xff]  ;;  %v6965_v43 = vld [vmem:[#allocation18 + $0x28] sm:$0xff]  ;;  %v7214_v10 = vld [vmem:[#allocation20 + $0x18] sm:$0xff] }
0x101a   :  { %v5899_v19 = vadd.f32 %v5898_v13, %v5897_v16  ;;  %v12916_v13 = vpack.c.bf16 %v6965_v43, %v6964_v12  ;;  %v7089_v12 = vld [vmem:[#allocation18 + $0x38] sm:$0xff] }
0x101c   :  { %13367 = vtanh.f32 %v5899_v19  ;;  %5902 = vst.msk [vmem:[#allocation8] sm:$0xff] %vm297_vm0, %v5899_v19  ;;  %v6301_v19 = vld [vmem:[#allocation3 + $0x38] sm:$0xff] }
0x101e   :  { %v13366_v20 = vpop.eup %13365 }
0x1023   :  { %v6216_v58 = vld [vmem:[#allocation8] sm:$0xff] }
0x1026   :  { %v13368_v23 = vpop.eup %13367 }
0x1027   :  { %v5901_v24 = vmul.f32 %v13368_v23, %v13366_v20 }
0x1029   :  { %5903 = vst.msk [vmem:[#allocation7] sm:$0xff] %vm297_vm0, %v5901_v24  ;;  %5904 = vst.msk [vmem:[#allocation6 + $0x28] sm:$0xff] %vm297_vm0, %v5901_v24 }
0x1030   :  { %v5905_v25 = vld [vmem:[#allocation7] sm:$0xff]  ;;  %v6550_v8 = vld [vmem:[#allocation6 + $0x28] sm:$0xff] }
0x1031   :  { %11931 = vmatmul.mubr.msk.f32.vlgmr.msra.gmra.mrb[98].mxu1 %vm297_vm0, %v5905_v25  ;;  %11942 = vmatmul.mubr.msk.f32.vlgmr.msra.gmra.mrb[86].mxu0 %vm297_vm0, %v5905_v25 }
0x1032   :  { %12866 = vmatpush3.bf16.msra.mxu1 %v14596_v46  ;;  %12872 = vmatpush3.bf16.msra.mxu0 %v14564_v40 }
0x1033   :  { %12867 = vmatprep.subr.bf16.mxu1 %v13739_v28  ;;  %12873 = vmatprep.subr.bf16.mxu0 %v13739_v28 }
0x1034   :  { %11952 = vmatprep.mubr.msk.f32.mxu1 %vm13740_vm2, %v13738_v0  ;;  %11963 = vmatprep.mubr.msk.f32.mxu0 %vm13740_vm2, %v13738_v0 }
0x1036   :  { %12869 = vmatpush3.bf16.msra.mxu1 %v14611_v17  ;;  %12875 = vmatpush3.bf16.msra.mxu0 %v14587_v45 }
0x1037   :  { %12876 = vmatprep.subr.bf16.mxu1 %v13739_v28  ;;  %12882 = vmatprep.subr.bf16.mxu0 %v13739_v28 }
0x1039   :  { %11953 = vmatmul.mubr.msk.f32.vlgmr.msra.gmra.mrb[100].mxu1 %vm297_vm0, %v5905_v25  ;;  %11964 = vmatmul.mubr.msk.f32.vlgmr.msra.gmra.mrb[88].mxu0 %vm297_vm0, %v5905_v25 }
0x103a   :  { %12878 = vmatpush3.bf16.msra.mxu1 %v14465_v49  ;;  %12884 = vmatpush3.bf16.msra.mxu0 %v14524_v15  ;;  %v5906_v49 = vld [vmem:[#allocation2 + $0x30] sm:$0xff] }
0x103b   :  { %12879 = vmatprep.subr.bf16.mxu1 %v13739_v28  ;;  %12885 = vmatprep.subr.bf16.mxu0 %v13739_v28 }
0x103c   :  { %11974 = vmatprep.mubr.msk.f32.mxu1 %vm13740_vm2, %v13738_v0  ;;  %11985 = vmatprep.mubr.msk.f32.mxu0 %vm13740_vm2, %v13738_v0 }
0x103e   :  { %12881 = vmatpush3.bf16.msra.mxu1 %v14475_v53  ;;  %12887 = vmatpush3.bf16.msra.mxu0 %v14543_v29  ;;  %v6125_v53 = vld [vmem:[#allocation5 + $0x30] sm:$0xff] }
0x103f   :  { %12888 = vmatprep.subr.bf16.mxu1 %v13739_v28  ;;  %12894 = vmatprep.subr.bf16.mxu0 %v13739_v28 }
0x1104   :  { %v5976_v15 = vpop.f32.mrb[98].mxu1  ;;  %v6048_v33 = vpop.f32.mrb[86].mxu0 }
0x1105   :  { %v5980_v34 = vadd.f32 %v5976_v15, %v5906_v49  ;;  %v6052_v35 = vadd.f32 %v6048_v33, %v5981_v32  ;;  %v11932_v36 = vpop.f32.mrb[99].mxu1  ;;  %v11943_v39 = vpop.f32.mrb[87].mxu0 }
0x1107   :  { %v10380_v41 = vmul.f32 -1.442695, %v5980_v34  ;;  %v10381_v42 = vmul.f32 -1.442695, %v6052_v35  ;;  %v6445_v34 = vld [vmem:[#allocation5 + $0x38] sm:$0xff] }
0x1109   :  { %13369 = vpow2.f32 %v10380_v41 }
0x110a   :  { %13371 = vpow2.f32 %v10381_v42  ;;  %v6373_v42 = vld [vmem:[#allocation4 + $0x38] sm:$0xff] }
0x110c   :  { %v6120_v38 = vpop.f32.mrb[100].mxu1  ;;  %v6192_v47 = vpop.f32.mrb[88].mxu0 }
0x110d   :  { %v6196_v29 = vadd.f32 %v6192_v47, %v6125_v53  ;;  %v11954_v48 = vpop.f32.mrb[101].mxu1  ;;  %v11965_v44 = vpop.f32.mrb[89].mxu0  ;;  %v6124_v22 = vadd.f32 %v6120_v38, %v6053_v18 }
0x110f   :  { %v10382_v21 = vmul.f32 -1.442695, %v6196_v29  ;;  %v14891_v29 = vld [vmem:[#allocation17] ss:$0 sm:$0xff] }
0x1111   :  { %13373 = vpow2.f32 %v10382_v21 }
0x1112   :  { %13375 = vtanh.f32 %v6124_v22 }
0x1113   :  { %v13370_v26 = vpop.eup %13369 }
0x1114   :  { %v13372_v30 = vpop.eup %13371  ;;  %v6200_v50 = vadd.f32 1.0, %v13370_v26 }
0x1115   :  { %v6206_v51 = vadd.f32 1.0, %v13372_v30 }
0x1116   :  { %13377 = vrcp.f32 %v6200_v50 }
0x1117   :  { %13379 = vrcp.f32 %v6206_v51 }
0x111b   :  { %v13374_v52 = vpop.eup %13373 }
0x111c   :  { %v13376_v54 = vpop.eup %13375  ;;  %v6213_v60 = vadd.f32 1.0, %v13374_v52 }
0x111e   :  { %13381 = vrcp.f32 %v6213_v60 }
0x1120   :  { %v13378_v55 = vpop.eup %13377 }
0x1121   :  { %v13380_v56 = vpop.eup %13379  ;;  %v6218_v59 = vmul.f32 %v13378_v55, %v13376_v54 }
0x1122   :  { %v6217_v61 = vmul.f32 %v13380_v56, %v6216_v58 }
0x1124   :  { %v6219_v57 = vadd.f32 %v6218_v59, %v6217_v61 }
0x1126   :  { %13383 = vtanh.f32 %v6219_v57  ;;  %6222 = vst.msk [vmem:[#allocation8] sm:$0xff] %vm297_vm0, %v6219_v57 }
0x1128   :  { %v13382_v62 = vpop.eup %13381 }
0x1130   :  { %v13384_v63 = vpop.eup %13383 }
0x1131   :  { %v6221_v1 = vmul.f32 %v13384_v63, %v13382_v62  ;;  %v6536_v63 = vld [vmem:[#allocation8] sm:$0xff] }
0x1133   :  { %6223 = vst.msk [vmem:[#allocation7] sm:$0xff] %vm297_vm0, %v6221_v1  ;;  %6224 = vst.msk [vmem:[#allocation6 + $0x30] sm:$0xff] %vm297_vm0, %v6221_v1 }
0x113a   :  { %v6225_v27 = vld [vmem:[#allocation7] sm:$0xff]  ;;  %v6551_v9 = vld [vmem:[#allocation6 + $0x30] sm:$0xff] }
0x113b   :  { %11975 = vmatmul.mubr.msk.f32.vlgmr.msra.gmra.mrb[102].mxu1 %vm297_vm0, %v6225_v27  ;;  %11986 = vmatmul.mubr.msk.f32.vlgmr.msra.gmra.mrb[90].mxu0 %vm297_vm0, %v6225_v27 }
0x113c   :  { %12890 = vmatpush3.bf16.msra.mxu1 %v14596_v46  ;;  %12896 = vmatpush3.bf16.msra.mxu0 %v14564_v40  ;;  %v6556_v46 = vld [vmem:[%s15381_s9 + $0x18] sm:$0xff] }
0x113d   :  { %12891 = vmatprep.subr.bf16.mxu1 %v13739_v28  ;;  %12897 = vmatprep.subr.bf16.mxu0 %v13739_v28  ;;  %v12904_v40 = vpack.c.bf16 %v6556_v46, %v6555_v4 }
0x113e   :  { %11996 = vmatprep.mubr.msk.f32.mxu1 %vm13740_vm2, %v13738_v0  ;;  %12007 = vmatprep.mubr.msk.f32.mxu0 %vm13740_vm2, %v13738_v0 }
0x1140   :  { %12893 = vmatpush3.bf16.msra.mxu1 %v14611_v17  ;;  %12899 = vmatpush3.bf16.msra.mxu0 %v14587_v45  ;;  %v6548_v17 = vld [vmem:[#allocation6 + $0x18] sm:$0xff]  ;;  %v6549_v45 = vld [vmem:[#allocation6 + $0x20] sm:$0xff] }
0x1141   :  { %12901 = vmatprep.subr.bf16.mxu1 %v12900_v3  ;;  %12909 = vmatprep.subr.bf16.mxu0 %v12908_v11 }
0x1143   :  { %11997 = vmatmul.mubr.msk.f32.vlgmr.msra.gmra.mrb[104].mxu1 %vm297_vm0, %v6225_v27  ;;  %12008 = vmatmul.mubr.msk.f32.vlgmr.msra.gmra.mrb[92].mxu0 %vm297_vm0, %v6225_v27 }
0x1144   :  { %12903 = vmatpush3.bf16.msra.mxu1 %v12900_v3  ;;  %12018 = vmatprep.mubr.msk.f32.mxu1 %vm297_vm0, %v6545_v5  ;;  %v6840_v5 = vld [vmem:[#allocation18 + $0x10] sm:$0xff] }
0x1145   :  { %12905 = vmatprep.subr.bf16.mxu1 %v12904_v40  ;;  %12911 = vmatpush3.bf16.msra.mxu0 %v12908_v11  ;;  %v7088_v11 = vld [vmem:[#allocation18 + $0x30] sm:$0xff] }
0x1146   :  { %v12920_v43 = vpack.c.bf16 %v7089_v12, %v7088_v11  ;;  %v10409_v11 = vld [vmem:[%s15385_s13 + $0x1] ss:$0 sm:$0xff] }
0x1148   :  { %12907 = vmatpush3.bf16.msra.mxu1 %v12904_v40 }
0x1149   :  { %12917 = vmatprep.subr.bf16.mxu1 %v12916_v13 }
0x114b   :  { %12019 = vmatmul.mubr.msk.f32.vlgmr.msra.gmra.mrb[106].mxu1 %vm297_vm0, %v6546_v6  ;;  %v6841_v6 = vld [vmem:[#allocation18 + $0x18] sm:$0xff] }
0x114c   :  { %12021 = vmatprep.mubr.msk.f32.mxu1 %vm297_vm0, %v6547_v7  ;;  %12919 = vmatpush3.bf16.msra.mxu1 %v12916_v13  ;;  %v12912_v7 = vpack.c.bf16 %v6841_v6, %v6840_v5  ;;  %v14954_v13 = vld [vmem:[%s15385_s13] ss:$0 sm:$0xff] }
0x114d   :  { %12924 = vmatprep.subr.bf16.mxu1 %v13739_v28 }
0x114e   :  { %12913 = vmatprep.subr.bf16.mxu0 %v12912_v7 }
0x114f   :  { %12022 = vmatmul.mubr.msk.f32.gmra.mrb[108].mxu1 %vm297_vm0, %v6548_v17  ;;  %v7211_v17 = vld [vmem:[#allocation20] sm:$0xff] }
0x1150   :  { %12024 = vmatprep.mubr.msk.f32.mxu1 %vm297_vm0, %v6549_v45  ;;  %v7212_v45 = vld [vmem:[#allocation20 + $0x8] sm:$0xff] }
0x1153   :  { %12025 = vmatmul.mubr.msk.f32.gmra.mrb[110].mxu1 %vm297_vm0, %v6550_v8  ;;  %v14943_v8 = vpack.c.bf16 %v7212_v45, %v7211_v17  ;;  %v7224_v17 = vld [vmem:[#allocation20 + $0x58] sm:$0xff] }
0x1154   :  { %12027 = vmatprep.mubr.msk.f32.mxu1 %vm297_vm0, %v6551_v9  ;;  %v7213_v9 = vld [vmem:[#allocation20 + $0x10] sm:$0xff] }
0x1155   :  { %v14947_v31 = vpack.c.bf16 %v7214_v10, %v7213_v9 }
0x120e   :  { %v6296_v16 = vpop.f32.mrb[102].mxu1  ;;  %v6368_v20 = vpop.f32.mrb[90].mxu0 }
0x120f   :  { %v6300_v23 = vadd.f32 %v6296_v16, %v6226_v14  ;;  %v6372_v24 = vadd.f32 %v6368_v20, %v6301_v19  ;;  %v11976_v25 = vpop.f32.mrb[103].mxu1  ;;  %v11987_v49 = vpop.f32.mrb[91].mxu0 }
0x1211   :  { %v10387_v15 = vmul.f32 -1.442695, %v6300_v23  ;;  %v10388_v32 = vmul.f32 -1.442695, %v6372_v24 }
0x1213   :  { %13385 = vpow2.f32 %v10387_v15 }
0x1214   :  { %13387 = vpow2.f32 %v10388_v32 }
0x1216   :  { %v6440_v33 = vpop.f32.mrb[104].mxu1  ;;  %v6512_v35 = vpop.f32.mrb[92].mxu0 }
0x1217   :  { %v6516_v36 = vadd.f32 %v6512_v35, %v6445_v34  ;;  %v11998_v39 = vpop.f32.mrb[105].mxu1  ;;  %v12009_v41 = vpop.f32.mrb[93].mxu0  ;;  %v6444_v53 = vadd.f32 %v6440_v33, %v6373_v42 }
0x1218   :  { %v14974_v41 = vld [vmem:[%s15385_s13 + $0x2] ss:$0 sm:$0xff] }
0x1219   :  { %v10389_v38 = vmul.f32 -1.442695, %v6516_v36 }
0x121b   :  { %13389 = vpow2.f32 %v10389_v38 }
0x121c   :  { %13391 = vtanh.f32 %v6444_v53  ;;  %v7216_v53 = vld [vmem:[#allocation20 + $0x20] sm:$0xff] }
0x121d   :  { %v13386_v47 = vpop.eup %13385 }
0x121e   :  { %v13388_v48 = vpop.eup %13387  ;;  %v6520_v44 = vadd.f32 1.0, %v13386_v47  ;;  %v12020_v18 = vpop.f32.mrb[106].mxu1  ;;  %v7217_v47 = vld [vmem:[#allocation20 + $0x28] sm:$0xff] }
0x121f   :  { %v6526_v21 = vadd.f32 1.0, %v13388_v48  ;;  %v6654_v22 = vpop.f32.mrb[107].mxu1  ;;  %v14897_v30 = vadd.f32 %v12020_v18, %v14891_v29 }
0x1220   :  { %13393 = vrcp.f32 %v6520_v44  ;;  %v14894_v26 = vadd.f32 %v14891_v29, %v6654_v22 }
0x1221   :  { %13395 = vrcp.f32 %v6526_v21  ;;  %v14996_v21 = vpack.c.bf16 %v7217_v47, %v7216_v53 }
0x1222   :  { %v12023_v50 = vpop.f32.mrb[108].mxu1  ;;  %12034 = vmatprep.mubr.msk.f32.mxu0 %vm3454_vm3, %v14894_v26 }
0x1223   :  { %v6664_v51 = vpop.f32.mrb[109].mxu1  ;;  %12035 = vmatmul.mubr.msk.f32.vlgmr.msra.gmra.mrb[94].mxu0 %vm3454_vm3, %v14897_v30  ;;  %v14907_v54 = vadd.f32 %v12023_v50, %v14891_v29  ;;  %v7218_v50 = vld [vmem:[#allocation20 + $0x30] sm:$0xff] }
0x1224   :  { %v14904_v52 = vadd.f32 %v14891_v29, %v6664_v51  ;;  %12915 = vmatpush3.bf16.msra.mxu0 %v12912_v7  ;;  %v7219_v51 = vld [vmem:[#allocation20 + $0x38] sm:$0xff]  ;;  %v7223_v7 = vld [vmem:[#allocation20 + $0x50] sm:$0xff] }
0x1225   :  { %v13390_v58 = vpop.eup %13389  ;;  %12921 = vmatprep.subr.bf16.mxu0 %v12920_v43  ;;  %v15053_v45 = vpack.c.bf16 %v7224_v17, %v7223_v7 }
0x1226   :  { %v12026_v55 = vpop.f32.mrb[110].mxu1  ;;  %12037 = vmatprep.mubr.msk.f32.mxu0 %vm3454_vm3, %v14904_v52  ;;  %v13392_v60 = vpop.eup %13391  ;;  %v6533_v27 = vadd.f32 1.0, %v13390_v58 }
0x1227   :  { %v6674_v56 = vpop.f32.mrb[111].mxu1  ;;  %12038 = vmatmul.mubr.msk.f32.gmra.mrb[96].mxu0 %vm3454_vm3, %v14907_v54  ;;  %v14917_v61 = vadd.f32 %v12026_v55, %v14891_v29 }
0x1228   :  { %v14914_v59 = vadd.f32 %v14891_v29, %v6674_v56  ;;  %13397 = vrcp.f32 %v6533_v27 }
0x122a   :  { %v13394_v57 = vpop.eup %13393  ;;  %12040 = vmatprep.mubr.msk.f32.mxu0 %vm3454_vm3, %v14914_v59 }
0x122b   :  { %v13396_v62 = vpop.eup %13395  ;;  %v6538_v1 = vmul.f32 %v13394_v57, %v13392_v60  ;;  %12041 = vmatmul.mubr.msk.f32.gmra.mrb[98].mxu0 %vm3454_vm3, %v14917_v61  ;;  %v15009_v60 = vpack.c.bf16 %v7219_v51, %v7218_v50 }
0x122c   :  { %v6537_v37 = vmul.f32 %v13396_v62, %v6536_v63  ;;  %v7226_v62 = vld [vmem:[#allocation20 + $0x60] sm:$0xff]  ;;  %v7227_v63 = vld [vmem:[#allocation20 + $0x68] sm:$0xff] }
0x122e   :  { %v6539_v2 = vadd.f32 %v6538_v1, %v6537_v37 }
0x1230   :  { %13399 = vtanh.f32 %v6539_v2  ;;  %6542 = vst.msk [vmem:[#allocation8] sm:$0xff] %vm297_vm0, %v6539_v2  ;;  %v15024_v2 = vpack.c.bf16 %v7227_v63, %v7226_v62 }
0x1231   :  { %7231 = vst.msk [vmem:[#allocation8] sm:$0xff] %vm297_vm0, %v13738_v0 }
0x1232   :  { %v13398_v3 = vpop.eup %13397 }
0x123a   :  { %v13400_v4 = vpop.eup %13399 }
0x123b   :  { %v6541_v46 = vmul.f32 %v13400_v4, %v13398_v3  ;;  %v7228_v3 = vld [vmem:[#allocation20 + $0x70] sm:$0xff]  ;;  %v7229_v4 = vld [vmem:[#allocation20 + $0x78] sm:$0xff] }
0x123c   :  { %v15035_v5 = vpack.c.bf16 %v7229_v4, %v7228_v3 }
0x123d   :  { %6543 = vst.msk [vmem:[#allocation7] sm:$0xff] %vm297_vm0, %v6541_v46  ;;  %6544 = vst.msk [vmem:[#allocation6 + $0x38] sm:$0xff] %vm297_vm0, %v6541_v46  ;;  %v7221_v46 = vld [vmem:[#allocation20 + $0x40] sm:$0xff] }
0x123e   :  { %7230 = vst.msk [vmem:[#allocation7] sm:$0xff] %vm297_vm0, %v13738_v0 }
0x1244   :  { %v6552_v40 = vld [vmem:[#allocation6 + $0x38] sm:$0xff] }
0x1245   :  { %12028 = vmatmul.mubr.msk.f32.gmra.mrb[112].mxu1 %vm297_vm0, %v6552_v40  ;;  %v14993_v18 = vld [vmem:[#allocation7] sm:$0xff] }
0x1246   :  { %12066 = vmatprep.mubr.msk.f32.mxu1 %vm3454_vm3, %v14894_v26  ;;  %v7222_v40 = vld [vmem:[#allocation20 + $0x48] sm:$0xff] }
0x1247   :  { %v15044_v6 = vpack.c.bf16 %v7222_v40, %v7221_v46 }
0x1249   :  { %12067 = vmatmul.mubr.msk.f32.vlgmr.msra.gmra.mrb[114].mxu1 %vm3454_vm3, %v14897_v30 }
0x124a   :  { %12069 = vmatprep.mubr.msk.f32.mxu1 %vm3454_vm3, %v14904_v52  ;;  %12926 = vmatpush3.bf16.msra.mxu1 %v14943_v8 }
0x124b   :  { %12927 = vmatprep.subr.bf16.mxu1 %v13739_v28 }
0x124d   :  { %12070 = vmatmul.mubr.msk.f32.gmra.mrb[116].mxu1 %vm3454_vm3, %v14907_v54 }
0x124e   :  { %12072 = vmatprep.mubr.msk.f32.mxu1 %vm3454_vm3, %v14914_v59  ;;  %12929 = vmatpush3.bf16.msra.mxu1 %v14947_v31 }
0x124f   :  { %12930 = vmatprep.subr.bf16.mxu1 %v13739_v28 }
0x1251   :  { %12073 = vmatmul.mubr.msk.f32.gmra.mrb[118].mxu1 %vm3454_vm3, %v14917_v61 }
0x12f6   :  { %v12036_v14 = vpop.f32.mrb[94].mxu0 }
0x12f7   :  { %v6798_v16 = vadd.f32 %v12036_v14, %v14954_v13  ;;  %v6792_v19 = vpop.f32.mrb[95].mxu0 }
0x12f8   :  { %v6793_v20 = vadd.f32 %v14954_v13, %v6792_v19 }
0x12f9   :  { %6832 = vst.msk [vmem:[#allocation2 + $0x8] sm:$0xff] %vm297_vm0, %v6798_v16 }
0x12fa   :  { %6831 = vst.msk [vmem:[#allocation2] sm:$0xff] %vm297_vm0, %v6793_v20  ;;  %v12039_v23 = vpop.f32.mrb[96].mxu0 }
0x12fb   :  { %v6808_v24 = vadd.f32 %v12039_v23, %v14954_v13  ;;  %v6802_v25 = vpop.f32.mrb[97].mxu0 }
0x12fc   :  { %v6803_v49 = vadd.f32 %v14954_v13, %v6802_v25 }
0x12fd   :  { %6834 = vst.msk [vmem:[#allocation2 + $0x18] sm:$0xff] %vm297_vm0, %v6808_v24 }
0x12fe   :  { %6833 = vst.msk [vmem:[#allocation2 + $0x10] sm:$0xff] %vm297_vm0, %v6803_v49  ;;  %v12042_v15 = vpop.f32.mrb[98].mxu0 }
0x12ff   :  { %v6818_v32 = vadd.f32 %v12042_v15, %v14954_v13  ;;  %v6812_v33 = vpop.f32.mrb[99].mxu0 }
0x1300   :  { %v6813_v34 = vadd.f32 %v14954_v13, %v6812_v33 }
0x1301   :  { %6836 = vst.msk [vmem:[#allocation2 + $0x28] sm:$0xff] %vm297_vm0, %v6818_v32  ;;  %v7233_v49 = vld [vmem:[#allocation2] sm:$0xff] }
0x1302   :  { %6835 = vst.msk [vmem:[#allocation2 + $0x20] sm:$0xff] %vm297_vm0, %v6813_v34 }
0x1318   :  { %v12029_v35 = vpop.f32.mrb[112].mxu1 }
0x1319   :  { %v6684_v36 = vpop.f32.mrb[113].mxu1  ;;  %v14977_v42 = vadd.f32 %v12029_v35, %v14891_v29 }
0x131a   :  { %v14969_v39 = vadd.f32 %v14891_v29, %v6684_v36 }
0x131c   :  { %12043 = vmatprep.mubr.msk.f32.mxu0 %vm3454_vm3, %v14969_v39  ;;  %v12068_v38 = vpop.f32.mrb[114].mxu1  ;;  %12075 = vmatprep.mubr.msk.f32.mxu1 %vm3454_vm3, %v14969_v39 }
0x131d   :  { %v7046_v48 = vadd.f32 %v12068_v38, %v14974_v41  ;;  %12044 = vmatmul.mubr.msk.f32.gmra.mrb[100].mxu0 %vm3454_vm3, %v14977_v42  ;;  %v7040_v44 = vpop.f32.mrb[115].mxu1  ;;  %12076 = vmatmul.mubr.msk.f32.gmra.mrb[120].mxu1 %vm3454_vm3, %v14977_v42 }
0x131e   :  { %v7041_v29 = vadd.f32 %v14974_v41, %v7040_v44  ;;  %12050 = vmatprep.mubr.msk.f32.mxu0 %vm3454_vm3, %v14894_v26  ;;  %12102 = vmatprep.mubr.msk.f32.mxu1 %vm13740_vm2, %v13738_v0 }
0x131f   :  { %7080 = vst.msk [vmem:[#allocation4 + $0x8] sm:$0xff] %vm297_vm0, %v7046_v48 }
0x1320   :  { %7079 = vst.msk [vmem:[#allocation4] sm:$0xff] %vm297_vm0, %v7041_v29  ;;  %v12071_v22 = vpop.f32.mrb[116].mxu1 }
0x1321   :  { %v7056_v55 = vadd.f32 %v12071_v22, %v14974_v41  ;;  %12051 = vmatmul.mubr.msk.f32.vlgmr.msra.gmra.mrb[102].mxu0 %vm3454_vm3, %v14897_v30  ;;  %v7050_v56 = vpop.f32.mrb[117].mxu1  ;;  %12103 = vmatmul.mubr.msk.f32.vlgmr.msra.gmra.mrb[122].mxu1 %vm297_vm0, %v14993_v18 }
0x1322   :  { %v7051_v58 = vadd.f32 %v14974_v41, %v7050_v56  ;;  %12053 = vmatprep.mubr.msk.f32.mxu0 %vm3454_vm3, %v14904_v52  ;;  %12923 = vmatpush3.bf16.msra.mxu0 %v12920_v43 }
0x1323   :  { %7082 = vst.msk [vmem:[#allocation4 + $0x18] sm:$0xff] %vm297_vm0, %v7056_v55  ;;  %12932 = vmatpush3.bf16.msra.mxu1 %v14996_v21  ;;  %12113 = vmatprep.mubr.msk.f32.mxu1 %vm13740_vm2, %v13738_v0 }
0x1324   :  { %7081 = vst.msk [vmem:[#allocation4 + $0x10] sm:$0xff] %vm297_vm0, %v7051_v58  ;;  %v12074_v57 = vpop.f32.mrb[118].mxu1  ;;  %12933 = vmatprep.subr.bf16.mxu1 %v13739_v28  ;;  %12936 = vmatprep.subr.bf16.mxu0 %v13739_v28 }
0x1325   :  { %v7066_v1 = vadd.f32 %v12074_v57, %v14974_v41  ;;  %12054 = vmatmul.mubr.msk.f32.gmra.mrb[104].mxu0 %vm3454_vm3, %v14907_v54  ;;  %v7060_v27 = vpop.f32.mrb[119].mxu1 }
0x1326   :  { %v7061_v37 = vadd.f32 %v14974_v41, %v7060_v27  ;;  %12056 = vmatprep.mubr.msk.f32.mxu0 %vm3454_vm3, %v14914_v59 }
0x1327   :  { %7084 = vst.msk [vmem:[#allocation4 + $0x28] sm:$0xff] %vm297_vm0, %v7066_v1  ;;  %12935 = vmatpush3.bf16.msra.mxu1 %v15009_v60 }
0x1328   :  { %7083 = vst.msk [vmem:[#allocation4 + $0x20] sm:$0xff] %vm297_vm0, %v7061_v37  ;;  %12942 = vmatprep.subr.bf16.mxu1 %v13739_v28 }
0x1329   :  { %12057 = vmatmul.mubr.msk.f32.gmra.mrb[106].mxu0 %vm3454_vm3, %v14917_v61 }
0x132a   :  { %12059 = vmatprep.mubr.msk.f32.mxu0 %vm3454_vm3, %v14969_v39  ;;  %12114 = vmatmul.mubr.msk.f32.vlgmr.msra.gmra.mrb[124].mxu1 %vm297_vm0, %v14993_v18 }
0x132b   :  { %12944 = vmatpush3.bf16.msra.mxu1 %v15024_v2  ;;  %12135 = vmatprep.mubr.msk.f32.mxu1 %vm13740_vm2, %v13738_v0 }
0x132c   :  { %12945 = vmatprep.subr.bf16.mxu1 %v13739_v28 }
0x132d   :  { %12060 = vmatmul.mubr.msk.f32.gmra.mrb[108].mxu0 %vm3454_vm3, %v14977_v42 }
0x132e   :  { %12082 = vmatprep.mubr.msk.f32.mxu0 %vm3454_vm3, %v14894_v26 }
0x132f   :  { %12947 = vmatpush3.bf16.msra.mxu1 %v15035_v5 }
0x1330   :  { %12954 = vmatprep.subr.bf16.mxu1 %v13739_v28 }
0x1331   :  { %12083 = vmatmul.mubr.msk.f32.vlgmr.msra.gmra.mrb[110].mxu0 %vm3454_vm3, %v14897_v30 }
0x1332   :  { %12085 = vmatprep.mubr.msk.f32.mxu0 %vm3454_vm3, %v14904_v52  ;;  %12938 = vmatpush3.bf16.msra.mxu0 %v15044_v6 }
0x1333   :  { %12939 = vmatprep.subr.bf16.mxu0 %v13739_v28  ;;  %12136 = vmatmul.mubr.msk.f32.vlgmr.msra.gmra.mrb[126].mxu1 %vm297_vm0, %v14993_v18 }
0x1334   :  { %12956 = vmatpush3.bf16.msra.mxu1 %v14996_v21  ;;  %12157 = vmatprep.mubr.msk.f32.mxu1 %vm13740_vm2, %v13738_v0 }
0x1335   :  { %12086 = vmatmul.mubr.msk.f32.gmra.mrb[112].mxu0 %vm3454_vm3, %v14907_v54  ;;  %12957 = vmatprep.subr.bf16.mxu1 %v13739_v28 }
0x1336   :  { %12088 = vmatprep.mubr.msk.f32.mxu0 %vm3454_vm3, %v14914_v59  ;;  %12941 = vmatpush3.bf16.msra.mxu0 %v15053_v45 }
0x1337   :  { %12948 = vmatprep.subr.bf16.mxu0 %v13739_v28 }
0x1338   :  { %12959 = vmatpush3.bf16.msra.mxu1 %v15009_v60 }
0x1339   :  { %12089 = vmatmul.mubr.msk.f32.gmra.mrb[114].mxu0 %vm3454_vm3, %v14917_v61  ;;  %12966 = vmatprep.subr.bf16.mxu1 %v13739_v28 }
0x133a   :  { %12091 = vmatprep.mubr.msk.f32.mxu0 %vm3454_vm3, %v14969_v39 }
0x133d   :  { %12092 = vmatmul.mubr.msk.f32.gmra.mrb[116].mxu0 %vm3454_vm3, %v14977_v42 }
0x133e   :  { %12124 = vmatprep.mubr.msk.f32.mxu0 %vm13740_vm2, %v13738_v0 }
0x1341   :  { %12125 = vmatmul.mubr.msk.f32.vlgmr.msra.gmra.mrb[118].mxu0 %vm297_vm0, %v14993_v18  ;;  %v10429_v18 = vld [vmem:[%s15385_s13 + $0x3] ss:$0 sm:$0xff] }
0x1342   :  { %12950 = vmatpush3.bf16.msra.mxu0 %v14943_v8  ;;  %12146 = vmatprep.mubr.msk.f32.mxu0 %vm13740_vm2, %v13738_v0 }
0x1343   :  { %12951 = vmatprep.subr.bf16.mxu0 %v13739_v28 }
0x1346   :  { %12953 = vmatpush3.bf16.msra.mxu0 %v14947_v31 }
0x1347   :  { %12960 = vmatprep.subr.bf16.mxu0 %v13739_v28 }
0x13f0   :  { %v12045_v26 = vpop.f32.mrb[100].mxu0  ;;  %v12077_v30 = vpop.f32.mrb[120].mxu1 }
0x13f1   :  { %v6828_v52 = vadd.f32 %v12045_v26, %v14954_v13  ;;  %v7076_v54 = vadd.f32 %v12077_v30, %v14974_v41  ;;  %v6822_v59 = vpop.f32.mrb[101].mxu0  ;;  %v7070_v61 = vpop.f32.mrb[121].mxu1 }
0x13f2   :  { %v6823_v9 = vadd.f32 %v14954_v13, %v6822_v59  ;;  %v7071_v10 = vadd.f32 %v14974_v41, %v7070_v61 }
0x13f3   :  { %6838 = vst.msk [vmem:[#allocation2 + $0x38] sm:$0xff] %vm297_vm0, %v6828_v52  ;;  %7086 = vst.msk [vmem:[#allocation4 + $0x38] sm:$0xff] %vm297_vm0, %v7076_v54 }
0x13f4   :  { %6837 = vst.msk [vmem:[#allocation2 + $0x30] sm:$0xff] %vm297_vm0, %v6823_v9  ;;  %7085 = vst.msk [vmem:[#allocation4 + $0x30] sm:$0xff] %vm297_vm0, %v7071_v10  ;;  %v12052_v12 = vpop.f32.mrb[102].mxu0  ;;  %v7303_v43 = vpop.f32.mrb[122].mxu1  ;;  %v7380_v10 = vld [vmem:[#allocation4] sm:$0xff] }
0x13f5   :  { %v6922_v14 = vadd.f32 %v12052_v12, %v10409_v11  ;;  %v6916_v16 = vpop.f32.mrb[103].mxu0  ;;  %v12104_v19 = vpop.f32.mrb[123].mxu1  ;;  %v7307_v32 = vadd.f32 %v7303_v43, %v7233_v49 }
0x13f6   :  { %v6917_v13 = vadd.f32 %v10409_v11, %v6916_v16  ;;  %v7543_v19 = vld [vmem:[#allocation8] sm:$0xff] }
0x13f7   :  { %6956 = vst.msk [vmem:[#allocation3 + $0x8] sm:$0xff] %vm297_vm0, %v6922_v14  ;;  %v10442_v53 = vmul.f32 -1.442695, %v7307_v32 }
0x13f8   :  { %6955 = vst.msk [vmem:[#allocation3] sm:$0xff] %vm297_vm0, %v6917_v13  ;;  %v12055_v20 = vpop.f32.mrb[104].mxu0 }
0x13f9   :  { %v6932_v23 = vadd.f32 %v12055_v20, %v10409_v11  ;;  %v6926_v24 = vpop.f32.mrb[105].mxu0 }
0x13fa   :  { %v6927_v25 = vadd.f32 %v10409_v11, %v6926_v24 }
0x13fb   :  { %6958 = vst.msk [vmem:[#allocation3 + $0x18] sm:$0xff] %vm297_vm0, %v6932_v23 }
0x13fc   :  { %6957 = vst.msk [vmem:[#allocation3 + $0x10] sm:$0xff] %vm297_vm0, %v6927_v25  ;;  %v12058_v15 = vpop.f32.mrb[106].mxu0 }
0x13fd   :  { %v6942_v33 = vadd.f32 %v12058_v15, %v10409_v11  ;;  %v6936_v34 = vpop.f32.mrb[107].mxu0  ;;  %v7375_v35 = vpop.f32.mrb[124].mxu1 }
0x13fe   :  { %v6937_v36 = vadd.f32 %v10409_v11, %v6936_v34  ;;  %v12115_v39 = vpop.f32.mrb[125].mxu1 }
0x13ff   :  { %6960 = vst.msk [vmem:[#allocation3 + $0x28] sm:$0xff] %vm297_vm0, %v6942_v33  ;;  %v7308_v41 = vld [vmem:[#allocation3] sm:$0xff]  ;;  %v7628_v39 = vld [vmem:[#allocation3 + $0x8] sm:$0xff] }
0x1400   :  { %6959 = vst.msk [vmem:[#allocation3 + $0x20] sm:$0xff] %vm297_vm0, %v6937_v36  ;;  %v7379_v42 = vadd.f32 %v7375_v35, %v7308_v41  ;;  %v12061_v38 = vpop.f32.mrb[108].mxu0  ;;  %v7553_v35 = vld [vmem:[#allocation2 + $0x8] sm:$0xff] }
0x1401   :  { %v6952_v47 = vadd.f32 %v12061_v38, %v10409_v11  ;;  %v6946_v48 = vpop.f32.mrb[109].mxu0 }
0x1402   :  { %v10443_v44 = vmul.f32 -1.442695, %v7379_v42  ;;  %v6947_v29 = vadd.f32 %v10409_v11, %v6946_v48 }
0x1403   :  { %6962 = vst.msk [vmem:[#allocation3 + $0x38] sm:$0xff] %vm297_vm0, %v6952_v47 }
0x1404   :  { %13401 = vpow2.f32 %v10443_v44  ;;  %6961 = vst.msk [vmem:[#allocation3 + $0x30] sm:$0xff] %vm297_vm0, %v6947_v29  ;;  %v12084_v22 = vpop.f32.mrb[110].mxu0 }
0x1405   :  { %13403 = vpow2.f32 %v10442_v53  ;;  %v7170_v50 = vadd.f32 %v12084_v22, %v10429_v18  ;;  %v7164_v51 = vpop.f32.mrb[111].mxu0 }
0x1406   :  { %v7165_v55 = vadd.f32 %v10429_v18, %v7164_v51  ;;  %v7519_v56 = vpop.f32.mrb[126].mxu1 }
0x1407   :  { %7204 = vst.msk [vmem:[#allocation5 + $0x8] sm:$0xff] %vm297_vm0, %v7170_v50  ;;  %v12137_v58 = vpop.f32.mrb[127].mxu1 }
0x1408   :  { %7203 = vst.msk [vmem:[#allocation5] sm:$0xff] %vm297_vm0, %v7165_v55  ;;  %v12087_v57 = vpop.f32.mrb[112].mxu0 }
0x1409   :  { %v7180_v62 = vadd.f32 %v12087_v57, %v10429_v18  ;;  %v7174_v63 = vpop.f32.mrb[113].mxu0 }
0x140a   :  { %v7175_v1 = vadd.f32 %v10429_v18, %v7174_v63 }
0x140b   :  { %7206 = vst.msk [vmem:[#allocation5 + $0x18] sm:$0xff] %vm297_vm0, %v7180_v62 }
0x140c   :  { %7205 = vst.msk [vmem:[#allocation5 + $0x10] sm:$0xff] %vm297_vm0, %v7175_v1  ;;  %v12090_v27 = vpop.f32.mrb[114].mxu0 }
0x140d   :  { %v7190_v37 = vadd.f32 %v12090_v27, %v10429_v18  ;;  %v7184_v3 = vpop.f32.mrb[115].mxu0 }
0x140e   :  { %v13402_v4 = vpop.eup %13401  ;;  %v7185_v46 = vadd.f32 %v10429_v18, %v7184_v3 }
0x140f   :  { %v13404_v40 = vpop.eup %13403  ;;  %7208 = vst.msk [vmem:[#allocation5 + $0x28] sm:$0xff] %vm297_vm0, %v7190_v37  ;;  %v7452_v7 = vld [vmem:[#allocation5] sm:$0xff]  ;;  %v7533_v30 = vadd.f32 1.0, %v13402_v4 }
0x1410   :  { %7207 = vst.msk [vmem:[#allocation5 + $0x20] sm:$0xff] %vm297_vm0, %v7185_v46  ;;  %v7523_v17 = vadd.f32 %v7519_v56, %v7452_v7  ;;  %v12093_v26 = vpop.f32.mrb[116].mxu0  ;;  %v7527_v59 = vadd.f32 1.0, %v13404_v40  ;;  %v7700_v56 = vld [vmem:[#allocation4 + $0x8] sm:$0xff] }
0x1411   :  { %v7200_v52 = vadd.f32 %v12093_v26, %v10429_v18  ;;  %v7194_v54 = vpop.f32.mrb[117].mxu0 }
0x1412   :  { %v10444_v61 = vmul.f32 -1.442695, %v7523_v17  ;;  %v7195_v9 = vadd.f32 %v10429_v18, %v7194_v54  ;;  %v7772_v18 = vld [vmem:[#allocation5 + $0x8] sm:$0xff] }
0x1413   :  { %7210 = vst.msk [vmem:[#allocation5 + $0x38] sm:$0xff] %vm297_vm0, %v7200_v52 }
0x1414   :  { %13405 = vpow2.f32 %v10444_v61  ;;  %7209 = vst.msk [vmem:[#allocation5 + $0x30] sm:$0xff] %vm297_vm0, %v7195_v9  ;;  %v7447_v11 = vpop.f32.mrb[118].mxu0  ;;  %v7873_v9 = vld [vmem:[#allocation2 + $0x10] sm:$0xff] }
0x1415   :  { %13407 = vrcp.f32 %v7533_v30  ;;  %v7451_v12 = vadd.f32 %v7447_v11, %v7380_v10  ;;  %v12126_v43 = vpop.f32.mrb[119].mxu0  ;;  %v7948_v11 = vld [vmem:[#allocation3 + $0x10] sm:$0xff] }
0x1416   :  { %13409 = vrcp.f32 %v7527_v59 }
0x1417   :  { %13411 = vtanh.f32 %v7451_v12 }
0x141e   :  { %v13406_v14 = vpop.eup %13405 }
0x141f   :  { %v13408_v16 = vpop.eup %13407  ;;  %v7540_v23 = vadd.f32 1.0, %v13406_v14 }
0x1420   :  { %v13410_v13 = vpop.eup %13409  ;;  %v7544_v24 = vmul.f32 %v13408_v16, %v7543_v19 }
0x1421   :  { %v13412_v20 = vpop.eup %13411  ;;  %13413 = vrcp.f32 %v7540_v23 }
0x1422   :  { %v7545_v25 = vmul.f32 %v13412_v20, %v13410_v13 }
0x1424   :  { %v7546_v49 = vadd.f32 %v7545_v25, %v7544_v24  ;;  %v8092_v24 = vld [vmem:[#allocation5 + $0x10] sm:$0xff] }
0x1426   :  { %13415 = vtanh.f32 %v7546_v49  ;;  %7549 = vst.msk [vmem:[#allocation8] sm:$0xff] %vm297_vm0, %v7546_v49 }
0x142b   :  { %v13414_v15 = vpop.eup %13413 }
0x142d   :  { %v7863_v40 = vld [vmem:[#allocation8] sm:$0xff] }
0x1430   :  { %v13416_v32 = vpop.eup %13415 }
0x1431   :  { %v7548_v33 = vmul.f32 %v13416_v32, %v13414_v15 }
0x1433   :  { %7550 = vst.msk [vmem:[#allocation7] sm:$0xff] %vm297_vm0, %v7548_v33  ;;  %7551 = vst.msk [vmem:[#allocation6] sm:$0xff] %vm297_vm0, %v7548_v33  ;;  %v8020_v33 = vld [vmem:[#allocation4 + $0x10] sm:$0xff] }
0x143a   :  { %v7552_v34 = vld [vmem:[#allocation7] sm:$0xff] }
0x143b   :  { %12147 = vmatmul.mubr.msk.f32.vlgmr.msra.gmra.mrb[120].mxu0 %vm297_vm0, %v7552_v34  ;;  %12158 = vmatmul.mubr.msk.f32.vlgmr.msra.gmra.mrb[128].mxu1 %vm297_vm0, %v7552_v34 }
0x143c   :  { %12962 = vmatpush3.bf16.msra.mxu0 %v15044_v6  ;;  %12968 = vmatpush3.bf16.msra.mxu1 %v15024_v2 }
0x143d   :  { %12963 = vmatprep.subr.bf16.mxu0 %v13739_v28  ;;  %12969 = vmatprep.subr.bf16.mxu1 %v13739_v28 }
0x143e   :  { %12168 = vmatprep.mubr.msk.f32.mxu0 %vm13740_vm2, %v13738_v0  ;;  %12179 = vmatprep.mubr.msk.f32.mxu1 %vm13740_vm2, %v13738_v0 }
0x1440   :  { %12965 = vmatpush3.bf16.msra.mxu0 %v15053_v45  ;;  %12971 = vmatpush3.bf16.msra.mxu1 %v15035_v5 }
0x1441   :  { %12972 = vmatprep.subr.bf16.mxu0 %v13739_v28  ;;  %12978 = vmatprep.subr.bf16.mxu1 %v13739_v28 }
0x1443   :  { %12169 = vmatmul.mubr.msk.f32.vlgmr.msra.gmra.mrb[122].mxu0 %vm297_vm0, %v7552_v34  ;;  %12180 = vmatmul.mubr.msk.f32.vlgmr.msra.gmra.mrb[130].mxu1 %vm297_vm0, %v7552_v34 }
0x1444   :  { %12974 = vmatpush3.bf16.msra.mxu0 %v14943_v8  ;;  %12980 = vmatpush3.bf16.msra.mxu1 %v14996_v21 }
0x1445   :  { %12975 = vmatprep.subr.bf16.mxu0 %v13739_v28  ;;  %12981 = vmatprep.subr.bf16.mxu1 %v13739_v28 }
0x1446   :  { %12190 = vmatprep.mubr.msk.f32.mxu0 %vm13740_vm2, %v13738_v0  ;;  %12201 = vmatprep.mubr.msk.f32.mxu1 %vm13740_vm2, %v13738_v0 }
0x1448   :  { %12977 = vmatpush3.bf16.msra.mxu0 %v14947_v31  ;;  %12983 = vmatpush3.bf16.msra.mxu1 %v15009_v60 }
0x1449   :  { %12984 = vmatprep.subr.bf16.mxu0 %v13739_v28  ;;  %12990 = vmatprep.subr.bf16.mxu1 %v13739_v28 }
0x150e   :  { %v7623_v36 = vpop.f32.mrb[120].mxu0  ;;  %v7695_v41 = vpop.f32.mrb[128].mxu1 }
0x150f   :  { %v7627_v42 = vadd.f32 %v7623_v36, %v7553_v35  ;;  %v7699_v38 = vadd.f32 %v7695_v41, %v7628_v39  ;;  %v12148_v53 = vpop.f32.mrb[121].mxu0  ;;  %v12159_v47 = vpop.f32.mrb[129].mxu1 }
0x1511   :  { %v10449_v48 = vmul.f32 -1.442695, %v7627_v42  ;;  %v10450_v44 = vmul.f32 -1.442695, %v7699_v38 }
0x1513   :  { %13417 = vpow2.f32 %v10449_v48 }
0x1514   :  { %13419 = vpow2.f32 %v10450_v44 }
0x1516   :  { %v7767_v29 = vpop.f32.mrb[122].mxu0  ;;  %v7839_v22 = vpop.f32.mrb[130].mxu1 }
0x1517   :  { %v7843_v50 = vadd.f32 %v7839_v22, %v7772_v18  ;;  %v12170_v51 = vpop.f32.mrb[123].mxu0  ;;  %v12181_v55 = vpop.f32.mrb[131].mxu1  ;;  %v7771_v57 = vadd.f32 %v7767_v29, %v7700_v56 }
0x1519   :  { %v10451_v58 = vmul.f32 -1.442695, %v7843_v50 }
0x151b   :  { %13421 = vpow2.f32 %v10451_v58 }
0x151c   :  { %13423 = vtanh.f32 %v7771_v57  ;;  %v8193_v57 = vld [vmem:[#allocation2 + $0x18] sm:$0xff] }
0x151d   :  { %v13418_v62 = vpop.eup %13417 }
0x151e   :  { %v13420_v63 = vpop.eup %13419  ;;  %v7847_v1 = vadd.f32 1.0, %v13418_v62 }
0x151f   :  { %v7853_v27 = vadd.f32 1.0, %v13420_v63  ;;  %v8268_v63 = vld [vmem:[#allocation3 + $0x18] sm:$0xff] }
0x1520   :  { %13425 = vrcp.f32 %v7847_v1 }
0x1521   :  { %13427 = vrcp.f32 %v7853_v27 }
0x1525   :  { %v13422_v37 = vpop.eup %13421 }
0x1526   :  { %v13424_v3 = vpop.eup %13423  ;;  %v7860_v17 = vadd.f32 1.0, %v13422_v37 }
0x1528   :  { %13429 = vrcp.f32 %v7860_v17  ;;  %v8412_v17 = vld [vmem:[#allocation5 + $0x18] sm:$0xff] }
0x152a   :  { %v13426_v4 = vpop.eup %13425 }
0x152b   :  { %v13428_v46 = vpop.eup %13427  ;;  %v7865_v7 = vmul.f32 %v13426_v4, %v13424_v3 }
0x152c   :  { %v7864_v26 = vmul.f32 %v13428_v46, %v7863_v40 }
0x152e   :  { %v7866_v30 = vadd.f32 %v7865_v7, %v7864_v26 }
0x1530   :  { %13431 = vtanh.f32 %v7866_v30  ;;  %7869 = vst.msk [vmem:[#allocation8] sm:$0xff] %vm297_vm0, %v7866_v30 }
0x1532   :  { %v13430_v52 = vpop.eup %13429 }
0x1537   :  { %v8183_v44 = vld [vmem:[#allocation8] sm:$0xff] }
0x153a   :  { %v13432_v54 = vpop.eup %13431 }
0x153b   :  { %v7868_v59 = vmul.f32 %v13432_v54, %v13430_v52 }
0x153d   :  { %7870 = vst.msk [vmem:[#allocation7] sm:$0xff] %vm297_vm0, %v7868_v59  ;;  %7871 = vst.msk [vmem:[#allocation6 + $0x8] sm:$0xff] %vm297_vm0, %v7868_v59  ;;  %v8340_v59 = vld [vmem:[#allocation4 + $0x18] sm:$0xff] }
0x1544   :  { %v7872_v61 = vld [vmem:[#allocation7] sm:$0xff] }
0x1545   :  { %12191 = vmatmul.mubr.msk.f32.vlgmr.msra.gmra.mrb[124].mxu0 %vm297_vm0, %v7872_v61  ;;  %12202 = vmatmul.mubr.msk.f32.vlgmr.msra.gmra.mrb[132].mxu1 %vm297_vm0, %v7872_v61 }
0x1546   :  { %12986 = vmatpush3.bf16.msra.mxu0 %v15044_v6  ;;  %12992 = vmatpush3.bf16.msra.mxu1 %v15024_v2 }
0x1547   :  { %12987 = vmatprep.subr.bf16.mxu0 %v13739_v28  ;;  %12993 = vmatprep.subr.bf16.mxu1 %v13739_v28 }
0x1548   :  { %12212 = vmatprep.mubr.msk.f32.mxu0 %vm13740_vm2, %v13738_v0  ;;  %12223 = vmatprep.mubr.msk.f32.mxu1 %vm13740_vm2, %v13738_v0 }
0x154a   :  { %12989 = vmatpush3.bf16.msra.mxu0 %v15053_v45  ;;  %12995 = vmatpush3.bf16.msra.mxu1 %v15035_v5 }
0x154b   :  { %12996 = vmatprep.subr.bf16.mxu0 %v13739_v28  ;;  %13002 = vmatprep.subr.bf16.mxu1 %v13739_v28 }
0x154d   :  { %12213 = vmatmul.mubr.msk.f32.vlgmr.msra.gmra.mrb[126].mxu0 %vm297_vm0, %v7872_v61  ;;  %12224 = vmatmul.mubr.msk.f32.vlgmr.msra.gmra.mrb[134].mxu1 %vm297_vm0, %v7872_v61 }
0x154e   :  { %12998 = vmatpush3.bf16.msra.mxu0 %v14943_v8  ;;  %13004 = vmatpush3.bf16.msra.mxu1 %v14996_v21 }
0x154f   :  { %12999 = vmatprep.subr.bf16.mxu0 %v13739_v28  ;;  %13005 = vmatprep.subr.bf16.mxu1 %v13739_v28 }
0x1550   :  { %12234 = vmatprep.mubr.msk.f32.mxu0 %vm13740_vm2, %v13738_v0  ;;  %12245 = vmatprep.mubr.msk.f32.mxu1 %vm13740_vm2, %v13738_v0 }
0x1552   :  { %13001 = vmatpush3.bf16.msra.mxu0 %v14947_v31  ;;  %13007 = vmatpush3.bf16.msra.mxu1 %v15009_v60 }
0x1553   :  { %13008 = vmatprep.subr.bf16.mxu0 %v13739_v28  ;;  %13014 = vmatprep.subr.bf16.mxu1 %v13739_v28 }
0x1618   :  { %v7943_v10 = vpop.f32.mrb[124].mxu0  ;;  %v8015_v12 = vpop.f32.mrb[132].mxu1 }
0x1619   :  { %v7947_v43 = vadd.f32 %v7943_v10, %v7873_v9  ;;  %v8019_v14 = vadd.f32 %v8015_v12, %v7948_v11  ;;  %v12192_v16 = vpop.f32.mrb[125].mxu0  ;;  %v12203_v19 = vpop.f32.mrb[133].mxu1 }
0x161b   :  { %v10456_v13 = vmul.f32 -1.442695, %v7947_v43  ;;  %v10457_v20 = vmul.f32 -1.442695, %v8019_v14 }
0x161d   :  { %13433 = vpow2.f32 %v10456_v13 }
0x161e   :  { %13435 = vpow2.f32 %v10457_v20 }
0x1620   :  { %v8087_v23 = vpop.f32.mrb[126].mxu0  ;;  %v8159_v25 = vpop.f32.mrb[134].mxu1 }
0x1621   :  { %v8163_v49 = vadd.f32 %v8159_v25, %v8092_v24  ;;  %v12214_v15 = vpop.f32.mrb[127].mxu0  ;;  %v12225_v32 = vpop.f32.mrb[135].mxu1  ;;  %v8091_v35 = vadd.f32 %v8087_v23, %v8020_v33 }
0x1623   :  { %v10458_v34 = vmul.f32 -1.442695, %v8163_v49 }
0x1625   :  { %13437 = vpow2.f32 %v10458_v34 }
0x1626   :  { %13439 = vtanh.f32 %v8091_v35  ;;  %v8513_v35 = vld [vmem:[#allocation2 + $0x20] sm:$0xff] }
0x1627   :  { %v13434_v36 = vpop.eup %13433 }
0x1628   :  { %v13436_v39 = vpop.eup %13435  ;;  %v8167_v41 = vadd.f32 1.0, %v13434_v36 }
0x1629   :  { %v8173_v42 = vadd.f32 1.0, %v13436_v39  ;;  %v8588_v39 = vld [vmem:[#allocation3 + $0x20] sm:$0xff] }
0x162a   :  { %13441 = vrcp.f32 %v8167_v41 }
0x162b   :  { %13443 = vrcp.f32 %v8173_v42 }
0x162f   :  { %v13438_v38 = vpop.eup %13437 }
0x1630   :  { %v13440_v53 = vpop.eup %13439  ;;  %v8180_v18 = vadd.f32 1.0, %v13438_v38 }
0x1632   :  { %13445 = vrcp.f32 %v8180_v18  ;;  %v8732_v18 = vld [vmem:[#allocation5 + $0x20] sm:$0xff] }
0x1634   :  { %v13442_v47 = vpop.eup %13441 }
0x1635   :  { %v13444_v48 = vpop.eup %13443  ;;  %v8185_v29 = vmul.f32 %v13442_v47, %v13440_v53 }
0x1636   :  { %v8184_v22 = vmul.f32 %v13444_v48, %v8183_v44 }
0x1638   :  { %v8186_v50 = vadd.f32 %v8185_v29, %v8184_v22 }
0x163a   :  { %13447 = vtanh.f32 %v8186_v50  ;;  %8189 = vst.msk [vmem:[#allocation8] sm:$0xff] %vm297_vm0, %v8186_v50 }
0x163c   :  { %v13446_v51 = vpop.eup %13445 }
0x1641   :  { %v8503_v20 = vld [vmem:[#allocation8] sm:$0xff] }
0x1644   :  { %v13448_v55 = vpop.eup %13447 }
0x1645   :  { %v8188_v56 = vmul.f32 %v13448_v55, %v13446_v51 }
0x1647   :  { %8190 = vst.msk [vmem:[#allocation7] sm:$0xff] %vm297_vm0, %v8188_v56  ;;  %8191 = vst.msk [vmem:[#allocation6 + $0x10] sm:$0xff] %vm297_vm0, %v8188_v56  ;;  %v8660_v56 = vld [vmem:[#allocation4 + $0x20] sm:$0xff] }
0x164e   :  { %v8192_v58 = vld [vmem:[#allocation7] sm:$0xff] }
0x164f   :  { %12235 = vmatmul.mubr.msk.f32.vlgmr.msra.gmra.mrb[128].mxu0 %vm297_vm0, %v8192_v58  ;;  %12246 = vmatmul.mubr.msk.f32.vlgmr.msra.gmra.mrb[136].mxu1 %vm297_vm0, %v8192_v58 }
0x1650   :  { %13010 = vmatpush3.bf16.msra.mxu0 %v15044_v6  ;;  %13016 = vmatpush3.bf16.msra.mxu1 %v15024_v2 }
0x1651   :  { %13011 = vmatprep.subr.bf16.mxu0 %v13739_v28  ;;  %13017 = vmatprep.subr.bf16.mxu1 %v13739_v28 }
0x1652   :  { %12256 = vmatprep.mubr.msk.f32.mxu0 %vm13740_vm2, %v13738_v0  ;;  %12267 = vmatprep.mubr.msk.f32.mxu1 %vm13740_vm2, %v13738_v0 }
0x1654   :  { %13013 = vmatpush3.bf16.msra.mxu0 %v15053_v45  ;;  %13019 = vmatpush3.bf16.msra.mxu1 %v15035_v5 }
0x1655   :  { %13020 = vmatprep.subr.bf16.mxu0 %v13739_v28  ;;  %13026 = vmatprep.subr.bf16.mxu1 %v13739_v28 }
0x1657   :  { %12257 = vmatmul.mubr.msk.f32.vlgmr.msra.gmra.mrb[130].mxu0 %vm297_vm0, %v8192_v58  ;;  %12268 = vmatmul.mubr.msk.f32.vlgmr.msra.gmra.mrb[138].mxu1 %vm297_vm0, %v8192_v58 }
0x1658   :  { %13022 = vmatpush3.bf16.msra.mxu0 %v14943_v8  ;;  %13028 = vmatpush3.bf16.msra.mxu1 %v14996_v21 }
0x1659   :  { %13023 = vmatprep.subr.bf16.mxu0 %v13739_v28  ;;  %13029 = vmatprep.subr.bf16.mxu1 %v13739_v28 }
0x165a   :  { %12278 = vmatprep.mubr.msk.f32.mxu0 %vm13740_vm2, %v13738_v0  ;;  %12289 = vmatprep.mubr.msk.f32.mxu1 %vm13740_vm2, %v13738_v0 }
0x165c   :  { %13025 = vmatpush3.bf16.msra.mxu0 %v14947_v31  ;;  %13031 = vmatpush3.bf16.msra.mxu1 %v15009_v60 }
0x165d   :  { %13032 = vmatprep.subr.bf16.mxu0 %v13739_v28  ;;  %13038 = vmatprep.subr.bf16.mxu1 %v13739_v28 }
0x1722   :  { %v8263_v62 = vpop.f32.mrb[128].mxu0  ;;  %v8335_v1 = vpop.f32.mrb[136].mxu1 }
0x1723   :  { %v8267_v27 = vadd.f32 %v8263_v62, %v8193_v57  ;;  %v8339_v37 = vadd.f32 %v8335_v1, %v8268_v63  ;;  %v12236_v3 = vpop.f32.mrb[129].mxu0  ;;  %v12247_v4 = vpop.f32.mrb[137].mxu1 }
0x1725   :  { %v10463_v46 = vmul.f32 -1.442695, %v8267_v27  ;;  %v10464_v40 = vmul.f32 -1.442695, %v8339_v37 }
0x1727   :  { %13449 = vpow2.f32 %v10463_v46 }
0x1728   :  { %13451 = vpow2.f32 %v10464_v40 }
0x172a   :  { %v8407_v7 = vpop.f32.mrb[130].mxu0  ;;  %v8479_v26 = vpop.f32.mrb[138].mxu1 }
0x172b   :  { %v8483_v30 = vadd.f32 %v8479_v26, %v8412_v17  ;;  %v12258_v52 = vpop.f32.mrb[131].mxu0  ;;  %v12269_v54 = vpop.f32.mrb[139].mxu1  ;;  %v8411_v9 = vadd.f32 %v8407_v7, %v8340_v59 }
0x172d   :  { %v10465_v61 = vmul.f32 -1.442695, %v8483_v30 }
0x172f   :  { %13453 = vpow2.f32 %v10465_v61 }
0x1730   :  { %13455 = vtanh.f32 %v8411_v9  ;;  %v8833_v9 = vld [vmem:[#allocation2 + $0x28] sm:$0xff] }
0x1731   :  { %v13450_v10 = vpop.eup %13449 }
0x1732   :  { %v13452_v11 = vpop.eup %13451  ;;  %v8487_v12 = vadd.f32 1.0, %v13450_v10 }
0x1733   :  { %v8493_v43 = vadd.f32 1.0, %v13452_v11  ;;  %v8908_v11 = vld [vmem:[#allocation3 + $0x28] sm:$0xff] }
0x1734   :  { %13457 = vrcp.f32 %v8487_v12 }
0x1735   :  { %13459 = vrcp.f32 %v8493_v43 }
0x1739   :  { %v13454_v14 = vpop.eup %13453 }
0x173a   :  { %v13456_v16 = vpop.eup %13455  ;;  %v8500_v24 = vadd.f32 1.0, %v13454_v14 }
0x173c   :  { %13461 = vrcp.f32 %v8500_v24  ;;  %v9052_v24 = vld [vmem:[#allocation5 + $0x28] sm:$0xff] }
0x173e   :  { %v13458_v19 = vpop.eup %13457 }
0x173f   :  { %v13460_v13 = vpop.eup %13459  ;;  %v8505_v23 = vmul.f32 %v13458_v19, %v13456_v16 }
0x1740   :  { %v8504_v25 = vmul.f32 %v13460_v13, %v8503_v20 }
0x1742   :  { %v8506_v49 = vadd.f32 %v8505_v23, %v8504_v25 }
0x1744   :  { %13463 = vtanh.f32 %v8506_v49  ;;  %8509 = vst.msk [vmem:[#allocation8] sm:$0xff] %vm297_vm0, %v8506_v49 }
0x1746   :  { %v13462_v15 = vpop.eup %13461 }
0x174b   :  { %v8823_v40 = vld [vmem:[#allocation8] sm:$0xff] }
0x174e   :  { %v13464_v32 = vpop.eup %13463 }
0x174f   :  { %v8508_v33 = vmul.f32 %v13464_v32, %v13462_v15 }
0x1751   :  { %8510 = vst.msk [vmem:[#allocation7] sm:$0xff] %vm297_vm0, %v8508_v33  ;;  %8511 = vst.msk [vmem:[#allocation6 + $0x18] sm:$0xff] %vm297_vm0, %v8508_v33  ;;  %v8980_v33 = vld [vmem:[#allocation4 + $0x28] sm:$0xff] }
0x1758   :  { %v8512_v34 = vld [vmem:[#allocation7] sm:$0xff] }
0x1759   :  { %12279 = vmatmul.mubr.msk.f32.vlgmr.msra.gmra.mrb[132].mxu0 %vm297_vm0, %v8512_v34  ;;  %12290 = vmatmul.mubr.msk.f32.vlgmr.msra.gmra.mrb[140].mxu1 %vm297_vm0, %v8512_v34 }
0x175a   :  { %13034 = vmatpush3.bf16.msra.mxu0 %v15044_v6  ;;  %13040 = vmatpush3.bf16.msra.mxu1 %v15024_v2 }
0x175b   :  { %13035 = vmatprep.subr.bf16.mxu0 %v13739_v28  ;;  %13041 = vmatprep.subr.bf16.mxu1 %v13739_v28 }
0x175c   :  { %12300 = vmatprep.mubr.msk.f32.mxu0 %vm13740_vm2, %v13738_v0  ;;  %12311 = vmatprep.mubr.msk.f32.mxu1 %vm13740_vm2, %v13738_v0 }
0x175e   :  { %13037 = vmatpush3.bf16.msra.mxu0 %v15053_v45  ;;  %13043 = vmatpush3.bf16.msra.mxu1 %v15035_v5 }
0x175f   :  { %13044 = vmatprep.subr.bf16.mxu0 %v13739_v28  ;;  %13050 = vmatprep.subr.bf16.mxu1 %v13739_v28 }
0x1761   :  { %12301 = vmatmul.mubr.msk.f32.vlgmr.msra.gmra.mrb[134].mxu0 %vm297_vm0, %v8512_v34  ;;  %12312 = vmatmul.mubr.msk.f32.vlgmr.msra.gmra.mrb[142].mxu1 %vm297_vm0, %v8512_v34 }
0x1762   :  { %13046 = vmatpush3.bf16.msra.mxu0 %v14943_v8  ;;  %13052 = vmatpush3.bf16.msra.mxu1 %v14996_v21 }
0x1763   :  { %13047 = vmatprep.subr.bf16.mxu0 %v13739_v28  ;;  %13053 = vmatprep.subr.bf16.mxu1 %v13739_v28 }
0x1764   :  { %12322 = vmatprep.mubr.msk.f32.mxu0 %vm13740_vm2, %v13738_v0  ;;  %12333 = vmatprep.mubr.msk.f32.mxu1 %vm13740_vm2, %v13738_v0 }
0x1766   :  { %13049 = vmatpush3.bf16.msra.mxu0 %v14947_v31  ;;  %13055 = vmatpush3.bf16.msra.mxu1 %v15009_v60 }
0x1767   :  { %13056 = vmatprep.subr.bf16.mxu0 %v13739_v28  ;;  %13062 = vmatprep.subr.bf16.mxu1 %v13739_v28 }
0x182c   :  { %v8583_v36 = vpop.f32.mrb[132].mxu0  ;;  %v8655_v41 = vpop.f32.mrb[140].mxu1 }
0x182d   :  { %v8587_v42 = vadd.f32 %v8583_v36, %v8513_v35  ;;  %v8659_v38 = vadd.f32 %v8655_v41, %v8588_v39  ;;  %v12280_v53 = vpop.f32.mrb[133].mxu0  ;;  %v12291_v47 = vpop.f32.mrb[141].mxu1 }
0x182f   :  { %v10470_v48 = vmul.f32 -1.442695, %v8587_v42  ;;  %v10471_v44 = vmul.f32 -1.442695, %v8659_v38 }
0x1831   :  { %13465 = vpow2.f32 %v10470_v48 }
0x1832   :  { %13467 = vpow2.f32 %v10471_v44 }
0x1834   :  { %v8727_v29 = vpop.f32.mrb[134].mxu0  ;;  %v8799_v22 = vpop.f32.mrb[142].mxu1 }
0x1835   :  { %v8803_v50 = vadd.f32 %v8799_v22, %v8732_v18  ;;  %v12302_v51 = vpop.f32.mrb[135].mxu0  ;;  %v12313_v55 = vpop.f32.mrb[143].mxu1  ;;  %v8731_v57 = vadd.f32 %v8727_v29, %v8660_v56 }
0x1837   :  { %v10472_v58 = vmul.f32 -1.442695, %v8803_v50 }
0x1839   :  { %13469 = vpow2.f32 %v10472_v58 }
0x183a   :  { %13471 = vtanh.f32 %v8731_v57  ;;  %v9228_v57 = vld [vmem:[#allocation3 + $0x30] sm:$0xff] }
0x183b   :  { %v13466_v62 = vpop.eup %13465 }
0x183c   :  { %v13468_v63 = vpop.eup %13467  ;;  %v8807_v1 = vadd.f32 1.0, %v13466_v62 }
0x183d   :  { %v8813_v27 = vadd.f32 1.0, %v13468_v63 }
0x183e   :  { %13473 = vrcp.f32 %v8807_v1 }
0x183f   :  { %13475 = vrcp.f32 %v8813_v27 }
0x1843   :  { %v13470_v37 = vpop.eup %13469 }
0x1844   :  { %v13472_v3 = vpop.eup %13471  ;;  %v8820_v17 = vadd.f32 1.0, %v13470_v37 }
0x1846   :  { %13477 = vrcp.f32 %v8820_v17 }
0x1848   :  { %v13474_v4 = vpop.eup %13473 }
0x1849   :  { %v13476_v46 = vpop.eup %13475  ;;  %v8825_v7 = vmul.f32 %v13474_v4, %v13472_v3 }
0x184a   :  { %v8824_v26 = vmul.f32 %v13476_v46, %v8823_v40 }
0x184c   :  { %v8826_v30 = vadd.f32 %v8825_v7, %v8824_v26  ;;  %v9300_v26 = vld [vmem:[#allocation4 + $0x30] sm:$0xff] }
0x184e   :  { %13479 = vtanh.f32 %v8826_v30  ;;  %8829 = vst.msk [vmem:[#allocation8] sm:$0xff] %vm297_vm0, %v8826_v30 }
0x1850   :  { %v13478_v52 = vpop.eup %13477 }
0x1855   :  { %v9143_v44 = vld [vmem:[#allocation8] sm:$0xff] }
0x1858   :  { %v13480_v54 = vpop.eup %13479 }
0x1859   :  { %v8828_v59 = vmul.f32 %v13480_v54, %v13478_v52 }
0x185b   :  { %8830 = vst.msk [vmem:[#allocation7] sm:$0xff] %vm297_vm0, %v8828_v59  ;;  %8831 = vst.msk [vmem:[#allocation6 + $0x20] sm:$0xff] %vm297_vm0, %v8828_v59 }
0x1862   :  { %v8832_v61 = vld [vmem:[#allocation7] sm:$0xff] }
0x1863   :  { %12323 = vmatmul.mubr.msk.f32.vlgmr.msra.gmra.mrb[136].mxu0 %vm297_vm0, %v8832_v61  ;;  %12334 = vmatmul.mubr.msk.f32.vlgmr.msra.gmra.mrb[144].mxu1 %vm297_vm0, %v8832_v61 }
0x1864   :  { %13058 = vmatpush3.bf16.msra.mxu0 %v15044_v6  ;;  %13064 = vmatpush3.bf16.msra.mxu1 %v15024_v2 }
0x1865   :  { %13059 = vmatprep.subr.bf16.mxu0 %v13739_v28  ;;  %13065 = vmatprep.subr.bf16.mxu1 %v13739_v28 }
0x1866   :  { %12344 = vmatprep.mubr.msk.f32.mxu0 %vm13740_vm2, %v13738_v0  ;;  %12355 = vmatprep.mubr.msk.f32.mxu1 %vm13740_vm2, %v13738_v0 }
0x1868   :  { %13061 = vmatpush3.bf16.msra.mxu0 %v15053_v45  ;;  %13067 = vmatpush3.bf16.msra.mxu1 %v15035_v5 }
0x1869   :  { %13068 = vmatprep.subr.bf16.mxu0 %v13739_v28  ;;  %13074 = vmatprep.subr.bf16.mxu1 %v13739_v28 }
0x186b   :  { %12345 = vmatmul.mubr.msk.f32.vlgmr.msra.gmra.mrb[138].mxu0 %vm297_vm0, %v8832_v61  ;;  %12356 = vmatmul.mubr.msk.f32.vlgmr.msra.gmra.mrb[146].mxu1 %vm297_vm0, %v8832_v61 }
0x186c   :  { %13070 = vmatpush3.bf16.msra.mxu0 %v14943_v8  ;;  %13076 = vmatpush3.bf16.msra.mxu1 %v14996_v21 }
0x186d   :  { %13071 = vmatprep.subr.bf16.mxu0 %v13739_v28  ;;  %13077 = vmatprep.subr.bf16.mxu1 %v13739_v28 }
0x186e   :  { %12366 = vmatprep.mubr.msk.f32.mxu0 %vm13740_vm2, %v13738_v0  ;;  %12377 = vmatprep.mubr.msk.f32.mxu1 %vm13740_vm2, %v13738_v0 }
0x1870   :  { %13073 = vmatpush3.bf16.msra.mxu0 %v14947_v31  ;;  %13079 = vmatpush3.bf16.msra.mxu1 %v15009_v60 }
0x1871   :  { %13080 = vmatprep.subr.bf16.mxu0 %v13739_v28  ;;  %13086 = vmatprep.subr.bf16.mxu1 %v13739_v28 }
0x1936   :  { %v8903_v10 = vpop.f32.mrb[136].mxu0  ;;  %v8975_v12 = vpop.f32.mrb[144].mxu1 }
0x1937   :  { %v8907_v43 = vadd.f32 %v8903_v10, %v8833_v9  ;;  %v8979_v14 = vadd.f32 %v8975_v12, %v8908_v11  ;;  %v12324_v16 = vpop.f32.mrb[137].mxu0  ;;  %v12335_v19 = vpop.f32.mrb[145].mxu1 }
0x1939   :  { %v10477_v13 = vmul.f32 -1.442695, %v8907_v43  ;;  %v10478_v20 = vmul.f32 -1.442695, %v8979_v14 }
0x193b   :  { %13481 = vpow2.f32 %v10477_v13 }
0x193c   :  { %13483 = vpow2.f32 %v10478_v20 }
0x193e   :  { %v9047_v23 = vpop.f32.mrb[138].mxu0  ;;  %v9119_v25 = vpop.f32.mrb[146].mxu1 }
0x193f   :  { %v9123_v49 = vadd.f32 %v9119_v25, %v9052_v24  ;;  %v12346_v15 = vpop.f32.mrb[139].mxu0  ;;  %v12357_v32 = vpop.f32.mrb[147].mxu1  ;;  %v9051_v35 = vadd.f32 %v9047_v23, %v8980_v33 }
0x1940   :  { %v9800_v15 = vld [vmem:[%s15386_s14] sm:$0xff]  ;;  %v9801_v32 = vld [vmem:[%s15386_s14 + $0x8] sm:$0xff] }
0x1941   :  { %v10479_v34 = vmul.f32 -1.442695, %v9123_v49  ;;  %v13116_v33 = vpack.c.bf16 %v9801_v32, %v9800_v15 }
0x1943   :  { %13485 = vpow2.f32 %v10479_v34  ;;  %v9802_v34 = vld [vmem:[%s15386_s14 + $0x10] sm:$0xff] }
0x1944   :  { %13487 = vtanh.f32 %v9051_v35  ;;  %v9795_v35 = vld [vmem:[#allocation6 + $0x18] sm:$0xff] }
0x1945   :  { %v13482_v36 = vpop.eup %13481 }
0x1946   :  { %v13484_v39 = vpop.eup %13483  ;;  %v9127_v41 = vadd.f32 1.0, %v13482_v36  ;;  %v9796_v36 = vld [vmem:[#allocation6 + $0x20] sm:$0xff] }
0x1947   :  { %v9133_v42 = vadd.f32 1.0, %v13484_v39 }
0x1948   :  { %13489 = vrcp.f32 %v9127_v41 }
0x1949   :  { %13491 = vrcp.f32 %v9133_v42  ;;  %v9473_v42 = vld [vmem:[#allocation2 + $0x38] sm:$0xff] }
0x194d   :  { %v13486_v38 = vpop.eup %13485 }
0x194e   :  { %v13488_v53 = vpop.eup %13487  ;;  %v9140_v18 = vadd.f32 1.0, %v13486_v38 }
0x1950   :  { %13493 = vrcp.f32 %v9140_v18 }
0x1952   :  { %v13490_v47 = vpop.eup %13489 }
0x1953   :  { %v13492_v48 = vpop.eup %13491  ;;  %v9145_v29 = vmul.f32 %v13490_v47, %v13488_v53  ;;  %v9548_v53 = vld [vmem:[#allocation3 + $0x38] sm:$0xff] }
0x1954   :  { %v9144_v22 = vmul.f32 %v13492_v48, %v9143_v44 }
0x1956   :  { %v9146_v50 = vadd.f32 %v9145_v29, %v9144_v22 }
0x1958   :  { %13495 = vtanh.f32 %v9146_v50  ;;  %9149 = vst.msk [vmem:[#allocation8] sm:$0xff] %vm297_vm0, %v9146_v50 }
0x195a   :  { %v13494_v51 = vpop.eup %13493 }
0x195f   :  { %v9463_v14 = vld [vmem:[#allocation8] sm:$0xff] }
0x1962   :  { %v13496_v55 = vpop.eup %13495 }
0x1963   :  { %v9148_v56 = vmul.f32 %v13496_v55, %v13494_v51  ;;  %v9692_v55 = vld [vmem:[#allocation5 + $0x38] sm:$0xff] }
0x1965   :  { %9150 = vst.msk [vmem:[#allocation7] sm:$0xff] %vm297_vm0, %v9148_v56  ;;  %9151 = vst.msk [vmem:[#allocation6 + $0x28] sm:$0xff] %vm297_vm0, %v9148_v56 }
0x196c   :  { %v9152_v58 = vld [vmem:[#allocation7] sm:$0xff]  ;;  %v9797_v39 = vld [vmem:[#allocation6 + $0x28] sm:$0xff] }
0x196d   :  { %12367 = vmatmul.mubr.msk.f32.vlgmr.msra.gmra.mrb[140].mxu0 %vm297_vm0, %v9152_v58  ;;  %12378 = vmatmul.mubr.msk.f32.vlgmr.msra.gmra.mrb[148].mxu1 %vm297_vm0, %v9152_v58 }
0x196e   :  { %13082 = vmatpush3.bf16.msra.mxu0 %v15044_v6  ;;  %13088 = vmatpush3.bf16.msra.mxu1 %v15024_v2 }
0x196f   :  { %13083 = vmatprep.subr.bf16.mxu0 %v13739_v28  ;;  %13089 = vmatprep.subr.bf16.mxu1 %v13739_v28 }
0x1970   :  { %12388 = vmatprep.mubr.msk.f32.mxu0 %vm13740_vm2, %v13738_v0  ;;  %12399 = vmatprep.mubr.msk.f32.mxu1 %vm13740_vm2, %v13738_v0 }
0x1972   :  { %13085 = vmatpush3.bf16.msra.mxu0 %v15053_v45  ;;  %13091 = vmatpush3.bf16.msra.mxu1 %v15035_v5 }
0x1973   :  { %13092 = vmatprep.subr.bf16.mxu0 %v13739_v28  ;;  %13098 = vmatprep.subr.bf16.mxu1 %v13739_v28 }
0x1975   :  { %12389 = vmatmul.mubr.msk.f32.vlgmr.msra.gmra.mrb[142].mxu0 %vm297_vm0, %v9152_v58  ;;  %12400 = vmatmul.mubr.msk.f32.vlgmr.msra.gmra.mrb[150].mxu1 %vm297_vm0, %v9152_v58 }
0x1976   :  { %13094 = vmatpush3.bf16.msra.mxu0 %v14943_v8  ;;  %13100 = vmatpush3.bf16.msra.mxu1 %v14996_v21  ;;  %v9153_v8 = vld [vmem:[#allocation2 + $0x30] sm:$0xff] }
0x1977   :  { %13095 = vmatprep.subr.bf16.mxu0 %v13739_v28  ;;  %13101 = vmatprep.subr.bf16.mxu1 %v13739_v28 }
0x1978   :  { %12410 = vmatprep.mubr.msk.f32.mxu0 %vm13740_vm2, %v13738_v0  ;;  %12421 = vmatprep.mubr.msk.f32.mxu1 %vm13740_vm2, %v13738_v0 }
0x197a   :  { %13097 = vmatpush3.bf16.msra.mxu0 %v14947_v31  ;;  %13103 = vmatpush3.bf16.msra.mxu1 %v15009_v60  ;;  %v9372_v31 = vld [vmem:[#allocation5 + $0x30] sm:$0xff] }
0x197b   :  { %13104 = vmatprep.subr.bf16.mxu0 %v13739_v28  ;;  %13110 = vmatprep.subr.bf16.mxu1 %v13739_v28 }
0x1a40   :  { %v9223_v21 = vpop.f32.mrb[140].mxu0  ;;  %v9295_v62 = vpop.f32.mrb[148].mxu1 }
0x1a41   :  { %v9227_v63 = vadd.f32 %v9223_v21, %v9153_v8  ;;  %v9299_v1 = vadd.f32 %v9295_v62, %v9228_v57  ;;  %v12368_v27 = vpop.f32.mrb[141].mxu0  ;;  %v12379_v37 = vpop.f32.mrb[149].mxu1  ;;  %v9620_v57 = vld [vmem:[#allocation4 + $0x38] sm:$0xff] }
0x1a43   :  { %v10484_v3 = vmul.f32 -1.442695, %v9227_v63  ;;  %v10485_v4 = vmul.f32 -1.442695, %v9299_v1 }
0x1a45   :  { %13497 = vpow2.f32 %v10484_v3 }
0x1a46   :  { %13499 = vpow2.f32 %v10485_v4 }
0x1a48   :  { %v9367_v46 = vpop.f32.mrb[142].mxu0  ;;  %v9439_v40 = vpop.f32.mrb[150].mxu1 }
0x1a49   :  { %v9443_v60 = vadd.f32 %v9439_v40, %v9372_v31  ;;  %v12390_v7 = vpop.f32.mrb[143].mxu0  ;;  %v12401_v17 = vpop.f32.mrb[151].mxu1  ;;  %v9371_v52 = vadd.f32 %v9367_v46, %v9300_v26 }
0x1a4b   :  { %v10486_v30 = vmul.f32 -1.442695, %v9443_v60 }
0x1a4d   :  { %13501 = vpow2.f32 %v10486_v30 }
0x1a4e   :  { %13503 = vtanh.f32 %v9371_v52 }
0x1a4f   :  { %v13498_v54 = vpop.eup %13497 }
0x1a50   :  { %v13500_v59 = vpop.eup %13499  ;;  %v9447_v61 = vadd.f32 1.0, %v13498_v54 }
0x1a51   :  { %v9453_v9 = vadd.f32 1.0, %v13500_v59 }
0x1a52   :  { %13505 = vrcp.f32 %v9447_v61 }
0x1a53   :  { %13507 = vrcp.f32 %v9453_v9 }
0x1a57   :  { %v13502_v10 = vpop.eup %13501 }
0x1a58   :  { %v13504_v11 = vpop.eup %13503  ;;  %v9460_v19 = vadd.f32 1.0, %v13502_v10 }
0x1a5a   :  { %13509 = vrcp.f32 %v9460_v19  ;;  %v10494_v19 = vld [vmem:[%s15387_s15] ss:$0 sm:$0xff]  ;;  %s13741_s15 = smov [#allocation21]  }
0x1a5b   :  { %s10157_s12 = sshll.u32 %s13741_s15, 4  ;;  %s10158_s12 = int_to_ptr.vmem [resolvable:$true] %s10157_s12 }
0x1a5c   :  { %v13506_v12 = vpop.eup %13505  ;;  %s13695_s7 = scalar_lea.vmem %s10158_s12, 128  ;;  %p13700_p1 = scmp.lt.s32.totalorder %s10158_s12, %s10158_s12 }
0x1a5d   :  { %v13508_v43 = vpop.eup %13507  ;;  %v9465_v16 = vmul.f32 %v13506_v12, %v13504_v11  ;;  %p13696_p0 = scmp.ne.s32.totalorder %s10158_s12, %s13695_s7  ;;  %p13701_p2 = scmp.lt.s32.totalorder %s13695_s7, %s13695_s7 }
0x1a5e   :  { %v9464_v13 = vmul.f32 %v13508_v43, %v9463_v14 }
0x1a5f   :  { %p13702_p3 = por %p13701_p2, %p13700_p1 }
0x1a60   :  { %v9466_v20 = vadd.f32 %v9465_v16, %v9464_v13  ;;  %v9933_v16 = vlaneseq }
0x1a61   :  { %p13703_p4 = pnand %p13702_p3, %p13696_p0 }
0x1a62   :  { %13511 = vtanh.f32 %v9466_v20  ;;  %9469 = vst.msk [vmem:[#allocation8] sm:$0xff] %vm297_vm0, %v9466_v20  ;;  %v9934_v13 = vshrl.u32 %v9933_v16, 7 }
0x1a64   :  { %v13510_v23 = vpop.eup %13509  ;;  %vm9935_vm4 = vcmp.lt.s32.totalorder %v9934_v13, 6 }
0x1a69   :  { %v9783_v54 = vld [vmem:[#allocation8] sm:$0xff] }
0x1a6c   :  { %v13512_v24 = vpop.eup %13511 }
0x1a6d   :  { %v9468_v25 = vmul.f32 %v13512_v24, %v13510_v23 }
0x1a6f   :  { %9470 = vst.msk [vmem:[#allocation7] sm:$0xff] %vm297_vm0, %v9468_v25  ;;  %9471 = vst.msk [vmem:[#allocation6 + $0x30] sm:$0xff] %vm297_vm0, %v9468_v25 }
0x1a76   :  { %v9472_v49 = vld [vmem:[#allocation7] sm:$0xff]  ;;  %v9798_v41 = vld [vmem:[#allocation6 + $0x30] sm:$0xff] }
0x1a77   :  { %12411 = vmatmul.mubr.msk.f32.vlgmr.msra.gmra.mrb[144].mxu0 %vm297_vm0, %v9472_v49  ;;  %12422 = vmatmul.mubr.msk.f32.vlgmr.msra.gmra.mrb[152].mxu1 %vm297_vm0, %v9472_v49 }
0x1a78   :  { %13106 = vmatpush3.bf16.msra.mxu0 %v15044_v6  ;;  %13112 = vmatpush3.bf16.msra.mxu1 %v15024_v2  ;;  %v9803_v6 = vld [vmem:[%s15386_s14 + $0x18] sm:$0xff]  ;;  %v9792_v2 = vld [vmem:[#allocation6] sm:$0xff] }
0x1a79   :  { %13107 = vmatprep.subr.bf16.mxu0 %v13739_v28  ;;  %13113 = vmatprep.subr.bf16.mxu1 %v13739_v28  ;;  %v13120_v28 = vpack.c.bf16 %v9803_v6, %v9802_v34 }
0x1a7a   :  { %12432 = vmatprep.mubr.msk.f32.mxu0 %vm13740_vm2, %v13738_v0  ;;  %12443 = vmatprep.mubr.msk.f32.mxu1 %vm13740_vm2, %v13738_v0 }
0x1a7c   :  { %13109 = vmatpush3.bf16.msra.mxu0 %v15053_v45  ;;  %13115 = vmatpush3.bf16.msra.mxu1 %v15035_v5  ;;  %v9793_v45 = vld [vmem:[#allocation6 + $0x8] sm:$0xff]  ;;  %v9794_v5 = vld [vmem:[#allocation6 + $0x10] sm:$0xff] }
0x1a7d   :  { %13117 = vmatprep.subr.bf16.mxu0 %v13116_v33  ;;  %12466 = vmatprep.subr.mxu1 %v13738_v0 }
0x1a7f   :  { %12433 = vmatmul.mubr.msk.f32.vlgmr.msra.gmra.mrb[146].mxu0 %vm297_vm0, %v9472_v49  ;;  %12444 = vmatmul.mubr.msk.f32.vlgmr.msra.gmra.mrb[154].mxu1 %vm297_vm0, %v9472_v49 }
0x1a80   :  { %13119 = vmatpush3.bf16.msra.mxu0 %v13116_v33  ;;  %12454 = vmatprep.mubr.msk.f32.mxu0 %vm297_vm0, %v9792_v2 }
0x1a81   :  { %13121 = vmatprep.subr.bf16.mxu0 %v13120_v28  ;;  %12468 = vmatprep.mubr.msk.f32.mxu1 %vm13740_vm2, %v13738_v0 }
0x1a84   :  { %13123 = vmatpush3.bf16.msra.mxu0 %v13120_v28 }
0x1a87   :  { %12455 = vmatmul.mubr.msk.f32.vlgmr.msra.gmra.mrb[148].mxu0 %vm297_vm0, %v9793_v45 }
0x1a88   :  { %12457 = vmatprep.mubr.msk.f32.mxu0 %vm297_vm0, %v9794_v5 }
0x1a8b   :  { %12458 = vmatmul.mubr.msk.f32.gmra.mrb[150].mxu0 %vm297_vm0, %v9795_v35 }
0x1a8c   :  { %12460 = vmatprep.mubr.msk.f32.mxu0 %vm297_vm0, %v9796_v36 }
0x1a8f   :  { %12461 = vmatmul.mubr.msk.f32.gmra.mrb[152].mxu0 %vm297_vm0, %v9797_v39 }
0x1a90   :  { %12463 = vmatprep.mubr.msk.f32.mxu0 %vm297_vm0, %v9798_v41  ;;  %v9963_v41 = vadd.s32 1, %v9934_v13 }
0x1b4a   :  { %v9543_v38 = vpop.f32.mrb[144].mxu0  ;;  %v9615_v47 = vpop.f32.mrb[152].mxu1 }
0x1b4b   :  { %v9547_v48 = vadd.f32 %v9543_v38, %v9473_v42  ;;  %v9619_v44 = vadd.f32 %v9615_v47, %v9548_v53  ;;  %v12412_v29 = vpop.f32.mrb[145].mxu0  ;;  %v12423_v18 = vpop.f32.mrb[153].mxu1  ;;  %v9960_v53 = vand.u32 127, %v9933_v16  ;;  %v9961_v47 = vmul.u32 3, %v9934_v13 }
0x1b4d   :  { %v10491_v22 = vmul.f32 -1.442695, %v9547_v48  ;;  %v10492_v50 = vmul.f32 -1.442695, %v9619_v44  ;;  %v9964_v48 = vmul.u32 3, %v9963_v41  ;;  %vm9962_vm7 = vcmp.ge.s32.totalorder %v9960_v53, %v9961_v47 }
0x1b4f   :  { %13513 = vpow2.f32 %v10491_v22  ;;  %vm9965_vm8 = vcmp.lt.s32.totalorder %v9960_v53, %v9964_v48 }
0x1b50   :  { %13515 = vpow2.f32 %v10492_v50  ;;  %vm9966_vm9 = vmand %vm9962_vm7, %vm9965_vm8 }
0x1b51   :  { %v9967_v18 = vsel %vm9966_vm9, 0.33333334, %v13738_v0 }
0x1b52   :  { %v9687_v51 = vpop.f32.mrb[146].mxu0  ;;  %v9759_v56 = vpop.f32.mrb[154].mxu1 }
0x1b53   :  { %v9763_v58 = vadd.f32 %v9759_v56, %v9692_v55  ;;  %v12434_v8 = vpop.f32.mrb[147].mxu0  ;;  %v12445_v21 = vpop.f32.mrb[155].mxu1  ;;  %v9691_v63 = vadd.f32 %v9687_v51, %v9620_v57 }
0x1b55   :  { %v10493_v62 = vmul.f32 -1.442695, %v9763_v58 }
0x1b57   :  { %13517 = vpow2.f32 %v10493_v62 }
0x1b58   :  { %13519 = vtanh.f32 %v9691_v63 }
0x1b59   :  { %v13514_v1 = vpop.eup %13513 }
0x1b5a   :  { %v13516_v27 = vpop.eup %13515  ;;  %v9767_v37 = vadd.f32 1.0, %v13514_v1  ;;  %v12456_v3 = vpop.f32.mrb[148].mxu0 }
0x1b5b   :  { %v9773_v4 = vadd.f32 1.0, %v13516_v27  ;;  %v9901_v46 = vpop.f32.mrb[149].mxu0 }
0x1b5c   :  { %13521 = vrcp.f32 %v9767_v37 }
0x1b5d   :  { %13523 = vrcp.f32 %v9773_v4 }
0x1b5e   :  { %v12459_v31 = vpop.f32.mrb[150].mxu0 }
0x1b5f   :  { %v9909_v40 = vpop.f32.mrb[151].mxu0 }
0x1b61   :  { %v13518_v17 = vpop.eup %13517 }
0x1b62   :  { %v12462_v60 = vpop.f32.mrb[152].mxu0  ;;  %v13520_v26 = vpop.eup %13519  ;;  %v9780_v61 = vadd.f32 1.0, %v13518_v17 }
0x1b63   :  { %v9917_v7 = vpop.f32.mrb[153].mxu0 }
0x1b64   :  { %13525 = vrcp.f32 %v9780_v61 }
0x1b66   :  { %v13522_v30 = vpop.eup %13521 }
0x1b67   :  { %v13524_v52 = vpop.eup %13523  ;;  %v9785_v59 = vmul.f32 %v13522_v30, %v13520_v26 }
0x1b68   :  { %v9784_v9 = vmul.f32 %v13524_v52, %v9783_v54 }
0x1b6a   :  { %v9786_v10 = vadd.f32 %v9785_v59, %v9784_v9 }
0x1b6c   :  { %13527 = vtanh.f32 %v9786_v10  ;;  %9789 = vst.msk [vmem:[#allocation8] sm:$0xff] %vm297_vm0, %v9786_v10 }
0x1b6e   :  { %v13526_v11 = vpop.eup %13525 }
0x1b76   :  { %v13528_v12 = vpop.eup %13527 }
0x1b77   :  { %v9788_v43 = vmul.f32 %v13528_v12, %v13526_v11 }
0x1b79   :  { %9790 = vst.msk [vmem:[#allocation7] sm:$0xff] %vm297_vm0, %v9788_v43  ;;  %9791 = vst.msk [vmem:[#allocation6 + $0x38] sm:$0xff] %vm297_vm0, %v9788_v43 }
0x1b80   :  { %v9799_v14 = vld [vmem:[#allocation6 + $0x38] sm:$0xff] }
0x1b81   :  { %12464 = vmatmul.mubr.msk.f32.gmra.mrb[154].mxu0 %vm297_vm0, %v9799_v14 }
0x1c54   :  { %v12465_v20 = vpop.f32.mrb[154].mxu0 }
0x1c55   :  { %v9930_v23 = vadd.f32 %v12465_v20, %v10494_v19  ;;  %v9925_v24 = vpop.f32.mrb[155].mxu0 }
0x1c57   :  { %v9936_v25 = vmul.f32 %v9930_v23, %v9930_v23 }
0x1c59   :  { %v9937_v49 = vsel %vm9935_vm4, %v9936_v25, 0.0 }
0x1c5a   :  { %v9938_v15 = vsel %vm3454_vm3, %v9937_v49, 0.0 }
0x1c5b   :  { %9939 = vadd.xlane.f32.xlu0 %v9938_v15 }
0x1ce8   :  { %v9940_v32 = vpop.xlane.xlu0 %9939 }
0x1ce9   :  { %v9941_v33 = vrot.slane %v9940_v32, 4 }
0x1ceb   :  { %v9942_v34 = vadd.f32 %v9941_v33, %v9940_v32 }
0x1ced   :  { %v9943_v6 = vrot.slane %v9942_v34, 2 }
0x1cef   :  { %v9944_v28 = vadd.f32 %v9943_v6, %v9942_v34 }
0x1cf1   :  { %v9945_v2 = vrot.slane %v9944_v28, 1 }
0x1cf3   :  { %v9946_v45 = vadd.f32 %v9945_v2, %v9944_v28 }
0x1cf5   :  { %13128 = vpush %v9946_v45 }
0x1d26   :  { %s13129_s3 = spop %13128 }
0x1d27   :  { %v9948_v5 = vstv %s13129_s3 }
0x1d28   :  { %13529 = vrsqrt.f32 %v9948_v5  ;;  %vm9951_vm5 = vcmp.eq.f32.partialorder %v9948_v5, inf  ;;  %v9954_v39 = vand.u32 2147483648, %v9948_v5  ;;  %vm9953_vm6 = vcmp.eq.f32.partialorder %v9948_v5, 0.0 }
0x1d32   :  { %v13530_v35 = vpop.eup %13529 }
0x1d33   :  { %v9950_v36 = vmul.f32 %v13530_v35, %v9948_v5 }
0x1d35   :  { %v9952_v42 = vsel %vm9951_vm5, %v9948_v5, %v9950_v36 }
0x1d36   :  { %v9955_v38 = vsel %vm9953_vm6, %v9954_v39, %v9952_v42 }
0x1d37   :  { %13531 = vrcp.f32 %v9955_v38 }
0x1d41   :  { %v13532_v44 = vpop.eup %13531 }
0x1d42   :  { %v9957_v29 = vmul.f32 %v13532_v44, %v9930_v23 }
0x1d44   :  { %12467 = vmatpush3.msra.mxu1 %v9957_v29  ;;  %9958 = vst.msk [vmem:[#allocation21] sm:$0xff] %vm3454_vm3, %v9957_v29  ;;  %v10042_v22 = vmul.f32 %v9957_v29, %v9957_v29 }
0x1d45   :  { %12469 = vmatmul.mubr.msk.f32.vlgmr.msra.gmra.mrb[156].mxu1 %vm9968_vm10, %v9967_v18  ;;  %12471 = vmatprep.subr.mxu1 %v13738_v0 }
0x1d46   :  { %v10043_v50 = vsel %vm3454_vm3, %v10042_v22, 0.0  ;;  %12473 = vmatprep.mubr.msk.f32.mxu1 %vm13740_vm2, %v13738_v0 }
0x1d47   :  { %10044 = vadd.xlane.f32.xlu1 %v10043_v50 }
0x1dd4   :  { %v10045_v8 = vpop.xlane.xlu1 %10044 }
0x1dd5   :  { %13533 = vrsqrt.f32 %v10045_v8  ;;  %vm10048_vm12 = vcmp.eq.f32.partialorder %v10045_v8, inf  ;;  %v10051_v1 = vand.u32 2147483648, %v10045_v8  ;;  %vm10050_vm13 = vcmp.eq.f32.partialorder %v10045_v8, 0.0 }
0x1ddf   :  { %v13534_v57 = vpop.eup %13533 }
0x1de0   :  { %v10047_v62 = vmul.f32 %v13534_v57, %v10045_v8 }
0x1de2   :  { %v10049_v63 = vsel %vm10048_vm12, %v10045_v8, %v10047_v62 }
0x1de3   :  { %v10052_v37 = vsel %vm10050_vm13, %v10051_v1, %v10049_v63 }
0x1de4   :  { %v10065_v46 = vmax.f32 %v10052_v37, 1e-08 }
0x1e18   :  { %v10038_v51 = vpop.f32.mrb[156].mxu1 }
0x1e19   :  { %v10053_v55 = vmul.f32 %v10038_v51, %v10038_v51  ;;  %v12470_v56 = vpop.f32.mrb[157].mxu1 }
0x1e1b   :  { %v10055_v58 = vsel %vm10054_vm11, %v10053_v55, 0.0 }
0x1e1c   :  { %10056 = vadd.xlane.f32.xlu0 %v10055_v58 }
0x1ea9   :  { %v10057_v21 = vpop.xlane.xlu0 %10056 }
0x1eaa   :  { %13535 = vrsqrt.f32 %v10057_v21  ;;  %vm10060_vm14 = vcmp.eq.f32.partialorder %v10057_v21, inf  ;;  %v10063_v3 = vand.u32 2147483648, %v10057_v21  ;;  %vm10062_vm15 = vcmp.eq.f32.partialorder %v10057_v21, 0.0 }
0x1eb4   :  { %v13536_v27 = vpop.eup %13535 }
0x1eb5   :  { %v10059_v0 = vmul.f32 %v13536_v27, %v10057_v21 }
0x1eb7   :  { %v10061_v4 = vsel %vm10060_vm14, %v10057_v21, %v10059_v0 }
0x1eb8   :  { %v10064_v31 = vsel %vm10062_vm15, %v10063_v3, %v10061_v4 }
0x1eb9   :  { %v10068_v40 = vmax.f32 %v10064_v31, 1e-08 }
0x1ebb   :  { %13537 = vrcp.f32 %v10068_v40 }
0x1ebc   :  { %13539 = vrcp.f32 %v10065_v46 }
0x1ec5   :  { %v13538_v60 = vpop.eup %13537 }
0x1ec6   :  { %v13540_v7 = vpop.eup %13539  ;;  %v10070_v17 = vmul.f32 %v13538_v60, %v10038_v51 }
0x1ec7   :  { %v10067_v26 = vmul.f32 %v13540_v7, %v9957_v29 }
0x1ec8   :  { %12472 = vmatpush3.xpose.msk.msra.mxu1 %vm3454_vm3, %v10070_v17 }
0x1ecb   :  { %12474 = vmatmul.mubr.msk.f32.vlgmr.msra.gmra.mrb[158].mxu1 %vm3454_vm3, %v10067_v26 }
0x1ecc   :  { %13706 = shalt.err (!%p13703_p4)
}
0x1ecd   :  { %s13707_s21 = scalar_lea.hbm %s15388_s16, 128 }
0x1ece   :  { %p13708_p5 = scmp.ne.s32.totalorder %s15388_s16, %s13707_s21  ;;  %p13711_p6 = scmp.lt.u32.totalorder %s13707_s21, %s15388_s16 }
0x1ed0   :  { %p13713_p7 = pnand %p13711_p6, %p13708_p5 }
0x1ed2   :  { %13716 = shalt.err (!%p13713_p7)
}
0x1ed3   :  { %10160 = dma.vmem_to_hbm [thread:$0]  %s10158_s12, 128, %s15388_s16, [#allocation11]   ;;  %vm10149_vm0 = vcmask 15360  }
0x1f9e   :  { %v10143_v30 = vpop.f32.mrb[158].mxu1 }
0x1f9f   :  { %v10147_v52 = vmul.f32 10.0, %v10143_v30  ;;  %v12475_v54 = vpop.f32.mrb[159].mxu1 }
0x1fa1   :  { %v10148_v59 = vadd.f32 -5.0, %v10147_v52 }
0x1fa3   :  { %10150 = vst.msk [vmem:[%s15389_s17] sm:$0xff] %vm10149_vm0, %v10148_v59 }
0x1fa4   :  { %13725 = dma.done.wait [#allocation11], 128  }
0x1fa5   :  { %13726 = vsyncadd [#allocation11], 4294967168 }
0x1fa6   :  { %10168 = vsyncpa [#allocation10], 1 }
0x1fa7   :  { %10169 = vsyncpa [#allocation13], 1 }
0x1fa8   :  { %10170 = vsyncpa [#allocation16], 1 }
0x1fa9   :  { %10171 = vsyncpa [#allocation19], 1 }
0x1faa   :  { %10172 = vsyncpa [#allocation11], 1 }

</bundles_post_ra>
